<compile_context>
chip_gen: v5e
topology: v5e:2x2
jax: 0.10.0
libtpu: 0.0.40
codegen_flags: <defaults>
</compile_context>

<pallas_src>
import math
from functools import partial

import jax
import jax.numpy as jnp
from jax.experimental import pallas as pl
from jax.experimental.pallas import tpu as pltpu


# ----------------------------------------------------------------------------
# Shared attention + residual + LayerNorm tail for one (TILE_L, C) query tile.
# ----------------------------------------------------------------------------
def _attend_and_norm(x_tile, pos_tile, k_p, v_p, wq, wo, bq, bo, gamma, beta,
                     ctx_scr, *, nhead, head_dim, ln_eps, exp_dtype):
    # x_tile/pos_tile: (TL, C) bf16; k_p/v_p: (S, C) bf16; weights bf16,
    # biases / LN params (1, C) f32.  1/sqrt(head_dim) already folded into wq/bq.
    q_in = x_tile + pos_tile
    q_p = (jnp.dot(q_in, wq, preferred_element_type=jnp.float32) + bq
           ).astype(jnp.bfloat16)                                    # (TL, C)

    # Per-head attention; each head's normalized context goes into its lane
    # slice of ctx_scr, then ONE full-width out-projection matmul follows.
    for h in range(nhead):
        lo = h * head_dim
        qh = q_p[:, lo:lo + head_dim]                                # (TL, hd)
        kh = k_p[:, lo:lo + head_dim]                                # (S, hd)
        vh = v_p[:, lo:lo + head_dim]                                # (S, hd)
        s = jax.lax.dot_general(qh, kh, (((1,), (1,)), ((), ())),
                                preferred_element_type=jnp.float32)  # (TL, S)
        s = s - jnp.max(s, axis=-1, keepdims=True)
        p = jnp.exp(s.astype(exp_dtype))            # bf16 EUP on v6e/v7x, f32 on v5e
        denom = jnp.sum(p.astype(jnp.float32), axis=-1, keepdims=True)
        inv = pl.reciprocal(denom, approx=True)                      # (TL, 1) f32
        ah = jnp.dot(p.astype(jnp.bfloat16), vh,
                     preferred_element_type=jnp.float32)             # (TL, hd)
        ctx_scr[:, lo:lo + head_dim] = (ah * inv).astype(ctx_scr.dtype)

    tgt = jnp.dot(ctx_scr[...], wo, preferred_element_type=jnp.float32) + bo

    # Residual + LayerNorm (single-pass variance), f32 math; dropout == identity.
    res = x_tile.astype(jnp.float32) + tgt
    mean = jnp.mean(res, axis=-1, keepdims=True)
    mean2 = jnp.mean(res * res, axis=-1, keepdims=True)
    var = mean2 - mean * mean
    normed = (res - mean) * jax.lax.rsqrt(var + ln_eps)
    return normed * gamma + beta                                     # (TL, C) f32


# ----------------------------------------------------------------------------
# Kernel A: K/V projection fused in-kernel, cached in VMEM scratch per batch.
# Grid = (batch, L // TILE_L), semantics ("parallel", "arbitrary").
# ----------------------------------------------------------------------------
def _sra_kernel_fused_kv(x_ref, pos_ref, kv_ref, kvpos_ref,
                         wq_ref, wk_ref, wv_ref, wo_ref,
                         bq_ref, bk_ref, bv_ref, bo_ref,
                         gamma_ref, beta_ref,
                         out_ref,
                         k_scr, v_scr, ctx_scr,
                         *, nhead, head_dim, ln_eps, exp_dtype):
    @pl.when(pl.program_id(1) == 0)
    def _():
        kv = kv_ref[0] + kvpos_ref[0]                                # (S, C) bf16
        k_p = jnp.dot(kv, wk_ref[...],
                      preferred_element_type=jnp.float32) + bk_ref[...]
        v_p = jnp.dot(kv, wv_ref[...],
                      preferred_element_type=jnp.float32) + bv_ref[...]
        k_scr[...] = k_p.astype(k_scr.dtype)
        v_scr[...] = v_p.astype(v_scr.dtype)

    out = _attend_and_norm(x_ref[0], pos_ref[0], k_scr[...], v_scr[...],
                           wq_ref[...], wo_ref[...], bq_ref[...], bo_ref[...],
                           gamma_ref[...], beta_ref[...], ctx_scr,
                           nhead=nhead, head_dim=head_dim,
                           ln_eps=ln_eps, exp_dtype=exp_dtype)
    out_ref[0] = out.astype(out_ref.dtype)


# ----------------------------------------------------------------------------
# Kernel B: K/V precomputed on the host (tiny XLA matmul), both grid axes
# "parallel" so v7x megacore can split the L axis when batch is 1 / odd.
# ----------------------------------------------------------------------------
def _sra_kernel_hoisted_kv(x_ref, pos_ref, k_ref, v_ref,
                           wq_ref, wo_ref, bq_ref, bo_ref,
                           gamma_ref, beta_ref,
                           out_ref, ctx_scr,
                           *, nhead, head_dim, ln_eps, exp_dtype):
    out = _attend_and_norm(x_ref[0], pos_ref[0], k_ref[0], v_ref[0],
                           wq_ref[...], wo_ref[...], bq_ref[...], bo_ref[...],
                           gamma_ref[...], beta_ref[...], ctx_scr,
                           nhead=nhead, head_dim=head_dim,
                           ln_eps=ln_eps, exp_dtype=exp_dtype)
    out_ref[0] = out.astype(out_ref.dtype)


# ----------------------------------------------------------------------------
# Sine positional encoding (mmdet-style, num_feats = d_model // 2).
# ----------------------------------------------------------------------------
def sine_positional_encoding(mask, num_feats, temperature=10000.0):
    bt, h, w = mask.shape
    not_mask = 1.0 - mask.astype(jnp.float32)
    y_embed = jnp.cumsum(not_mask, axis=1)
    x_embed = jnp.cumsum(not_mask, axis=2)
    dim_t = jnp.arange(num_feats, dtype=jnp.float32)
    dim_t = temperature ** (2.0 * jnp.floor(dim_t / 2.0) / num_feats)
    pos_x = x_embed[..., None] / dim_t
    pos_y = y_embed[..., None] / dim_t
    pos_x = jnp.stack((jnp.sin(pos_x[..., 0::2]), jnp.cos(pos_x[..., 1::2])),
                      axis=4).reshape(bt, h, w, -1)
    pos_y = jnp.stack((jnp.sin(pos_y[..., 0::2]), jnp.cos(pos_y[..., 1::2])),
                      axis=4).reshape(bt, h, w, -1)
    pos = jnp.concatenate((pos_y, pos_x), axis=3).transpose(0, 3, 1, 2)
    return pos  # (bt, 2*num_feats, h, w)


# ----------------------------------------------------------------------------
# Device-aware budgeting helpers.
# ----------------------------------------------------------------------------
def _device_budget():
    kind = ""
    try:
        kind = jax.devices()[0].device_kind.lower()
    except Exception:
        pass
    if any(t in kind for t in ("v4", "v5", "v6")):
        vmem_cap = 128 * 1024 * 1024
    else:  # v7x (64 MiB per TC) or unknown: be conservative
        vmem_cap = 64 * 1024 * 1024
    bf16_eup = any(t in kind for t in ("v6", "v7", "tpu7"))
    return vmem_cap, bf16_eup


def _pick_tile_l(L, target):
    t = min(target, L)
    if t >= L:
        return L
    for d in range(t, 7, -1):           # largest divisor of L, multiple of 8
        if L % d == 0 and d % 8 == 0:
            return d
    return L


def _vmem_need_bytes(tile_l, S, c, out_bytes):
    bf, f4 = 2, 4
    need = 2 * S * c * bf                       # K/V VMEM scratch
    need += tile_l * c * bf                     # per-head context scratch
    need += 2 * 2 * tile_l * c * bf             # x + pos tiles (double buffered)
    need += 2 * tile_l * c * out_bytes          # out tile (double buffered)
    need += 2 * S * c * bf                      # kv + kvpos inputs (single buffered)
    need += 4 * c * c * bf + 6 * c * f4         # weights + biases (single buffered)
    need += 4 * tile_l * S * f4                 # live f32 score/prob temporaries
    need += 8 * tile_l * c * f4                 # q / out-proj / LN temporaries
    return need


def _maybe_buffered_spec(shape, index_map, buffer_count):
    # Single-buffer constant-ish streams to free VMEM; silently fall back if
    # this jax build lacks BlockSpec(pipeline_mode=...).
    try:
        return pl.BlockSpec(shape, index_map,
                            pipeline_mode=pl.Buffered(buffer_count))
    except Exception:
        return pl.BlockSpec(shape, index_map)


# ----------------------------------------------------------------------------
# Wrapper: parameter fusion, layout plumbing, pallas_call.
# ----------------------------------------------------------------------------
def spatial_reduced_attention(x, params, *, scale_factor, nhead,
                              use_pos_emb=True, y=None,
                              tile_l=None, out_dtype=None):
    bt, c, h, w = x.shape
    assert c % nhead == 0
    head_dim = c // nhead
    L = h * w
    out_dtype = x.dtype if out_dtype is None else out_dtype

    vmem_cap, bf16_eup = _device_budget()
    exp_dtype = jnp.bfloat16 if bf16_eup else jnp.float32
    usable_vmem = int(vmem_cap * 0.85)

    # Positional encoding is batch-invariant (mask is all zeros): compute once
    # with batch 1 and ship it with a constant index_map.
    if use_pos_emb:
        assert c % 4 == 0
        pos = sine_positional_encoding(jnp.zeros((1, h, w), jnp.bool_), c // 2)
    else:
        pos = jnp.zeros((1, c, h, w), jnp.float32)

    # Reduced KV source.  Nearest interpolation to (h/sf, w/sf) == index
    # subsample, which commutes with the elementwise pos add, so the base and
    # the (batch-invariant) pos are reduced separately.
    kv_base = y if y is not None else x
    if scale_factor > 1:
        new_h, new_w = int(h / scale_factor), int(w / scale_factor)
        ih = jnp.floor(jnp.arange(new_h) * (h / new_h)).astype(jnp.int32)
        iw = jnp.floor(jnp.arange(new_w) * (w / new_w)).astype(jnp.int32)
        kv_base_r = kv_base[:, :, ih][:, :, :, iw]
        kv_pos_r = pos[:, :, ih][:, :, :, iw]
    else:
        kv_base_r, kv_pos_r = kv_base, pos
    S = kv_base_r.shape[2] * kv_base_r.shape[3]

    # NCHW -> (batch, seq, channel), bf16 for MXU + halved DMA.
    # TODO(synk): if the surrounding model can hand over (B, L, C) activations
    # directly, drop this transpose round trip (pure HBM-bandwidth win).
    def to_seq(a):
        return a.reshape(a.shape[0], c, -1).transpose(0, 2, 1)

    x_seq = to_seq(x).astype(jnp.bfloat16)               # (bt, L, C)
    pos_seq = to_seq(pos).astype(jnp.bfloat16)           # (1,  L, C)
    kv_seq_f32 = to_seq(kv_base_r)                       # (bt, S, C) f32
    kvpos_seq_f32 = to_seq(kv_pos_r)                     # (1,  S, C) f32

    # ---- Host-side weight fusion (f32 math, bf16 shipping) ----
    wkv, bkv = params['kv_w'], params['kv_b']             # (2C, C), (2C,)
    inw, inb = params['in_proj_w'], params['in_proj_b']   # (3C, C), (3C,)
    wo, bo = params['out_proj_w'], params['out_proj_b']   # (C, C), (C,)
    gamma, beta = params['ln_g'], params['ln_b']          # (C,), (C,)

    wkvk, wkvv = wkv[:c].T, wkv[c:].T                     # x @ W layout
    bkvk, bkvv = bkv[:c], bkv[c:]
    wq_t, wk_t, wv_t = inw[:c].T, inw[c:2 * c].T, inw[2 * c:].T
    bq, bk, bv = inb[:c], inb[c:2 * c], inb[2 * c:]

    scale = 1.0 / math.sqrt(head_dim)
    wq_f = wq_t * scale                                   # fold attention scale
    bq_f = bq * scale
    wk_f = wkvk @ wk_t                                    # fuse kv_proj into K proj
    bk_f = bkvk @ wk_t + bk
    wv_f = wkvv @ wv_t                                    # fuse kv_proj into V proj
    bv_f = bkvv @ wv_t + bv
    wo_t = wo.T

    bf16w = lambda m: m.astype(jnp.bfloat16)
    f32row = lambda v: v.reshape(1, c).astype(jnp.float32)

    # ---- Query tile + VMEM budget (derived, not hardcoded) ----
    out_bytes = jnp.dtype(out_dtype).itemsize
    if tile_l is None:
        target = 512 if vmem_cap >= 128 * 1024 * 1024 else 256
        tile_l = _pick_tile_l(L, target)
        while _vmem_need_bytes(tile_l, S, c, out_bytes) > usable_vmem and tile_l > 8:
            smaller = _pick_tile_l(L, max(8, tile_l // 2))
            if smaller == tile_l:
                break
            tile_l = smaller
    tile_l = min(tile_l, L)
    assert L % tile_l == 0, "query length must be divisible by tile_l"
    n_l = L // tile_l
    need = _vmem_need_bytes(tile_l, S, c, out_bytes)
    vmem_limit = int(min(usable_vmem, max(2 * need, 32 * 1024 * 1024)))

    out_shape = jax.ShapeDtypeStruct((bt, L, c), out_dtype)
    qspec = pl.BlockSpec((1, tile_l, c), lambda b, l: (b, l, 0))
    pspec = pl.BlockSpec((1, tile_l, c), lambda b, l: (0, l, 0))
    ospec = pl.BlockSpec((1, tile_l, c), lambda b, l: (b, l, 0))
    kvspec = _maybe_buffered_spec((1, S, c), lambda b, l: (b, 0, 0), 1)
    kvpspec = _maybe_buffered_spec((1, S, c), lambda b, l: (0, 0, 0), 1)
    wspec = _maybe_buffered_spec((c, c), lambda b, l: (0, 0), 1)
    bspec = _maybe_buffered_spec((1, c), lambda b, l: (0, 0), 1)

    kern_kwargs = dict(nhead=nhead, head_dim=head_dim, ln_eps=1e-5,
                       exp_dtype=exp_dtype)

    # v7x megacore balance: with an odd batch (esp. bt == 1) and several query
    # tiles, hoist K/V out so both grid axes can be "parallel".
    use_hoisted_kv = (bt % 2 == 1) and (n_l >= 2)

    if not use_hoisted_kv:
        kv_seq = kv_seq_f32.astype(jnp.bfloat16)
        kvpos_seq = kvpos_seq_f32.astype(jnp.bfloat16)
        out = pl.pallas_call(
            partial(_sra_kernel_fused_kv, **kern_kwargs),
            out_shape=out_shape,
            grid_spec=pltpu.PrefetchScalarGridSpec(
                num_scalar_prefetch=0,
                grid=(bt, n_l),
                in_specs=[qspec, pspec, kvspec, kvpspec,
                          wspec, wspec, wspec, wspec,
                          bspec, bspec, bspec, bspec, bspec, bspec],
                out_specs=ospec,
                scratch_shapes=[pltpu.VMEM((S, c), jnp.bfloat16),      # K cache
                                pltpu.VMEM((S, c), jnp.bfloat16),      # V cache
                                pltpu.VMEM((tile_l, c), jnp.bfloat16)]),  # ctx
            compiler_params=pltpu.CompilerParams(
                dimension_semantics=("parallel", "arbitrary"),
                vmem_limit_bytes=vmem_limit),
        )(x_seq, pos_seq, kv_seq, kvpos_seq,
          bf16w(wq_f), bf16w(wk_f), bf16w(wv_f), bf16w(wo_t),
          f32row(bq_f), f32row(bk_f), f32row(bv_f), f32row(bo),
          f32row(gamma), f32row(beta))
    else:
        kv_full = kv_seq_f32 + kvpos_seq_f32                           # (bt, S, C)
        k_pre = (jnp.einsum('bsc,cd->bsd', kv_full, wk_f) + bk_f).astype(jnp.bfloat16)
        v_pre = (jnp.einsum('bsc,cd->bsd', kv_full, wv_f) + bv_f).astype(jnp.bfloat16)
        out = pl.pallas_call(
            partial(_sra_kernel_hoisted_kv, **kern_kwargs),
            out_shape=out_shape,
            grid_spec=pltpu.PrefetchScalarGridSpec(
                num_scalar_prefetch=0,
                grid=(bt, n_l),
                in_specs=[qspec, pspec, kvspec, kvspec,
                          wspec, wspec,
                          bspec, bspec, bspec, bspec],
                out_specs=ospec,
                scratch_shapes=[pltpu.VMEM((tile_l, c), jnp.bfloat16)]),  # ctx
            compiler_params=pltpu.CompilerParams(
                dimension_semantics=("parallel", "parallel"),
                vmem_limit_bytes=vmem_limit),
        )(x_seq, pos_seq, k_pre, v_pre,
          bf16w(wq_f), bf16w(wo_t),
          f32row(bq_f), f32row(bo),
          f32row(gamma), f32row(beta))
    return out  # (bt, L, C) == torch output (bt, h*w, d_model)


# ----------------------------------------------------------------------------
# Pure-JAX f32 reference (torch-faithful, unfused) for correctness checking.
# ----------------------------------------------------------------------------
def reference_forward(x, params, *, scale_factor, nhead, use_pos_emb=True, y=None):
    bt, c, h, w = x.shape
    if use_pos_emb:
        pos = sine_positional_encoding(jnp.zeros((1, h, w), jnp.bool_), c // 2)
        pos = jnp.broadcast_to(pos, (bt, c, h, w))
    else:
        pos = jnp.zeros((bt, c, h, w), jnp.float32)
    x_ = x + pos
    src = (y + pos) if y is not None else x_
    if scale_factor > 1:
        new_h, new_w = int(h / scale_factor), int(w / scale_factor)
        ih = jnp.floor(jnp.arange(new_h) * (h / new_h)).astype(jnp.int32)
        iw = jnp.floor(jnp.arange(new_w) * (w / new_w)).astype(jnp.int32)
        src_r = src[:, :, ih][:, :, :, iw]
    else:
        src_r = src
    q = x_.reshape(bt, c, -1).transpose(0, 2, 1)
    kv_in = src_r.reshape(bt, c, -1).transpose(0, 2, 1)
    kvp = kv_in @ params['kv_w'].T + params['kv_b']
    k_raw, v_raw = kvp[..., :c], kvp[..., c:]
    inw, inb = params['in_proj_w'], params['in_proj_b']
    qp = q @ inw[:c].T + inb[:c]
    kp = k_raw @ inw[c:2 * c].T + inb[c:2 * c]
    vp = v_raw @ inw[2 * c:].T + inb[2 * c:]
    hd = c // nhead

    def split(a):
        return a.reshape(bt, -1, nhead, hd).transpose(0, 2, 1, 3)

    qh, kh, vh = split(qp), split(kp), split(vp)
    scores = jnp.einsum('bhqd,bhkd->bhqk', qh, kh) * (1.0 / math.sqrt(hd))
    attn = jax.nn.softmax(scores, axis=-1)
    ctx = jnp.einsum('bhqk,bhkd->bhqd', attn, vh).transpose(0, 2, 1, 3).reshape(bt, -1, c)
    tgt = ctx @ params['out_proj_w'].T + params['out_proj_b']
    res = x.reshape(bt, c, -1).transpose(0, 2, 1) + tgt
    mean = res.mean(-1, keepdims=True)
    var = ((res - mean) ** 2).mean(-1, keepdims=True)
    normed = (res - mean) / jnp.sqrt(var + 1e-5)
    return normed * params['ln_g'] + params['ln_b']


def init_params(key, d_model):
    c = d_model
    ks = jax.random.split(key, 6)
    std = 0.02
    return {
        'kv_w': std * jax.random.normal(ks[0], (2 * c, c), jnp.float32),
        'kv_b': std * jax.random.normal(ks[1], (2 * c,), jnp.float32),
        'in_proj_w': std * jax.random.normal(ks[2], (3 * c, c), jnp.float32),
        'in_proj_b': std * jax.random.normal(ks[3], (3 * c,), jnp.float32),
        'out_proj_w': std * jax.random.normal(ks[4], (c, c), jnp.float32),
        'out_proj_b': std * jax.random.normal(ks[5], (c,), jnp.float32),
        'ln_g': jnp.ones((c,), jnp.float32),
        'ln_b': jnp.zeros((c,), jnp.float32),
    }


if __name__ == "__main__":
    # Small, module-consistent shapes: bt=2, d_model=c=32, nhead=4, h=w=16, sf=2.
    bt, c, h, w = 2, 32, 16, 16
    nhead = 4
    scale_factor = 2

    key = jax.random.PRNGKey(0)
    kx, ky, kp = jax.random.split(key, 3)
    x = jax.random.normal(kx, (bt, c, h, w), jnp.float32)
    y = jax.random.normal(ky, (bt, c, h, w), jnp.float32)
    params = init_params(kp, c)

    fwd = jax.jit(spatial_reduced_attention,
                  static_argnames=("scale_factor", "nhead", "use_pos_emb",
                                   "tile_l", "out_dtype"))

    # Cross-source KV branch (y is not None) — fused-KV kernel, grid (bt, n_l).
    out = fwd(x, params, scale_factor=scale_factor, nhead=nhead,
              use_pos_emb=True, y=y)
    jax.block_until_ready(out)
    assert out.shape == (bt, h * w, c)
    assert bool(jnp.all(jnp.isfinite(out)))
    ref = reference_forward(x, params, scale_factor=scale_factor, nhead=nhead,
                            use_pos_emb=True, y=y)
    assert float(jnp.max(jnp.abs(out.astype(jnp.float32) - ref))) < 0.1

    # Self branch (y is None).
    out_self = fwd(x, params, scale_factor=scale_factor, nhead=nhead,
                   use_pos_emb=True)
    jax.block_until_ready(out_self)
    assert out_self.shape == (bt, h * w, c)
    ref_self = reference_forward(x, params, scale_factor=scale_factor,
                                 nhead=nhead, use_pos_emb=True)
    assert float(jnp.max(jnp.abs(out_self.astype(jnp.float32) - ref_self))) < 0.1

    # bt == 1 with several query tiles — exercises the hoisted-KV /
    # dual-"parallel" (v7x megacore) path.
    out_b1 = fwd(x[:1], params, scale_factor=scale_factor, nhead=nhead,
                 use_pos_emb=True, tile_l=128)
    jax.block_until_ready(out_b1)
    assert out_b1.shape == (1, h * w, c)
    assert float(jnp.max(jnp.abs(out_b1.astype(jnp.float32) - ref_self[:1]))) < 0.1

    print("KERNEL_OK")
</pallas_src>

<mosaic_0001>
module attributes {stable_mosaic.version = 11 : i64} {
  func.func @_sra_kernel_fused_kv(%arg0: i32, %arg1: i32, %arg2: memref<1x256x32xbf16, #tpu.memory_space<vmem>>, %arg3: memref<1x256x32xbf16, #tpu.memory_space<vmem>>, %arg4: memref<1x64x32xbf16, #tpu.memory_space<vmem>>, %arg5: memref<1x64x32xbf16, #tpu.memory_space<vmem>>, %arg6: memref<32x32xbf16, #tpu.memory_space<vmem>>, %arg7: memref<32x32xbf16, #tpu.memory_space<vmem>>, %arg8: memref<32x32xbf16, #tpu.memory_space<vmem>>, %arg9: memref<32x32xbf16, #tpu.memory_space<vmem>>, %arg10: memref<1x32xf32, #tpu.memory_space<vmem>>, %arg11: memref<1x32xf32, #tpu.memory_space<vmem>>, %arg12: memref<1x32xf32, #tpu.memory_space<vmem>>, %arg13: memref<1x32xf32, #tpu.memory_space<vmem>>, %arg14: memref<1x32xf32, #tpu.memory_space<vmem>>, %arg15: memref<1x32xf32, #tpu.memory_space<vmem>>, %arg16: memref<1x256x32xf32, #tpu.memory_space<vmem>>, %arg17: memref<64x32xbf16, #tpu.memory_space<vmem>>, %arg18: memref<64x32xbf16, #tpu.memory_space<vmem>>, %arg19: memref<256x32xbf16, #tpu.memory_space<vmem>>) attributes {dimension_semantics = [#tpu.dimension_semantics<parallel>, #tpu.dimension_semantics<arbitrary>], iteration_bounds = array<i64: 2, 1>, scalar_prefetch = 0 : i64, scratch_operands = 3 : i64, tpu.core_type = #tpu.core_type<tc>, window_params = [{transform_indices = @transform_0, window_bounds = array<i64: 1, 256, 32>}, {transform_indices = @transform_1, window_bounds = array<i64: 1, 256, 32>}, {pipeline_mode = #tpu.pipeline_mode<synchronous>, transform_indices = @transform_2, window_bounds = array<i64: 1, 64, 32>}, {pipeline_mode = #tpu.pipeline_mode<synchronous>, transform_indices = @transform_3, window_bounds = array<i64: 1, 64, 32>}, {pipeline_mode = #tpu.pipeline_mode<synchronous>, transform_indices = @transform_4, window_bounds = array<i64: 32, 32>}, {pipeline_mode = #tpu.pipeline_mode<synchronous>, transform_indices = @transform_5, window_bounds = array<i64: 32, 32>}, {pipeline_mode = #tpu.pipeline_mode<synchronous>, transform_indices = @transform_6, window_bounds = array<i64: 32, 32>}, {pipeline_mode = #tpu.pipeline_mode<synchronous>, transform_indices = @transform_7, window_bounds = array<i64: 32, 32>}, {pipeline_mode = #tpu.pipeline_mode<synchronous>, transform_indices = @transform_8, window_bounds = array<i64: 1, 32>}, {pipeline_mode = #tpu.pipeline_mode<synchronous>, transform_indices = @transform_9, window_bounds = array<i64: 1, 32>}, {pipeline_mode = #tpu.pipeline_mode<synchronous>, transform_indices = @transform_10, window_bounds = array<i64: 1, 32>}, {pipeline_mode = #tpu.pipeline_mode<synchronous>, transform_indices = @transform_11, window_bounds = array<i64: 1, 32>}, {pipeline_mode = #tpu.pipeline_mode<synchronous>, transform_indices = @transform_12, window_bounds = array<i64: 1, 32>}, {pipeline_mode = #tpu.pipeline_mode<synchronous>, transform_indices = @transform_13, window_bounds = array<i64: 1, 32>}, {transform_indices = @transform_14, window_bounds = array<i64: 1, 256, 32>}]} {
    %c0_i32 = arith.constant 0 : i32
    %0 = arith.cmpi eq, %arg1, %c0_i32 : i32
    %1 = arith.extui %0 : i1 to i32
    %c0_i32_0 = arith.constant 0 : i32
    %2 = arith.cmpi ne, %1, %c0_i32_0 : i32
    scf.if %2 {
      %c0_54 = arith.constant 0 : index
      %c0_55 = arith.constant 0 : index
      %c0_56 = arith.constant 0 : index
      %123 = vector.load %arg4[%c0_54, %c0_55, %c0_56] : memref<1x64x32xbf16, #tpu.memory_space<vmem>>, vector<1x64x32xbf16>
      %124 = vector.shape_cast %123 : vector<1x64x32xbf16> to vector<64x32xbf16>
      %c0_57 = arith.constant 0 : index
      %c0_58 = arith.constant 0 : index
      %c0_59 = arith.constant 0 : index
      %125 = vector.load %arg5[%c0_57, %c0_58, %c0_59] : memref<1x64x32xbf16, #tpu.memory_space<vmem>>, vector<1x64x32xbf16>
      %126 = vector.shape_cast %125 : vector<1x64x32xbf16> to vector<64x32xbf16>
      %127 = arith.addf %124, %126 : vector<64x32xbf16>
      %c0_60 = arith.constant 0 : index
      %c0_61 = arith.constant 0 : index
      %128 = vector.load %arg7[%c0_60, %c0_61] : memref<32x32xbf16, #tpu.memory_space<vmem>>, vector<32x32xbf16>
      %cst_62 = arith.constant dense<0.000000e+00> : vector<64x32xf32>
      %129 = tpu.matmul %127, %128, %cst_62 {dimension_numbers = #tpu.dot_dimension_numbers<[1], [0], [0], [1], [0, 0, 1, 1], [], []>} : vector<64x32xbf16>, vector<32x32xbf16>, vector<64x32xf32> -> vector<64x32xf32>
      %c0_63 = arith.constant 0 : index
      %c0_64 = arith.constant 0 : index
      %130 = vector.load %arg11[%c0_63, %c0_64] : memref<1x32xf32, #tpu.memory_space<vmem>>, vector<1x32xf32>
      %131 = vector.broadcast %130 : vector<1x32xf32> to vector<64x32xf32>
      %132 = arith.addf %129, %131 : vector<64x32xf32>
      %c0_65 = arith.constant 0 : index
      %c0_66 = arith.constant 0 : index
      %133 = vector.load %arg8[%c0_65, %c0_66] : memref<32x32xbf16, #tpu.memory_space<vmem>>, vector<32x32xbf16>
      %cst_67 = arith.constant dense<0.000000e+00> : vector<64x32xf32>
      %134 = tpu.matmul %127, %133, %cst_67 {dimension_numbers = #tpu.dot_dimension_numbers<[1], [0], [0], [1], [0, 0, 1, 1], [], []>} : vector<64x32xbf16>, vector<32x32xbf16>, vector<64x32xf32> -> vector<64x32xf32>
      %c0_68 = arith.constant 0 : index
      %c0_69 = arith.constant 0 : index
      %135 = vector.load %arg12[%c0_68, %c0_69] : memref<1x32xf32, #tpu.memory_space<vmem>>, vector<1x32xf32>
      %136 = vector.broadcast %135 : vector<1x32xf32> to vector<64x32xf32>
      %137 = arith.addf %134, %136 : vector<64x32xf32>
      %138 = arith.truncf %132 : vector<64x32xf32> to vector<64x32xbf16>
      %c0_70 = arith.constant 0 : index
      %c0_71 = arith.constant 0 : index
      %139 = vector.load %arg17[%c0_70, %c0_71] : memref<64x32xbf16, #tpu.memory_space<vmem>>, vector<64x32xbf16>
      tpu.vector_store %arg17[%c0_70, %c0_71], %138 {strides = array<i32>} : memref<64x32xbf16, #tpu.memory_space<vmem>>, vector<64x32xbf16>,
      %140 = arith.truncf %137 : vector<64x32xf32> to vector<64x32xbf16>
      %c0_72 = arith.constant 0 : index
      %c0_73 = arith.constant 0 : index
      %141 = vector.load %arg18[%c0_72, %c0_73] : memref<64x32xbf16, #tpu.memory_space<vmem>>, vector<64x32xbf16>
      tpu.vector_store %arg18[%c0_72, %c0_73], %140 {strides = array<i32>} : memref<64x32xbf16, #tpu.memory_space<vmem>>, vector<64x32xbf16>,
    } else {
    }
    %c0 = arith.constant 0 : index
    %c0_1 = arith.constant 0 : index
    %c0_2 = arith.constant 0 : index
    %3 = vector.load %arg2[%c0, %c0_1, %c0_2] : memref<1x256x32xbf16, #tpu.memory_space<vmem>>, vector<1x256x32xbf16>
    %4 = vector.shape_cast %3 : vector<1x256x32xbf16> to vector<256x32xbf16>
    %c0_3 = arith.constant 0 : index
    %c0_4 = arith.constant 0 : index
    %c0_5 = arith.constant 0 : index
    %5 = vector.load %arg3[%c0_3, %c0_4, %c0_5] : memref<1x256x32xbf16, #tpu.memory_space<vmem>>, vector<1x256x32xbf16>
    %6 = vector.shape_cast %5 : vector<1x256x32xbf16> to vector<256x32xbf16>
    %c0_6 = arith.constant 0 : index
    %c0_7 = arith.constant 0 : index
    %7 = vector.load %arg17[%c0_6, %c0_7] : memref<64x32xbf16, #tpu.memory_space<vmem>>, vector<64x32xbf16>
    %c0_8 = arith.constant 0 : index
    %c0_9 = arith.constant 0 : index
    %8 = vector.load %arg18[%c0_8, %c0_9] : memref<64x32xbf16, #tpu.memory_space<vmem>>, vector<64x32xbf16>
    %c0_10 = arith.constant 0 : index
    %c0_11 = arith.constant 0 : index
    %9 = vector.load %arg6[%c0_10, %c0_11] : memref<32x32xbf16, #tpu.memory_space<vmem>>, vector<32x32xbf16>
    %c0_12 = arith.constant 0 : index
    %c0_13 = arith.constant 0 : index
    %10 = vector.load %arg9[%c0_12, %c0_13] : memref<32x32xbf16, #tpu.memory_space<vmem>>, vector<32x32xbf16>
    %c0_14 = arith.constant 0 : index
    %c0_15 = arith.constant 0 : index
    %11 = vector.load %arg10[%c0_14, %c0_15] : memref<1x32xf32, #tpu.memory_space<vmem>>, vector<1x32xf32>
    %c0_16 = arith.constant 0 : index
    %c0_17 = arith.constant 0 : index
    %12 = vector.load %arg13[%c0_16, %c0_17] : memref<1x32xf32, #tpu.memory_space<vmem>>, vector<1x32xf32>
    %c0_18 = arith.constant 0 : index
    %c0_19 = arith.constant 0 : index
    %13 = vector.load %arg14[%c0_18, %c0_19] : memref<1x32xf32, #tpu.memory_space<vmem>>, vector<1x32xf32>
    %c0_20 = arith.constant 0 : index
    %c0_21 = arith.constant 0 : index
    %14 = vector.load %arg15[%c0_20, %c0_21] : memref<1x32xf32, #tpu.memory_space<vmem>>, vector<1x32xf32>
    %15 = arith.addf %4, %6 : vector<256x32xbf16>
    %cst = arith.constant dense<0.000000e+00> : vector<256x32xf32>
    %16 = tpu.matmul %15, %9, %cst {dimension_numbers = #tpu.dot_dimension_numbers<[1], [0], [0], [1], [0, 0, 1, 1], [], []>} : vector<256x32xbf16>, vector<32x32xbf16>, vector<256x32xf32> -> vector<256x32xf32>
    %17 = vector.broadcast %11 : vector<1x32xf32> to vector<256x32xf32>
    %18 = arith.addf %16, %17 : vector<256x32xf32>
    %19 = arith.truncf %18 : vector<256x32xf32> to vector<256x32xbf16>
    %20 = vector.extract_strided_slice %19 {offsets = [0, 0], sizes = [256, 8], strides = [1, 1]} : vector<256x32xbf16> to vector<256x8xbf16>
    %21 = vector.extract_strided_slice %7 {offsets = [0, 0], sizes = [64, 8], strides = [1, 1]} : vector<64x32xbf16> to vector<64x8xbf16>
    %22 = vector.extract_strided_slice %8 {offsets = [0, 0], sizes = [64, 8], strides = [1, 1]} : vector<64x32xbf16> to vector<64x8xbf16>
    %cst_22 = arith.constant dense<0.000000e+00> : vector<256x64xf32>
    %23 = tpu.matmul %20, %21, %cst_22 {dimension_numbers = #tpu.dot_dimension_numbers<[1], [1], [0], [0], [0, 0, 1, 0], [], []>} : vector<256x8xbf16>, vector<64x8xbf16>, vector<256x64xf32> -> vector<256x64xf32>
    %cst_23 = arith.constant dense<0xFF800000> : vector<256xf32>
    %24 = vector.multi_reduction <maximumf>, %23, %cst_23 [1] : vector<256x64xf32> to vector<256xf32>
    %25 = vector.shape_cast %24 : vector<256xf32> to vector<256x1xf32>
    %26 = vector.broadcast %25 : vector<256x1xf32> to vector<256x64xf32>
    %27 = arith.subf %23, %26 : vector<256x64xf32>
    %28 = math.exp %27 : vector<256x64xf32>
    %cst_24 = arith.constant dense<0.000000e+00> : vector<256xf32>
    %29 = vector.multi_reduction <add>, %28, %cst_24 [1] : vector<256x64xf32> to vector<256xf32>
    %30 = vector.shape_cast %29 : vector<256xf32> to vector<256x1xf32>
    %31 = tpu.reciprocal %30 {approx = true} : vector<256x1xf32> -> vector<256x1xf32>
    %32 = arith.truncf %28 : vector<256x64xf32> to vector<256x64xbf16>
    %cst_25 = arith.constant dense<0.000000e+00> : vector<256x8xf32>
    %33 = tpu.matmul %32, %22, %cst_25 {dimension_numbers = #tpu.dot_dimension_numbers<[1], [0], [0], [1], [0, 0, 1, 1], [], []>} : vector<256x64xbf16>, vector<64x8xbf16>, vector<256x8xf32> -> vector<256x8xf32>
    %34 = vector.broadcast %31 : vector<256x1xf32> to vector<256x8xf32>
    %35 = arith.mulf %33, %34 : vector<256x8xf32>
    %36 = arith.truncf %35 : vector<256x8xf32> to vector<256x8xbf16>
    %c0_26 = arith.constant 0 : index
    %c0_27 = arith.constant 0 : index
    %37 = vector.load %arg19[%c0_26, %c0_27] : memref<256x32xbf16, #tpu.memory_space<vmem>>, vector<256x8xbf16>
    tpu.vector_store %arg19[%c0_26, %c0_27], %36 {strides = array<i32>} : memref<256x32xbf16, #tpu.memory_space<vmem>>, vector<256x8xbf16>,
    %38 = vector.extract_strided_slice %19 {offsets = [0, 8], sizes = [256, 8], strides = [1, 1]} : vector<256x32xbf16> to vector<256x8xbf16>
    %39 = vector.extract_strided_slice %7 {offsets = [0, 8], sizes = [64, 8], strides = [1, 1]} : vector<64x32xbf16> to vector<64x8xbf16>
    %40 = vector.extract_strided_slice %8 {offsets = [0, 8], sizes = [64, 8], strides = [1, 1]} : vector<64x32xbf16> to vector<64x8xbf16>
    %cst_28 = arith.constant dense<0.000000e+00> : vector<256x64xf32>
    %41 = tpu.matmul %38, %39, %cst_28 {dimension_numbers = #tpu.dot_dimension_numbers<[1], [1], [0], [0], [0, 0, 1, 0], [], []>} : vector<256x8xbf16>, vector<64x8xbf16>, vector<256x64xf32> -> vector<256x64xf32>
    %cst_29 = arith.constant dense<0xFF800000> : vector<256xf32>
    %42 = vector.multi_reduction <maximumf>, %41, %cst_29 [1] : vector<256x64xf32> to vector<256xf32>
    %43 = vector.shape_cast %42 : vector<256xf32> to vector<256x1xf32>
    %44 = vector.broadcast %43 : vector<256x1xf32> to vector<256x64xf32>
    %45 = arith.subf %41, %44 : vector<256x64xf32>
    %46 = math.exp %45 : vector<256x64xf32>
    %cst_30 = arith.constant dense<0.000000e+00> : vector<256xf32>
    %47 = vector.multi_reduction <add>, %46, %cst_30 [1] : vector<256x64xf32> to vector<256xf32>
    %48 = vector.shape_cast %47 : vector<256xf32> to vector<256x1xf32>
    %49 = tpu.reciprocal %48 {approx = true} : vector<256x1xf32> -> vector<256x1xf32>
    %50 = arith.truncf %46 : vector<256x64xf32> to vector<256x64xbf16>
    %cst_31 = arith.constant dense<0.000000e+00> : vector<256x8xf32>
    %51 = tpu.matmul %50, %40, %cst_31 {dimension_numbers = #tpu.dot_dimension_numbers<[1], [0], [0], [1], [0, 0, 1, 1], [], []>} : vector<256x64xbf16>, vector<64x8xbf16>, vector<256x8xf32> -> vector<256x8xf32>
    %52 = vector.broadcast %49 : vector<256x1xf32> to vector<256x8xf32>
    %53 = arith.mulf %51, %52 : vector<256x8xf32>
    %54 = arith.truncf %53 : vector<256x8xf32> to vector<256x8xbf16>
    %c0_32 = arith.constant 0 : index
    %c8 = arith.constant 8 : index
    %55 = vector.load %arg19[%c0_32, %c8] : memref<256x32xbf16, #tpu.memory_space<vmem>>, vector<256x8xbf16>
    tpu.vector_store %arg19[%c0_32, %c8], %54 {strides = array<i32>} : memref<256x32xbf16, #tpu.memory_space<vmem>>, vector<256x8xbf16>,
    %56 = vector.extract_strided_slice %19 {offsets = [0, 16], sizes = [256, 8], strides = [1, 1]} : vector<256x32xbf16> to vector<256x8xbf16>
    %57 = vector.extract_strided_slice %7 {offsets = [0, 16], sizes = [64, 8], strides = [1, 1]} : vector<64x32xbf16> to vector<64x8xbf16>
    %58 = vector.extract_strided_slice %8 {offsets = [0, 16], sizes = [64, 8], strides = [1, 1]} : vector<64x32xbf16> to vector<64x8xbf16>
    %cst_33 = arith.constant dense<0.000000e+00> : vector<256x64xf32>
    %59 = tpu.matmul %56, %57, %cst_33 {dimension_numbers = #tpu.dot_dimension_numbers<[1], [1], [0], [0], [0, 0, 1, 0], [], []>} : vector<256x8xbf16>, vector<64x8xbf16>, vector<256x64xf32> -> vector<256x64xf32>
    %cst_34 = arith.constant dense<0xFF800000> : vector<256xf32>
    %60 = vector.multi_reduction <maximumf>, %59, %cst_34 [1] : vector<256x64xf32> to vector<256xf32>
    %61 = vector.shape_cast %60 : vector<256xf32> to vector<256x1xf32>
    %62 = vector.broadcast %61 : vector<256x1xf32> to vector<256x64xf32>
    %63 = arith.subf %59, %62 : vector<256x64xf32>
    %64 = math.exp %63 : vector<256x64xf32>
    %cst_35 = arith.constant dense<0.000000e+00> : vector<256xf32>
    %65 = vector.multi_reduction <add>, %64, %cst_35 [1] : vector<256x64xf32> to vector<256xf32>
    %66 = vector.shape_cast %65 : vector<256xf32> to vector<256x1xf32>
    %67 = tpu.reciprocal %66 {approx = true} : vector<256x1xf32> -> vector<256x1xf32>
    %68 = arith.truncf %64 : vector<256x64xf32> to vector<256x64xbf16>
    %cst_36 = arith.constant dense<0.000000e+00> : vector<256x8xf32>
    %69 = tpu.matmul %68, %58, %cst_36 {dimension_numbers = #tpu.dot_dimension_numbers<[1], [0], [0], [1], [0, 0, 1, 1], [], []>} : vector<256x64xbf16>, vector<64x8xbf16>, vector<256x8xf32> -> vector<256x8xf32>
    %70 = vector.broadcast %67 : vector<256x1xf32> to vector<256x8xf32>
    %71 = arith.mulf %69, %70 : vector<256x8xf32>
    %72 = arith.truncf %71 : vector<256x8xf32> to vector<256x8xbf16>
    %c0_37 = arith.constant 0 : index
    %c16 = arith.constant 16 : index
    %73 = vector.load %arg19[%c0_37, %c16] : memref<256x32xbf16, #tpu.memory_space<vmem>>, vector<256x8xbf16>
    tpu.vector_store %arg19[%c0_37, %c16], %72 {strides = array<i32>} : memref<256x32xbf16, #tpu.memory_space<vmem>>, vector<256x8xbf16>,
    %74 = vector.extract_strided_slice %19 {offsets = [0, 24], sizes = [256, 8], strides = [1, 1]} : vector<256x32xbf16> to vector<256x8xbf16>
    %75 = vector.extract_strided_slice %7 {offsets = [0, 24], sizes = [64, 8], strides = [1, 1]} : vector<64x32xbf16> to vector<64x8xbf16>
    %76 = vector.extract_strided_slice %8 {offsets = [0, 24], sizes = [64, 8], strides = [1, 1]} : vector<64x32xbf16> to vector<64x8xbf16>
    %cst_38 = arith.constant dense<0.000000e+00> : vector<256x64xf32>
    %77 = tpu.matmul %74, %75, %cst_38 {dimension_numbers = #tpu.dot_dimension_numbers<[1], [1], [0], [0], [0, 0, 1, 0], [], []>} : vector<256x8xbf16>, vector<64x8xbf16>, vector<256x64xf32> -> vector<256x64xf32>
    %cst_39 = arith.constant dense<0xFF800000> : vector<256xf32>
    %78 = vector.multi_reduction <maximumf>, %77, %cst_39 [1] : vector<256x64xf32> to vector<256xf32>
    %79 = vector.shape_cast %78 : vector<256xf32> to vector<256x1xf32>
    %80 = vector.broadcast %79 : vector<256x1xf32> to vector<256x64xf32>
    %81 = arith.subf %77, %80 : vector<256x64xf32>
    %82 = math.exp %81 : vector<256x64xf32>
    %cst_40 = arith.constant dense<0.000000e+00> : vector<256xf32>
    %83 = vector.multi_reduction <add>, %82, %cst_40 [1] : vector<256x64xf32> to vector<256xf32>
    %84 = vector.shape_cast %83 : vector<256xf32> to vector<256x1xf32>
    %85 = tpu.reciprocal %84 {approx = true} : vector<256x1xf32> -> vector<256x1xf32>
    %86 = arith.truncf %82 : vector<256x64xf32> to vector<256x64xbf16>
    %cst_41 = arith.constant dense<0.000000e+00> : vector<256x8xf32>
    %87 = tpu.matmul %86, %76, %cst_41 {dimension_numbers = #tpu.dot_dimension_numbers<[1], [0], [0], [1], [0, 0, 1, 1], [], []>} : vector<256x64xbf16>, vector<64x8xbf16>, vector<256x8xf32> -> vector<256x8xf32>
    %88 = vector.broadcast %85 : vector<256x1xf32> to vector<256x8xf32>
    %89 = arith.mulf %87, %88 : vector<256x8xf32>
    %90 = arith.truncf %89 : vector<256x8xf32> to vector<256x8xbf16>
    %c0_42 = arith.constant 0 : index
    %c24 = arith.constant 24 : index
    %91 = vector.load %arg19[%c0_42, %c24] : memref<256x32xbf16, #tpu.memory_space<vmem>>, vector<256x8xbf16>
    tpu.vector_store %arg19[%c0_42, %c24], %90 {strides = array<i32>} : memref<256x32xbf16, #tpu.memory_space<vmem>>, vector<256x8xbf16>,
    %c0_43 = arith.constant 0 : index
    %c0_44 = arith.constant 0 : index
    %92 = vector.load %arg19[%c0_43, %c0_44] : memref<256x32xbf16, #tpu.memory_space<vmem>>, vector<256x32xbf16>
    %cst_45 = arith.constant dense<0.000000e+00> : vector<256x32xf32>
    %93 = tpu.matmul %92, %10, %cst_45 {dimension_numbers = #tpu.dot_dimension_numbers<[1], [0], [0], [1], [0, 0, 1, 1], [], []>} : vector<256x32xbf16>, vector<32x32xbf16>, vector<256x32xf32> -> vector<256x32xf32>
    %94 = vector.broadcast %12 : vector<1x32xf32> to vector<256x32xf32>
    %95 = arith.addf %93, %94 : vector<256x32xf32>
    %96 = arith.extf %4 : vector<256x32xbf16> to vector<256x32xf32>
    %97 = arith.addf %96, %95 : vector<256x32xf32>
    %cst_46 = arith.constant dense<0.000000e+00> : vector<256xf32>
    %98 = vector.multi_reduction <add>, %97, %cst_46 [1] : vector<256x32xf32> to vector<256xf32>
    %99 = vector.shape_cast %98 : vector<256xf32> to vector<256x1xf32>
    %cst_47 = arith.constant 3.200000e+01 : f32
    %100 = vector.broadcast %cst_47 : f32 to vector<256x1xf32>
    %101 = arith.divf %99, %100 : vector<256x1xf32>
    %102 = arith.mulf %97, %97 : vector<256x32xf32>
    %cst_48 = arith.constant dense<0.000000e+00> : vector<256xf32>
    %103 = vector.multi_reduction <add>, %102, %cst_48 [1] : vector<256x32xf32> to vector<256xf32>
    %104 = vector.shape_cast %103 : vector<256xf32> to vector<256x1xf32>
    %cst_49 = arith.constant 3.200000e+01 : f32
    %105 = vector.broadcast %cst_49 : f32 to vector<256x1xf32>
    %106 = arith.divf %104, %105 : vector<256x1xf32>
    %107 = arith.mulf %101, %101 : vector<256x1xf32>
    %108 = arith.subf %106, %107 : vector<256x1xf32>
    %109 = vector.broadcast %101 : vector<256x1xf32> to vector<256x32xf32>
    %110 = arith.subf %97, %109 : vector<256x32xf32>
    %cst_50 = arith.constant 9.99999974E-6 : f32
    %111 = vector.broadcast %cst_50 : f32 to vector<256x1xf32>
    %112 = arith.addf %108, %111 : vector<256x1xf32>
    %113 = math.rsqrt %112 : vector<256x1xf32>
    %114 = vector.broadcast %113 : vector<256x1xf32> to vector<256x32xf32>
    %115 = arith.mulf %110, %114 : vector<256x32xf32>
    %116 = vector.broadcast %13 : vector<1x32xf32> to vector<256x32xf32>
    %117 = arith.mulf %115, %116 : vector<256x32xf32>
    %118 = vector.broadcast %14 : vector<1x32xf32> to vector<256x32xf32>
    %119 = arith.addf %117, %118 : vector<256x32xf32>
    %c0_51 = arith.constant 0 : index
    %c0_52 = arith.constant 0 : index
    %c0_53 = arith.constant 0 : index
    %120 = vector.load %arg16[%c0_51, %c0_52, %c0_53] : memref<1x256x32xf32, #tpu.memory_space<vmem>>, vector<1x256x32xf32>
    %121 = vector.shape_cast %120 : vector<1x256x32xf32> to vector<256x32xf32>
    %122 = vector.shape_cast %119 : vector<256x32xf32> to vector<1x256x32xf32>
    tpu.vector_store %arg16[%c0_51, %c0_52, %c0_53], %122 {strides = array<i32>} : memref<1x256x32xf32, #tpu.memory_space<vmem>>, vector<1x256x32xf32>,
    return
  }
  func.func @transform_0(%arg0: i32, %arg1: i32) -> (i32, i32, i32) {
    %c0_i32 = arith.constant 0 : i32
    %c0_i32_0 = arith.constant 0 : i32
    return %arg0, %arg1, %c0_i32 : i32, i32, i32
  }
  func.func @transform_1(%arg0: i32, %arg1: i32) -> (i32, i32, i32) {
    %c0_i32 = arith.constant 0 : i32
    %c0_i32_0 = arith.constant 0 : i32
    %c0_i32_1 = arith.constant 0 : i32
    return %c0_i32, %arg1, %c0_i32_0 : i32, i32, i32
  }
  func.func @transform_2(%arg0: i32, %arg1: i32) -> (i32, i32, i32) {
    %c0_i32 = arith.constant 0 : i32
    %c0_i32_0 = arith.constant 0 : i32
    %c0_i32_1 = arith.constant 0 : i32
    return %arg0, %c0_i32, %c0_i32_0 : i32, i32, i32
  }
  func.func @transform_3(%arg0: i32, %arg1: i32) -> (i32, i32, i32) {
    %c0_i32 = arith.constant 0 : i32
    %c0_i32_0 = arith.constant 0 : i32
    %c0_i32_1 = arith.constant 0 : i32
    %c0_i32_2 = arith.constant 0 : i32
    return %c0_i32, %c0_i32_0, %c0_i32_1 : i32, i32, i32
  }
  func.func @transform_4(%arg0: i32, %arg1: i32) -> (i32, i32) {
    %c0_i32 = arith.constant 0 : i32
    %c0_i32_0 = arith.constant 0 : i32
    %c0_i32_1 = arith.constant 0 : i32
    return %c0_i32, %c0_i32_0 : i32, i32
  }
  func.func @transform_5(%arg0: i32, %arg1: i32) -> (i32, i32) {
    %c0_i32 = arith.constant 0 : i32
    %c0_i32_0 = arith.constant 0 : i32
    %c0_i32_1 = arith.constant 0 : i32
    return %c0_i32, %c0_i32_0 : i32, i32
  }
  func.func @transform_6(%arg0: i32, %arg1: i32) -> (i32, i32) {
    %c0_i32 = arith.constant 0 : i32
    %c0_i32_0 = arith.constant 0 : i32
    %c0_i32_1 = arith.constant 0 : i32
    return %c0_i32, %c0_i32_0 : i32, i32
  }
  func.func @transform_7(%arg0: i32, %arg1: i32) -> (i32, i32) {
    %c0_i32 = arith.constant 0 : i32
    %c0_i32_0 = arith.constant 0 : i32
    %c0_i32_1 = arith.constant 0 : i32
    return %c0_i32, %c0_i32_0 : i32, i32
  }
  func.func @transform_8(%arg0: i32, %arg1: i32) -> (i32, i32) {
    %c0_i32 = arith.constant 0 : i32
    %c0_i32_0 = arith.constant 0 : i32
    %c0_i32_1 = arith.constant 0 : i32
    return %c0_i32, %c0_i32_0 : i32, i32
  }
  func.func @transform_9(%arg0: i32, %arg1: i32) -> (i32, i32) {
    %c0_i32 = arith.constant 0 : i32
    %c0_i32_0 = arith.constant 0 : i32
    %c0_i32_1 = arith.constant 0 : i32
    return %c0_i32, %c0_i32_0 : i32, i32
  }
  func.func @transform_10(%arg0: i32, %arg1: i32) -> (i32, i32) {
    %c0_i32 = arith.constant 0 : i32
    %c0_i32_0 = arith.constant 0 : i32
    %c0_i32_1 = arith.constant 0 : i32
    return %c0_i32, %c0_i32_0 : i32, i32
  }
  func.func @transform_11(%arg0: i32, %arg1: i32) -> (i32, i32) {
    %c0_i32 = arith.constant 0 : i32
    %c0_i32_0 = arith.constant 0 : i32
    %c0_i32_1 = arith.constant 0 : i32
    return %c0_i32, %c0_i32_0 : i32, i32
  }
  func.func @transform_12(%arg0: i32, %arg1: i32) -> (i32, i32) {
    %c0_i32 = arith.constant 0 : i32
    %c0_i32_0 = arith.constant 0 : i32
    %c0_i32_1 = arith.constant 0 : i32
    return %c0_i32, %c0_i32_0 : i32, i32
  }
  func.func @transform_13(%arg0: i32, %arg1: i32) -> (i32, i32) {
    %c0_i32 = arith.constant 0 : i32
    %c0_i32_0 = arith.constant 0 : i32
    %c0_i32_1 = arith.constant 0 : i32
    return %c0_i32, %c0_i32_0 : i32, i32
  }
  func.func @transform_14(%arg0: i32, %arg1: i32) -> (i32, i32, i32) {
    %c0_i32 = arith.constant 0 : i32
    %c0_i32_0 = arith.constant 0 : i32
    return %arg0, %arg1, %c0_i32 : i32, i32, i32
  }
}

</mosaic_0001>

<bundles_post_ra>
// kernel: spatial_reduced_attention.1
= control target key start
LH: loop header
LB: loop body
LE: loop exit
PB: predicated region body
PF: predicated region fallthrough
CT: control target
= control target key end

     0   :  { %s7233_s29 = smov 0   ;;  %s7235_s30 = smov 0   ;;  %s11246_s0 = inlined_call_operand.vmem [shape: bf16[2,256,32], index: 0, kind: input, shape index: {}]   ;;  %s11247_s1 = inlined_call_operand.vmem [shape: bf16[1,256,32], index: 1, kind: input, shape index: {}]   ;;  %s11248_s2 = inlined_call_operand.vmem [shape: bf16[2,64,32], index: 2, kind: input, shape index: {}]   ;;  %s11249_s3 = inlined_call_operand.vmem [shape: bf16[1,64,32], index: 3, kind: input, shape index: {}]   ;;  %s11250_s4 = inlined_call_operand.vmem [shape: bf16[32,32], index: 4, kind: input, shape index: {}]   ;;  %s11251_s5 = inlined_call_operand.vmem [shape: bf16[32,32], index: 5, kind: input, shape index: {}]   ;;  %s11252_s6 = inlined_call_operand.vmem [shape: bf16[32,32], index: 6, kind: input, shape index: {}]   ;;  %s11253_s7 = inlined_call_operand.vmem [shape: bf16[32,32], index: 7, kind: input, shape index: {}]   ;;  %s11254_s8 = inlined_call_operand.vmem [shape: f32[1,32], index: 8, kind: input, shape index: {}]   ;;  %s11255_s9 = inlined_call_operand.vmem [shape: f32[1,32], index: 9, kind: input, shape index: {}]   ;;  %s11256_s10 = inlined_call_operand.vmem [shape: f32[1,32], index: 10, kind: input, shape index: {}]   ;;  %s11257_s11 = inlined_call_operand.vmem [shape: f32[1,32], index: 11, kind: input, shape index: {}]   ;;  %s11258_s12 = inlined_call_operand.vmem [shape: f32[1,32], index: 12, kind: input, shape index: {}]   ;;  %s11259_s13 = inlined_call_operand.vmem [shape: f32[1,32], index: 13, kind: input, shape index: {}]   ;;  %s11260_s14 = inlined_call_operand.vmem [shape: f32[2,256,32], index: 14, kind: output, shape index: {}]  }
   0x1   :  { %s7237_s15 = smov 0  }
   0x2 LB: > { %s36_s16 = sadd.s32 1, %s7145_s30  ;;  %p5968_p0 = scmp.ge.s32.totalorder %s7149_s15, 1  ;;  %s7149_s15 = sphi %s7237_s15, %s24_s15   ;;  %s7145_s30 = sphi %s7235_s30, %s11562_s30   ;;  %s7141_s29 = sphi %s7233_s29, %s11561_s29  }
   0x3   : > { %p38_p1 = scmp.ge.s32.totalorder %s36_s16, 2  ;;  %p454_p2 = scmp.lt.s32.totalorder %s7149_s15, 3 }
   0x5   : > { %s11564_s16 = smov (%p38_p1, %s36_s16), 0  ;;  %p455_p3 = pnand %p5968_p0, %p454_p2 }
   0x7   : > { %458 = sbr.rel (%p455_p3) target bundleno = 3171 (0xc63), region = 76 }
   0xc   : > { %v6277_v0 = vld [vmem:[%s11251_s5 + $0x8] sm:$0xff]  ;;  %p519_p4 = scmp.lt.s32.totalorder %s7141_s29, 1  ;;  %v6276_v2 = vld [vmem:[%s11251_s5] sm:$0xff]  ;;  %vm618_vm0 = vcmask 261120   ;;  %v6494_v25 = vld [vmem:[%s11247_s1 + $0x30] sm:$0xff]   ;;  %vm717_vm1 = vcmask 257024  }
   0xd   : > { %v6289_v1 = vld [vmem:[%s11250_s4 + $0x8] sm:$0xff]  ;;  %637 = vmatpush.bf16.msra.mxu0 %v6277_v0  ;;  %v6288_v4 = vld [vmem:[%s11250_s4] sm:$0xff]  ;;  %v6430_v30 = vunpack.c.l.bf16 %v6494_v25  ;;  %v6431_v31 = vunpack.c.h.bf16 %v6494_v25  ;;  %v6472_v43 = vld [vmem:[%s11249_s3 + $0x10] sm:$0xff]   ;;  %s7151_s27 = smov 120   ;;  %s7153_s17 = smov 104   ;;  %vm1231_vm2 = vcmask 64512  }
   0xe   : > { %v6279_v3 = vld [vmem:[%s11252_s6 + $0x8] sm:$0xff]  ;;  %6504 = vmatpush.bf16.msra.mxu2 %v6289_v1  ;;  %s11566_s29 = smov (!%p519_p4, %s7141_s29), 1  ;;  %v6325_v5 = vld [vmem:[%s11249_s3] sm:$0xff]   ;;  %v6495_v45 = vld [vmem:[%s11247_s1 + $0x38] sm:$0xff]   ;;  %v6334_v48 = vunpack.c.l.bf16 %v6472_v43  ;;  %v6335_v49 = vunpack.c.h.bf16 %v6472_v43  ;;  %vm1381_vm3 = vcmask 523264   ;;  %vm1943_vm4 = vcmask 60416  }
   0xf   : > { %v6493_v6 = vld [vmem:[%s11247_s1 + $0x28] sm:$0xff]   ;;  %686 = vmatpush.bf16.msra.mxu1 %v6279_v3  ;;  %v6278_v7 = vld [vmem:[%s11252_s6] sm:$0xff]  ;;  %s6273_s21 = sshll.u32 %s11566_s29, 7  ;;  %s6274_s22 = sshll.u32 %s11566_s29, 5  ;;  %v6326_v8 = vunpack.c.l.bf16 %v6325_v5  ;;  %v6327_v9 = vunpack.c.h.bf16 %v6325_v5  ;;  %v6434_v52 = vunpack.c.l.bf16 %v6495_v45  ;;  %v6435_v53 = vunpack.c.h.bf16 %v6495_v45  ;;  %v6473_v61 = vld [vmem:[%s11249_s3 + $0x18] sm:$0xff]  }
  0x10   : > { %s7282_s25 = scalar_lea.vmem %s11246_s0, %s6273_s21  ;;  %s7287_s28 = scalar_lea.vmem %s11248_s2, %s6274_s22  ;;  %v6426_v10 = vunpack.c.l.bf16 %v6493_v6  ;;  %v6427_v11 = vunpack.c.h.bf16 %v6493_v6  ;;  %v6471_v24 = vld [vmem:[%s11249_s3 + $0x8] sm:$0xff]   ;;  %v6496_v63 = vld [vmem:[%s11247_s1 + $0x40] sm:$0xff]   ;;  %v6339_v3 = vunpack.c.h.bf16 %v6473_v61  ;;  %vm2842_vm5 = vcmask 126016  }
  0x11   : > { %638 = vmatpush.bf16.msra.mxu0 %v6276_v2  ;;  %v6309_v12 = vld [vmem:[%s7287_s28] sm:$0xff]   ;;  %v7291_v13 = vld [vmem:[%s7282_s25 + $0x28] sm:$0xff]   ;;  %v7310_v27 = vld [vmem:[%s7282_s25 + $0x30] sm:$0xff]   ;;  %v6330_v28 = vunpack.c.l.bf16 %v6471_v24  ;;  %v6331_v29 = vunpack.c.h.bf16 %v6471_v24  ;;  %v6338_v2 = vunpack.c.l.bf16 %v6473_v61  ;;  %v6438_v6 = vunpack.c.l.bf16 %v6496_v63  ;;  %s7154_s18 = smov 8   ;;  %s7156_s19 = smov 24  }
  0x12   : > { %6505 = vmatpush.bf16.msra.mxu2 %v6288_v4  ;;  %11364 = vst [vmem:[#allocation5_spill] sm:$0xff] %v7291_v13  ;;  %v6310_v14 = vunpack.c.l.bf16 %v6309_v12  ;;  %v6311_v15 = vunpack.c.h.bf16 %v6309_v12  ;;  %v11274_v16 = vunpack.c.l.bf16 %v7291_v13  ;;  %v11283_v17 = vunpack.c.h.bf16 %v7291_v13  ;;  %v6468_v26 = vld [vmem:[%s7287_s28 + $0x8] sm:$0xff]   ;;  %v6469_v42 = vld [vmem:[%s7287_s28 + $0x10] sm:$0xff]   ;;  %v7326_v44 = vld [vmem:[%s7282_s25 + $0x38] sm:$0xff]  }
  0x13   : > { %687 = vmatpush.bf16.msra.mxu1 %v6278_v7  ;;  %11365 = vst [vmem:[#allocation6_spill] sm:$0xff] %v7310_v27  ;;  %v6314_v32 = vunpack.c.l.bf16 %v6468_v26  ;;  %v6315_v33 = vunpack.c.h.bf16 %v6468_v26  ;;  %v11286_v34 = vunpack.c.l.bf16 %v7310_v27  ;;  %v11273_v35 = vunpack.c.h.bf16 %v7310_v27  ;;  %v6470_v60 = vld [vmem:[%s7287_s28 + $0x18] sm:$0xff]   ;;  %v7345_v62 = vld [vmem:[%s7282_s25 + $0x40] sm:$0xff]   ;;  %v7418_v61 = vld [vmem:[%s7282_s25 + $0x10] sm:$0xff]   ;;  %s7155_s28 = smov 16  }
  0x14   : > { %v586_v18 = vadd.f32 %v6326_v8, %v6310_v14  ;;  %v587_v19 = vadd.f32 %v6327_v9, %v6311_v15  ;;  %v908_v20 = vadd.f32 %v6426_v10, %v11274_v16  ;;  %v909_v21 = vadd.f32 %v6427_v11, %v11283_v17  ;;  %11366 = vst [vmem:[#allocation7_spill] sm:$0xff] %v7326_v44  ;;  %v7360_v15 = vld [vmem:[%s7282_s25 + $0x48] sm:$0xff]  }
  0x15   : > { %v588_v36 = vadd.f32 %v6330_v28, %v6314_v32  ;;  %v589_v37 = vadd.f32 %v6331_v29, %v6315_v33  ;;  %v910_v38 = vadd.f32 %v6430_v30, %v11286_v34  ;;  %v911_v39 = vadd.f32 %v6431_v31, %v11273_v35  ;;  %11367 = vst [vmem:[#allocation8_spill] sm:$0xff] %v7345_v62 }
  0x16   : > { %v594_v22 = vpack.c.bf16 %v587_v19, %v586_v18  ;;  %v935_v23 = vpack.c.bf16 %v909_v21, %v908_v20  ;;  %v6318_v46 = vunpack.c.l.bf16 %v6469_v42  ;;  %v6319_v47 = vunpack.c.h.bf16 %v6469_v42  ;;  %11368 = vst [vmem:[#allocation9_spill] sm:$0xff] %v7360_v15  ;;  %v6497_v18 = vld [vmem:[%s11247_s1 + $0x48] sm:$0xff]   ;;  %v7366_v19 = vld [vmem:[%s7282_s25] sm:$0xff]  }
  0x17   : > { %1016 = vmatpush.bf16.msrb.mxu1 %v6289_v1  ;;  %v595_v40 = vpack.c.bf16 %v589_v37, %v588_v36  ;;  %v936_v41 = vpack.c.bf16 %v911_v39, %v910_v38  ;;  %v11281_v50 = vunpack.c.l.bf16 %v7326_v44  ;;  %v11284_v51 = vunpack.c.h.bf16 %v7326_v44  ;;  %11369 = vst [vmem:[#allocation10_spill] sm:$0xff] %v7366_v19  ;;  %v6405_v20 = vld [vmem:[%s11247_s1] sm:$0xff]   ;;  %v7386_v38 = vld [vmem:[%s7282_s25 + $0x50] sm:$0xff]  }
  0x18   : > { %5983 = vmatmul.msk.bf16.vlgmr.msra.gmra.mxu0 %vm618_vm0, %v594_v22  ;;  %6012 = vmatmul.msk.bf16.vlgmr.msra.gmra.mxu2 %vm618_vm0, %v935_v23  ;;  %v590_v54 = vadd.f32 %v6334_v48, %v6318_v46  ;;  %v591_v55 = vadd.f32 %v6335_v49, %v6319_v47  ;;  %v6322_v0 = vunpack.c.l.bf16 %v6470_v60  ;;  %v6323_v1 = vunpack.c.h.bf16 %v6470_v60  ;;  %11370 = vst [vmem:[#allocation11_spill] sm:$0xff] %v7386_v38  ;;  %v6498_v39 = vld [vmem:[%s11247_s1 + $0x50] sm:$0xff]   ;;  %v6499_v60 = vld [vmem:[%s11247_s1 + $0x58] sm:$0xff]  }
  0x19   : > { %5995 = vmatmul.msk.bf16.vlgmr.msra.gmra.mxu1 %vm618_vm0, %v594_v22  ;;  %v912_v56 = vadd.f32 %v6434_v52, %v11281_v50  ;;  %v913_v57 = vadd.f32 %v6435_v53, %v11284_v51  ;;  %v11280_v5 = vunpack.c.h.bf16 %v7345_v62  ;;  %v6439_v7 = vunpack.c.h.bf16 %v6496_v63  ;;  %11373 = vst [vmem:[#allocation14_spill] sm:$0xff] %v7418_v61  ;;  %v6490_v63 = vld [vmem:[%s11247_s1 + $0x10] sm:$0xff]  }
  0x1a   : > { %v596_v58 = vpack.c.bf16 %v591_v55, %v590_v54  ;;  %v592_v8 = vadd.f32 %v6338_v2, %v6322_v0  ;;  %v593_v9 = vadd.f32 %v6339_v3, %v6323_v1  ;;  %v11282_v21 = vunpack.c.l.bf16 %v7360_v15 }
  0x1b   : > { %1017 = vmatpush.bf16.msrb.mxu1 %v6288_v4  ;;  %v937_v59 = vpack.c.bf16 %v913_v57, %v912_v56  ;;  %v11272_v4 = vunpack.c.l.bf16 %v7345_v62  ;;  %v915_v11 = vadd.f32 %v6439_v7, %v11280_v5  ;;  %v11271_v22 = vunpack.c.h.bf16 %v7360_v15 }
  0x1c   : > { %v597_v12 = vpack.c.bf16 %v593_v9, %v592_v8  ;;  %v6442_v23 = vunpack.c.l.bf16 %v6497_v18  ;;  %v6443_v24 = vunpack.c.h.bf16 %v6497_v18  ;;  %v11277_v25 = vunpack.c.l.bf16 %v7366_v19 }
  0x1d   : > { %v914_v10 = vadd.f32 %v6438_v6, %v11272_v4  ;;  %v11292_v26 = vunpack.c.h.bf16 %v7366_v19  ;;  %v6406_v28 = vunpack.c.l.bf16 %v6405_v20  ;;  %v6407_v29 = vunpack.c.h.bf16 %v6405_v20 }
  0x1e   : > { %v916_v30 = vadd.f32 %v6442_v23, %v11282_v21  ;;  %v917_v31 = vadd.f32 %v6443_v24, %v11271_v22  ;;  %v11279_v42 = vunpack.c.l.bf16 %v7386_v38  ;;  %v11278_v43 = vunpack.c.h.bf16 %v7386_v38  ;;  %v7438_v23 = vld [vmem:[%s7282_s25 + $0x60] sm:$0xff]  }
  0x1f   : > { %v938_v14 = vpack.c.bf16 %v915_v11, %v914_v10  ;;  %v898_v32 = vadd.f32 %v6406_v28, %v11277_v25  ;;  %v899_v33 = vadd.f32 %v6407_v29, %v11292_v26  ;;  %v6446_v45 = vunpack.c.l.bf16 %v6498_v39  ;;  %11374 = vst [vmem:[#allocation15_spill] sm:$0xff] %v7438_v23  ;;  %v6500_v24 = vld [vmem:[%s11247_s1 + $0x60] sm:$0xff]   ;;  %v7444_v28 = vld [vmem:[%s7282_s25 + $0x18] sm:$0xff]  }
  0x20   : > { %v939_v36 = vpack.c.bf16 %v917_v31, %v916_v30  ;;  %v6447_v46 = vunpack.c.h.bf16 %v6498_v39  ;;  %v6450_v2 = vunpack.c.l.bf16 %v6499_v60  ;;  %v6451_v3 = vunpack.c.h.bf16 %v6499_v60  ;;  %11375 = vst [vmem:[#allocation16_spill] sm:$0xff] %v7444_v28  ;;  %v6491_v29 = vld [vmem:[%s11247_s1 + $0x18] sm:$0xff]  }
  0x21   : > { %v930_v37 = vpack.c.bf16 %v899_v33, %v898_v32  ;;  %v918_v53 = vadd.f32 %v6446_v45, %v11279_v42  ;;  %v11276_v6 = vunpack.c.l.bf16 %v7418_v61  ;;  %v11287_v7 = vunpack.c.h.bf16 %v7418_v61 }
  0x22   : > { %v919_v54 = vadd.f32 %v6447_v46, %v11278_v43  ;;  %v6414_v8 = vunpack.c.l.bf16 %v6490_v63  ;;  %v6415_v9 = vunpack.c.h.bf16 %v6490_v63  ;;  %v11268_v30 = vunpack.c.l.bf16 %v7438_v23 }
  0x23   : > { %v11267_v31 = vunpack.c.h.bf16 %v7438_v23  ;;  %v6454_v32 = vunpack.c.l.bf16 %v6500_v24  ;;  %v6455_v33 = vunpack.c.h.bf16 %v6500_v24  ;;  %v6418_v39 = vunpack.c.l.bf16 %v6491_v29  ;;  %v7490_v24 = vld [vmem:[%s11255_s9] ss:$0 sm:$0xff] }
  0x24   : > { %v940_v57 = vpack.c.bf16 %v919_v54, %v918_v53  ;;  %vm3741_vm6 = vcmask 191616   ;;  %vm4640_vm7 = vcmask 257216  }
  0x25   : > { %v922_v45 = vadd.f32 %v6454_v32, %v11268_v30  ;;  %v923_v46 = vadd.f32 %v6455_v33, %v11267_v31 }
  0x27   : > { %v942_v53 = vpack.c.bf16 %v923_v46, %v922_v45 }
  0x28   : > { %5984 = vmatmul.msk.bf16.gmra.mxu0 %vm618_vm0, %v595_v40  ;;  %6013 = vmatmul.msk.bf16.gmra.mxu2 %vm618_vm0, %v936_v41  ;;  %v6489_v41 = vld [vmem:[%s11247_s1 + $0x8] sm:$0xff]  }
  0x29   : > { %5996 = vmatmul.msk.bf16.gmra.mxu1 %vm618_vm0, %v595_v40  ;;  %v7392_v40 = vld [vmem:[%s7282_s25 + $0x8] sm:$0xff]   ;;  %v6410_v49 = vunpack.c.l.bf16 %v6489_v41  ;;  %v6411_v52 = vunpack.c.h.bf16 %v6489_v41  ;;  %v6419_v41 = vunpack.c.h.bf16 %v6491_v29  ;;  %v7495_v29 = vld [vmem:[%s11256_s10] ss:$0 sm:$0xff] }
  0x2a   : > { %11371 = vst [vmem:[#allocation12_spill] sm:$0xff] %v7392_v40  ;;  %v11289_v47 = vunpack.c.l.bf16 %v7392_v40  ;;  %v11291_v48 = vunpack.c.h.bf16 %v7392_v40 }
  0x2c   : > { %v900_v55 = vadd.f32 %v6410_v49, %v11289_v47  ;;  %v901_v56 = vadd.f32 %v6411_v52, %v11291_v48 }
  0x38   : > { %5985 = vmatmul.msk.bf16.gmra.mxu0 %vm618_vm0, %v596_v58  ;;  %6014 = vmatmul.msk.bf16.gmra.mxu2 %vm618_vm0, %v937_v59  ;;  %v7412_v59 = vld [vmem:[%s7282_s25 + $0x58] sm:$0xff]  }
  0x39   : > { %5997 = vmatmul.msk.bf16.gmra.mxu1 %vm618_vm0, %v596_v58  ;;  %v931_v58 = vpack.c.bf16 %v901_v56, %v900_v55  ;;  %11372 = vst [vmem:[#allocation13_spill] sm:$0xff] %v7412_v59  ;;  %v11270_v0 = vunpack.c.l.bf16 %v7412_v59  ;;  %v11269_v1 = vunpack.c.h.bf16 %v7412_v59  ;;  %v7464_v55 = vld [vmem:[%s7282_s25 + $0x68] sm:$0xff]  }
  0x3a   : > { %11376 = vst [vmem:[#allocation17_spill] sm:$0xff] %v7464_v55  ;;  %v6501_v56 = vld [vmem:[%s11247_s1 + $0x68] sm:$0xff]   ;;  %v11264_v60 = vunpack.c.l.bf16 %v7464_v55  ;;  %v11263_v63 = vunpack.c.h.bf16 %v7464_v55 }
  0x3b   : > { %v920_v10 = vadd.f32 %v6450_v2, %v11270_v0  ;;  %v921_v11 = vadd.f32 %v6451_v3, %v11269_v1  ;;  %v6458_v2 = vunpack.c.l.bf16 %v6501_v56  ;;  %v6459_v3 = vunpack.c.h.bf16 %v6501_v56  ;;  %v7511_v56 = vld [vmem:[%s11254_s8] ss:$0 sm:$0xff] }
  0x3d   : > { %v941_v18 = vpack.c.bf16 %v921_v11, %v920_v10 }
  0x48   : > { %5986 = vmatmul.msk.bf16.gmra.mxu0 %vm618_vm0, %v597_v12  ;;  %6015 = vmatmul.msk.bf16.gmra.mxu2 %vm618_vm0, %v938_v14  ;;  %v903_v14 = vadd.f32 %v6415_v9, %v11287_v7 }
  0x49   : > { %5998 = vmatmul.msk.bf16.gmra.mxu1 %vm618_vm0, %v597_v12  ;;  %v902_v12 = vadd.f32 %v6414_v8, %v11276_v6 }
  0x4b   : > { %v932_v20 = vpack.c.bf16 %v903_v14, %v902_v12  ;;  %v924_v12 = vadd.f32 %v6458_v2, %v11264_v60  ;;  %v925_v14 = vadd.f32 %v6459_v3, %v11263_v63 }
  0x4d   : > { %v943_v32 = vpack.c.bf16 %v925_v14, %v924_v12 }
  0x58   : > { %6016 = vmatmul.msk.bf16.gmra.mxu2 %vm618_vm0, %v939_v36  ;;  %v11290_v36 = vunpack.c.l.bf16 %v7444_v28 }
  0x59   : > { %6007 = vmatmul.msk.bf16.vlgmr.msrb.gmra.mxu1 %vm618_vm0, %v930_v37  ;;  %v11275_v37 = vunpack.c.h.bf16 %v7444_v28 }
  0x5a   : > { %v904_v49 = vadd.f32 %v6418_v39, %v11290_v36 }
  0x5b   : > { %v905_v52 = vadd.f32 %v6419_v41, %v11275_v37 }
  0x5d   : > { %v933_v54 = vpack.c.bf16 %v905_v52, %v904_v49 }
  0x68   : > { %6017 = vmatmul.msk.bf16.gmra.mxu2 %vm618_vm0, %v940_v57  ;;  %v7470_v57 = vld [vmem:[%s7282_s25 + $0x20] sm:$0xff]  }
  0x69   : > { %6008 = vmatmul.msk.bf16.gmra.mxu1 %vm618_vm0, %v931_v58  ;;  %11377 = vst [vmem:[#allocation18_spill] sm:$0xff] %v7470_v57  ;;  %v6492_v58 = vld [vmem:[%s11247_s1 + $0x20] sm:$0xff]   ;;  %v11285_v8 = vunpack.c.l.bf16 %v7470_v57  ;;  %v11288_v9 = vunpack.c.h.bf16 %v7470_v57 }
  0x6a   : > { %v6422_v10 = vunpack.c.l.bf16 %v6492_v58  ;;  %v6423_v11 = vunpack.c.h.bf16 %v6492_v58 }
  0x78   : > { %6018 = vmatmul.msk.bf16.gmra.mxu2 %vm618_vm0, %v941_v18  ;;  %v906_v18 = vadd.f32 %v6422_v10, %v11285_v8 }
  0x79   : > { %6009 = vmatmul.msk.bf16.gmra.mxu1 %vm618_vm0, %v932_v20  ;;  %v907_v20 = vadd.f32 %v6423_v11, %v11288_v9 }
  0x7b   : > { %v934_v39 = vpack.c.bf16 %v907_v20, %v906_v18 }
  0x88   : > { %6019 = vmatmul.msk.bf16.gmra.mxu2 %vm618_vm0, %v942_v53  ;;  %v7502_v53 = vld [vmem:[%s7282_s25 + $0x70] sm:$0xff]  }
  0x89   : > { %6010 = vmatmul.msk.bf16.gmra.mxu1 %vm618_vm0, %v933_v54  ;;  %11378 = vst [vmem:[#allocation19_spill] sm:$0xff] %v7502_v53  ;;  %v6502_v54 = vld [vmem:[%s11247_s1 + $0x70] sm:$0xff]   ;;  %v11261_v2 = vunpack.c.l.bf16 %v7502_v53  ;;  %v11262_v3 = vunpack.c.h.bf16 %v7502_v53 }
  0x8a   : > { %v6462_v10 = vunpack.c.l.bf16 %v6502_v54  ;;  %v6463_v11 = vunpack.c.h.bf16 %v6502_v54 }
  0x95   : > { %v640_v33 = vpop.f32.mrf.mxu0 }
  0x96   : > { %v641_v41 = vadd.f32 %v7490_v24, %v640_v33  ;;  %v689_v45 = vpop.f32.mrf.mxu1 }
  0x97   : > { %v690_v46 = vadd.f32 %v7495_v29, %v689_v45 }
  0x98   : > { %v709_v49 = vpack.c.bf16 %v641_v41, %v641_v41  ;;  %6020 = vmatmul.msk.bf16.gmra.mxu2 %vm618_vm0, %v943_v32  ;;  %v927_v41 = vadd.f32 %v6463_v11, %v11262_v3 }
  0x99   : > { %v726_v52 = vpack.c.bf16 %v690_v46, %v690_v46  ;;  %6011 = vmatmul.msk.bf16.gmra.mxu1 %vm618_vm0, %v934_v39  ;;  %v926_v39 = vadd.f32 %v6462_v10, %v11261_v2 }
  0x9a   : > { %718 = vst.msk [vmem:[#allocation2] sm:$0xf] %vm717_vm1, %v709_v49 }
  0x9b   : > { %734 = vst.msk [vmem:[#allocation3] sm:$0xf] %vm717_vm1, %v726_v52  ;;  %v1044_v58 = vpop.f32.mrf.mxu2  ;;  %v944_v54 = vpack.c.bf16 %v927_v41, %v926_v39  ;;  %v6503_v39 = vld [vmem:[%s11247_s1 + $0x78] sm:$0xff]  }
  0x9c   : > { %v1045_v14 = vadd.f32 %v7511_v56, %v1044_v58 }
  0x9d   : > { %v642_v12 = vpop.f32.mrf.mxu0 }
  0x9e   : > { %v643_v18 = vadd.f32 %v7490_v24, %v642_v12  ;;  %v691_v20 = vpop.f32.mrf.mxu1  ;;  %v1109_v46 = vpack.c.bf16 %v1045_v14, %v1045_v14 }
  0x9f   : > { %v692_v32 = vadd.f32 %v7495_v29, %v691_v20 }
  0xa0   : > { %v710_v33 = vpack.c.bf16 %v643_v18, %v643_v18  ;;  %v1173_v12 = vunpack.c.l.b16 %v1109_v46 }
  0xa1   : > { %v727_v45 = vpack.c.bf16 %v692_v32, %v692_v32 }
  0xa2   : > { %719 = vst.msk [vmem:[#allocation2 + $0x4] sm:$0xf] %vm717_vm1, %v710_v33 }
  0xa3   : > { %735 = vst.msk [vmem:[#allocation3 + $0x4] sm:$0xf] %vm717_vm1, %v727_v45  ;;  %v1046_v49 = vpop.f32.mrf.mxu2  ;;  %v7532_v45 = vld [vmem:[%s7282_s25 + $0x78] sm:$0xff]   ;;  %s7152_s25 = smov 112  }
  0xa4   : > { %v1047_v52 = vadd.f32 %v7511_v56, %v1046_v49  ;;  %11379 = vst [vmem:[#allocation20_spill] sm:$0xff] %v7532_v45 }
  0xa5   : > { %v645_v58 = vpop.f32.mrf.mxu0 }
  0xa6   : > { %v1110_v18 = vpack.c.bf16 %v1047_v52, %v1047_v52  ;;  %v646_v20 = vadd.f32 %v7490_v24, %v645_v58  ;;  %v694_v10 = vpop.f32.mrf.mxu1  ;;  %v11265_v52 = vunpack.c.h.bf16 %v7532_v45  ;;  %v6467_v58 = vunpack.c.h.bf16 %v6503_v39 }
  0xa7   : > { %v695_v2 = vadd.f32 %v7495_v29, %v694_v10 }
  0xa8   : > { %v1174_v11 = vunpack.c.l.b16 %v1110_v18  ;;  %v711_v32 = vpack.c.bf16 %v646_v20, %v646_v20  ;;  %6021 = vmatmul.msk.bf16.gmra.mxu2 %vm618_vm0, %v944_v54  ;;  %v6466_v54 = vunpack.c.l.bf16 %v6503_v39  ;;  %v929_v3 = vadd.f32 %v6467_v58, %v11265_v52 }
  0xa9   : > { %v7529_v14 = vld [vmem:[#allocation2] sm:$0xff]  ;;  %v728_v33 = vpack.c.bf16 %v695_v2, %v695_v2  ;;  %v11266_v2 = vunpack.c.l.bf16 %v7532_v45 }
  0xaa   : > { %v7537_v41 = vpack.c.b16 %v1174_v11, %v1173_v12  ;;  %720 = vst.msk [vmem:[#allocation2 + $0x8] sm:$0xf] %vm717_vm1, %v711_v32  ;;  %v7540_v46 = vld [vmem:[#allocation3] sm:$0xff]  ;;  %2008 = vrot.lane.b32.xlu1 %v7529_v14, %s7151_s27 }
  0xab   : > { %v1049_v49 = vpop.f32.mrf.mxu2  ;;  %736 = vst.msk [vmem:[#allocation3 + $0x8] sm:$0xf] %vm717_vm1, %v728_v33  ;;  %2501 = vrot.lane.b32.xlu2 %v7540_v46, %s7151_s27  ;;  %v928_v33 = vadd.f32 %v6466_v54, %v11266_v2 }
  0xac   : > { %1986 = vrot.lane.b32.xlu0 %v7537_v41, %s7151_s27  ;;  %v1050_v20 = vadd.f32 %v7511_v56, %v1049_v49 }
  0xad   : > { %v647_v12 = vpop.f32.mrf.mxu0  ;;  %v945_v54 = vpack.c.bf16 %v929_v3, %v928_v33 }
  0xae   : > { %v648_v18 = vadd.f32 %v7490_v24, %v647_v12  ;;  %v696_v10 = vpop.f32.mrf.mxu1  ;;  %v1111_v60 = vpack.c.bf16 %v1050_v20, %v1050_v20 }
  0xaf   : > { %v697_v11 = vadd.f32 %v7495_v29, %v696_v10 }
  0xb0   : > { %v712_v32 = vpack.c.bf16 %v648_v18, %v648_v18  ;;  %v1175_v12 = vunpack.c.l.b16 %v1111_v60 }
  0xb1   : > { %v729_v63 = vpack.c.bf16 %v697_v11, %v697_v11 }
  0xb2   : > { %721 = vst.msk [vmem:[#allocation2 + $0xc] sm:$0xf] %vm717_vm1, %v712_v32  ;;  %2885 = vrot.lane.b32.xlu1 %v7537_v41, %s7152_s25 }
  0xb3   : > { %v1051_v39 = vpop.f32.mrf.mxu2  ;;  %737 = vst.msk [vmem:[#allocation3 + $0xc] sm:$0xf] %vm717_vm1, %v729_v63  ;;  %4299 = vrot.lane.b32.xlu2 %v7540_v46, %s7153_s17 }
  0xb4   : > { %2907 = vrot.lane.b32.xlu0 %v7529_v14, %s7152_s25  ;;  %v1052_v49 = vadd.f32 %v7511_v56, %v1051_v39 }
  0xb5   : > { %v650_v58 = vpop.f32.mrf.mxu0 }
  0xb6   : > { %v651_v18 = vadd.f32 %v7490_v24, %v650_v58  ;;  %v1112_v20 = vpack.c.bf16 %v1052_v49, %v1052_v49  ;;  %v699_v10 = vpop.f32.mrf.mxu1 }
  0xb7   : > { %v700_v11 = vadd.f32 %v7495_v29, %v699_v10 }
  0xb8   : > { %v713_v32 = vpack.c.bf16 %v651_v18, %v651_v18  ;;  %v1176_v63 = vunpack.c.l.b16 %v1112_v20  ;;  %6022 = vmatmul.msk.bf16.gmra.mxu2 %vm618_vm0, %v945_v54 }
  0xb9   : > { %v7570_v52 = vld [vmem:[#allocation2 + $0x8] sm:$0xff]  ;;  %v730_v39 = vpack.c.bf16 %v700_v11, %v700_v11 }
  0xba   : > { %722 = vst.msk [vmem:[#allocation2 + $0x10] sm:$0xf] %vm717_vm1, %v713_v32  ;;  %v7573_v2 = vpack.c.b16 %v1176_v63, %v1175_v12  ;;  %3806 = vrot.lane.b32.xlu1 %v7529_v14, %s7153_s17 }
  0xbb   : > { %738 = vst.msk [vmem:[#allocation3 + $0x10] sm:$0xf] %vm717_vm1, %v730_v39  ;;  %v1054_v60 = vpop.f32.mrf.mxu2  ;;  %v7594_v39 = vld [vmem:[#allocation3 + $0x8] sm:$0xff] }
  0xbc   : > { %2010 = vrot.lane.b32.xlu0 %v7570_v52, %s7151_s27  ;;  %1988 = vrot.lane.b32.xlu2 %v7573_v2, %s7151_s27 }
  0xbd   : > { %v652_v3 = vpop.f32.mrf.mxu0 }
  0xbe   : > { %v653_v33 = vadd.f32 %v7490_v24, %v652_v3  ;;  %v701_v49 = vpop.f32.mrf.mxu1 }
  0xbf   : > { %v702_v54 = vadd.f32 %v7495_v29, %v701_v49 }
  0xc0   : > { %v714_v58 = vpack.c.bf16 %v653_v33, %v653_v33 }
  0xc1   : > { %v731_v12 = vpack.c.bf16 %v702_v54, %v702_v54 }
  0xc2   : > { %723 = vst.msk [vmem:[#allocation2 + $0x14] sm:$0xf] %vm717_vm1, %v714_v58  ;;  %3784 = vrot.lane.b32.xlu1 %v7537_v41, %s7153_s17 }
  0xc3   : > { %739 = vst.msk [vmem:[#allocation3 + $0x14] sm:$0xf] %vm717_vm1, %v731_v12  ;;  %v1056_v18 = vpop.f32.mrf.mxu2 }
  0xc4   : > { %3786 = vrot.lane.b32.xlu0 %v7573_v2, %s7153_s17  ;;  %2887 = vrot.lane.b32.xlu2 %v7573_v2, %s7152_s25 }
  0xc5   : > { %v655_v20 = vpop.f32.mrf.mxu0 }
  0xc6   : > { %v656_v10 = vadd.f32 %v7490_v24, %v655_v20  ;;  %v704_v11 = vpop.f32.mrf.mxu1 }
  0xc7   : > { %v705_v32 = vadd.f32 %v7495_v29, %v704_v11 }
  0xc8   : > { %v715_v63 = vpack.c.bf16 %v656_v10, %v656_v10 }
  0xc9   : > { %v732_v3 = vpack.c.bf16 %v705_v32, %v705_v32  ;;  %v6282_v10 = vld [vmem:[#allocation2 + $0x10] sm:$0xff] }
  0xca   : > { %724 = vst.msk [vmem:[#allocation2 + $0x18] sm:$0xf] %vm717_vm1, %v715_v63  ;;  %3400 = vrot.lane.b32.xlu1 %v7540_v46, %s7152_s25 }
  0xcb   : > { %740 = vst.msk [vmem:[#allocation3 + $0x18] sm:$0xf] %vm717_vm1, %v732_v3  ;;  %v1059_v33 = vpop.f32.mrf.mxu2  ;;  %v7615_v3 = vld [vmem:[#allocation3 + $0x10] sm:$0xff] }
  0xcc   : > { %4301 = vrot.lane.b32.xlu0 %v7594_v39, %s7153_s17  ;;  %3808 = vrot.lane.b32.xlu2 %v7570_v52, %s7153_s17  ;;  %v1060_v1 = vadd.f32 %v7511_v56, %v1059_v33  ;;  %v1284_v33 = vsel %vm1231_vm2, %v7570_v52, 0 }
  0xcd   : > { %v657_v49 = vpop.f32.mrf.mxu0 }
  0xce   : > { %v658_v54 = vadd.f32 %v7490_v24, %v657_v49  ;;  %v706_v58 = vpop.f32.mrf.mxu1  ;;  %v1055_v24 = vadd.f32 %v7511_v56, %v1054_v60 }
  0xcf   : > { %v707_v12 = vadd.f32 %v7495_v29, %v706_v58  ;;  %v1057_v29 = vadd.f32 %v7511_v56, %v1056_v18 }
  0xd0   : > { %v716_v20 = vpack.c.bf16 %v658_v54, %v658_v54  ;;  %v1113_v49 = vpack.c.bf16 %v1055_v24, %v1055_v24 }
  0xd1   : > { %v733_v11 = vpack.c.bf16 %v707_v12, %v707_v12  ;;  %v1114_v54 = vpack.c.bf16 %v1057_v29, %v1057_v29  ;;  %v1287_v29 = vsel %vm1231_vm2, %v6282_v10, 0 }
  0xd2   : > { %725 = vst.msk [vmem:[#allocation2 + $0x1c] sm:$0xf] %vm717_vm1, %v716_v20  ;;  %2503 = vrot.lane.b32.xlu1 %v7594_v39, %s7151_s27  ;;  %v1177_v60 = vunpack.c.l.b16 %v1113_v49 }
  0xd3   : > { %741 = vst.msk [vmem:[#allocation3 + $0x1c] sm:$0xf] %vm717_vm1, %v733_v11  ;;  %v1061_v32 = vpop.f32.mrf.mxu2  ;;  %v1178_v18 = vunpack.c.l.b16 %v1114_v54 }
  0xd4   : > { %3402 = vrot.lane.b32.xlu0 %v7594_v39, %s7152_s25  ;;  %2012 = vrot.lane.b32.xlu2 %v6282_v10, %s7151_s27  ;;  %v1062_v0 = vadd.f32 %v7511_v56, %v1061_v32 }
  0xd5   : > { %v1202_v24 = vpack.c.b16 %v1178_v18, %v1177_v60  ;;  %v1115_v60 = vpack.c.bf16 %v1060_v1, %v1060_v1 }
  0xd6   : > { %v1019_v63 = vpop.f32.mrf.mxu1  ;;  %v1116_v18 = vpack.c.bf16 %v1062_v0, %v1062_v0 }
  0xd7   : > { %v1020_v49 = vadd.f32 %v7511_v56, %v1019_v63  ;;  %v1179_v35 = vunpack.c.l.b16 %v1115_v60 }
  0xd9   : > { %v7617_v58 = vld [vmem:[#allocation2 + $0x18] sm:$0xff]  ;;  %v1099_v22 = vpack.c.bf16 %v1020_v49, %v1020_v49 }
  0xda   : > { %2909 = vrot.lane.b32.xlu1 %v7570_v52, %s7152_s25  ;;  %v1290_v12 = vsel %vm1231_vm2, %v7617_v58, 0  ;;  %v7627_v31 = vld [vmem:[#allocation3 + $0x18] sm:$0xff] }
  0xdb   : > { %v1064_v20 = vpop.f32.mrf.mxu2  ;;  %1296 = vmatpush.bf16.xpose.msrb.mxu0 %v1290_v12  ;;  %6506 = vmatpush.bf16.xpose.msra.mxu3 %v1290_v12  ;;  %v1163_v63 = vunpack.c.l.b16 %v1099_v22 }
  0xdc   : > { %2505 = vrot.lane.b32.xlu0 %v7615_v3, %s7151_s27  ;;  %3810 = vrot.lane.b32.xlu2 %v6282_v10, %s7153_s17  ;;  %v1065_v0 = vadd.f32 %v7511_v56, %v1064_v20 }
  0xde   : > { %v1021_v11 = vpop.f32.mrf.mxu1 }
  0xdf   : > { %v1022_v54 = vadd.f32 %v7511_v56, %v1021_v11 }
  0xe1   : > { %v1100_v4 = vpack.c.bf16 %v1022_v54, %v1022_v54  ;;  %v1117_v54 = vpack.c.bf16 %v1065_v0, %v1065_v0 }
  0xe2   : > { %1990 = vrot.lane.b32.xlu1 %v1202_v24, %s7151_s27 }
  0xe3   : > { %v1066_v30 = vpop.f32.mrf.mxu2  ;;  %1297 = vmatpush.bf16.xpose.msrb.mxu0 %v1287_v29  ;;  %6507 = vmatpush.bf16.xpose.msra.mxu3 %v1287_v29  ;;  %v1180_v29 = vunpack.c.l.b16 %v1116_v18  ;;  %v1164_v1 = vunpack.c.l.b16 %v1100_v4  ;;  %v1281_v18 = vsel %vm1231_vm2, %v7529_v14, 0  ;;  %v1181_v4 = vunpack.c.l.b16 %v1117_v54 }
  0xe4   : > { %2889 = vrot.lane.b32.xlu0 %v1202_v24, %s7152_s25  ;;  %2507 = vrot.lane.b32.xlu2 %v7627_v31, %s7151_s27  ;;  %v1067_v11 = vadd.f32 %v7511_v56, %v1066_v30 }
  0xe5   : > { %v1203_v49 = vpack.c.b16 %v1180_v29, %v1179_v35  ;;  %v7645_v52 = vpack.c.b16 %v1164_v1, %v1163_v63 }
  0xe6   : > { %v1024_v12 = vpop.f32.mrf.mxu1  ;;  %v1118_v60 = vpack.c.bf16 %v1067_v11, %v1067_v11 }
  0xe7   : > { %v1025_v20 = vadd.f32 %v7511_v56, %v1024_v12 }
  0xe8   : > { %v1182_v22 = vunpack.c.l.b16 %v1118_v60 }
  0xe9   : > { %v1101_v63 = vpack.c.bf16 %v1025_v20, %v1025_v20 }
  0xea   : > { %2911 = vrot.lane.b32.xlu1 %v6282_v10, %s7152_s25  ;;  %v1204_v30 = vpack.c.b16 %v1182_v22, %v1181_v4 }
  0xeb   : > { %v1069_v32 = vpop.f32.mrf.mxu2  ;;  %1298 = vmatpush.bf16.xpose.msrb.mxu0 %v1284_v33  ;;  %6508 = vmatpush.bf16.xpose.msra.mxu3 %v1284_v33 }
  0xec   : > { %3788 = vrot.lane.b32.xlu0 %v1202_v24, %s7153_s17  ;;  %2913 = vrot.lane.b32.xlu2 %v7617_v58, %s7152_s25 }
  0xee   : > { %v1026_v10 = vpop.f32.mrf.mxu1 }
  0xef   : > { %v1027_v14 = vadd.f32 %v7511_v56, %v1026_v10 }
  0xf1   : > { %v1102_v12 = vpack.c.bf16 %v1027_v14, %v1027_v14 }
  0xf2   : > { %4303 = vrot.lane.b32.xlu1 %v7615_v3, %s7153_s17 }
  0xf3   : > { %v1071_v33 = vpop.f32.mrf.mxu2  ;;  %1299 = vmatpush.bf16.xpose.msrb.mxu0 %v1281_v18  ;;  %6509 = vmatpush.bf16.xpose.msra.mxu3 %v1281_v18  ;;  %v1166_v1 = vunpack.c.l.b16 %v1102_v12 }
  0xf4   : > { %1992 = vrot.lane.b32.xlu0 %v1203_v49, %s7151_s27  ;;  %2875 = vrot.lane.b32.xlu2 %v7645_v52, %s7152_s25  ;;  %v1072_v18 = vadd.f32 %v7511_v56, %v1071_v33 }
  0xf6   : > { %v1029_v35 = vpop.f32.mrf.mxu1  ;;  %v1120_v14 = vpack.c.bf16 %v1072_v18, %v1072_v18 }
  0xf7   : > { %v1030_v54 = vadd.f32 %v7511_v56, %v1029_v35 }
  0xf9   : > { %v1103_v22 = vpack.c.bf16 %v1030_v54, %v1030_v54 }
  0xfa   : > { %3404 = vrot.lane.b32.xlu1 %v7615_v3, %s7152_s25  ;;  %6039 = vmatmul.msk.bf16.vlgmr.msrb.gmra.mxu0 %vm1231_vm2, %v7645_v52 }
  0xfb   : > { %1794 = vmatpush.bf16.msra.mxu0 %v7627_v31  ;;  %v1074_v29 = vpop.f32.mrf.mxu2  ;;  %6046 = vmatmul.msk.bf16.vlgmr.msra.gmra.mxu3 %vm1231_vm2, %v1202_v24 }
  0xfc   : > { %3812 = vrot.lane.b32.xlu0 %v7617_v58, %s7153_s17  ;;  %1994 = vrot.lane.b32.xlu2 %v1204_v30, %s7151_s27 }
  0xfe   : > { %v1031_v0 = vpop.f32.mrf.mxu1 }
  0xff   : > { %1795 = vmatpush.bf16.msra.mxu0 %v7615_v3  ;;  %v1165_v3 = vunpack.c.l.b16 %v1101_v63  ;;  %v1167_v63 = vunpack.c.l.b16 %v1103_v22 }
 0x102   : > { %2014 = vrot.lane.b32.xlu1 %v7617_v58, %s7151_s27  ;;  %v1070_v58 = vadd.f32 %v7511_v56, %v1069_v32 }
 0x103   : > { %1796 = vmatpush.bf16.msra.mxu0 %v7594_v39  ;;  %v1076_v11 = vpop.f32.mrf.mxu2  ;;  %v1196_v39 = vpack.c.b16 %v1166_v1, %v1165_v3 }
 0x104   : > { %3790 = vrot.lane.b32.xlu0 %v1203_v49, %s7153_s17  ;;  %2893 = vrot.lane.b32.xlu2 %v1204_v30, %s7152_s25  ;;  %v1119_v20 = vpack.c.bf16 %v1070_v58, %v1070_v58 }
 0x105   : > { %v7672_v24 = vpop.permute.xlu2 %2501 }
 0x106   : > { %v1034_v10 = vpop.f32.mrf.mxu1 }
 0x107   : > { %1797 = vmatpush.bf16.msra.mxu0 %v7540_v46  ;;  %v1032_v46 = vadd.f32 %v7511_v56, %v1031_v0  ;;  %v1183_v0 = vunpack.c.l.b16 %v1119_v20  ;;  %v1035_v3 = vadd.f32 %v7511_v56, %v1034_v10  ;;  %v1075_v10 = vadd.f32 %v7511_v56, %v1074_v29 }
 0x108   : > { %v1077_v20 = vadd.f32 %v7511_v56, %v1076_v11 }
 0x109   : > { %v1104_v35 = vpack.c.bf16 %v1032_v46, %v1032_v46  ;;  %v1105_v18 = vpack.c.bf16 %v1035_v3, %v1035_v3 }
 0x10a   : > { %2891 = vrot.lane.b32.xlu1 %v1203_v49, %s7152_s25  ;;  %6040 = vmatmul.msk.bf16.gmra.mxu0 %vm1231_vm2, %v1196_v39  ;;  %v1122_v3 = vpack.c.bf16 %v1077_v20, %v1077_v20 }
 0x10b   : > { %v7678_v60 = vpop.f32.mrf.mxu2  ;;  %6047 = vmatmul.msk.bf16.gmra.mxu3 %vm1231_vm2, %v1203_v49  ;;  %v1168_v12 = vunpack.c.l.b16 %v1104_v35  ;;  %v1184_v49 = vunpack.c.l.b16 %v1120_v14 }
 0x10c   : > { %3774 = vrot.lane.b32.xlu0 %v7645_v52, %s7153_s17  ;;  %3792 = vrot.lane.b32.xlu2 %v1204_v30, %s7153_s17 }
 0x10d   : > { %v7686_v4 = vpop.permute.xlu2 %4299  ;;  %v7696_v46 = vpack.c.b16 %v1168_v12, %v1167_v63  ;;  %v1205_v58 = vpack.c.b16 %v1184_v49, %v1183_v0  ;;  %v1169_v12 = vunpack.c.l.b16 %v1105_v18  ;;  %v1121_v49 = vpack.c.bf16 %v1075_v10, %v1075_v10 }
 0x10e   : > { %v1036_v32 = vpop.f32.mrf.mxu1 }
 0x10f   : > { %v1037_v54 = vadd.f32 %v7511_v56, %v1036_v32  ;;  %v1185_v11 = vunpack.c.l.b16 %v1121_v49 }
 0x111   : > { %v1106_v22 = vpack.c.bf16 %v1037_v54, %v1037_v54  ;;  %v1186_v54 = vunpack.c.l.b16 %v1122_v3  ;;  %v1080_v3 = vadd.f32 %v7511_v56, %v7678_v60 }
 0x112   : > { %4305 = vrot.lane.b32.xlu1 %v7627_v31, %s7153_s17 }
 0x113   : > { %v1081_v33 = vpop.f32.mrf.mxu2  ;;  %v1170_v0 = vunpack.c.l.b16 %v1106_v22  ;;  %v7724_v10 = vpack.c.b16 %v1186_v54, %v1185_v11  ;;  %v1123_v37 = vpack.c.bf16 %v1080_v3, %v1080_v3 }
 0x114   : > { %2877 = vrot.lane.b32.xlu0 %v1196_v39, %s7152_s25  ;;  %1978 = vrot.lane.b32.xlu2 %v1196_v39, %s7151_s27  ;;  %v1082_v11 = vadd.f32 %v7511_v56, %v1081_v33 }
 0x115   : > { %v1198_v29 = vpack.c.b16 %v1170_v0, %v1169_v12  ;;  %v1187_v33 = vunpack.c.l.b16 %v1123_v37 }
 0x116   : > { %v7693_v1 = vpop.permute.xlu2 %1988  ;;  %v1039_v63 = vpop.f32.mrf.mxu1  ;;  %v1124_v6 = vpack.c.bf16 %v1082_v11, %v1082_v11 }
 0x117   : > { %v1040_v12 = vadd.f32 %v7511_v56, %v1039_v63 }
 0x118   : > { %v1188_v5 = vunpack.c.l.b16 %v1124_v6 }
 0x119   : > { %v1107_v54 = vpack.c.bf16 %v1040_v12, %v1040_v12 }
 0x11a   : > { %3406 = vrot.lane.b32.xlu1 %v7627_v31, %s7152_s25  ;;  %6041 = vmatmul.msk.bf16.gmra.mxu0 %vm1231_vm2, %v7696_v46  ;;  %v1207_v3 = vpack.c.b16 %v1188_v5, %v1187_v33 }
 0x11b   : > { %v1084_v35 = vpop.f32.mrf.mxu2  ;;  %6048 = vmatmul.msk.bf16.gmra.mxu3 %vm1231_vm2, %v1204_v30  ;;  %v1171_v25 = vunpack.c.l.b16 %v1107_v54 }
 0x11c   : > { %2895 = vrot.lane.b32.xlu0 %v1205_v58, %s7152_s25  ;;  %v7706_v14 = vpop.permute.xlu1 %2008  ;;  %3794 = vrot.lane.b32.xlu2 %v1205_v58, %s7153_s17  ;;  %v1085_v11 = vadd.f32 %v7511_v56, %v1084_v35 }
 0x11e   : > { %v7708_v32 = vpop.permute.xlu0 %1986  ;;  %v7711_v31 = vpop.permute.xlu2 %2887 }
 0x11f   : > { %v1041_v20 = vpop.f32.mrf.mxu1 }
 0x122   : > { %1976 = vrot.lane.b32.xlu1 %v7645_v52, %s7151_s27  ;;  %v1042_v52 = vadd.f32 %v7511_v56, %v1041_v20 }
 0x123   : > { %v1086_v30 = vpop.f32.mrf.mxu2 }
 0x124   : > { %1980 = vrot.lane.b32.xlu0 %v7696_v46, %s7151_s27  ;;  %v7717_v18 = vpop.permute.xlu1 %2885  ;;  %1982 = vrot.lane.b32.xlu2 %v1198_v29, %s7151_s27  ;;  %v1108_v20 = vpack.c.bf16 %v1042_v52, %v1042_v52  ;;  %v1087_v54 = vadd.f32 %v7511_v56, %v1086_v30 }
 0x126   : > { %v7719_v16 = vpop.permute.xlu0 %2907  ;;  %v7722_v22 = vpop.permute.xlu2 %3808  ;;  %v1172_v43 = vunpack.c.l.b16 %v1108_v20  ;;  %v1126_v37 = vpack.c.bf16 %v1087_v54, %v1087_v54 }
 0x128   : > { %v1199_v12 = vpack.c.b16 %v1172_v43, %v1171_v25  ;;  %v1125_v43 = vpack.c.bf16 %v1085_v11, %v1085_v11  ;;  %v1190_v30 = vunpack.c.l.b16 %v1126_v37 }
 0x12a   : > { %3776 = vrot.lane.b32.xlu1 %v1196_v39, %s7153_s17  ;;  %6042 = vmatmul.msk.bf16.gmra.mxu0 %vm1231_vm2, %v1198_v29 }
 0x12b   : > { %v1089_v0 = vpop.f32.mrf.mxu2  ;;  %6049 = vmatmul.msk.bf16.gmra.mxu3 %vm1231_vm2, %v1205_v58 }
 0x12c   : > { %1998 = vrot.lane.b32.xlu0 %v7724_v10, %s7151_s27  ;;  %v7733_v49 = vpop.permute.xlu1 %3806  ;;  %2881 = vrot.lane.b32.xlu2 %v1198_v29, %s7152_s25  ;;  %v1090_v20 = vadd.f32 %v7511_v56, %v1089_v0 }
 0x12e   : > { %v7738_v63 = vpop.permute.xlu0 %2010  ;;  %v7741_v39 = vpop.permute.xlu2 %2012 }
 0x132   : > { %1996 = vrot.lane.b32.xlu1 %v1205_v58, %s7151_s27 }
 0x133   : > { %v1091_v42 = vpop.f32.mrf.mxu2 }
 0x134   : > { %3796 = vrot.lane.b32.xlu0 %v7724_v10, %s7153_s17  ;;  %v7746_v60 = vpop.permute.xlu1 %3784  ;;  %3780 = vrot.lane.b32.xlu2 %v1198_v29, %s7153_s17  ;;  %v1189_v29 = vunpack.c.l.b16 %v1125_v43  ;;  %v1092_v33 = vadd.f32 %v7511_v56, %v1091_v42 }
 0x135   : > { %11380 = vst [vmem:[#allocation21_spill] sm:$0xff] %v7746_v60 }
 0x136   : > { %v7748_v50 = vpop.permute.xlu0 %3786  ;;  %v7751_v52 = vpop.permute.xlu2 %3810  ;;  %v1128_v43 = vpack.c.bf16 %v1092_v33, %v1092_v33  ;;  %v2964_v33 = vsel %vm1231_vm2, %v7719_v16, 0 }
 0x137   : > { %11381 = vst [vmem:[#allocation22_spill] sm:$0xff] %v7748_v50 }
 0x138   : > { %v1192_v8 = vunpack.c.l.b16 %v1128_v43 }
 0x13a   : > { %2879 = vrot.lane.b32.xlu1 %v7696_v46, %s7152_s25  ;;  %6043 = vmatmul.msk.bf16.gmra.mxu0 %vm1231_vm2, %v1199_v12 }
 0x13b   : > { %v1094_v58 = vpop.f32.mrf.mxu2  ;;  %6050 = vmatmul.msk.bf16.gmra.mxu3 %vm1231_vm2, %v7724_v10 }
 0x13c   : > { %2883 = vrot.lane.b32.xlu0 %v1199_v12, %s7152_s25  ;;  %v7761_v6 = vpop.permute.xlu1 %3400  ;;  %2000 = vrot.lane.b32.xlu2 %v1207_v3, %s7151_s27  ;;  %v1095_v51 = vadd.f32 %v7511_v56, %v1094_v58 }
 0x13e   : > { %v7763_v25 = vpop.permute.xlu0 %4301  ;;  %v2508_v5 = vpop.permute.xlu2 %2507  ;;  %v1129_v42 = vpack.c.bf16 %v1095_v51, %v1095_v51 }
 0x13f   : > { %2565 = vmatpush.bf16.msrb.mxu2 %v2508_v5  ;;  %v1127_v5 = vpack.c.bf16 %v1090_v20, %v1090_v20 }
 0x141   : > { %v1191_v58 = vunpack.c.l.b16 %v1127_v5 }
 0x142   : > { %3778 = vrot.lane.b32.xlu1 %v7696_v46, %s7153_s17  ;;  %v7776_v46 = vpack.c.b16 %v1190_v30, %v1189_v29 }
 0x143   : > { %v1096_v35 = vpop.f32.mrf.mxu2  ;;  %v7787_v51 = vpack.c.b16 %v1192_v8, %v1191_v58 }
 0x144   : > { %3782 = vrot.lane.b32.xlu0 %v1199_v12, %s7153_s17  ;;  %v2504_v21 = vpop.permute.xlu1 %2503  ;;  %2899 = vrot.lane.b32.xlu2 %v1207_v3, %s7152_s25  ;;  %v1097_v11 = vadd.f32 %v7511_v56, %v1096_v35  ;;  %11382 = vst [vmem:[#allocation23_spill] sm:$0xff] %v7776_v46  ;;  %v1193_v35 = vunpack.c.l.b16 %v1129_v42 }
 0x145   : > { %11383 = vst [vmem:[#allocation24_spill] sm:$0xff] %v7787_v51 }
 0x146   : > { %v7771_v17 = vpop.permute.xlu0 %3402  ;;  %v2914_v54 = vpop.permute.xlu2 %2913  ;;  %v1130_v37 = vpack.c.bf16 %v1097_v11, %v1097_v11 }
 0x147   : > { %v2973_v0 = vsel %vm1231_vm2, %v2914_v54, 0 }
 0x148   : > { %2979 = vmatpush.bf16.xpose.msrb.mxu3 %v2973_v0  ;;  %v1194_v30 = vunpack.c.l.b16 %v1130_v37  ;;  %v2071_v37 = vsel %vm1231_vm2, %v7741_v39, 0  ;;  %v2068_v39 = vsel %vm1231_vm2, %v7738_v63, 0  ;;  %v2065_v63 = vsel %vm1231_vm2, %v7706_v14, 0 }
 0x14a   : > { %2897 = vrot.lane.b32.xlu1 %v7724_v10, %s7152_s25  ;;  %6044 = vmatmul.msk.bf16.gmra.mxu0 %vm1231_vm2, %v7537_v41  ;;  %v7789_v10 = vpack.c.b16 %v1194_v30, %v1193_v35 }
 0x14b   : > { %6051 = vmatmul.msk.bf16.gmra.mxu3 %vm1231_vm2, %v1207_v3 }
 0x14c   : > { %2901 = vrot.lane.b32.xlu0 %v7776_v46, %s7152_s25  ;;  %v2910_v56 = vpop.permute.xlu1 %2909  ;;  %3798 = vrot.lane.b32.xlu2 %v1207_v3, %s7153_s17  ;;  %11384 = vst [vmem:[#allocation25_spill] sm:$0xff] %v7789_v10 }
 0x14d   : > { %v2967_v3 = vsel %vm1231_vm2, %v2910_v56, 0 }
 0x14e   : > { %v2506_v29 = vpop.permute.xlu0 %2505  ;;  %v2876_v43 = vpop.permute.xlu2 %2875 }
 0x14f   : > { %2566 = vmatpush.bf16.msrb.mxu2 %v2506_v29 }
 0x152   : > { %1984 = vrot.lane.b32.xlu1 %v1199_v12, %s7151_s27 }
 0x153   : > { %2567 = vmatpush.bf16.msrb.mxu2 %v2504_v21 }
 0x154   : > { %2004 = vrot.lane.b32.xlu0 %v7787_v51, %s7151_s27  ;;  %v7794_v41 = vpop.permute.xlu1 %1990  ;;  %2006 = vrot.lane.b32.xlu2 %v7789_v10, %s7151_s27 }
 0x156   : > { %v7808_v12 = vpop.permute.xlu0 %2889  ;;  %v7836_v29 = vpop.permute.xlu2 %1994 }
 0x157   : > { %2568 = vmatpush.bf16.msrb.mxu2 %v7672_v24 }
 0x15a   : > { %2002 = vrot.lane.b32.xlu1 %v7776_v46, %s7151_s27  ;;  %6045 = vmatmul.msk.bf16.gmra.mxu0 %vm1231_vm2, %v7573_v2 }
 0x15b   : > { %6052 = vmatmul.msk.bf16.gmra.mxu3 %vm1231_vm2, %v7776_v46 }
 0x15c   : > { %2905 = vrot.lane.b32.xlu0 %v7789_v10, %s7152_s25  ;;  %v2912_v21 = vpop.permute.xlu1 %2911 }
 0x15d   : > { %v2970_v8 = vsel %vm1231_vm2, %v2912_v21, 0 }
 0x15e   : > { %2980 = vmatpush.bf16.xpose.msrb.mxu3 %v2970_v8  ;;  %v7813_v2 = vpop.permute.xlu0 %3788 }
 0x15f   : > { %11385 = vst [vmem:[#allocation26_spill] sm:$0xff] %v7813_v2 }
 0x162   : > { %2903 = vrot.lane.b32.xlu1 %v7787_v51, %s7152_s25 }
 0x164   : > { %v4304_v24 = vpop.permute.xlu1 %4303 }
 0x166   : > { %2981 = vmatpush.bf16.xpose.msrb.mxu3 %v2967_v3  ;;  %v7819_v11 = vpop.permute.xlu0 %1992 }
 0x16b   : > { %6053 = vmatmul.msk.bf16.gmra.mxu3 %vm1231_vm2, %v7787_v51 }
 0x16c   : > { %v3405_v20 = vpop.permute.xlu1 %3404 }
 0x16e   : > { %2982 = vmatpush.bf16.xpose.msrb.mxu3 %v2964_v33  ;;  %v3813_v16 = vpop.permute.xlu0 %3812 }
 0x174   : > { %v2015_v54 = vpop.permute.xlu1 %2014 }
 0x175   : > { %v2074_v5 = vsel %vm1231_vm2, %v2015_v54, 0 }
 0x176   : > { %2080 = vmatpush.bf16.xpose.msra.mxu1 %v2074_v5  ;;  %v7846_v33 = vpop.permute.xlu0 %3790 }
 0x177   : > { %v7822_v0 = vpop.f32.mrf.mxu0  ;;  %11386 = vst [vmem:[#allocation27_spill] sm:$0xff] %v7846_v33 }
 0x178   : > { %v1382_v30 = vsel %vm1381_vm3, %v7822_v0, -inf }
 0x17b   : > { %6054 = vmatmul.msk.bf16.gmra.mxu3 %vm1231_vm2, %v7789_v10 }
 0x17c   : > { %v7826_v42 = vpop.permute.xlu1 %2891 }
 0x17e   : > { %v7830_v58 = vpop.f32.mrf.mxu3  ;;  %2081 = vmatpush.bf16.xpose.msra.mxu1 %v2071_v37  ;;  %v7852_v37 = vpop.permute.xlu2 %2893 }
 0x17f   : > { %v1424_v56 = vsel %vm1381_vm3, %v7830_v58, -inf  ;;  %v7834_v35 = vpop.f32.mrf.mxu0 }
 0x180   : > { %1425 = vmax.xlane.f32.xlu2 %v1424_v56  ;;  %v1385_v5 = vsel %vm1381_vm3, %v7834_v35, -inf }
 0x184   : > { %v4306_v21 = vpop.permute.xlu1 %4305 }
 0x185   : > { %4363 = vmatpush.bf16.msra.mxu2 %v4306_v21 }
 0x186   : > { %1383 = vmax.xlane.f32.xlu0 %v1382_v30  ;;  %v7842_v8 = vpop.f32.mrf.mxu3  ;;  %2082 = vmatpush.bf16.xpose.msra.mxu1 %v2068_v39  ;;  %v3872_v30 = vsel %vm1231_vm2, %v3813_v16, 0  ;;  %v7863_v39 = vpop.permute.xlu0 %3774 }
 0x187   : > { %v7844_v3 = vpop.f32.mrf.mxu0  ;;  %v1427_v14 = vsel %vm1381_vm3, %v7842_v8, -inf  ;;  %v7870_v16 = vpop.permute.xlu2 %3792 }
 0x188   : > { %v1388_v54 = vsel %vm1381_vm3, %v7844_v3, -inf  ;;  %11387 = vst [vmem:[#allocation28_spill] sm:$0xff] %v7870_v16 }
 0x189   : > { %4364 = vmatpush.bf16.msra.mxu2 %v4304_v24 }
 0x18b   : > { %6119 = vmatmul.msk.bf16.vlgmr.msrb.gmra.mxu3 %vm1231_vm2, %v2876_v43 }
 0x18c   : > { %v3407_v56 = vpop.permute.xlu1 %3406  ;;  %1389 = vmax.xlane.f32.xlu1 %v1388_v54 }
 0x18d   : > { %3464 = vmatpush.bf16.msrb.mxu0 %v3407_v56  ;;  %4365 = vmatpush.bf16.msra.mxu2 %v7763_v25 }
 0x18e   : > { %1386 = vmax.xlane.f32.xlu0 %v1385_v5  ;;  %v7858_v24 = vpop.f32.mrf.mxu3  ;;  %2083 = vmatpush.bf16.xpose.msra.mxu1 %v2065_v63  ;;  %v2878_v63 = vpop.permute.xlu0 %2877 }
 0x18f   : > { %v7861_v21 = vpop.f32.mrf.mxu0  ;;  %v1430_v43 = vsel %vm1381_vm3, %v7858_v24, -inf }
 0x190   : > { %v1391_v56 = vsel %vm1381_vm3, %v7861_v21, -inf }
 0x191   : > { %3465 = vmatpush.bf16.msrb.mxu0 %v3405_v20  ;;  %4366 = vmatpush.bf16.msra.mxu2 %v7686_v4  ;;  %v3869_v4 = vsel %vm1231_vm2, %v7751_v52, 0 }
 0x194   : > { %v1977_v54 = vpop.permute.xlu1 %1976  ;;  %1431 = vmax.xlane.f32.xlu1 %v1430_v43  ;;  %v1979_v43 = vpop.permute.xlu2 %1978 }
 0x195   : > { %6087 = vmatmul.msk.bf16.vlgmr.msra.gmra.mxu1 %vm1231_vm2, %v1977_v54  ;;  %3466 = vmatpush.bf16.msrb.mxu0 %v7771_v17  ;;  %v3866_v54 = vsel %vm1231_vm2, %v7722_v22, 0  ;;  %v3863_v22 = vsel %vm1231_vm2, %v7733_v49, 0 }
 0x196   : > { %3878 = vmatpush.bf16.xpose.msrb.mxu1 %v3872_v30  ;;  %1428 = vmax.xlane.f32.xlu0 %v1427_v14  ;;  %v7873_v25 = vpop.f32.mrf.mxu3 }
 0x197   : > { %v1433_v20 = vsel %vm1381_vm3, %v7873_v25, -inf  ;;  %v7880_v5 = vpop.f32.mrf.mxu0 }
 0x198   : > { %1434 = vmax.xlane.f32.xlu2 %v1433_v20  ;;  %v1394_v17 = vsel %vm1381_vm3, %v7880_v5, -inf }
 0x199   : > { %3467 = vmatpush.bf16.msrb.mxu0 %v7761_v6 }
 0x19b   : > { %6120 = vmatmul.msk.bf16.gmra.mxu3 %vm1231_vm2, %v2878_v63  ;;  %v7907_v63 = vpop.permute.xlu0 %2895 }
 0x19c   : > { %v7886_v30 = vpop.permute.xlu1 %3776  ;;  %1392 = vmax.xlane.f32.xlu1 %v1391_v56 }
 0x19e   : > { %3879 = vmatpush.bf16.xpose.msrb.mxu1 %v3869_v4  ;;  %v7890_v52 = vpop.f32.mrf.mxu3 }
 0x19f   : > { %v1436_v14 = vsel %vm1381_vm3, %v7890_v52, -inf  ;;  %v7896_v6 = vpop.f32.mrf.mxu0 }
 0x1a0   : > { %1437 = vmax.xlane.f32.xlu0 %v1436_v14  ;;  %1395 = vmax.xlane.f32.xlu2 %v1394_v17  ;;  %v1397_v20 = vsel %vm1381_vm3, %v7896_v6, -inf  ;;  %v7913_v17 = vpop.permute.xlu2 %3794 }
 0x1a1   : > { %11388 = vst [vmem:[#allocation29_spill] sm:$0xff] %v7913_v17 }
 0x1a4   : > { %v7898_v4 = vpop.permute.xlu1 %1996 }
 0x1a5   : > { %6088 = vmatmul.msk.bf16.gmra.mxu1 %vm1231_vm2, %v1979_v43 }
 0x1a6   : > { %3880 = vmatpush.bf16.xpose.msrb.mxu1 %v3866_v54  ;;  %v7903_v56 = vpop.f32.mrf.mxu3 }
 0x1a7   : > { %v1439_v54 = vsel %vm1381_vm3, %v7903_v56, -inf  ;;  %v7911_v14 = vpop.f32.mrf.mxu0 }
 0x1a8   : > { %1440 = vmax.xlane.f32.xlu1 %v1439_v54  ;;  %1398 = vmax.xlane.f32.xlu2 %v1397_v20  ;;  %v1400_v43 = vsel %vm1381_vm3, %v7911_v14, -inf  ;;  %v1981_v54 = vpop.permute.xlu0 %1980  ;;  %v1983_v20 = vpop.permute.xlu2 %1982 }
 0x1a9   : > { %1401 = vmax.xlane.f32.xlu0 %v1400_v43 }
 0x1ac   : > { %v2880_v34 = vpop.permute.xlu1 %2879 }
 0x1ad   : > { %6121 = vmatmul.msk.bf16.gmra.mxu3 %vm1231_vm2, %v2880_v34 }
 0x1ae   : > { %3881 = vmatpush.bf16.xpose.msrb.mxu1 %v3863_v22  ;;  %v7918_v49 = vpop.f32.mrf.mxu3 }
 0x1af   : > { %v1442_v22 = vsel %vm1381_vm3, %v7918_v49, -inf  ;;  %v7922_v7 = vpop.f32.mrf.mxu0 }
 0x1b0   : > { %1443 = vmax.xlane.f32.xlu2 %v1442_v22  ;;  %v1403_v9 = vsel %vm1381_vm3, %v7922_v7, -inf  ;;  %v7935_v22 = vpop.permute.xlu0 %1998  ;;  %v2882_v48 = vpop.permute.xlu2 %2881 }
 0x1b1   : > { %1404 = vmax.xlane.f32.xlu1 %v1403_v9 }
 0x1b4   : > { %v7946_v45 = vpop.permute.xlu1 %3778 }
 0x1b5   : > { %6089 = vmatmul.msk.bf16.gmra.mxu1 %vm1231_vm2, %v1981_v54 }
 0x1b6   : > { %v7927_v43 = vpop.f32.mrf.mxu3 }
 0x1b7   : > { %v1445_v34 = vsel %vm1381_vm3, %v7927_v43, -inf  ;;  %v7931_v47 = vpop.f32.mrf.mxu0 }
 0x1b8   : > { %1446 = vmax.xlane.f32.xlu0 %v1445_v34  ;;  %v1406_v36 = vsel %vm1381_vm3, %v7931_v47, -inf  ;;  %v7970_v15 = vpop.permute.xlu2 %3780 }
 0x1b9   : > { %1407 = vmax.xlane.f32.xlu2 %v1406_v36  ;;  %v7948_v36 = vpop.permute.xlu0 %3796  ;;  %11390 = vst [vmem:[#allocation31_spill] sm:$0xff] %v7970_v15 }
 0x1ba   : > { %11389 = vst [vmem:[#allocation30_spill] sm:$0xff] %v7948_v36 }
 0x1bc   : > { %v7959_v23 = vpop.permute.xlu1 %2897 }
 0x1bd   : > { %6122 = vmatmul.msk.bf16.gmra.mxu3 %vm1231_vm2, %v2882_v48 }
 0x1be   : > { %v7938_v9 = vpop.f32.mrf.mxu3 }
 0x1bf   : > { %v1448_v54 = vsel %vm1381_vm3, %v7938_v9, -inf  ;;  %v7942_v26 = vpop.f32.mrf.mxu0 }
 0x1c0   : > { %1449 = vmax.xlane.f32.xlu1 %v1448_v54  ;;  %v1409_v34 = vsel %vm1381_vm3, %v7942_v26, -inf }
 0x1c1   : > { %1410 = vmax.xlane.f32.xlu0 %v1409_v34  ;;  %v2884_v59 = vpop.permute.xlu0 %2883 }
 0x1c4   : > { %v1985_v62 = vpop.permute.xlu1 %1984 }
 0x1c5   : > { %6090 = vmatmul.msk.bf16.gmra.mxu1 %vm1231_vm2, %v1983_v20 }
 0x1c6   : > { %v7951_v53 = vpop.f32.mrf.mxu3 }
 0x1c7   : > { %v1451_v48 = vsel %vm1381_vm3, %v7951_v53, -inf  ;;  %v7955_v55 = vpop.f32.mrf.mxu0 }
 0x1c8   : > { %1452 = vmax.xlane.f32.xlu2 %v1451_v48  ;;  %v1412_v54 = vsel %vm1381_vm3, %v7955_v55, -inf }
 0x1c9   : > { %1413 = vmax.xlane.f32.xlu1 %v1412_v54 }
 0x1cc   : > { %v8011_v19 = vpop.permute.xlu1 %2002 }
 0x1cd   : > { %6123 = vmatmul.msk.bf16.gmra.mxu3 %vm1231_vm2, %v2884_v59  ;;  %v7975_v59 = vpop.permute.xlu0 %3782 }
 0x1ce   : > { %v7962_v34 = vpop.f32.mrf.mxu3  ;;  %11391 = vst [vmem:[#allocation32_spill] sm:$0xff] %v7975_v59 }
 0x1cf   : > { %v1454_v20 = vsel %vm1381_vm3, %v7962_v34, -inf  ;;  %v7966_v38 = vpop.f32.mrf.mxu0 }
 0x1d0   : > { %1455 = vmax.xlane.f32.xlu0 %v1454_v20  ;;  %v1415_v48 = vsel %vm1381_vm3, %v7966_v38, -inf }
 0x1d1   : > { %1416 = vmax.xlane.f32.xlu2 %v1415_v48 }
 0x1d5   : > { %6091 = vmatmul.msk.bf16.gmra.mxu1 %vm1231_vm2, %v1985_v62  ;;  %v7987_v62 = vpop.permute.xlu2 %2000  ;;  %v7993_v57 = vpop.permute.xlu0 %2901 }
 0x1d6   : > { %v7973_v54 = vpop.f32.mrf.mxu3 }
 0x1d7   : > { %v1457_v13 = vsel %vm1381_vm3, %v7973_v54, -inf  ;;  %v7979_v44 = vpop.f32.mrf.mxu0 }
 0x1d8   : > { %1458 = vmax.xlane.f32.xlu1 %v1457_v13  ;;  %v1418_v20 = vsel %vm1381_vm3, %v7979_v44, -inf }
 0x1d9   : > { %1419 = vmax.xlane.f32.xlu0 %v1418_v20 }
 0x1dd   : > { %6124 = vmatmul.msk.bf16.gmra.mxu3 %vm1231_vm2, %v7717_v18  ;;  %v8003_v28 = vpop.permute.xlu0 %2004  ;;  %v8005_v40 = vpop.permute.xlu2 %2899 }
 0x1de   : > { %v7985_v48 = vpop.f32.mrf.mxu3 }
 0x1df   : > { %v1460_v27 = vsel %vm1381_vm3, %v7985_v48, -inf  ;;  %v7991_v61 = vpop.f32.mrf.mxu0 }
 0x1e0   : > { %1461 = vmax.xlane.f32.xlu2 %v1460_v27  ;;  %v1421_v13 = vsel %vm1381_vm3, %v7991_v61, -inf }
 0x1e1   : > { %1422 = vmax.xlane.f32.xlu1 %v1421_v13 }
 0x1e5   : > { %6092 = vmatmul.msk.bf16.gmra.mxu1 %vm1231_vm2, %v7708_v32  ;;  %v8015_v13 = vpop.permute.xlu0 %2905  ;;  %v8017_v10 = vpop.permute.xlu2 %3798 }
 0x1e6   : > { %v7999_v18 = vpop.f32.mrf.mxu3  ;;  %11392 = vst [vmem:[#allocation33_spill] sm:$0xff] %v8017_v10 }
 0x1e7   : > { %v1463_v20 = vsel %vm1381_vm3, %v7999_v18, -inf }
 0x1e8   : > { %1464 = vmax.xlane.f32.xlu0 %v1463_v20  ;;  %v8021_v20 = vpop.permute.xlu1 %2903 }
 0x1ed   : > { %6125 = vmatmul.msk.bf16.gmra.mxu3 %vm1231_vm2, %v7711_v31  ;;  %v8023_v36 = vpop.permute.xlu2 %2006 }
 0x1ee   : > { %v8009_v27 = vpop.f32.mrf.mxu3 }
 0x1ef   : > { %v1466_v32 = vsel %vm1381_vm3, %v8009_v27, -inf }
 0x1f0   : > { %1467 = vmax.xlane.f32.xlu1 %v1466_v32 }
 0x1f5   : > { %6093 = vmatmul.msk.bf16.gmra.mxu1 %vm1231_vm2, %v7693_v1  ;;  %v1426_v2 = vpop.xlane.xlu2 %1425 }
 0x1f6   : > { %v1492_v1 = vsub.f32 %v7830_v58, %v1426_v2 }
 0x1f9   : > { %v1384_v51 = vpop.xlane.xlu0 %1383 }
 0x1fa   : > { %v1478_v31 = vsub.f32 %v7822_v0, %v1384_v51 }
 0x1fc   : > { %v1510_v16 = vmul.f32 1.442695, %v1478_v31  ;;  %v1538_v31 = vmul.f32 1.442695, %v1492_v1 }
 0x1fd   : > { %6126 = vmatmul.msk.bf16.gmra.mxu3 %vm1231_vm2, %v7808_v12 }
 0x1fe   : > { %6547 = vpow2.f32 %v1510_v16 }
 0x1ff   : > { %v1390_v17 = vpop.xlane.xlu1 %1389 }
 0x201   : > { %v1387_v33 = vpop.xlane.xlu0 %1386 }
 0x202   : > { %v1479_v32 = vsub.f32 %v7834_v35, %v1387_v33  ;;  %v1480_v35 = vsub.f32 %v7844_v3, %v1390_v17 }
 0x204   : > { %v1512_v10 = vmul.f32 1.442695, %v1479_v32  ;;  %v8034_v0 = vpop.eup %6547  ;;  %v1514_v2 = vmul.f32 1.442695, %v1480_v35 }
 0x205   : > { %6094 = vmatmul.msk.bf16.gmra.mxu1 %vm1231_vm2, %v7794_v41 }
 0x206   : > { %6549 = vpow2.f32 %v1512_v10 }
 0x207   : > { %v1432_v50 = vpop.xlane.xlu1 %1431 }
 0x208   : > { %v1494_v51 = vsub.f32 %v7858_v24, %v1432_v50  ;;  %v8041_v50 = vpop.f32.mrf.mxu3 }
 0x209   : > { %v1429_v60 = vpop.xlane.xlu0 %1428 }
 0x20a   : > { %v1493_v12 = vsub.f32 %v7842_v8, %v1429_v60  ;;  %v1542_v16 = vmul.f32 1.442695, %v1494_v51 }
 0x20b   : > { %v1435_v10 = vpop.xlane.xlu2 %1434 }
 0x20c   : > { %v6550_v46 = vpop.eup %6549  ;;  %v1540_v33 = vmul.f32 1.442695, %v1493_v12  ;;  %v1495_v41 = vsub.f32 %v7873_v25, %v1435_v10 }
 0x20d   : > { %v1702_v32 = vpack.c.bf16 %v6550_v46, %v8034_v0  ;;  %6127 = vmatmul.msk.bf16.gmra.mxu3 %vm1231_vm2, %v7826_v42 }
 0x20e   : > { %6551 = vpow2.f32 %v1540_v33  ;;  %v1544_v60 = vmul.f32 1.442695, %v1495_v41 }
 0x20f   : > { %6553 = vpow2.f32 %v1538_v31  ;;  %6071 = vmatmul.msk.bf16.vlgmr.msra.gmra.mxu0 %vm1381_vm3, %v1702_v32  ;;  %v1393_v58 = vpop.xlane.xlu1 %1392 }
 0x210   : > { %6555 = vpow2.f32 %v1542_v16  ;;  %v1481_v8 = vsub.f32 %v7861_v21, %v1393_v58  ;;  %v8064_v16 = vpop.f32.mrf.mxu3 }
 0x211   : > { %6557 = vpow2.f32 %v1544_v60 }
 0x212   : > { %v1516_v3 = vmul.f32 1.442695, %v1481_v8  ;;  %v8045_v24 = vpop.f32.mrf.mxu1  ;;  %6559 = vpow2.f32 %v1514_v2 }
 0x213   : > { %v1396_v17 = vpop.xlane.xlu2 %1395  ;;  %v2165_v42 = vsel %vm1381_vm3, %v8045_v24, -inf  ;;  %v1438_v51 = vpop.xlane.xlu0 %1437 }
 0x214   : > { %v8047_v25 = vpop.eup %6551  ;;  %6561 = vpow2.f32 %v1516_v3  ;;  %2166 = vmax.xlane.f32.xlu0 %v2165_v42  ;;  %v1496_v35 = vsub.f32 %v7890_v52, %v1438_v51  ;;  %v1472_v52 = vsel %vm1381_vm3, %v8064_v16, -inf  ;;  %v1482_v51 = vsub.f32 %v7880_v5, %v1396_v17 }
 0x215   : > { %v8051_v1 = vpop.eup %6553  ;;  %6095 = vmatmul.msk.bf16.gmra.mxu1 %vm1231_vm2, %v7819_v11  ;;  %v1577_v5 = vsel %vm1381_vm3, %v6550_v46, 0.0 }
 0x216   : > { %v8053_v12 = vpop.eup %6555  ;;  %v1546_v60 = vmul.f32 1.442695, %v1496_v35  ;;  %v1518_v21 = vmul.f32 1.442695, %v1482_v51 }
 0x217   : > { %v8059_v31 = vpop.eup %6557 }
 0x218   : > { %v8066_v10 = vpop.eup %6559  ;;  %6563 = vpow2.f32 %v1546_v60  ;;  %v8086_v15 = vpop.f32.mrf.mxu3 }
 0x21a   : > { %v8068_v32 = vpop.eup %6561  ;;  %v8070_v41 = vpop.f32.mrf.mxu1 }
 0x21b   : > { %v1441_v11 = vpop.xlane.xlu1 %1440  ;;  %v1399_v2 = vpop.xlane.xlu2 %1398  ;;  %v2168_v58 = vsel %vm1381_vm3, %v8070_v41, -inf  ;;  %v1703_v8 = vpack.c.bf16 %v8068_v32, %v8066_v10 }
 0x21c   : > { %v1497_v3 = vsub.f32 %v7903_v56, %v1441_v11  ;;  %v1483_v42 = vsub.f32 %v7896_v6, %v1399_v2  ;;  %2169 = vmax.xlane.f32.xlu2 %v2168_v58  ;;  %1473 = vmax.xlane.f32.xlu0 %v1472_v52  ;;  %v1469_v6 = vsel %vm1381_vm3, %v8041_v50, -inf  ;;  %v1402_v60 = vpop.xlane.xlu0 %1401 }
 0x21d   : > { %6128 = vmatmul.msk.bf16.gmra.mxu3 %vm1231_vm2, %v7852_v37  ;;  %v1484_v51 = vsub.f32 %v7911_v14, %v1402_v60  ;;  %v1622_v14 = vsel %vm1381_vm3, %v8053_v12, 0.0 }
 0x21e   : > { %v1548_v35 = vmul.f32 1.442695, %v1497_v3  ;;  %v1520_v33 = vmul.f32 1.442695, %v1483_v42  ;;  %v8093_v56 = vpop.eup %6563 }
 0x21f   : > { %6072 = vmatmul.msk.bf16.gmra.mxu0 %vm1381_vm3, %v1703_v8  ;;  %v1616_v8 = vsel %vm1381_vm3, %v8051_v1, 0.0 }
 0x220   : > { %6565 = vpow2.f32 %v1548_v35  ;;  %v8113_v42 = vpop.f32.mrf.mxu3 }
 0x221   : > { %6567 = vpow2.f32 %v1520_v33 }
 0x222   : > { %v8084_v59 = vpop.f32.mrf.mxu1  ;;  %6569 = vpow2.f32 %v1518_v21  ;;  %v1574_v21 = vsel %vm1381_vm3, %v8034_v0, 0.0 }
 0x223   : > { %v2171_v37 = vsel %vm1381_vm3, %v8084_v59, -inf  ;;  %v8119_v0 = vpop.xlane.xlu2 %1443 }
 0x224   : > { %1470 = vmax.xlane.f32.xlu2 %v1469_v6  ;;  %1578 = vadd.xlane.f32.xlu0 %v1577_v5  ;;  %v1405_v11 = vpop.xlane.xlu1 %1404  ;;  %v1522_v6 = vmul.f32 1.442695, %v1484_v51 }
 0x225   : > { %2172 = vmax.xlane.f32.xlu1 %v2171_v37  ;;  %6096 = vmatmul.msk.bf16.gmra.mxu1 %vm1231_vm2, %v7836_v29  ;;  %v1485_v52 = vsub.f32 %v7922_v7, %v1405_v11  ;;  %v1619_v37 = vsel %vm1381_vm3, %v8047_v25, 0.0 }
 0x226   : > { %v8097_v17 = vpop.eup %6565 }
 0x227   : > { %v8101_v46 = vpop.eup %6567  ;;  %v1524_v7 = vmul.f32 1.442695, %v1485_v52 }
 0x228   : > { %v6570_v58 = vpop.eup %6569  ;;  %v8133_v60 = vpop.f32.mrf.mxu3 }
 0x229   : > { %v1704_v3 = vpack.c.bf16 %v8101_v46, %v6570_v58  ;;  %6571 = vpow2.f32 %v1524_v7  ;;  %v3067_v7 = vsel %vm1381_vm3, %v8133_v60, -inf }
 0x22a   : > { %v8103_v2 = vpop.f32.mrf.mxu1  ;;  %6573 = vpow2.f32 %v1522_v6 }
 0x22b   : > { %v2174_v29 = vsel %vm1381_vm3, %v8103_v2, -inf  ;;  %v8121_v35 = vpop.xlane.xlu0 %1446 }
 0x22c   : > { %1575 = vadd.xlane.f32.xlu2 %v1574_v21  ;;  %2175 = vmax.xlane.f32.xlu0 %v2174_v29  ;;  %v1408_v11 = vpop.xlane.xlu2 %1407 }
 0x22d   : > { %1617 = vadd.xlane.f32.xlu1 %v1616_v8  ;;  %6129 = vmatmul.msk.bf16.gmra.mxu3 %vm1231_vm2, %v7907_v63  ;;  %v1475_v63 = vsel %vm1381_vm3, %v8086_v15, -inf }
 0x22f   : > { %6073 = vmatmul.msk.bf16.gmra.mxu0 %vm1381_vm3, %v1704_v3  ;;  %v8135_v21 = vpop.eup %6571 }
 0x230   : > { %v8139_v8 = vpop.eup %6573 }
 0x231   : > { %v1705_v6 = vpack.c.bf16 %v8135_v21, %v8139_v8 }
 0x232   : > { %v8123_v5 = vpop.f32.mrf.mxu1 }
 0x233   : > { %v2177_v51 = vsel %vm1381_vm3, %v8123_v5, -inf }
 0x234   : > { %1620 = vadd.xlane.f32.xlu2 %v1619_v37  ;;  %1623 = vadd.xlane.f32.xlu0 %v1622_v14  ;;  %v1411_v52 = vpop.xlane.xlu0 %1410  ;;  %v1486_v37 = vsub.f32 %v7931_v47, %v1408_v11  ;;  %v8154_v14 = vpop.xlane.xlu1 %1449  ;;  %v1586_v47 = vsel %vm1381_vm3, %v6570_v58, 0.0 }
 0x235   : > { %1476 = vmax.xlane.f32.xlu1 %v1475_v63  ;;  %6097 = vmatmul.msk.bf16.gmra.mxu1 %vm1231_vm2, %v7898_v4  ;;  %v1487_v3 = vsub.f32 %v7942_v26, %v1411_v52  ;;  %v1580_v4 = vsel %vm1381_vm3, %v8066_v10, 0.0  ;;  %v3064_v10 = vsel %vm1381_vm3, %v8113_v42, -inf }
 0x236   : > { %v1526_v52 = vmul.f32 1.442695, %v1486_v37  ;;  %v1583_v37 = vsel %vm1381_vm3, %v8068_v32, 0.0 }
 0x237   : > { %v1528_v26 = vmul.f32 1.442695, %v1487_v3 }
 0x239   : > { %6575 = vpow2.f32 %v1528_v26 }
 0x23a   : > { %v8137_v29 = vpop.f32.mrf.mxu1  ;;  %6577 = vpow2.f32 %v1526_v52 }
 0x23b   : > { %v8156_v63 = vpop.xlane.xlu2 %1452 }
 0x23c   : > { %2178 = vmax.xlane.f32.xlu2 %v2177_v51  ;;  %3068 = vmax.xlane.f32.xlu0 %v3067_v7  ;;  %v1414_v11 = vpop.xlane.xlu1 %1413 }
 0x23d   : > { %1581 = vadd.xlane.f32.xlu1 %v1580_v4  ;;  %6130 = vmatmul.msk.bf16.gmra.mxu3 %vm1231_vm2, %v7959_v23  ;;  %v2180_v23 = vsel %vm1381_vm3, %v8137_v29, -inf }
 0x23f   : > { %6074 = vmatmul.msk.bf16.gmra.mxu0 %vm1381_vm3, %v1705_v6  ;;  %v8167_v7 = vpop.eup %6575 }
 0x240   : > { %v8171_v6 = vpop.eup %6577 }
 0x241   : > { %v1706_v52 = vpack.c.bf16 %v8167_v7, %v8171_v6 }
 0x242   : > { %v8158_v51 = vpop.f32.mrf.mxu1 }
 0x243   : > { %v2183_v26 = vsel %vm1381_vm3, %v8158_v51, -inf }
 0x244   : > { %3065 = vmax.xlane.f32.xlu2 %v3064_v10  ;;  %1587 = vadd.xlane.f32.xlu0 %v1586_v47  ;;  %v1417_v3 = vpop.xlane.xlu2 %1416  ;;  %v8182_v10 = vpop.f32.mrf.mxu3  ;;  %v1488_v47 = vsub.f32 %v7955_v55, %v1414_v11  ;;  %v1631_v55 = vsel %vm1381_vm3, %v8097_v17, 0.0 }
 0x245   : > { %2181 = vmax.xlane.f32.xlu1 %v2180_v23  ;;  %6098 = vmatmul.msk.bf16.gmra.mxu1 %vm1231_vm2, %v7935_v22  ;;  %v1489_v58 = vsub.f32 %v7966_v38, %v1417_v3  ;;  %v1625_v22 = vsel %vm1381_vm3, %v8059_v31, 0.0  ;;  %11393 = vst [vmem:[#allocation34_spill] sm:$0xff] %v8182_v10  ;;  %v8190_v3 = vpop.xlane.xlu0 %1455 }
 0x246   : > { %v1530_v23 = vmul.f32 1.442695, %v1488_v47 }
 0x247   : > { %v1532_v38 = vmul.f32 1.442695, %v1489_v58 }
 0x249   : > { %6579 = vpow2.f32 %v1532_v38 }
 0x24a   : > { %v8169_v4 = vpop.f32.mrf.mxu1  ;;  %6581 = vpow2.f32 %v1530_v23 }
 0x24b   : > { %v8188_v32 = vpop.xlane.xlu1 %1458  ;;  %v2186_v23 = vsel %vm1381_vm3, %v8169_v4, -inf }
 0x24c   : > { %1584 = vadd.xlane.f32.xlu2 %v1583_v37  ;;  %2184 = vmax.xlane.f32.xlu0 %v2183_v26  ;;  %v1628_v26 = vsel %vm1381_vm3, %v8093_v56, 0.0  ;;  %v8202_v11 = vpop.f32.mrf.mxu3 }
 0x24d   : > { %1626 = vadd.xlane.f32.xlu1 %v1625_v22  ;;  %6131 = vmatmul.msk.bf16.gmra.mxu3 %vm1231_vm2, %v8005_v40  ;;  %v3070_v40 = vsel %vm1381_vm3, %v8182_v10, -inf  ;;  %v1420_v47 = vpop.xlane.xlu0 %1419 }
 0x24f   : > { %6075 = vmatmul.msk.bf16.gmra.mxu0 %vm1381_vm3, %v1706_v52  ;;  %v8204_v22 = vpop.eup %6579  ;;  %v1498_v52 = vsub.f32 %v7918_v49, %v8119_v0  ;;  %v1490_v0 = vsub.f32 %v7979_v44, %v1420_v47  ;;  %v1592_v44 = vsel %vm1381_vm3, %v8139_v8, 0.0 }
 0x252   : > { %v8192_v37 = vpop.f32.mrf.mxu1 }
 0x254   : > { %1629 = vadd.xlane.f32.xlu2 %v1628_v26  ;;  %1632 = vadd.xlane.f32.xlu0 %v1631_v55  ;;  %v1423_v58 = vpop.xlane.xlu1 %1422  ;;  %v8210_v26 = vpop.eup %6581 }
 0x255   : > { %3071 = vmax.xlane.f32.xlu1 %v3070_v40  ;;  %6099 = vmatmul.msk.bf16.gmra.mxu1 %vm1231_vm2, %v7987_v62  ;;  %v1491_v55 = vsub.f32 %v7991_v61, %v1423_v58  ;;  %v3073_v62 = vsel %vm1381_vm3, %v8202_v11, -inf  ;;  %v1589_v40 = vsel %vm1381_vm3, %v8101_v46, 0.0  ;;  %v1707_v49 = vpack.c.bf16 %v8204_v22, %v8210_v26  ;;  %v8225_v58 = vpop.f32.mrf.mxu3 }
 0x256   : > { %v1550_v61 = vmul.f32 1.442695, %v1498_v52  ;;  %v1500_v46 = vsub.f32 %v7938_v9, %v8154_v14  ;;  %v2189_v52 = vsel %vm1381_vm3, %v8192_v37, -inf  ;;  %v3076_v47 = vsel %vm1381_vm3, %v8225_v58, -inf }
 0x257   : > { %v1536_v33 = vmul.f32 1.442695, %v1491_v55 }
 0x258   : > { %6583 = vpow2.f32 %v1550_v61  ;;  %v1554_v9 = vmul.f32 1.442695, %v1500_v46 }
 0x259   : > { %6585 = vpow2.f32 %v1536_v33 }
 0x25a   : > { %v8208_v38 = vpop.f32.mrf.mxu1 }
 0x25b   : > { %v2192_v55 = vsel %vm1381_vm3, %v8208_v38, -inf }
 0x25c   : > { %2187 = vmax.xlane.f32.xlu2 %v2186_v23  ;;  %3074 = vmax.xlane.f32.xlu0 %v3073_v62  ;;  %v1499_v23 = vsub.f32 %v7927_v43, %v8121_v35  ;;  %v1534_v62 = vmul.f32 1.442695, %v1490_v0 }
 0x25d   : > { %1590 = vadd.xlane.f32.xlu1 %v1589_v40  ;;  %6132 = vmatmul.msk.bf16.gmra.mxu3 %vm1231_vm2, %v7993_v57  ;;  %v1595_v57 = vsel %vm1381_vm3, %v8135_v21, 0.0  ;;  %v8245_v8 = vpop.f32.mrf.mxu3 }
 0x25e   : > { %v1552_v43 = vmul.f32 1.442695, %v1499_v23  ;;  %6587 = vpow2.f32 %v1534_v62  ;;  %v8241_v35 = vpop.eup %6583 }
 0x25f   : > { %6076 = vmatmul.msk.bf16.gmra.mxu0 %vm1381_vm3, %v1707_v49  ;;  %v8243_v33 = vpop.eup %6585 }
 0x260   : > { %6589 = vpow2.f32 %v1552_v43 }
 0x261   : > { %6591 = vpow2.f32 %v1554_v9 }
 0x262   : > { %v8231_v10 = vpop.f32.mrf.mxu1 }
 0x263   : > { %v2195_v43 = vsel %vm1381_vm3, %v8231_v10, -inf }
 0x264   : > { %1593 = vadd.xlane.f32.xlu2 %v1592_v44  ;;  %1596 = vadd.xlane.f32.xlu0 %v1595_v57  ;;  %v8249_v14 = vpop.eup %6587  ;;  %v1502_v44 = vsub.f32 %v7962_v34, %v8190_v3  ;;  %v1465_v3 = vpop.xlane.xlu0 %1464 }
 0x265   : > { %2190 = vmax.xlane.f32.xlu1 %v2189_v52  ;;  %6100 = vmatmul.msk.bf16.gmra.mxu1 %vm1231_vm2, %v8011_v19  ;;  %v1634_v19 = vsel %vm1381_vm3, %v8241_v35, 0.0  ;;  %v1708_v40 = vpack.c.bf16 %v8243_v33, %v8249_v14  ;;  %v8268_v23 = vpop.f32.mrf.mxu3  ;;  %v1501_v52 = vsub.f32 %v7951_v53, %v8156_v63  ;;  %v11394_v53 = vpack.c.bf16 %v8047_v25, %v8051_v1 }
 0x266   : > { %v8262_v49 = vpop.eup %6589  ;;  %v3082_v9 = vsel %vm1381_vm3, %v8268_v23, -inf  ;;  %v1558_v34 = vmul.f32 1.442695, %v1502_v44 }
 0x267   : > { %v8264_v0 = vpop.eup %6591  ;;  %v1637_v62 = vsel %vm1381_vm3, %v8262_v49, 0.0  ;;  %v1556_v63 = vmul.f32 1.442695, %v1501_v52  ;;  %v11395_v52 = vpack.c.bf16 %v8059_v31, %v8053_v12 }
 0x268   : > { %v1640_v46 = vsel %vm1381_vm3, %v8264_v0, 0.0  ;;  %6593 = vpow2.f32 %v1558_v34  ;;  %v1468_v34 = vpop.xlane.xlu1 %1467 }
 0x269   : > { %6595 = vpow2.f32 %v1556_v63  ;;  %v1505_v63 = vsub.f32 %v7999_v18, %v1465_v3 }
 0x26a   : > { %v8247_v21 = vpop.f32.mrf.mxu1 }
 0x26b   : > { %v2198_v25 = vsel %vm1381_vm3, %v8247_v21, -inf  ;;  %v1564_v18 = vmul.f32 1.442695, %v1505_v63 }
 0x26c   : > { %3077 = vmax.xlane.f32.xlu2 %v3076_v47  ;;  %2193 = vmax.xlane.f32.xlu0 %v2192_v55  ;;  %v1598_v47 = vsel %vm1381_vm3, %v8171_v6, 0.0  ;;  %v1503_v55 = vsub.f32 %v7973_v54, %v8188_v32  ;;  %v1601_v6 = vsel %vm1381_vm3, %v8167_v7, 0.0  ;;  %v1462_v54 = vpop.xlane.xlu2 %1461 }
 0x26d   : > { %1635 = vadd.xlane.f32.xlu1 %v1634_v19  ;;  %6133 = vmatmul.msk.bf16.gmra.mxu3 %vm1231_vm2, %v8021_v20  ;;  %v3079_v20 = vsel %vm1381_vm3, %v8245_v8, -inf }
 0x26e   : > { %v1560_v1 = vmul.f32 1.442695, %v1503_v55 }
 0x26f   : > { %6077 = vmatmul.msk.bf16.gmra.mxu0 %vm1381_vm3, %v1708_v40  ;;  %v8310_v40 = vpop.eup %6593 }
 0x270   : > { %6597 = vpow2.f32 %v1560_v1 }
 0x272   : > { %v8266_v61 = vpop.f32.mrf.mxu1 }
 0x274   : > { %1638 = vadd.xlane.f32.xlu2 %v1637_v62  ;;  %1641 = vadd.xlane.f32.xlu0 %v1640_v46  ;;  %v8312_v62 = vpop.eup %6595 }
 0x275   : > { %3080 = vmax.xlane.f32.xlu1 %v3079_v20  ;;  %6101 = vmatmul.msk.bf16.gmra.mxu1 %vm1231_vm2, %v8003_v28  ;;  %v8290_v28 = vpop.f32.mrf.mxu3  ;;  %v1646_v20 = vsel %vm1381_vm3, %v8310_v40, 0.0  ;;  %v1643_v44 = vsel %vm1381_vm3, %v8312_v62, 0.0 }
 0x27a   : > { %v8280_v57 = vpop.f32.mrf.mxu1 }
 0x27b   : > { %v2204_v12 = vsel %vm1381_vm3, %v8280_v57, -inf }
 0x27c   : > { %2196 = vmax.xlane.f32.xlu2 %v2195_v43  ;;  %3083 = vmax.xlane.f32.xlu0 %v3082_v9 }
 0x27d   : > { %1599 = vadd.xlane.f32.xlu1 %v1598_v47  ;;  %6134 = vmatmul.msk.bf16.gmra.mxu3 %vm1231_vm2, %v8015_v13  ;;  %v1604_v13 = vsel %vm1381_vm3, %v8210_v26, 0.0  ;;  %v8331_v47 = vpop.eup %6597 }
 0x27e   : > { %v1649_v31 = vsel %vm1381_vm3, %v8331_v47, 0.0 }
 0x27f   : > { %6078 = vmatmul.msk.bf16.gmra.mxu0 %vm1381_vm3, %v11394_v53 }
 0x282   : > { %v8300_v19 = vpop.f32.mrf.mxu1 }
 0x284   : > { %1602 = vadd.xlane.f32.xlu2 %v1601_v6  ;;  %1605 = vadd.xlane.f32.xlu0 %v1604_v13 }
 0x285   : > { %2199 = vmax.xlane.f32.xlu1 %v2198_v25  ;;  %6102 = vmatmul.msk.bf16.gmra.mxu1 %vm1231_vm2, %v8023_v36  ;;  %v2201_v36 = vsel %vm1381_vm3, %v8266_v61, -inf  ;;  %v3085_v25 = vsel %vm1381_vm3, %v8290_v28, -inf }
 0x287   : > { %v2167_v32 = vpop.xlane.xlu0 %2166 }
 0x288   : > { %v2261_v26 = vsub.f32 %v8045_v24, %v2167_v32 }
 0x28a   : > { %v8314_v7 = vpop.f32.mrf.mxu1  ;;  %v2293_v24 = vmul.f32 1.442695, %v2261_v26  ;;  %v1504_v26 = vsub.f32 %v7985_v48, %v1462_v54  ;;  %v1607_v54 = vsel %vm1381_vm3, %v8204_v22, 0.0 }
 0x28c   : > { %v8317_v46 = vpop.f32.mrf.mxu0  ;;  %1647 = vadd.xlane.f32.xlu2 %v1646_v20  ;;  %2202 = vmax.xlane.f32.xlu0 %v2201_v36  ;;  %6599 = vpow2.f32 %v2293_v24  ;;  %v1506_v36 = vsub.f32 %v8009_v27, %v1468_v34  ;;  %v1610_v24 = vsel %vm1381_vm3, %v8249_v14, 0.0  ;;  %v1562_v27 = vmul.f32 1.442695, %v1504_v26 }
 0x28d   : > { %1644 = vadd.xlane.f32.xlu1 %v1643_v44  ;;  %v11396_v14 = vpack.c.bf16 %v8097_v17, %v8093_v56 }
 0x28e   : > { %v1566_v34 = vmul.f32 1.442695, %v1506_v36 }
 0x28f   : > { %6079 = vmatmul.msk.bf16.gmra.mxu0 %vm1381_vm3, %v11395_v52  ;;  %v2170_v43 = vpop.xlane.xlu2 %2169  ;;  %v8329_v9 = vpop.xlane.xlu0 %1473 }
 0x290   : > { %v2262_v53 = vsub.f32 %v8070_v41, %v2170_v43  ;;  %v1613_v43 = vsel %vm1381_vm3, %v8243_v33, 0.0 }
 0x292   : > { %v2295_v55 = vmul.f32 1.442695, %v2262_v53  ;;  %v8335_v6 = vpop.f32.mrf.mxu1  ;;  %v8347_v32 = vpop.eup %6599 }
 0x294   : > { %v1801_v13 = vpop.f32.mrf.mxu0  ;;  %6601 = vpow2.f32 %v2295_v55  ;;  %2205 = vmax.xlane.f32.xlu2 %v2204_v12  ;;  %1650 = vadd.xlane.f32.xlu0 %v1649_v31 }
 0x295   : > { %3086 = vmax.xlane.f32.xlu1 %v3085_v25  ;;  %6151 = vmatmul.msk.bf16.vlgmr.msrb.gmra.mxu1 %vm1231_vm2, %v7863_v39 }
 0x297   : > { %v8345_v41 = vpop.xlane.xlu2 %1470  ;;  %v1579_v3 = vpop.xlane.xlu0 %1578 }
 0x298   : > { %6603 = vrcp.f32 %v1579_v3  ;;  %v2173_v1 = vpop.xlane.xlu1 %2172 }
 0x299   : > { %6605 = vpow2.f32 %v1564_v18  ;;  %v2263_v52 = vsub.f32 %v8084_v59, %v2173_v1 }
 0x29a   : > { %v8350_v20 = vpop.eup %6601  ;;  %v8353_v44 = vpop.f32.mrf.mxu1 }
 0x29b   : > { %v2485_v48 = vpack.c.bf16 %v8350_v20, %v8347_v32  ;;  %v2297_v33 = vmul.f32 1.442695, %v2263_v52 }
 0x29c   : > { %v8356_v39 = vpop.f32.mrf.mxu0  ;;  %1611 = vadd.xlane.f32.xlu2 %v1610_v24  ;;  %1614 = vadd.xlane.f32.xlu0 %v1613_v43 }
 0x29d   : > { %1608 = vadd.xlane.f32.xlu1 %v1607_v54  ;;  %6103 = vmatmul.msk.bf16.vlgmr.msrb.gmra.mxu2 %vm1381_vm3, %v2485_v48 }
 0x29e   : > { %v6604_v59 = vpop.eup %6603 }
 0x29f   : > { %6080 = vmatmul.msk.bf16.gmra.mxu0 %vm1381_vm3, %v11396_v14  ;;  %v1576_v53 = vpop.xlane.xlu2 %1575  ;;  %v2176_v63 = vpop.xlane.xlu0 %2175  ;;  %v1880_v55 = vmul.f32 %v6604_v59, %v1801_v13  ;;  %v2210_v13 = vsel %vm1381_vm3, %v8314_v7, -inf }
 0x2a0   : > { %v8371_v12 = vpop.eup %6605  ;;  %6607 = vrcp.f32 %v1576_v53  ;;  %v2264_v22 = vsub.f32 %v8103_v2, %v2176_v63  ;;  %v8374_v31 = vpop.xlane.xlu1 %1617  ;;  %v2207_v2 = vsel %vm1381_vm3, %v8300_v19, -inf }
 0x2a1   : > { %6609 = vpow2.f32 %v1562_v27  ;;  %v1912_v25 = vpack.c.bf16 %v1880_v55, %v1880_v55  ;;  %v1655_v17 = vsel %vm1381_vm3, %v8371_v12, 0.0 }
 0x2a2   : > { %6611 = vpow2.f32 %v1566_v34  ;;  %v2299_v18 = vmul.f32 1.442695, %v2264_v22  ;;  %v8376_v3 = vpop.f32.mrf.mxu1  ;;  %v1508_v34 = vsub.f32 %v8064_v16, %v8329_v9  ;;  %v1712_v16 = vpack.c.bf16 %v8262_v49, %v8241_v35 }
 0x2a3   : > { %6613 = vpow2.f32 %v2297_v33  ;;  %1945 = vst.msk [vmem:[#allocation4 + $0x4] sm:$0xf] %vm1943_vm4, %v1912_v25  ;;  %v2213_v33 = vsel %vm1381_vm3, %v8335_v6, -inf  ;;  %v2360_v49 = vsel %vm1381_vm3, %v8350_v20, 0.0 }
 0x2a4   : > { %v8378_v56 = vpop.f32.mrf.mxu0  ;;  %6615 = vpow2.f32 %v2299_v18  ;;  %1656 = vadd.xlane.f32.xlu2 %v1655_v17  ;;  %2211 = vmax.xlane.f32.xlu0 %v2210_v13  ;;  %v1570_v9 = vmul.f32 1.442695, %v1508_v34  ;;  %v1507_v13 = vsub.f32 %v8041_v50, %v8345_v41 }
 0x2a5   : > { %2208 = vmax.xlane.f32.xlu1 %v2207_v2  ;;  %6152 = vmatmul.msk.bf16.gmra.mxu1 %vm1231_vm2, %v7886_v30 }
 0x2a6   : > { %v6608_v1 = vpop.eup %6607  ;;  %v1568_v41 = vmul.f32 1.442695, %v1507_v13 }
 0x2a7   : > { %v8389_v26 = vpop.eup %6609  ;;  %v8391_v36 = vpop.xlane.xlu2 %1620  ;;  %v1879_v24 = vmul.f32 %v6608_v1, %v8317_v46 }
 0x2a8   : > { %v8393_v52 = vpop.xlane.xlu0 %1623  ;;  %v8396_v43 = vpop.eup %6611  ;;  %v1652_v63 = vsel %vm1381_vm3, %v8389_v26, 0.0 }
 0x2a9   : > { %v1477_v48 = vpop.xlane.xlu1 %1476  ;;  %v6614_v54 = vpop.eup %6613  ;;  %v1911_v27 = vpack.c.bf16 %v1879_v24, %v1879_v24  ;;  %v1658_v53 = vsel %vm1381_vm3, %v8396_v43, 0.0  ;;  %v2357_v24 = vsel %vm1381_vm3, %v8347_v32, 0.0 }
 0x2aa   : > { %v8398_v59 = vpop.eup %6615  ;;  %v8402_v30 = vpop.f32.mrf.mxu1  ;;  %v1509_v18 = vsub.f32 %v8086_v15, %v1477_v48  ;;  %v2363_v2 = vsel %vm1381_vm3, %v6614_v54, 0.0 }
 0x2ab   : > { %v2486_v46 = vpack.c.bf16 %v8398_v59, %v6614_v54  ;;  %1944 = vst.msk [vmem:[#allocation4] sm:$0xf] %vm1943_vm4, %v1911_v27 }
 0x2ac   : > { %v1809_v14 = vpop.f32.mrf.mxu0  ;;  %2214 = vmax.xlane.f32.xlu2 %v2213_v33  ;;  %1659 = vadd.xlane.f32.xlu0 %v1658_v53  ;;  %v1572_v15 = vmul.f32 1.442695, %v1509_v18 }
 0x2ad   : > { %1653 = vadd.xlane.f32.xlu1 %v1652_v63  ;;  %6104 = vmatmul.msk.bf16.gmra.mxu2 %vm1381_vm3, %v2486_v46  ;;  %v2219_v63 = vsel %vm1381_vm3, %v8376_v3, -inf }
 0x2af   : > { %6081 = vmatmul.msk.bf16.gmra.mxu0 %vm1381_vm3, %v1712_v16  ;;  %v2179_v55 = vpop.xlane.xlu2 %2178 }
 0x2b0   : > { %v8416_v22 = vpop.xlane.xlu0 %3068  ;;  %v2265_v1 = vsub.f32 %v8123_v5, %v2179_v55 }
 0x2b1   : > { %v1582_v25 = vpop.xlane.xlu1 %1581 }
 0x2b2   : > { %6617 = vrcp.f32 %v1582_v25  ;;  %v8419_v17 = vpop.f32.mrf.mxu1  ;;  %v2301_v54 = vmul.f32 1.442695, %v2265_v1 }
 0x2b3   : > { %6619 = vpow2.f32 %v1570_v9 }
 0x2b4   : > { %v8423_v35 = vpop.f32.mrf.mxu0  ;;  %2361 = vadd.xlane.f32.xlu0 %v2360_v49  ;;  %2364 = vadd.xlane.f32.xlu2 %v2363_v2 }
 0x2b5   : > { %2358 = vadd.xlane.f32.xlu1 %v2357_v24  ;;  %6153 = vmatmul.msk.bf16.gmra.mxu1 %vm1231_vm2, %v7946_v45 }
 0x2b7   : > { %v8433_v48 = vpop.xlane.xlu2 %3065 }
 0x2b8   : > { %v6618_v50 = vpop.eup %6617  ;;  %v1588_v27 = vpop.xlane.xlu0 %1587 }
 0x2b9   : > { %v8435_v20 = vpop.eup %6619  ;;  %6621 = vrcp.f32 %v1588_v27  ;;  %v2182_v5 = vpop.xlane.xlu1 %2181  ;;  %v1881_v34 = vmul.f32 %v6618_v50, %v8356_v39  ;;  %v2216_v39 = vsel %vm1381_vm3, %v8353_v44, -inf  ;;  %v2222_v50 = vsel %vm1381_vm3, %v8402_v30, -inf }
 0x2ba   : > { %v2266_v32 = vsub.f32 %v8137_v29, %v2182_v5  ;;  %6623 = vpow2.f32 %v1572_v15  ;;  %v8439_v33 = vpop.f32.mrf.mxu1  ;;  %v1664_v16 = vsel %vm1381_vm3, %v8435_v20, 0.0  ;;  %v1713_v29 = vpack.c.bf16 %v8312_v62, %v8264_v0 }
 0x2bb   : > { %v1913_v53 = vpack.c.bf16 %v1881_v34, %v1881_v34  ;;  %6625 = vpow2.f32 %v1568_v41 }
 0x2bc   : > { %v2303_v45 = vmul.f32 1.442695, %v2266_v32  ;;  %v8441_v46 = vpop.f32.mrf.mxu0  ;;  %6627 = vpow2.f32 %v2301_v54  ;;  %2220 = vmax.xlane.f32.xlu0 %v2219_v63  ;;  %1665 = vadd.xlane.f32.xlu2 %v1664_v16  ;;  %v11397_v54 = vld [vmem:[#allocation31_spill] sm:$0xff] }
 0x2bd   : > { %1946 = vst.msk [vmem:[#allocation4 + $0x8] sm:$0xf] %vm1943_vm4, %v1913_v53  ;;  %2217 = vmax.xlane.f32.xlu1 %v2216_v39 }
 0x2be   : > { %6629 = vpow2.f32 %v2303_v45 }
 0x2bf   : > { %v6622_v9 = vpop.eup %6621  ;;  %6082 = vmatmul.msk.bf16.gmra.mxu0 %vm1381_vm3, %v1713_v29  ;;  %v1585_v55 = vpop.xlane.xlu2 %1584 }
 0x2c0   : > { %v2185_v25 = vpop.xlane.xlu0 %2184  ;;  %v1883_v18 = vmul.f32 %v6622_v9, %v1809_v14  ;;  %v8453_v13 = vpop.eup %6623  ;;  %6631 = vrcp.f32 %v1585_v55 }
 0x2c1   : > { %v8455_v49 = vpop.xlane.xlu1 %1626  ;;  %v8457_v2 = vpop.eup %6625  ;;  %v1667_v14 = vsel %vm1381_vm3, %v8453_v13, 0.0  ;;  %v2267_v39 = vsub.f32 %v8158_v51, %v2185_v25 }
 0x2c2   : > { %v1915_v1 = vpack.c.bf16 %v1883_v18, %v1883_v18  ;;  %v6628_v24 = vpop.eup %6627  ;;  %v8459_v0 = vpop.f32.mrf.mxu1  ;;  %v1661_v41 = vsel %vm1381_vm3, %v8457_v2, 0.0 }
 0x2c3   : > { %v2369_v9 = vsel %vm1381_vm3, %v6628_v24, 0.0  ;;  %v2305_v18 = vmul.f32 1.442695, %v2267_v39 }
 0x2c4   : > { %v6630_v62 = vpop.eup %6629  ;;  %v8461_v15 = vpop.f32.mrf.mxu0  ;;  %1948 = vst.msk [vmem:[#allocation4 + $0x10] sm:$0xf] %vm1943_vm4, %v1915_v1  ;;  %2223 = vmax.xlane.f32.xlu2 %v2222_v50  ;;  %1668 = vadd.xlane.f32.xlu0 %v1667_v14  ;;  %v2228_v14 = vsel %vm1381_vm3, %v8439_v33, -inf }
 0x2c5   : > { %v2487_v27 = vpack.c.bf16 %v6630_v62, %v6628_v24  ;;  %1662 = vadd.xlane.f32.xlu1 %v1661_v41  ;;  %6154 = vmatmul.msk.bf16.gmra.mxu1 %vm1231_vm2, %v11397_v54  ;;  %v2372_v55 = vsel %vm1381_vm3, %v6630_v62, 0.0  ;;  %v11398_v41 = vld [vmem:[#allocation32_spill] sm:$0xff] }
 0x2c6   : > { %v6632_v5 = vpop.eup %6631 }
 0x2c7   : > { %6105 = vmatmul.msk.bf16.gmra.mxu2 %vm1381_vm3, %v2487_v27  ;;  %v8473_v34 = vpop.xlane.xlu2 %1629  ;;  %v1882_v53 = vmul.f32 %v6632_v5, %v8378_v56  ;;  %v1714_v56 = vpack.c.bf16 %v8331_v47, %v8310_v40  ;;  %v2231_v40 = vsel %vm1381_vm3, %v8459_v0, -inf }
 0x2c8   : > { %v8475_v32 = vpop.xlane.xlu0 %1632 }
 0x2c9   : > { %v8478_v45 = vpop.xlane.xlu1 %3071  ;;  %v1914_v63 = vpack.c.bf16 %v1882_v53, %v1882_v53 }
 0x2ca   : > { %v8480_v16 = vpop.f32.mrf.mxu1 }
 0x2cb   : > { %1947 = vst.msk [vmem:[#allocation4 + $0xc] sm:$0xf] %vm1943_vm4, %v1914_v63 }
 0x2cc   : > { %v8483_v29 = vpop.f32.mrf.mxu0  ;;  %2370 = vadd.xlane.f32.xlu0 %v2369_v9  ;;  %2373 = vadd.xlane.f32.xlu2 %v2372_v55 }
 0x2cf   : > { %6083 = vmatmul.msk.bf16.gmra.mxu0 %vm1381_vm3, %v1714_v56  ;;  %v2188_v1 = vpop.xlane.xlu2 %2187 }
 0x2d0   : > { %v8491_v50 = vpop.xlane.xlu0 %3074  ;;  %v2268_v51 = vsub.f32 %v8169_v4, %v2188_v1 }
 0x2d1   : > { %v1591_v25 = vpop.xlane.xlu1 %1590 }
 0x2d2   : > { %6633 = vrcp.f32 %v1591_v25  ;;  %v2307_v24 = vmul.f32 1.442695, %v2268_v51  ;;  %v8500_v47 = vpop.f32.mrf.mxu1  ;;  %v1715_v25 = vpack.c.bf16 %v8371_v12, %v8389_v26 }
 0x2d3   : > { %6635 = vpow2.f32 %v2305_v18 }
 0x2d4   : > { %v8494_v62 = vpop.f32.mrf.mxu0  ;;  %6637 = vpow2.f32 %v2307_v24  ;;  %2229 = vmax.xlane.f32.xlu0 %v2228_v14  ;;  %2232 = vmax.xlane.f32.xlu2 %v2231_v40  ;;  %v11399_v24 = vld [vmem:[#allocation23_spill] sm:$0xff] }
 0x2d5   : > { %6155 = vmatmul.msk.bf16.gmra.mxu1 %vm1231_vm2, %v11398_v41 }
 0x2d7   : > { %v1594_v27 = vpop.xlane.xlu2 %1593 }
 0x2d8   : > { %v6634_v4 = vpop.eup %6633  ;;  %v1597_v54 = vpop.xlane.xlu0 %1596  ;;  %6639 = vrcp.f32 %v1594_v27 }
 0x2d9   : > { %v2191_v5 = vpop.xlane.xlu1 %2190  ;;  %v1884_v53 = vmul.f32 %v6634_v4, %v8423_v35  ;;  %v8505_v63 = vpop.eup %6635  ;;  %6641 = vrcp.f32 %v1597_v54 }
 0x2da   : > { %v2269_v39 = vsub.f32 %v8192_v37, %v2191_v5  ;;  %v6638_v9 = vpop.eup %6637  ;;  %v8516_v37 = vpop.f32.mrf.mxu1 }
 0x2db   : > { %v1916_v55 = vpack.c.bf16 %v1884_v53, %v1884_v53  ;;  %v2378_v1 = vsel %vm1381_vm3, %v6638_v9, 0.0  ;;  %v2488_v51 = vpack.c.bf16 %v6638_v9, %v8505_v63 }
 0x2dc   : > { %v2309_v56 = vmul.f32 1.442695, %v2269_v39  ;;  %v8508_v18 = vpop.f32.mrf.mxu0  ;;  %2379 = vadd.xlane.f32.xlu0 %v2378_v1 }
 0x2dd   : > { %1949 = vst.msk [vmem:[#allocation4 + $0x14] sm:$0xf] %vm1943_vm4, %v1916_v55  ;;  %6106 = vmatmul.msk.bf16.gmra.mxu2 %vm1381_vm3, %v2488_v51  ;;  %v2237_v55 = vsel %vm1381_vm3, %v8500_v47, -inf }
 0x2de   : > { %6643 = vpow2.f32 %v2309_v56  ;;  %v6640_v35 = vpop.eup %6639  ;;  %3800 = vrot.lane.b32.xlu1 %v11399_v24, %s7153_s17  ;;  %v2240_v24 = vsel %vm1381_vm3, %v8516_v37, -inf }
 0x2df   : > { %6084 = vmatmul.msk.bf16.gmra.mxu0 %vm1381_vm3, %v1715_v25  ;;  %v6642_v14 = vpop.eup %6641  ;;  %v8521_v40 = vpop.xlane.xlu2 %3077  ;;  %v1885_v4 = vmul.f32 %v6640_v35, %v8441_v46 }
 0x2e0   : > { %v2194_v41 = vpop.xlane.xlu0 %2193  ;;  %v1886_v27 = vmul.f32 %v6642_v14, %v8461_v15  ;;  %v1716_v14 = vpack.c.bf16 %v8457_v2, %v8396_v43  ;;  %v11401_v43 = vld [vmem:[#allocation22_spill] sm:$0xff] }
 0x2e1   : > { %v2270_v12 = vsub.f32 %v8208_v38, %v2194_v41  ;;  %v8525_v26 = vpop.xlane.xlu1 %1635  ;;  %v1917_v54 = vpack.c.bf16 %v1885_v4, %v1885_v4  ;;  %v11400_v38 = vld [vmem:[#allocation21_spill] sm:$0xff] }
 0x2e2   : > { %v1918_v53 = vpack.c.bf16 %v1886_v27, %v1886_v27  ;;  %v8541_v1 = vpop.f32.mrf.mxu1 }
 0x2e3   : > { %v2311_v5 = vmul.f32 1.442695, %v2270_v12  ;;  %1950 = vst.msk [vmem:[#allocation4 + $0x18] sm:$0xf] %vm1943_vm4, %v1917_v54 }
 0x2e4   : > { %v6644_v39 = vpop.eup %6643  ;;  %v8528_v9 = vpop.f32.mrf.mxu0  ;;  %2238 = vmax.xlane.f32.xlu0 %v2237_v55  ;;  %1951 = vst.msk [vmem:[#allocation4 + $0x1c] sm:$0xf] %vm1943_vm4, %v1918_v53 }
 0x2e5   : > { %v2381_v46 = vsel %vm1381_vm3, %v6644_v39, 0.0  ;;  %6645 = vpow2.f32 %v2311_v5  ;;  %6156 = vmatmul.msk.bf16.gmra.mxu1 %vm1231_vm2, %v11400_v38 }
 0x2e6   : > { %2382 = vadd.xlane.f32.xlu2 %v2381_v46 }
 0x2e7   : > { %v8537_v15 = vpop.xlane.xlu2 %1638 }
 0x2e8   : > { %v8539_v56 = vpop.xlane.xlu0 %1641 }
 0x2e9   : > { %v8543_v51 = vpop.xlane.xlu1 %3080 }
 0x2ea   : > { %v8559_v5 = vpop.f32.mrf.mxu1 }
 0x2eb   : > { %v8545_v25 = vpop.eup %6645 }
 0x2ec   : > { %v8547_v35 = vpop.f32.mrf.mxu0  ;;  %v2489_v41 = vpack.c.bf16 %v8545_v25, %v6644_v39 }
 0x2ee   : > { %2241 = vmax.xlane.f32.xlu2 %v2240_v24  ;;  %6107 = vmatmul.msk.bf16.gmra.mxu2 %vm1381_vm3, %v2489_v41 }
 0x2ef   : > { %6085 = vmatmul.msk.bf16.gmra.mxu0 %vm1381_vm3, %v1716_v14  ;;  %v2197_v4 = vpop.xlane.xlu2 %2196 }
 0x2f0   : > { %v8556_v12 = vpop.xlane.xlu0 %3083  ;;  %v2271_v27 = vsub.f32 %v8231_v10, %v2197_v4 }
 0x2f1   : > { %v1600_v54 = vpop.xlane.xlu1 %1599 }
 0x2f2   : > { %6647 = vrcp.f32 %v1600_v54  ;;  %v2313_v53 = vmul.f32 1.442695, %v2271_v27  ;;  %v3160_v27 = vsub.f32 %v8113_v42, %v8433_v48 }
 0x2f4   : > { %v8561_v55 = vpop.f32.mrf.mxu0  ;;  %6649 = vpow2.f32 %v2313_v53 }
 0x2f5   : > { %6651 = vrcp.f32 %v8374_v31  ;;  %6157 = vmatmul.msk.bf16.gmra.mxu1 %vm1231_vm2, %v11401_v43  ;;  %v8572_v43 = vpop.f32.mrf.mxu1 }
 0x2f7   : > { %v1603_v39 = vpop.xlane.xlu2 %1602 }
 0x2f8   : > { %v6648_v2 = vpop.eup %6647  ;;  %v1606_v46 = vpop.xlane.xlu0 %1605  ;;  %6653 = vrcp.f32 %v1603_v39 }
 0x2f9   : > { %v2200_v38 = vpop.xlane.xlu1 %2199  ;;  %v1887_v10 = vmul.f32 %v6648_v2, %v8483_v29  ;;  %6655 = vrcp.f32 %v1606_v46  ;;  %v1717_v29 = vpack.c.bf16 %v8453_v13, %v8435_v20  ;;  %v3192_v46 = vmul.f32 1.442695, %v3160_v27 }
 0x2fa   : > { %v2272_v24 = vsub.f32 %v8247_v21, %v2200_v38  ;;  %v6650_v14 = vpop.eup %6649  ;;  %6657 = vrcp.f32 %v8391_v36  ;;  %v3161_v21 = vsub.f32 %v8133_v60, %v8416_v22 }
 0x2fb   : > { %v1919_v41 = vpack.c.bf16 %v1887_v10, %v1887_v10  ;;  %v6652_v4 = vpop.eup %6651  ;;  %v2387_v53 = vsel %vm1381_vm3, %v6650_v14, 0.0 }
 0x2fc   : > { %v2315_v31 = vmul.f32 1.442695, %v2272_v24  ;;  %v1834_v54 = vpop.f32.mrf.mxu0  ;;  %2388 = vadd.xlane.f32.xlu0 %v2387_v53  ;;  %v3194_v24 = vmul.f32 1.442695, %v3161_v21 }
 0x2fd   : > { %v1893_v39 = vmul.f32 %v6652_v4, %v1834_v54  ;;  %1952 = vst.msk [vmem:[#allocation4 + $0x20] sm:$0xf] %vm1943_vm4, %v1919_v41  ;;  %v2246_v54 = vsel %vm1381_vm3, %v8559_v5, -inf }
 0x2fe   : > { %6659 = vpow2.f32 %v2315_v31  ;;  %v6654_v42 = vpop.eup %6653 }
 0x2ff   : > { %v1925_v48 = vpack.c.bf16 %v1893_v39, %v1893_v39  ;;  %6086 = vmatmul.msk.bf16.gmra.mxu0 %vm1381_vm3, %v1717_v29  ;;  %v6656_v2 = vpop.eup %6655  ;;  %v8580_v36 = vpop.xlane.xlu2 %1647  ;;  %v1888_v10 = vmul.f32 %v6654_v42, %v8494_v62  ;;  %6661 = vpow2.f32 %v3192_v46  ;;  %v11402_v39 = vld [vmem:[#allocation26_spill] sm:$0xff] }
 0x300   : > { %v2203_v38 = vpop.xlane.xlu0 %2202  ;;  %v1889_v13 = vmul.f32 %v6656_v2, %v8508_v18  ;;  %v6658_v22 = vpop.eup %6657  ;;  %6663 = vrcp.f32 %v8393_v52 }
 0x301   : > { %1958 = vst.msk [vmem:[#allocation4 + $0x38] sm:$0xf] %vm1943_vm4, %v1925_v48  ;;  %v8584_v20 = vpop.xlane.xlu1 %1644  ;;  %v1920_v60 = vpack.c.bf16 %v1888_v10, %v1888_v10  ;;  %v2273_v31 = vsub.f32 %v8266_v61, %v2203_v38  ;;  %6665 = vpow2.f32 %v3194_v24  ;;  %v8596_v61 = vpop.f32.mrf.mxu1  ;;  %v2366_v48 = vsel %vm1381_vm3, %v8398_v59, 0.0 }
 0x302   : > { %v1921_v41 = vpack.c.bf16 %v1889_v13, %v1889_v13  ;;  %v3163_v24 = vsub.f32 %v8202_v11, %v8491_v50 }
 0x303   : > { %1953 = vst.msk [vmem:[#allocation4 + $0x24] sm:$0xf] %vm1943_vm4, %v1920_v60  ;;  %v2317_v21 = vmul.f32 1.442695, %v2273_v31 }
 0x304   : > { %v6660_v4 = vpop.eup %6659  ;;  %v1836_v27 = vpop.f32.mrf.mxu0  ;;  %2247 = vmax.xlane.f32.xlu0 %v2246_v54  ;;  %1954 = vst.msk [vmem:[#allocation4 + $0x28] sm:$0xf] %vm1943_vm4, %v1921_v41  ;;  %v11403_v41 = vld [vmem:[#allocation34_spill] sm:$0xff]  ;;  %v3198_v11 = vmul.f32 1.442695, %v3163_v24 }
 0x305   : > { %v1894_v62 = vmul.f32 %v6658_v22, %v1836_v27  ;;  %v2390_v18 = vsel %vm1381_vm3, %v6660_v4, 0.0  ;;  %v2490_v53 = vpack.c.bf16 %v6660_v4, %v6650_v14  ;;  %6158 = vmatmul.msk.bf16.gmra.mxu1 %vm1231_vm2, %v11402_v39  ;;  %v8607_v46 = vpop.eup %6661  ;;  %6667 = vpow2.f32 %v2317_v21 }
 0x306   : > { %2391 = vadd.xlane.f32.xlu2 %v2390_v18  ;;  %v6664_v38 = vpop.eup %6663  ;;  %v3162_v4 = vsub.f32 %v11403_v41, %v8478_v45  ;;  %v2225_v27 = vsel %vm1381_vm3, %v8419_v17, -inf }
 0x307   : > { %v1926_v29 = vpack.c.bf16 %v1894_v62, %v1894_v62  ;;  %6108 = vmatmul.msk.bf16.gmra.mxu2 %vm1381_vm3, %v2490_v53  ;;  %v2206_v42 = vpop.xlane.xlu2 %2205  ;;  %v8609_v13 = vpop.eup %6665 }
 0x308   : > { %v8599_v52 = vpop.xlane.xlu0 %1650  ;;  %v2274_v14 = vsub.f32 %v8280_v57, %v2206_v42  ;;  %2367 = vadd.xlane.f32.xlu1 %v2366_v48  ;;  %v3384_v59 = vpack.c.bf16 %v8609_v13, %v8607_v46  ;;  %v2249_v57 = vsel %vm1381_vm3, %v8572_v43, -inf  ;;  %v3196_v45 = vmul.f32 1.442695, %v3162_v4 }
 0x309   : > { %1959 = vst.msk [vmem:[#allocation4 + $0x3c] sm:$0xf] %vm1943_vm4, %v1926_v29  ;;  %v8605_v2 = vpop.xlane.xlu1 %3086  ;;  %v8623_v62 = vpop.f32.mrf.mxu1 }
 0x30a   : > { %v2319_v10 = vmul.f32 1.442695, %v2274_v14  ;;  %v11404_v14 = vld [vmem:[#allocation27_spill] sm:$0xff] }
 0x30b   : > { %v8626_v18 = vpop.eup %6667 }
 0x30c   : > { %v1839_v60 = vpop.f32.mrf.mxu0  ;;  %6669 = vpow2.f32 %v2319_v10 }
 0x30d   : > { %v1895_v22 = vmul.f32 %v6664_v38, %v1839_v60  ;;  %6671 = vrcp.f32 %v8455_v49 }
 0x30e   : > { %2250 = vmax.xlane.f32.xlu2 %v2249_v57 }
 0x30f   : > { %v1927_v31 = vpack.c.bf16 %v1895_v22, %v1895_v22  ;;  %6135 = vmatmul.msk.bf16.vlgmr.msrb.gmra.mxu0 %vm1381_vm3, %v3384_v59  ;;  %v1612_v50 = vpop.xlane.xlu2 %1611  ;;  %v2375_v59 = vsel %vm1381_vm3, %v8505_v63, 0.0 }
 0x310   : > { %v1615_v54 = vpop.xlane.xlu0 %1614  ;;  %6673 = vrcp.f32 %v1612_v50  ;;  %2226 = vmax.xlane.f32.xlu1 %v2225_v27 }
 0x311   : > { %1960 = vst.msk [vmem:[#allocation4 + $0x40] sm:$0xf] %vm1943_vm4, %v1927_v31  ;;  %v1609_v49 = vpop.xlane.xlu1 %1608  ;;  %6675 = vrcp.f32 %v1615_v54 }
 0x312   : > { %v6670_v53 = vpop.eup %6669  ;;  %6677 = vrcp.f32 %v1609_v49 }
 0x313   : > { %v6672_v39 = vpop.eup %6671  ;;  %6679 = vpow2.f32 %v3198_v11  ;;  %v2396_v21 = vsel %vm1381_vm3, %v6670_v53, 0.0  ;;  %v2491_v42 = vpack.c.bf16 %v6670_v53, %v8626_v18 }
 0x314   : > { %v1841_v29 = vpop.f32.mrf.mxu0  ;;  %6681 = vrcp.f32 %v8473_v34  ;;  %2397 = vadd.xlane.f32.xlu0 %v2396_v21  ;;  %v3164_v21 = vsub.f32 %v8225_v58, %v8521_v40 }
 0x315   : > { %v1896_v48 = vmul.f32 %v6672_v39, %v1841_v29  ;;  %6683 = vpow2.f32 %v3196_v45  ;;  %6159 = vmatmul.msk.bf16.gmra.mxu1 %vm1231_vm2, %v11404_v14 }
 0x316   : > { %v6674_v38 = vpop.eup %6673  ;;  %6685 = vrcp.f32 %v8475_v32  ;;  %v3200_v58 = vmul.f32 1.442695, %v3164_v21 }
 0x317   : > { %v1928_v10 = vpack.c.bf16 %v1896_v48, %v1896_v48  ;;  %6109 = vmatmul.msk.bf16.gmra.mxu2 %vm1381_vm3, %v2491_v42  ;;  %v6676_v24 = vpop.eup %6675  ;;  %v8634_v60 = vpop.xlane.xlu2 %1656  ;;  %v1891_v57 = vmul.f32 %v6674_v38, %v8547_v35  ;;  %v2234_v48 = vsel %vm1381_vm3, %v8480_v16, -inf }
 0x318   : > { %v2212_v22 = vpop.xlane.xlu0 %2211  ;;  %v6678_v34 = vpop.eup %6677  ;;  %2376 = vadd.xlane.f32.xlu1 %v2375_v59  ;;  %v1892_v31 = vmul.f32 %v6676_v24, %v8561_v55 }
 0x319   : > { %1961 = vst.msk [vmem:[#allocation4 + $0x44] sm:$0xf] %vm1943_vm4, %v1928_v10  ;;  %v2276_v41 = vsub.f32 %v8314_v7, %v2212_v22  ;;  %v2209_v4 = vpop.xlane.xlu1 %2208  ;;  %v8642_v11 = vpop.eup %6679  ;;  %v1923_v27 = vpack.c.bf16 %v1891_v57, %v1891_v57  ;;  %v1890_v54 = vmul.f32 %v6678_v34, %v8528_v9  ;;  %v3165_v7 = vsub.f32 %v8245_v8, %v8543_v51 }
 0x31a   : > { %v2275_v50 = vsub.f32 %v8300_v19, %v2209_v4  ;;  %v6682_v63 = vpop.eup %6681  ;;  %v8647_v35 = vpop.f32.mrf.mxu1  ;;  %v1924_v45 = vpack.c.bf16 %v1892_v31, %v1892_v31  ;;  %v2255_v19 = vsel %vm1381_vm3, %v8623_v62, -inf  ;;  %v11405_v4 = vld [vmem:[#allocation28_spill] sm:$0xff] }
 0x31b   : > { %v2323_v49 = vmul.f32 1.442695, %v2276_v41  ;;  %v8649_v53 = vpop.eup %6683  ;;  %1956 = vst.msk [vmem:[#allocation4 + $0x30] sm:$0xf] %vm1943_vm4, %v1923_v27  ;;  %v1922_v9 = vpack.c.bf16 %v1890_v54, %v1890_v54  ;;  %v3202_v51 = vmul.f32 1.442695, %v3165_v7 }
 0x31c   : > { %v2321_v55 = vmul.f32 1.442695, %v2275_v50  ;;  %v1844_v39 = vpop.f32.mrf.mxu0  ;;  %2256 = vmax.xlane.f32.xlu0 %v2255_v19  ;;  %v3385_v32 = vpack.c.bf16 %v8642_v11, %v8649_v53  ;;  %1957 = vst.msk [vmem:[#allocation4 + $0x34] sm:$0xf] %vm1943_vm4, %v1924_v45  ;;  %v6686_v14 = vpop.eup %6685  ;;  %v2384_v50 = vsel %vm1381_vm3, %v8545_v25, 0.0  ;;  %v3166_v25 = vsub.f32 %v8268_v23, %v8556_v12 }
 0x31d   : > { %6687 = vpow2.f32 %v2323_v49  ;;  %v1897_v29 = vmul.f32 %v6682_v63, %v1844_v39  ;;  %1955 = vst.msk [vmem:[#allocation4 + $0x2c] sm:$0xf] %vm1943_vm4, %v1922_v9  ;;  %v2243_v23 = vsel %vm1381_vm3, %v8541_v1, -inf }
 0x31e   : > { %6689 = vpow2.f32 %v2321_v55  ;;  %v3167_v55 = vsub.f32 %v8290_v28, %v8605_v2 }
 0x31f   : > { %v1929_v8 = vpack.c.bf16 %v1897_v29, %v1897_v29  ;;  %6136 = vmatmul.msk.bf16.gmra.mxu0 %vm1381_vm3, %v3385_v32  ;;  %v2215_v42 = vpop.xlane.xlu2 %2214  ;;  %6691 = vrcp.f32 %v8525_v26  ;;  %v2258_v29 = vsel %vm1381_vm3, %v8647_v35, -inf }
 0x320   : > { %v2277_v38 = vsub.f32 %v8335_v6, %v2215_v42  ;;  %2235 = vmax.xlane.f32.xlu1 %v2234_v48  ;;  %6693 = vpow2.f32 %v3202_v51  ;;  %v8678_v31 = vpop.xlane.xlu0 %1659  ;;  %v3206_v2 = vmul.f32 1.442695, %v3167_v55 }
 0x321   : > { %1962 = vst.msk [vmem:[#allocation4 + $0x48] sm:$0xf] %vm1943_vm4, %v1929_v8  ;;  %v8667_v10 = vpop.xlane.xlu1 %1653  ;;  %v3204_v8 = vmul.f32 1.442695, %v3166_v25 }
 0x322   : > { %v2325_v24 = vmul.f32 1.442695, %v2277_v38  ;;  %v8672_v57 = vpop.f32.mrf.mxu1 }
 0x323   : > { %v8669_v40 = vpop.eup %6687 }
 0x324   : > { %v6690_v59 = vpop.eup %6689  ;;  %v1846_v22 = vpop.f32.mrf.mxu0  ;;  %6695 = vpow2.f32 %v2325_v24 }
 0x325   : > { %v1898_v34 = vmul.f32 %v6686_v14, %v1846_v22  ;;  %v2399_v41 = vsel %vm1381_vm3, %v6690_v59, 0.0  ;;  %v2492_v6 = vpack.c.bf16 %v8669_v40, %v6690_v59  ;;  %6697 = vpow2.f32 %v3200_v58  ;;  %6160 = vmatmul.msk.bf16.gmra.mxu1 %vm1231_vm2, %v11405_v4  ;;  %v6692_v54 = vpop.eup %6691  ;;  %v11406_v22 = vld [vmem:[#allocation29_spill] sm:$0xff] }
 0x326   : > { %2400 = vadd.xlane.f32.xlu2 %v2399_v41  ;;  %v8688_v49 = vpop.eup %6693  ;;  %6699 = vrcp.f32 %v8537_v15  ;;  %v3963_v59 = vsel %vm1381_vm3, %v8672_v57, -inf }
 0x327   : > { %v1930_v26 = vpack.c.bf16 %v1898_v34, %v1898_v34  ;;  %6110 = vmatmul.msk.bf16.gmra.mxu2 %vm1381_vm3, %v2492_v6  ;;  %v8683_v27 = vpop.xlane.xlu2 %2364  ;;  %6701 = vrcp.f32 %v8539_v56  ;;  %v2393_v56 = vsel %vm1381_vm3, %v8626_v18, 0.0 }
 0x328   : > { %2385 = vadd.xlane.f32.xlu1 %v2384_v50  ;;  %v8709_v51 = vpop.xlane.xlu0 %2361  ;;  %6703 = vpow2.f32 %v3206_v2  ;;  %v2252_v2 = vsel %vm1381_vm3, %v8596_v61, -inf }
 0x329   : > { %1963 = vst.msk [vmem:[#allocation4 + $0x4c] sm:$0xf] %vm1943_vm4, %v1930_v26  ;;  %v8686_v63 = vpop.xlane.xlu1 %2358  ;;  %6705 = vpow2.f32 %v3204_v8  ;;  %v11407_v8 = vld [vmem:[#allocation30_spill] sm:$0xff] }
 0x32a   : > { %v6696_v45 = vpop.eup %6695  ;;  %v8702_v21 = vpop.f32.mrf.mxu1 }
 0x32b   : > { %v8690_v7 = vpop.eup %6697  ;;  %v2405_v19 = vsel %vm1381_vm3, %v6696_v45, 0.0  ;;  %v3966_v58 = vsel %vm1381_vm3, %v8702_v21, -inf }
 0x32c   : > { %v1849_v39 = vpop.f32.mrf.mxu0  ;;  %2406 = vadd.xlane.f32.xlu0 %v2405_v19  ;;  %v3386_v32 = vpack.c.bf16 %v8688_v49, %v8690_v7  ;;  %v6700_v48 = vpop.eup %6699 }
 0x32d   : > { %v1899_v9 = vmul.f32 %v6692_v54, %v1849_v39  ;;  %v6702_v34 = vpop.eup %6701 }
 0x32e   : > { %2259 = vmax.xlane.f32.xlu2 %v2258_v29  ;;  %v8725_v4 = vpop.eup %6703 }
 0x32f   : > { %v1931_v28 = vpack.c.bf16 %v1899_v9, %v1899_v9  ;;  %6137 = vmatmul.msk.bf16.gmra.mxu0 %vm1381_vm3, %v3386_v32  ;;  %v8707_v12 = vpop.xlane.xlu2 %1665  ;;  %v8727_v26 = vpop.eup %6705 }
 0x330   : > { %2244 = vmax.xlane.f32.xlu1 %v2243_v23  ;;  %v2221_v50 = vpop.xlane.xlu0 %2220  ;;  %v3387_v29 = vpack.c.bf16 %v8725_v4, %v8727_v26 }
 0x331   : > { %1964 = vst.msk [vmem:[#allocation4 + $0x50] sm:$0xf] %vm1943_vm4, %v1931_v28  ;;  %v2218_v42 = vpop.xlane.xlu1 %2217  ;;  %v2279_v32 = vsub.f32 %v8376_v3, %v2221_v50 }
 0x332   : > { %v2278_v15 = vsub.f32 %v8353_v44, %v2218_v42  ;;  %v8722_v41 = vpop.f32.mrf.mxu1 }
 0x333   : > { %v3969_v19 = vsel %vm1381_vm3, %v8722_v41, -inf }
 0x334   : > { %v2327_v14 = vmul.f32 1.442695, %v2278_v15  ;;  %v1851_v38 = vpop.f32.mrf.mxu0  ;;  %3967 = vmax.xlane.f32.xlu0 %v3966_v58 }
 0x335   : > { %v1900_v24 = vmul.f32 %v6700_v48, %v1851_v38  ;;  %6161 = vmatmul.msk.bf16.gmra.mxu1 %vm1231_vm2, %v11406_v22  ;;  %v2402_v48 = vsel %vm1381_vm3, %v8669_v40, 0.0 }
 0x336   : > { %6707 = vpow2.f32 %v2327_v14  ;;  %3964 = vmax.xlane.f32.xlu2 %v3963_v59  ;;  %v2570_v14 = vpop.f32.mrf.mxu2 }
 0x337   : > { %v1932_v44 = vpack.c.bf16 %v1900_v24, %v1900_v24  ;;  %v2224_v6 = vpop.xlane.xlu2 %2223  ;;  %6709 = vrcp.f32 %v8584_v20 }
 0x338   : > { %2394 = vadd.xlane.f32.xlu1 %v2393_v56  ;;  %v2280_v55 = vsub.f32 %v8402_v30, %v2224_v6  ;;  %6711 = vrcp.f32 %v8686_v63 }
 0x339   : > { %1965 = vst.msk [vmem:[#allocation4 + $0x54] sm:$0xf] %vm1943_vm4, %v1932_v44 }
 0x33a   : > { %v2331_v30 = vmul.f32 1.442695, %v2280_v55 }
 0x33c   : > { %v6708_v54 = vpop.eup %6707  ;;  %v1854_v39 = vpop.f32.mrf.mxu0  ;;  %3970 = vmax.xlane.f32.xlu0 %v3969_v19  ;;  %6713 = vpow2.f32 %v2331_v30 }
 0x33d   : > { %v1901_v18 = vmul.f32 %v6702_v34, %v1854_v39  ;;  %v2408_v25 = vsel %vm1381_vm3, %v6708_v54, 0.0  ;;  %v2493_v9 = vpack.c.bf16 %v6708_v54, %v6696_v45  ;;  %v2329_v45 = vmul.f32 1.442695, %v2279_v32  ;;  %v6710_v23 = vpop.eup %6709  ;;  %v1669_v34 = vpop.xlane.xlu0 %1668 }
 0x33e   : > { %2409 = vadd.xlane.f32.xlu2 %v2408_v25  ;;  %6715 = vrcp.f32 %v8580_v36  ;;  %v6712_v15 = vpop.eup %6711  ;;  %v8757_v54 = vpop.f32.mrf.mxu1 }
 0x33f   : > { %v1933_v28 = vpack.c.bf16 %v1901_v18, %v1901_v18  ;;  %6111 = vmatmul.msk.bf16.gmra.mxu2 %vm1381_vm3, %v2493_v9  ;;  %6138 = vmatmul.msk.bf16.gmra.mxu0 %vm1381_vm3, %v3387_v29  ;;  %6717 = vpow2.f32 %v2329_v45  ;;  %v2650_v58 = vmul.f32 %v6712_v15, %v2570_v14  ;;  %v3972_v19 = vsel %vm1381_vm3, %v8757_v54, -inf  ;;  %v1663_v9 = vpop.xlane.xlu1 %1662 }
 0x340   : > { %2253 = vmax.xlane.f32.xlu1 %v2252_v2  ;;  %6719 = vrcp.f32 %v8599_v52  ;;  %v11408_v52 = vld [vmem:[#allocation33_spill] sm:$0xff] }
 0x341   : > { %1966 = vst.msk [vmem:[#allocation4 + $0x58] sm:$0xf] %vm1943_vm4, %v1933_v28  ;;  %v2682_v56 = vpack.c.bf16 %v2650_v58, %v2650_v58  ;;  %6721 = vrcp.f32 %v8667_v10 }
 0x342   : > { %v8749_v63 = vpop.eup %6713  ;;  %6723 = vrcp.f32 %v8634_v60 }
 0x343   : > { %6725 = vrcp.f32 %v8709_v51 }
 0x344   : > { %v1856_v20 = vpop.f32.mrf.mxu0  ;;  %v6716_v38 = vpop.eup %6715  ;;  %6727 = vrcp.f32 %v8678_v31 }
 0x345   : > { %v1902_v3 = vmul.f32 %v6710_v23, %v1856_v20  ;;  %6162 = vmatmul.msk.bf16.gmra.mxu1 %vm1231_vm2, %v11407_v8  ;;  %v6718_v24 = vpop.eup %6717  ;;  %v8765_v29 = vpop.xlane.xlu0 %2370  ;;  %6729 = vrcp.f32 %v1663_v9 }
 0x346   : > { %v2494_v22 = vpack.c.bf16 %v8749_v63, %v6718_v24  ;;  %v2411_v40 = vsel %vm1381_vm3, %v6718_v24, 0.0  ;;  %v6720_v6 = vpop.eup %6719  ;;  %v2572_v8 = vpop.f32.mrf.mxu2  ;;  %6731 = vrcp.f32 %v8707_v12 }
 0x347   : > { %v1934_v42 = vpack.c.bf16 %v1902_v3, %v1902_v3  ;;  %v6722_v18 = vpop.eup %6721  ;;  %v8777_v24 = vpop.f32.mrf.mxu1  ;;  %6733 = vrcp.f32 %v1669_v34 }
 0x348   : > { %2403 = vadd.xlane.f32.xlu1 %v2402_v48  ;;  %v6724_v10 = vpop.eup %6723  ;;  %v8788_v12 = vpop.xlane.xlu2 %2373 }
 0x349   : > { %1967 = vst.msk [vmem:[#allocation4 + $0x5c] sm:$0xf] %vm1943_vm4, %v1934_v42  ;;  %v6726_v3 = vpop.eup %6725 }
 0x34a   : > { %v6728_v60 = vpop.eup %6727  ;;  %v2651_v42 = vmul.f32 %v6726_v3, %v2572_v8 }
 0x34b   : > { %v6730_v31 = vpop.eup %6729 }
 0x34c   : > { %v1859_v36 = vpop.f32.mrf.mxu0  ;;  %v2683_v14 = vpack.c.bf16 %v2651_v42, %v2651_v42 }
 0x34d   : > { %v1903_v59 = vmul.f32 %v6716_v38, %v1859_v36  ;;  %v2230_v23 = vpop.xlane.xlu0 %2229 }
 0x34f   : > { %v1935_v44 = vpack.c.bf16 %v1903_v59, %v1903_v59  ;;  %6112 = vmatmul.msk.bf16.gmra.mxu2 %vm1381_vm3, %v2494_v22  ;;  %v2414_v22 = vsel %vm1381_vm3, %v8749_v63, 0.0 }
 0x350   : > { %2412 = vadd.xlane.f32.xlu1 %v2411_v40  ;;  %2746 = vrot.lane.b32.xlu0 %v2682_v56, %s7154_s18  ;;  %v3801_v2 = vpop.permute.xlu1 %3800  ;;  %v6732_v56 = vpop.eup %6731 }
 0x351   : > { %1968 = vst.msk [vmem:[#allocation4 + $0x60] sm:$0xf] %vm1943_vm4, %v1935_v44 }
 0x354   : > { %v1861_v50 = vpop.f32.mrf.mxu0 }
 0x355   : > { %v1904_v55 = vmul.f32 %v6720_v6, %v1861_v50  ;;  %6163 = vmatmul.msk.bf16.gmra.mxu1 %vm1231_vm2, %v11408_v52  ;;  %v8773_v38 = vpop.xlane.xlu0 %2379  ;;  %v2282_v52 = vsub.f32 %v8439_v33, %v2230_v23 }
 0x357   : > { %v1936_v39 = vpack.c.bf16 %v1904_v55, %v1904_v55  ;;  %v8785_v55 = vpop.f32.mrf.mxu1 }
 0x358   : > { %3973 = vmax.xlane.f32.xlu1 %v3972_v19  ;;  %v3978_v63 = vsel %vm1381_vm3, %v8785_v55, -inf  ;;  %v2335_v19 = vmul.f32 1.442695, %v2282_v52 }
 0x359   : > { %1969 = vst.msk [vmem:[#allocation4 + $0x64] sm:$0xf] %vm1943_vm4, %v1936_v39 }
 0x35a   : > { %6735 = vpow2.f32 %v2335_v19 }
 0x35c   : > { %v1864_v25 = vpop.f32.mrf.mxu0 }
 0x35d   : > { %v1905_v32 = vmul.f32 %v6722_v18, %v1864_v25  ;;  %v8783_v44 = vpop.xlane.xlu0 %2238  ;;  %v6734_v25 = vpop.eup %6733 }
 0x35e   : > { %v2285_v19 = vsub.f32 %v8500_v47, %v8783_v44 }
 0x35f   : > { %v1937_v28 = vpack.c.bf16 %v1905_v32, %v1905_v32 }
 0x360   : > { %v6736_v23 = vpop.eup %6735 }
 0x361   : > { %1970 = vst.msk [vmem:[#allocation4 + $0x68] sm:$0xf] %vm1943_vm4, %v1937_v28 }
 0x364   : > { %v1866_v30 = vpop.f32.mrf.mxu0 }
 0x365   : > { %v1906_v45 = vmul.f32 %v6724_v10, %v1866_v30  ;;  %6164 = vmatmul.msk.bf16.gmra.mxu1 %vm1231_vm2, %v3801_v2  ;;  %v2575_v10 = vpop.f32.mrf.mxu2  ;;  %v2233_v2 = vpop.xlane.xlu2 %2232 }
 0x366   : > { %v2283_v42 = vsub.f32 %v8459_v0, %v2233_v2  ;;  %v3975_v0 = vsel %vm1381_vm3, %v8777_v24, -inf }
 0x367   : > { %v1938_v20 = vpack.c.bf16 %v1906_v45, %v1906_v45 }
 0x369   : > { %1971 = vst.msk [vmem:[#allocation4 + $0x6c] sm:$0xf] %vm1943_vm4, %v1938_v20 }
 0x36c   : > { %v1869_v15 = vpop.f32.mrf.mxu0 }
 0x36d   : > { %v1907_v48 = vmul.f32 %v6728_v60, %v1869_v15  ;;  %v2577_v60 = vpop.f32.mrf.mxu2 }
 0x36f   : > { %v1939_v51 = vpack.c.bf16 %v1907_v48, %v1907_v48  ;;  %v8793_v18 = vpop.xlane.xlu0 %2388 }
 0x371   : > { %1972 = vst.msk [vmem:[#allocation4 + $0x70] sm:$0xf] %vm1943_vm4, %v1939_v51  ;;  %2748 = vrot.lane.b32.xlu1 %v2683_v14, %s7154_s18  ;;  %v8801_v51 = vpop.xlane.xlu2 %2382  ;;  %v2337_v14 = vmul.f32 1.442695, %v2283_v42 }
 0x374   : > { %v1871_v58 = vpop.f32.mrf.mxu0 }
 0x375   : > { %v1908_v36 = vmul.f32 %v6730_v31, %v1871_v58 }
 0x377   : > { %v1940_v59 = vpack.c.bf16 %v1908_v36, %v1908_v36  ;;  %v2248_v20 = vpop.xlane.xlu0 %2247 }
 0x379   : > { %1973 = vst.msk [vmem:[#allocation4 + $0x74] sm:$0xf] %vm1943_vm4, %v1940_v59 }
 0x37a   : > { %2415 = vadd.xlane.f32.xlu0 %v2414_v22 }
 0x37b   : > { %v2368_v6 = vpop.xlane.xlu1 %2367 }
 0x37c   : > { %v1874_v40 = vpop.f32.mrf.mxu0  ;;  %6737 = vrcp.f32 %v2368_v6 }
 0x37d   : > { %v1909_v50 = vmul.f32 %v6732_v56, %v1874_v40  ;;  %v2420_v56 = vsel %vm1381_vm3, %v6736_v23, 0.0  ;;  %v2242_v40 = vpop.xlane.xlu2 %2241 }
 0x37f   : > { %v1941_v39 = vpack.c.bf16 %v1909_v50, %v1909_v50 }
 0x381   : > { %1974 = vst.msk [vmem:[#allocation4 + $0x78] sm:$0xf] %vm1943_vm4, %v1941_v39 }
 0x382   : > { %3979 = vmax.xlane.f32.xlu0 %v3978_v63  ;;  %v6738_v3 = vpop.eup %6737 }
 0x383   : > { %v2227_v32 = vpop.xlane.xlu1 %2226  ;;  %v2653_v48 = vmul.f32 %v6738_v3, %v2577_v60 }
 0x384   : > { %v1876_v9 = vpop.f32.mrf.mxu0  ;;  %v2281_v28 = vsub.f32 %v8419_v17, %v2227_v32 }
 0x385   : > { %v1910_v34 = vmul.f32 %v6734_v25, %v1876_v9  ;;  %v2685_v59 = vpack.c.bf16 %v2653_v48, %v2653_v48  ;;  %v2341_v9 = vmul.f32 1.442695, %v2285_v19  ;;  %v8831_v3 = vpop.xlane.xlu2 %2391 }
 0x386   : > { %v2333_v30 = vmul.f32 1.442695, %v2281_v28 }
 0x387   : > { %v1942_v33 = vpack.c.bf16 %v1910_v34, %v1910_v34  ;;  %v8804_v58 = vpop.xlane.xlu0 %2397 }
 0x388   : > { %6739 = vpow2.f32 %v2333_v30 }
 0x389   : > { %1975 = vst.msk [vmem:[#allocation4 + $0x7c] sm:$0xf] %vm1943_vm4, %v1942_v33  ;;  %6741 = vpow2.f32 %v2337_v14  ;;  %v2580_v33 = vpop.f32.mrf.mxu2 }
 0x38b   : > { %v8797_v45 = vpop.xlane.xlu1 %2376 }
 0x38e   : > { %v6740_v8 = vpop.eup %6739 }
 0x38f   : > { %v2417_v17 = vsel %vm1381_vm3, %v6740_v8, 0.0  ;;  %v2495_v15 = vpack.c.bf16 %v6736_v23, %v6740_v8  ;;  %v6742_v6 = vpop.eup %6741  ;;  %v8816_v39 = vpop.xlane.xlu0 %2256 }
 0x390   : > { %2418 = vadd.xlane.f32.xlu2 %v2417_v17 }
 0x391   : > { %6113 = vmatmul.msk.bf16.gmra.mxu2 %vm1381_vm3, %v2495_v15 }
 0x393   : > { %v2236_v31 = vpop.xlane.xlu1 %2235 }
 0x394   : > { %v2284_v36 = vsub.f32 %v8480_v16, %v2236_v31  ;;  %v2286_v16 = vsub.f32 %v8516_v37, %v2242_v40 }
 0x396   : > { %v2339_v22 = vmul.f32 1.442695, %v2284_v36  ;;  %2752 = vrot.lane.b32.xlu0 %v2685_v59, %s7154_s18  ;;  %v2343_v25 = vmul.f32 1.442695, %v2286_v16  ;;  %v2423_v36 = vsel %vm1381_vm3, %v6742_v6, 0.0 }
 0x398   : > { %6743 = vpow2.f32 %v2339_v22  ;;  %3976 = vmax.xlane.f32.xlu2 %v3975_v0 }
 0x399   : > { %6745 = vrcp.f32 %v8683_v27 }
 0x39a   : > { %6747 = vpow2.f32 %v2343_v25 }
 0x39b   : > { %2421 = vadd.xlane.f32.xlu1 %v2420_v56  ;;  %v8811_v50 = vpop.xlane.xlu1 %2385  ;;  %6749 = vrcp.f32 %v8765_v29  ;;  %v2288_v29 = vsub.f32 %v8559_v5, %v2248_v20  ;;  %v8857_v56 = vpop.f32.mrf.mxu1 }
 0x39c   : > { %6751 = vpow2.f32 %v2341_v9 }
 0x39d   : > { %v2347_v15 = vmul.f32 1.442695, %v2288_v29 }
 0x39e   : > { %v8813_v52 = vpop.eup %6743 }
 0x39f   : > { %v2496_v63 = vpack.c.bf16 %v8813_v52, %v6742_v6  ;;  %v8823_v32 = vpop.xlane.xlu0 %2406  ;;  %v6746_v37 = vpop.eup %6745 }
 0x3a0   : > { %v2652_v28 = vmul.f32 %v6746_v37, %v2575_v10  ;;  %v8826_v30 = vpop.eup %6747 }
 0x3a1   : > { %6114 = vmatmul.msk.bf16.gmra.mxu2 %vm1381_vm3, %v2496_v63  ;;  %v6750_v2 = vpop.eup %6749  ;;  %v3981_v63 = vsel %vm1381_vm3, %v8857_v56, -inf }
 0x3a2   : > { %v8828_v47 = vpop.eup %6751  ;;  %v2684_v44 = vpack.c.bf16 %v2652_v28, %v2652_v28  ;;  %v2654_v23 = vmul.f32 %v6750_v2, %v2580_v33 }
 0x3a3   : > { %v2245_v34 = vpop.xlane.xlu1 %2244  ;;  %v2497_v8 = vpack.c.bf16 %v8826_v30, %v8828_v47  ;;  %v8866_v9 = vpop.f32.mrf.mxu1 }
 0x3a4   : > { %v2287_v27 = vsub.f32 %v8541_v1, %v2245_v34  ;;  %v2686_v42 = vpack.c.bf16 %v2654_v23, %v2654_v23  ;;  %v2251_v1 = vpop.xlane.xlu2 %2250  ;;  %v3984_v28 = vsel %vm1381_vm3, %v8866_v9, -inf }
 0x3a5   : > { %v2289_v22 = vsub.f32 %v8572_v43, %v2251_v1  ;;  %v2582_v43 = vpop.f32.mrf.mxu2  ;;  %v2429_v1 = vsel %vm1381_vm3, %v8828_v47, 0.0 }
 0x3a6   : > { %v2345_v17 = vmul.f32 1.442695, %v2287_v27 }
 0x3a7   : > { %v8836_v60 = vpop.xlane.xlu0 %3967 }
 0x3a8   : > { %6753 = vpow2.f32 %v2345_v17 }
 0x3a9   : > { %6755 = vpow2.f32 %v2347_v15 }
 0x3ab   : > { %v8839_v10 = vpop.xlane.xlu1 %2394 }
 0x3ac   : > { %v8854_v0 = vpop.xlane.xlu2 %2400 }
 0x3ad   : > { %v2585_v2 = vpop.f32.mrf.mxu2 }
 0x3ae   : > { %v8845_v5 = vpop.eup %6753 }
 0x3af   : > { %v8843_v48 = vpop.xlane.xlu0 %3970  ;;  %v8847_v20 = vpop.eup %6755 }
 0x3b0   : > { %2750 = vrot.lane.b32.xlu2 %v2684_v44, %s7154_s18  ;;  %v2498_v59 = vpack.c.bf16 %v8847_v20, %v8845_v5  ;;  %v2291_v44 = vsub.f32 %v8623_v62, %v8816_v39  ;;  %v4060_v39 = vsub.f32 %v8702_v21, %v8836_v60 }
 0x3b1   : > { %6115 = vmatmul.msk.bf16.gmra.mxu2 %vm1381_vm3, %v2497_v8 }
 0x3b2   : > { %v2353_v8 = vmul.f32 1.442695, %v2291_v44 }
 0x3b3   : > { %v2254_v14 = vpop.xlane.xlu1 %2253 }
 0x3b4   : > { %2754 = vrot.lane.b32.xlu1 %v2686_v42, %s7154_s18  ;;  %v2290_v31 = vsub.f32 %v8596_v61, %v2254_v14  ;;  %v2349_v61 = vmul.f32 1.442695, %v2289_v22  ;;  %v2260_v19 = vpop.xlane.xlu2 %2259 }
 0x3b5   : > { %v2292_v37 = vsub.f32 %v8647_v35, %v2260_v19  ;;  %v2426_v35 = vsel %vm1381_vm3, %v8813_v52, 0.0  ;;  %v2587_v29 = vpop.f32.mrf.mxu2 }
 0x3b6   : > { %v2351_v40 = vmul.f32 1.442695, %v2290_v31 }
 0x3b7   : > { %v2355_v27 = vmul.f32 1.442695, %v2292_v37 }
 0x3b8   : > { %6757 = vpow2.f32 %v2351_v40 }
 0x3b9   : > { %6759 = vpow2.f32 %v2349_v61 }
 0x3ba   : > { %6761 = vrcp.f32 %v8797_v45 }
 0x3bb   : > { %v8860_v6 = vpop.xlane.xlu1 %2403  ;;  %6763 = vpow2.f32 %v2355_v27 }
 0x3bc   : > { %6765 = vpow2.f32 %v2353_v8  ;;  %v3965_v17 = vpop.xlane.xlu2 %3964 }
 0x3bd   : > { %v4059_v45 = vsub.f32 %v8672_v57, %v3965_v17  ;;  %6767 = vrcp.f32 %v8788_v12  ;;  %v8898_v21 = vpop.f32.mrf.mxu2 }
 0x3be   : > { %v8864_v25 = vpop.eup %6757 }
 0x3bf   : > { %v8868_v34 = vpop.eup %6759 }
 0x3c0   : > { %2424 = vadd.xlane.f32.xlu0 %v2423_v36  ;;  %v2499_v33 = vpack.c.bf16 %v8864_v25, %v8868_v34  ;;  %v6762_v42 = vpop.eup %6761  ;;  %v4093_v36 = vmul.f32 1.442695, %v4060_v39 }
 0x3c1   : > { %6116 = vmatmul.msk.bf16.gmra.mxu2 %vm1381_vm3, %v2498_v59  ;;  %v8883_v62 = vpop.eup %6763  ;;  %v2656_v31 = vmul.f32 %v6762_v42, %v2585_v2  ;;  %v4091_v59 = vmul.f32 1.442695, %v4059_v45 }
 0x3c2   : > { %v2747_v16 = vpop.permute.xlu0 %2746  ;;  %v8889_v14 = vpop.eup %6765  ;;  %6769 = vpow2.f32 %v4093_v36 }
 0x3c3   : > { %2843 = vst.msk [vmem:[#allocation4] sm:$0xf] %vm2842_vm5, %v2747_v16  ;;  %v8877_v23 = vpop.xlane.xlu1 %2412  ;;  %v2500_v52 = vpack.c.bf16 %v8883_v62, %v8889_v14  ;;  %v2688_v22 = vpack.c.bf16 %v2656_v31, %v2656_v31  ;;  %6771 = vpow2.f32 %v4091_v59  ;;  %v6768_v57 = vpop.eup %6767  ;;  %v2432_v31 = vsel %vm1381_vm3, %v8826_v30, 0.0 }
 0x3c4   : > { %6773 = vrcp.f32 %v8773_v38  ;;  %v2655_v60 = vmul.f32 %v6768_v57, %v2582_v43  ;;  %v8915_v27 = vpop.xlane.xlu2 %2409  ;;  %v8933_v59 = vpop.f32.mrf.mxu1 }
 0x3c5   : > { %v2592_v12 = vpop.f32.mrf.mxu2 }
 0x3c8   : > { %3982 = vmax.xlane.f32.xlu0 %v3981_v63  ;;  %v8901_v47 = vpop.eup %6769  ;;  %v2687_v63 = vpack.c.bf16 %v2655_v60, %v2655_v60  ;;  %v2435_v60 = vsel %vm1381_vm3, %v8845_v5, 0.0 }
 0x3c9   : > { %v8903_v16 = vpop.eup %6771 }
 0x3ca   : > { %v4283_v19 = vpack.c.bf16 %v8901_v47, %v8903_v16  ;;  %v6774_v37 = vpop.eup %6773 }
 0x3cb   : > { %v3974_v15 = vpop.xlane.xlu1 %3973 }
 0x3cc   : > { %v4062_v61 = vsub.f32 %v8757_v54, %v3974_v15 }
 0x3cd   : > { %v2595_v54 = vpop.f32.mrf.mxu2 }
 0x3ce   : > { %v4097_v38 = vmul.f32 1.442695, %v4062_v61 }
 0x3d0   : > { %3985 = vmax.xlane.f32.xlu0 %v3984_v28  ;;  %v4061_v28 = vsub.f32 %v8722_v41, %v8843_v48  ;;  %6775 = vpow2.f32 %v4097_v38 }
 0x3d1   : > { %6117 = vmatmul.msk.bf16.gmra.mxu2 %vm1381_vm3, %v2499_v33  ;;  %v2657_v33 = vmul.f32 %v6774_v37, %v2587_v29 }
 0x3d2   : > { %v4095_v43 = vmul.f32 1.442695, %v4061_v28 }
 0x3d3   : > { %v2689_v2 = vpack.c.bf16 %v2657_v33, %v2657_v33 }
 0x3d4   : > { %6777 = vpow2.f32 %v4095_v43 }
 0x3d5   : > { %v8923_v29 = vpop.f32.mrf.mxu2 }
 0x3d6   : > { %v8917_v8 = vpop.eup %6775 }
 0x3d9   : > { %2427 = vadd.xlane.f32.xlu2 %v2426_v35 }
 0x3da   : > { %v8919_v41 = vpop.eup %6777 }
 0x3db   : > { %v4284_v48 = vpack.c.bf16 %v8917_v8, %v8919_v41 }
 0x3dd   : > { %v2600_v36 = vpop.f32.mrf.mxu2 }
 0x3de   : > { %2430 = vadd.xlane.f32.xlu1 %v2429_v1 }
 0x3e1   : > { %6118 = vmatmul.msk.bf16.gmra.mxu2 %vm1381_vm3, %v2500_v52 }
 0x3e3   : > { %v2749_v40 = vpop.permute.xlu1 %2748 }
 0x3e4   : > { %2844 = vst.msk [vmem:[#allocation4 + $0x4] sm:$0xf] %vm2842_vm5, %v2749_v40  ;;  %2758 = vrot.lane.b32.xlu0 %v2688_v22, %s7154_s18  ;;  %v3987_v40 = vsel %vm1381_vm3, %v8933_v59, -inf }
 0x3e5   : > { %v8944_v30 = vpop.f32.mrf.mxu2 }
 0x3ed   : > { %v8912_v44 = vpop.xlane.xlu0 %2415 }
 0x3f1   : > { %2756 = vrot.lane.b32.xlu2 %v2687_v63, %s7154_s18  ;;  %6167 = vmatmul.msk.bf16.vlgmr.msra.gmra.mxu2 %vm1381_vm3, %v4283_v19  ;;  %v2438_v63 = vsel %vm1381_vm3, %v8847_v20, 0.0 }
 0x3f5   : > { %v3980_v35 = vpop.xlane.xlu0 %3979 }
 0x3f6   : > { %v4064_v17 = vsub.f32 %v8785_v55, %v3980_v35 }
 0x3f7   : > { %2760 = vrot.lane.b32.xlu1 %v2689_v2, %s7154_s18 }
 0x3f8   : > { %v4101_v39 = vmul.f32 1.442695, %v4064_v17 }
 0x3fa   : > { %6779 = vpow2.f32 %v4101_v39  ;;  %v2605_v39 = vpop.f32.mrf.mxu2 }
 0x400   : > { %v8936_v55 = vpop.eup %6779 }
 0x401   : > { %6168 = vmatmul.msk.bf16.gmra.mxu2 %vm1381_vm3, %v4284_v48 }
 0x403   : > { %v8926_v42 = vpop.xlane.xlu2 %2418 }
 0x408   : > { %v2753_v15 = vpop.permute.xlu0 %2752 }
 0x409   : > { %2846 = vst.msk [vmem:[#allocation4 + $0xc] sm:$0xf] %vm2842_vm5, %v2753_v15 }
 0x40b   : > { %v3977_v1 = vpop.xlane.xlu2 %3976 }
 0x40c   : > { %v4063_v45 = vsub.f32 %v8777_v24, %v3977_v1 }
 0x40e   : > { %v4099_v52 = vmul.f32 1.442695, %v4063_v45  ;;  %2433 = vadd.xlane.f32.xlu0 %v2432_v31  ;;  %v8950_v61 = vpop.xlane.xlu1 %2421 }
 0x410   : > { %6781 = vpow2.f32 %v4099_v52  ;;  %v2607_v52 = vpop.f32.mrf.mxu2 }
 0x411   : > { %6783 = vrcp.f32 %v8811_v50 }
 0x412   : > { %6785 = vrcp.f32 %v8801_v51  ;;  %v11409_v51 = vld [vmem:[#allocation24_spill] sm:$0xff] }
 0x413   : > { %v2751_v22 = vpop.permute.xlu2 %2750  ;;  %6787 = vrcp.f32 %v8793_v18 }
 0x414   : > { %2845 = vst.msk [vmem:[#allocation4 + $0x8] sm:$0xf] %vm2842_vm5, %v2751_v22 }
 0x416   : > { %v8940_v57 = vpop.eup %6781  ;;  %3988 = vmax.xlane.f32.xlu0 %v3987_v40 }
 0x417   : > { %v4285_v24 = vpack.c.bf16 %v8936_v55, %v8940_v57  ;;  %v6784_v19 = vpop.eup %6783 }
 0x418   : > { %v2659_v37 = vmul.f32 %v6784_v19, %v2592_v12  ;;  %v6786_v5 = vpop.eup %6785 }
 0x419   : > { %6169 = vmatmul.msk.bf16.gmra.mxu2 %vm1381_vm3, %v4285_v24  ;;  %v2658_v38 = vmul.f32 %v6786_v5, %v8898_v21  ;;  %v6788_v20 = vpop.eup %6787 }
 0x41a   : > { %2436 = vadd.xlane.f32.xlu2 %v2435_v60  ;;  %v2691_v33 = vpack.c.bf16 %v2659_v37, %v2659_v37  ;;  %v2660_v12 = vmul.f32 %v6788_v20, %v2595_v54  ;;  %v2444_v60 = vsel %vm1381_vm3, %v8864_v25, 0.0 }
 0x41b   : > { %v2690_v50 = vpack.c.bf16 %v2658_v38, %v2658_v38 }
 0x41c   : > { %v2692_v2 = vpack.c.bf16 %v2660_v12, %v2660_v12 }
 0x421   : > { %2439 = vadd.xlane.f32.xlu1 %v2438_v63 }
 0x426   : > { %v2755_v28 = vpop.permute.xlu1 %2754 }
 0x427   : > { %2847 = vst.msk [vmem:[#allocation4 + $0x10] sm:$0xf] %vm2842_vm5, %v2755_v28 }
 0x42a   : > { %2764 = vrot.lane.b32.xlu0 %v2691_v33, %s7154_s18 }
 0x432   : > { %2762 = vrot.lane.b32.xlu2 %v2690_v50, %s7154_s18 }
 0x433   : > { %v8960_v43 = vpop.xlane.xlu0 %2424 }
 0x43a   : > { %2766 = vrot.lane.b32.xlu1 %v2692_v2, %s7154_s18  ;;  %3802 = vrot.lane.b32.xlu2 %v11409_v51, %s7153_s17  ;;  %v2450_v2 = vsel %vm1381_vm3, %v8883_v62, 0.0 }
 0x43b   : > { %v3983_v48 = vpop.xlane.xlu0 %3982 }
 0x43c   : > { %v4065_v35 = vsub.f32 %v8857_v56, %v3983_v48  ;;  %v2441_v56 = vsel %vm1381_vm3, %v8868_v34, 0.0  ;;  %v2447_v34 = vsel %vm1381_vm3, %v8889_v14, 0.0  ;;  %v2610_v14 = vpop.f32.mrf.mxu2 }
 0x43e   : > { %v4103_v17 = vmul.f32 1.442695, %v4065_v35 }
 0x440   : > { %6789 = vpow2.f32 %v4103_v17  ;;  %v9011_v17 = vpop.f32.mrf.mxu1 }
 0x443   : > { %v3986_v21 = vpop.xlane.xlu0 %3985 }
 0x444   : > { %v4066_v18 = vsub.f32 %v8866_v9, %v3986_v21  ;;  %v9013_v21 = vpop.f32.mrf.mxu3 }
 0x446   : > { %v4105_v15 = vmul.f32 1.442695, %v4066_v18  ;;  %v8969_v54 = vpop.eup %6789 }
 0x448   : > { %6791 = vpow2.f32 %v4105_v15  ;;  %v3990_v15 = vsel %vm1381_vm3, %v9011_v17, -inf }
 0x449   : > { %6793 = vrcp.f32 %v8839_v10 }
 0x44a   : > { %6795 = vrcp.f32 %v8831_v3  ;;  %v2612_v3 = vpop.f32.mrf.mxu2 }
 0x44b   : > { %6797 = vrcp.f32 %v8804_v58 }
 0x44c   : > { %v8967_v1 = vpop.xlane.xlu2 %2427  ;;  %6799 = vrcp.f32 %v8854_v0 }
 0x44d   : > { %6801 = vrcp.f32 %v8915_v27 }
 0x44e   : > { %v8971_v45 = vpop.eup %6791  ;;  %6803 = vrcp.f32 %v8860_v6 }
 0x44f   : > { %v4286_v31 = vpack.c.bf16 %v8971_v45, %v8969_v54  ;;  %v6794_v40 = vpop.eup %6793  ;;  %6805 = vrcp.f32 %v8877_v23 }
 0x450   : > { %v2662_v63 = vmul.f32 %v6794_v40, %v2600_v36  ;;  %v6796_v10 = vpop.eup %6795  ;;  %6807 = vrcp.f32 %v8823_v32 }
 0x451   : > { %6170 = vmatmul.msk.bf16.gmra.mxu2 %vm1381_vm3, %v4286_v31  ;;  %v8981_v24 = vpop.xlane.xlu1 %2430  ;;  %v2661_v28 = vmul.f32 %v6796_v10, %v8923_v29  ;;  %v6798_v25 = vpop.eup %6797  ;;  %6809 = vrcp.f32 %v8926_v42 }
 0x452   : > { %v2694_v19 = vpack.c.bf16 %v2662_v63, %v2662_v63  ;;  %v2663_v36 = vmul.f32 %v6798_v25, %v8944_v30  ;;  %v6800_v38 = vpop.eup %6799  ;;  %v2615_v6 = vpop.f32.mrf.mxu2  ;;  %v3088_v63 = vsel %vm1381_vm3, %v9013_v21, -inf  ;;  %6811 = vrcp.f32 %v8950_v61 }
 0x453   : > { %v2693_v33 = vpack.c.bf16 %v2661_v28, %v2661_v28  ;;  %v2664_v50 = vmul.f32 %v6800_v38, %v2605_v39  ;;  %v6802_v29 = vpop.eup %6801  ;;  %v11410_v39 = vld [vmem:[#allocation25_spill] sm:$0xff]  ;;  %6813 = vrcp.f32 %v8912_v44 }
 0x454   : > { %v2757_v9 = vpop.permute.xlu2 %2756  ;;  %2442 = vadd.xlane.f32.xlu0 %v2441_v56  ;;  %v2695_v5 = vpack.c.bf16 %v2663_v36, %v2663_v36  ;;  %v2667_v20 = vmul.f32 %v6802_v29, %v2612_v3  ;;  %v6804_v62 = vpop.eup %6803  ;;  %6815 = vrcp.f32 %v8967_v1 }
 0x455   : > { %2848 = vst.msk [vmem:[#allocation4 + $0x14] sm:$0xf] %vm2842_vm5, %v2757_v9  ;;  %v2696_v58 = vpack.c.bf16 %v2664_v50, %v2664_v50  ;;  %v2665_v31 = vmul.f32 %v6804_v62, %v2607_v52  ;;  %v6806_v40 = vpop.eup %6805 }
 0x456   : > { %v2759_v22 = vpop.permute.xlu0 %2758  ;;  %v2699_v0 = vpack.c.bf16 %v2667_v20, %v2667_v20  ;;  %v6808_v52 = vpop.eup %6807 }
 0x457   : > { %2849 = vst.msk [vmem:[#allocation4 + $0x18] sm:$0xf] %vm2842_vm5, %v2759_v22  ;;  %v2697_v9 = vpack.c.bf16 %v2665_v31, %v2665_v31  ;;  %v9023_v22 = vpop.f32.mrf.mxu3  ;;  %v6810_v25 = vpop.eup %6809 }
 0x458   : > { %v3091_v42 = vsel %vm1381_vm3, %v9023_v22, -inf }
 0x45a   : > { %v2617_v28 = vpop.f32.mrf.mxu2 }
 0x45f   : > { %v9030_v23 = vpop.f32.mrf.mxu3 }
 0x462   : > { %v2620_v32 = vpop.f32.mrf.mxu2 }
 0x463   : > { %2445 = vadd.xlane.f32.xlu2 %v2444_v60  ;;  %v2668_v60 = vmul.f32 %v6806_v40, %v2615_v6  ;;  %v2670_v36 = vmul.f32 %v6810_v25, %v2620_v32 }
 0x464   : > { %2448 = vadd.xlane.f32.xlu1 %v2447_v34 }
 0x465   : > { %v2700_v34 = vpack.c.bf16 %v2668_v60, %v2668_v60 }
 0x467   : > { %v9063_v31 = vpop.f32.mrf.mxu3 }
 0x468   : > { %2770 = vrot.lane.b32.xlu0 %v2694_v19, %s7154_s18  ;;  %v2666_v19 = vmul.f32 %v6808_v52, %v2610_v14  ;;  %v3097_v6 = vsel %vm1381_vm3, %v9063_v31, -inf }
 0x469   : > { %v2761_v37 = vpop.permute.xlu1 %2760 }
 0x46a   : > { %2850 = vst.msk [vmem:[#allocation4 + $0x1c] sm:$0xf] %vm2842_vm5, %v2761_v37  ;;  %v3094_v37 = vsel %vm1381_vm3, %v9030_v23, -inf  ;;  %v2698_v10 = vpack.c.bf16 %v2666_v19, %v2666_v19 }
 0x46f   : > { %v9083_v25 = vpop.f32.mrf.mxu3 }
 0x47b   : > { %2768 = vrot.lane.b32.xlu2 %v2693_v33, %s7154_s18  ;;  %v9036_v33 = vpop.f32.mrf.mxu1 }
 0x47d   : > { %2772 = vrot.lane.b32.xlu1 %v2695_v5, %s7154_s18  ;;  %v2702_v5 = vpack.c.bf16 %v2670_v36, %v2670_v36 }
 0x481   : > { %v8998_v12 = vpop.xlane.xlu0 %2433 }
 0x483   : > { %2774 = vrot.lane.b32.xlu2 %v2696_v58, %s7154_s18  ;;  %v9043_v50 = vpop.f32.mrf.mxu1 }
 0x484   : > { %v3996_v62 = vsel %vm1381_vm3, %v9043_v50, -inf }
 0x489   : > { %v9005_v51 = vpop.xlane.xlu0 %3988 }
 0x48a   : > { %v4067_v44 = vsub.f32 %v8933_v59, %v9005_v51 }
 0x48b   : > { %2780 = vrot.lane.b32.xlu2 %v2699_v0, %s7154_s18  ;;  %v9049_v29 = vpop.f32.mrf.mxu1 }
 0x48d   : > { %v9001_v30 = vpop.xlane.xlu2 %2436 }
 0x492   : > { %2451 = vadd.xlane.f32.xlu0 %v2450_v2  ;;  %v3999_v2 = vsel %vm1381_vm3, %v9049_v29, -inf }
 0x494   : > { %v9015_v18 = vpop.xlane.xlu1 %2439 }
 0x495   : > { %v2763_v27 = vpop.permute.xlu2 %2762 }
 0x496   : > { %2851 = vst.msk [vmem:[#allocation4 + $0x20] sm:$0xf] %vm2842_vm5, %v2763_v27  ;;  %v3993_v27 = vsel %vm1381_vm3, %v9036_v33, -inf }
 0x49c   : > { %v2765_v48 = vpop.permute.xlu0 %2764 }
 0x49d   : > { %2852 = vst.msk [vmem:[#allocation4 + $0x24] sm:$0xf] %vm2842_vm5, %v2765_v48  ;;  %v3803_v35 = vpop.permute.xlu2 %3802 }
 0x49e   : > { %6165 = vmatmul.msk.bf16.gmra.mxu1 %vm1231_vm2, %v3803_v35 }
 0x4a6   : > { %3804 = vrot.lane.b32.xlu0 %v11410_v39, %s7153_s17  ;;  %v6812_v39 = vpop.eup %6811  ;;  %s6275_s17 = sshll.u32 %s11566_s29, 8 }
 0x4a7   : > { %3991 = vmax.xlane.f32.xlu1 %v3990_v15  ;;  %v2622_v15 = vpop.f32.mrf.mxu2  ;;  %s10368_s21 = scalar_lea.vmem %s11260_s14, %s6275_s17 }
 0x4ac   : > { %v2767_v56 = vpop.permute.xlu1 %2766 }
 0x4ad   : > { %2853 = vst.msk [vmem:[#allocation4 + $0x28] sm:$0xf] %vm2842_vm5, %v2767_v56  ;;  %v2671_v56 = vmul.f32 %v6812_v39, %v2622_v15 }
 0x4ae   : > { %2776 = vrot.lane.b32.xlu0 %v2697_v9, %s7154_s18  ;;  %v9065_v9 = vpop.f32.mrf.mxu1 }
 0x4af   : > { %v2703_v61 = vpack.c.bf16 %v2671_v56, %v2671_v56  ;;  %v4002_v40 = vsel %vm1381_vm3, %v9065_v9, -inf  ;;  %v9077_v52 = vpop.f32.mrf.mxu2 }
 0x4b4   : > { %3089 = vmax.xlane.f32.xlu2 %v3088_v63 }
 0x4b6   : > { %2782 = vrot.lane.b32.xlu0 %v2700_v34, %s7154_s18  ;;  %v9072_v60 = vpop.f32.mrf.mxu1  ;;  %v6814_v34 = vpop.eup %6813 }
 0x4b7   : > { %v4005_v63 = vsel %vm1381_vm3, %v9072_v60, -inf  ;;  %v2669_v19 = vmul.f32 %v6814_v34, %v2617_v28  ;;  %v6816_v32 = vpop.eup %6815  ;;  %v2627_v36 = vpop.f32.mrf.mxu2  ;;  %v3100_v34 = vsel %vm1381_vm3, %v9083_v25, -inf }
 0x4bc   : > { %3095 = vmax.xlane.f32.xlu2 %v3094_v37 }
 0x4c0   : > { %2778 = vrot.lane.b32.xlu1 %v2698_v10, %s7154_s18  ;;  %v2701_v10 = vpack.c.bf16 %v2669_v19, %v2669_v19 }
 0x4c7   : > { %v9038_v38 = vpop.xlane.xlu0 %2442 }
 0x4d4   : > { %2786 = vrot.lane.b32.xlu2 %v2702_v5, %s7154_s18  ;;  %v2673_v5 = vmul.f32 %v6816_v32, %v2627_v36  ;;  %v9114_v36 = vpop.f32.mrf.mxu1 }
 0x4d6   : > { %v9041_v14 = vpop.xlane.xlu2 %2445 }
 0x4d7   : > { %v9051_v0 = vpop.xlane.xlu1 %2448 }
 0x4da   : > { %v2771_v58 = vpop.permute.xlu0 %2770 }
 0x4db   : > { %2855 = vst.msk [vmem:[#allocation4 + $0x30] sm:$0xf] %vm2842_vm5, %v2771_v58 }
 0x4de   : > { %v2769_v3 = vpop.permute.xlu2 %2768 }
 0x4df   : > { %2854 = vst.msk [vmem:[#allocation4 + $0x2c] sm:$0xf] %vm2842_vm5, %v2769_v3  ;;  %v4107_v3 = vmul.f32 1.442695, %v4067_v44 }
 0x4e0   : > { %3092 = vmax.xlane.f32.xlu0 %v3091_v42  ;;  %v2705_v42 = vpack.c.bf16 %v2673_v5, %v2673_v5 }
 0x4e1   : > { %6817 = vpow2.f32 %v4107_v3 }
 0x4e6   : > { %v2775_v20 = vpop.permute.xlu2 %2774 }
 0x4e7   : > { %2857 = vst.msk [vmem:[#allocation4 + $0x38] sm:$0xf] %vm2842_vm5, %v2775_v20  ;;  %v9093_v59 = vpop.eup %6817 }
 0x4e8   : > { %4000 = vmax.xlane.f32.xlu0 %v3999_v2  ;;  %v9090_v2 = vpop.f32.mrf.mxu3 }
 0x4ea   : > { %3994 = vmax.xlane.f32.xlu1 %v3993_v27 }
 0x4ee   : > { %v2781_v48 = vpop.permute.xlu2 %2780 }
 0x4ef   : > { %2860 = vst.msk [vmem:[#allocation4 + $0x44] sm:$0xf] %vm2842_vm5, %v2781_v48  ;;  %v2773_v35 = vpop.permute.xlu1 %2772  ;;  %v3103_v48 = vsel %vm1381_vm3, %v9090_v2, -inf }
 0x4f0   : > { %2856 = vst.msk [vmem:[#allocation4 + $0x34] sm:$0xf] %vm2842_vm5, %v2773_v35  ;;  %v9103_v15 = vpop.f32.mrf.mxu3 }
 0x4f1   : > { %v3106_v39 = vsel %vm1381_vm3, %v9103_v15, -inf }
 0x4f2   : > { %3997 = vmax.xlane.f32.xlu1 %v3996_v62 }
 0x4fa   : > { %3098 = vmax.xlane.f32.xlu1 %v3097_v6 }
 0x4fc   : > { %2788 = vrot.lane.b32.xlu0 %v2703_v61, %s7154_s18 }
 0x4fd   : > { %4003 = vmax.xlane.f32.xlu2 %v4002_v40 }
 0x505   : > { %4006 = vmax.xlane.f32.xlu2 %v4005_v63  ;;  %v9080_v37 = vpop.xlane.xlu0 %2451  ;;  %v2630_v63 = vpop.f32.mrf.mxu2 }
 0x513   : > { %2784 = vrot.lane.b32.xlu1 %v2701_v10, %s7154_s18  ;;  %v9112_v10 = vpop.f32.mrf.mxu3 }
 0x514   : > { %v3109_v44 = vsel %vm1381_vm3, %v9112_v10, -inf }
 0x518   : > { %v3805_v58 = vpop.permute.xlu0 %3804 }
 0x519   : > { %6166 = vmatmul.msk.bf16.gmra.mxu1 %vm1231_vm2, %v3805_v58 }
 0x51a   : > { %v3992_v28 = vpop.xlane.xlu1 %3991 }
 0x51b   : > { %v4068_v1 = vsub.f32 %v9011_v17, %v3992_v28  ;;  %v9121_v5 = vpop.f32.mrf.mxu3 }
 0x51c   : > { %v3112_v58 = vsel %vm1381_vm3, %v9121_v5, -inf }
 0x51d   : > { %v4109_v20 = vmul.f32 1.442695, %v4068_v1  ;;  %2792 = vrot.lane.b32.xlu2 %v2705_v42, %s7154_s18 }
 0x51f   : > { %6819 = vpow2.f32 %v4109_v20 }
 0x520   : > { %v2777_v27 = vpop.permute.xlu0 %2776  ;;  %6821 = vrcp.f32 %v8981_v24  ;;  %v4008_v24 = vsel %vm1381_vm3, %v9114_v36, -inf }
 0x521   : > { %2858 = vst.msk [vmem:[#allocation4 + $0x3c] sm:$0xf] %vm2842_vm5, %v2777_v27  ;;  %6823 = vrcp.f32 %v8960_v43  ;;  %v9128_v27 = vpop.f32.mrf.mxu2 }
 0x522   : > { %6825 = vrcp.f32 %v9001_v30 }
 0x525   : > { %v9095_v51 = vpop.eup %6819 }
 0x526   : > { %3104 = vmax.xlane.f32.xlu0 %v3103_v48  ;;  %v4287_v17 = vpack.c.bf16 %v9095_v51, %v9093_v59  ;;  %v6822_v40 = vpop.eup %6821 }
 0x527   : > { %v3090_v35 = vpop.xlane.xlu2 %3089  ;;  %v2674_v19 = vmul.f32 %v6822_v40, %v2630_v63  ;;  %v6824_v20 = vpop.eup %6823 }
 0x528   : > { %6171 = vmatmul.msk.bf16.gmra.mxu2 %vm1381_vm3, %v4287_v17  ;;  %v2783_v62 = vpop.permute.xlu0 %2782  ;;  %v3168_v3 = vsub.f32 %v9013_v21, %v3090_v35  ;;  %v2672_v17 = vmul.f32 %v6824_v20, %v9077_v52 }
 0x529   : > { %2861 = vst.msk [vmem:[#allocation4 + $0x48] sm:$0xf] %vm2842_vm5, %v2783_v62  ;;  %v2706_v32 = vpack.c.bf16 %v2674_v19, %v2674_v19  ;;  %v6826_v62 = vpop.eup %6825 }
 0x52a   : > { %v3208_v28 = vmul.f32 1.442695, %v3168_v3  ;;  %v2704_v43 = vpack.c.bf16 %v2672_v17, %v2672_v17 }
 0x52c   : > { %6827 = vpow2.f32 %v3208_v28 }
 0x52e   : > { %3107 = vmax.xlane.f32.xlu0 %v3106_v39  ;;  %v9132_v39 = vpop.f32.mrf.mxu1 }
 0x52f   : > { %v3096_v56 = vpop.xlane.xlu2 %3095 }
 0x532   : > { %v2779_v6 = vpop.permute.xlu1 %2778 }
 0x533   : > { %2859 = vst.msk [vmem:[#allocation4 + $0x40] sm:$0xf] %vm2842_vm5, %v2779_v6  ;;  %v9134_v6 = vpop.eup %6827 }
 0x536   : > { %v9143_v19 = vpop.f32.mrf.mxu1 }
 0x537   : > { %v2787_v61 = vpop.permute.xlu2 %2786 }
 0x538   : > { %2863 = vst.msk [vmem:[#allocation4 + $0x50] sm:$0xf] %vm2842_vm5, %v2787_v61 }
 0x53d   : > { %3101 = vmax.xlane.f32.xlu1 %v3100_v34 }
 0x542   : > { %2794 = vrot.lane.b32.xlu0 %v2706_v32, %s7154_s18 }
 0x545   : > { %4009 = vmax.xlane.f32.xlu1 %v4008_v24 }
 0x546   : > { %3110 = vmax.xlane.f32.xlu2 %v3109_v44 }
 0x54e   : > { %3113 = vmax.xlane.f32.xlu2 %v3112_v58  ;;  %v3170_v58 = vsub.f32 %v9030_v23, %v3096_v56 }
 0x550   : > { %v3212_v3 = vmul.f32 1.442695, %v3170_v58 }
 0x553   : > { %v3093_v1 = vpop.xlane.xlu0 %3092 }
 0x554   : > { %v3169_v42 = vsub.f32 %v9023_v22, %v3093_v1  ;;  %v2635_v22 = vpop.f32.mrf.mxu2 }
 0x555   : > { %v2676_v61 = vmul.f32 %v6826_v62, %v2635_v22 }
 0x556   : > { %v3210_v48 = vmul.f32 1.442695, %v3169_v42 }
 0x557   : > { %v2708_v52 = vpack.c.bf16 %v2676_v61, %v2676_v61 }
 0x558   : > { %6829 = vpow2.f32 %v3210_v48  ;;  %v9156_v48 = vpop.f32.mrf.mxu1 }
 0x55b   : > { %v4001_v32 = vpop.xlane.xlu0 %4000 }
 0x55d   : > { %v3995_v21 = vpop.xlane.xlu1 %3994 }
 0x55e   : > { %v9136_v35 = vpop.eup %6829  ;;  %2790 = vrot.lane.b32.xlu1 %v2704_v43, %s7154_s18  ;;  %v4069_v40 = vsub.f32 %v9036_v33, %v3995_v21  ;;  %v4014_v33 = vsel %vm1381_vm3, %v9143_v19, -inf  ;;  %v4071_v43 = vsub.f32 %v9049_v29, %v4001_v32  ;;  %v2637_v32 = vpop.f32.mrf.mxu2 }
 0x55f   : > { %v3388_v30 = vpack.c.bf16 %v9136_v35, %v9134_v6 }
 0x560   : > { %v4111_v63 = vmul.f32 1.442695, %v4069_v40  ;;  %v4115_v22 = vmul.f32 1.442695, %v4071_v43 }
 0x561   : > { %6139 = vmatmul.msk.bf16.gmra.mxu0 %vm1381_vm3, %v3388_v30 }
 0x562   : > { %6831 = vpow2.f32 %v4111_v63 }
 0x565   : > { %v3998_v34 = vpop.xlane.xlu1 %3997 }
 0x566   : > { %v4070_v24 = vsub.f32 %v9043_v50, %v3998_v34  ;;  %2798 = vrot.lane.b32.xlu2 %v2708_v52, %s7154_s18 }
 0x568   : > { %v4113_v44 = vmul.f32 1.442695, %v4070_v24  ;;  %v9151_v20 = vpop.eup %6831 }
 0x56a   : > { %6833 = vpow2.f32 %v4113_v44 }
 0x56b   : > { %6835 = vpow2.f32 %v3212_v3  ;;  %v9185_v3 = vpop.f32.mrf.mxu1 }
 0x56c   : > { %4015 = vmax.xlane.f32.xlu0 %v4014_v33  ;;  %v4011_v33 = vsel %vm1381_vm3, %v9132_v39, -inf }
 0x56d   : > { %v3099_v28 = vpop.xlane.xlu1 %3098 }
 0x56e   : > { %v3171_v1 = vsub.f32 %v9063_v31, %v3099_v28  ;;  %v2789_v42 = vpop.permute.xlu0 %2788  ;;  %v4017_v31 = vsel %vm1381_vm3, %v9156_v48, -inf  ;;  %v9187_v28 = vpop.f32.mrf.mxu3 }
 0x56f   : > { %2864 = vst.msk [vmem:[#allocation4 + $0x54] sm:$0xf] %vm2842_vm5, %v2789_v42  ;;  %v3115_v42 = vsel %vm1381_vm3, %v9187_v28, -inf }
 0x570   : > { %v9154_v50 = vpop.eup %6833  ;;  %v3214_v23 = vmul.f32 1.442695, %v3171_v1  ;;  %v4004_v56 = vpop.xlane.xlu2 %4003  ;;  %v4020_v1 = vsel %vm1381_vm3, %v9185_v3, -inf }
 0x571   : > { %v4072_v17 = vsub.f32 %v9065_v9, %v4004_v56  ;;  %v4288_v62 = vpack.c.bf16 %v9154_v50, %v9151_v20  ;;  %v9165_v30 = vpop.eup %6835  ;;  %v9196_v56 = vpop.f32.mrf.mxu2 }
 0x572   : > { %6837 = vpow2.f32 %v3214_v23  ;;  %v4155_v23 = vsel %vm1381_vm3, %v8903_v16, 0.0 }
 0x573   : > { %6172 = vmatmul.msk.bf16.gmra.mxu2 %vm1381_vm3, %v4288_v62  ;;  %v4117_v21 = vmul.f32 1.442695, %v4072_v17 }
 0x574   : > { %4018 = vmax.xlane.f32.xlu0 %v4017_v31 }
 0x575   : > { %6839 = vpow2.f32 %v4117_v21 }
 0x576   : > { %6841 = vrcp.f32 %v9015_v18 }
 0x577   : > { %6843 = vpow2.f32 %v4115_v22 }
 0x578   : > { %v9167_v61 = vpop.eup %6837  ;;  %v4007_v9 = vpop.xlane.xlu2 %4006  ;;  %6845 = vrcp.f32 %v8998_v12 }
 0x579   : > { %v3389_v29 = vpack.c.bf16 %v9167_v61, %v9165_v30  ;;  %6847 = vrcp.f32 %v9041_v14  ;;  %v2642_v22 = vpop.f32.mrf.mxu2  ;;  %v3259_v14 = vsel %vm1381_vm3, %v8609_v13, 0.0 }
 0x57b   : > { %6140 = vmatmul.msk.bf16.gmra.mxu0 %vm1381_vm3, %v3389_v29  ;;  %v9173_v40 = vpop.eup %6839 }
 0x57c   : > { %v6842_v52 = vpop.eup %6841 }
 0x57d   : > { %v9175_v63 = vpop.eup %6843  ;;  %v2677_v44 = vmul.f32 %v6842_v52, %v2637_v32 }
 0x57e   : > { %v4289_v24 = vpack.c.bf16 %v9173_v40, %v9175_v63  ;;  %v6846_v17 = vpop.eup %6845 }
 0x57f   : > { %v2709_v58 = vpack.c.bf16 %v2677_v44, %v2677_v44  ;;  %v2675_v43 = vmul.f32 %v6846_v17, %v9128_v27  ;;  %v6848_v31 = vpop.eup %6847  ;;  %v4073_v44 = vsub.f32 %v9072_v60, %v4007_v9 }
 0x580   : > { %v2793_v34 = vpop.permute.xlu2 %2792  ;;  %v2679_v29 = vmul.f32 %v6848_v31, %v2642_v22 }
 0x581   : > { %2866 = vst.msk [vmem:[#allocation4 + $0x5c] sm:$0xf] %vm2842_vm5, %v2793_v34  ;;  %v2707_v21 = vpack.c.bf16 %v2675_v43, %v2675_v43 }
 0x582   : > { %v2711_v34 = vpack.c.bf16 %v2679_v29, %v2679_v29 }
 0x583   : > { %6173 = vmatmul.msk.bf16.gmra.mxu2 %vm1381_vm3, %v4289_v24 }
 0x585   : > { %v2785_v18 = vpop.permute.xlu1 %2784 }
 0x586   : > { %2862 = vst.msk [vmem:[#allocation4 + $0x4c] sm:$0xf] %vm2842_vm5, %v2785_v18 }
 0x588   : > { %4012 = vmax.xlane.f32.xlu1 %v4011_v33  ;;  %2800 = vrot.lane.b32.xlu0 %v2709_v58, %s7154_s18  ;;  %v4119_v58 = vmul.f32 1.442695, %v4073_v44 }
 0x58f   : > { %4021 = vmax.xlane.f32.xlu2 %v4020_v1 }
 0x590   : > { %3116 = vmax.xlane.f32.xlu1 %v3115_v42 }
 0x597   : > { %4156 = vadd.xlane.f32.xlu2 %v4155_v23 }
 0x599   : > { %v3105_v62 = vpop.xlane.xlu0 %3104 }
 0x59a   : > { %v3173_v52 = vsub.f32 %v9090_v2, %v3105_v62  ;;  %v9208_v2 = vpop.f32.mrf.mxu3 }
 0x59c   : > { %v3218_v12 = vmul.f32 1.442695, %v3173_v52 }
 0x59e   : > { %6849 = vpow2.f32 %v3218_v12 }
 0x5a1   : > { %v3108_v16 = vpop.xlane.xlu0 %3107 }
 0x5a2   : > { %v3174_v62 = vsub.f32 %v9103_v15, %v3108_v16  ;;  %v2645_v15 = vpop.f32.mrf.mxu2  ;;  %v9246_v44 = vpop.f32.mrf.mxu3 }
 0x5a4   : > { %v9213_v13 = vpop.eup %6849  ;;  %v3220_v43 = vmul.f32 1.442695, %v3174_v62 }
 0x5a9   : > { %2796 = vrot.lane.b32.xlu1 %v2707_v21, %s7154_s18 }
 0x5af   : > { %2804 = vrot.lane.b32.xlu2 %v2711_v34, %s7154_s18 }
 0x5b0   : > { %v3102_v32 = vpop.xlane.xlu1 %3101 }
 0x5b1   : > { %v3172_v24 = vsub.f32 %v9083_v25, %v3102_v32  ;;  %v3118_v25 = vsel %vm1381_vm3, %v9208_v2, -inf }
 0x5b2   : > { %3260 = vadd.xlane.f32.xlu0 %v3259_v14  ;;  %v9242_v14 = vpop.f32.mrf.mxu1 }
 0x5b3   : > { %v3216_v27 = vmul.f32 1.442695, %v3172_v24 }
 0x5b4   : > { %v2795_v18 = vpop.permute.xlu0 %2794 }
 0x5b5   : > { %6851 = vpow2.f32 %v3216_v27  ;;  %2867 = vst.msk [vmem:[#allocation4 + $0x60] sm:$0xf] %vm2842_vm5, %v2795_v18  ;;  %v3256_v27 = vsel %vm1381_vm3, %v8607_v46, 0.0  ;;  %v3121_v18 = vsel %vm1381_vm3, %v9246_v44, -inf }
 0x5b6   : > { %6853 = vpow2.f32 %v4119_v58  ;;  %v4158_v58 = vsel %vm1381_vm3, %v8901_v47, 0.0 }
 0x5b8   : > { %v4010_v33 = vpop.xlane.xlu1 %4009 }
 0x5b9   : > { %v4074_v1 = vsub.f32 %v9114_v36, %v4010_v33  ;;  %v3111_v42 = vpop.xlane.xlu2 %3110 }
 0x5ba   : > { %3119 = vmax.xlane.f32.xlu0 %v3118_v25  ;;  %v3175_v9 = vsub.f32 %v9112_v10, %v3111_v42  ;;  %v9252_v33 = vpop.f32.mrf.mxu1  ;;  %v4164_v42 = vsel %vm1381_vm3, %v8917_v8, 0.0  ;;  %v9261_v25 = vpop.f32.mrf.mxu3 }
 0x5bb   : > { %v9215_v23 = vpop.eup %6851  ;;  %v4121_v60 = vmul.f32 1.442695, %v4074_v1  ;;  %v3262_v1 = vsel %vm1381_vm3, %v8649_v53, 0.0 }
 0x5bc   : > { %v3390_v17 = vpack.c.bf16 %v9213_v13, %v9215_v23  ;;  %v3222_v36 = vmul.f32 1.442695, %v3175_v9  ;;  %v9225_v21 = vpop.eup %6853 }
 0x5bd   : > { %6855 = vpow2.f32 %v4121_v60 }
 0x5be   : > { %6141 = vmatmul.msk.bf16.gmra.mxu0 %vm1381_vm3, %v3390_v17  ;;  %6857 = vrcp.f32 %v9051_v0 }
 0x5bf   : > { %6859 = vpow2.f32 %v3222_v36 }
 0x5c0   : > { %6861 = vpow2.f32 %v3220_v43  ;;  %v3271_v43 = vsel %vm1381_vm3, %v8688_v49, 0.0 }
 0x5c1   : > { %v9223_v31 = vpop.xlane.xlu2 %3113  ;;  %6863 = vrcp.f32 %v9038_v38 }
 0x5c2   : > { %v9257_v46 = vpop.f32.mrf.mxu1  ;;  %v9268_v53 = vpop.f32.mrf.mxu3  ;;  %v3176_v49 = vsub.f32 %v9121_v5, %v9223_v31 }
 0x5c3   : > { %v9227_v22 = vpop.eup %6855  ;;  %v4029_v17 = vsel %vm1381_vm3, %v9257_v46, -inf }
 0x5c4   : > { %v4290_v10 = vpack.c.bf16 %v9227_v22, %v9225_v21  ;;  %v6858_v29 = vpop.eup %6857 }
 0x5c5   : > { %v2680_v52 = vmul.f32 %v6858_v29, %v2645_v15  ;;  %v9232_v16 = vpop.eup %6859 }
 0x5c6   : > { %6174 = vmatmul.msk.bf16.gmra.mxu2 %vm1381_vm3, %v4290_v10  ;;  %v9235_v34 = vpop.eup %6861 }
 0x5c7   : > { %v3391_v12 = vpack.c.bf16 %v9232_v16, %v9235_v34  ;;  %v2712_v32 = vpack.c.bf16 %v2680_v52, %v2680_v52  ;;  %v6864_v9 = vpop.eup %6863 }
 0x5c8   : > { %v2678_v47 = vmul.f32 %v6864_v9, %v9196_v56  ;;  %v4026_v56 = vsel %vm1381_vm3, %v9252_v33, -inf  ;;  %v3127_v9 = vsel %vm1381_vm3, %v9268_v53, -inf }
 0x5c9   : > { %v2799_v0 = vpop.permute.xlu2 %2798 }
 0x5ca   : > { %2869 = vst.msk [vmem:[#allocation4 + $0x68] sm:$0xf] %vm2842_vm5, %v2799_v0  ;;  %v9266_v62 = vpop.f32.mrf.mxu1  ;;  %v2710_v36 = vpack.c.bf16 %v2678_v47, %v2678_v47  ;;  %v9279_v0 = vpop.f32.mrf.mxu3 }
 0x5ce   : > { %6142 = vmatmul.msk.bf16.gmra.mxu0 %vm1381_vm3, %v3391_v12  ;;  %2806 = vrot.lane.b32.xlu0 %v2712_v32, %s7154_s18  ;;  %v3130_v32 = vsel %vm1381_vm3, %v9279_v0, -inf }
 0x5d0   : > { %v2791_v24 = vpop.permute.xlu1 %2790 }
 0x5d1   : > { %2865 = vst.msk [vmem:[#allocation4 + $0x58] sm:$0xf] %vm2842_vm5, %v2791_v24  ;;  %v4161_v24 = vsel %vm1381_vm3, %v8919_v41, 0.0 }
 0x5d2   : > { %v9276_v10 = vpop.f32.mrf.mxu1 }
 0x5d3   : > { %3257 = vadd.xlane.f32.xlu1 %v3256_v27 }
 0x5d8   : > { %3122 = vmax.xlane.f32.xlu2 %v3121_v18  ;;  %v3224_v18 = vmul.f32 1.442695, %v3176_v49  ;;  %v4035_v49 = vsel %vm1381_vm3, %v9276_v10, -inf }
 0x5db   : > { %4159 = vadd.xlane.f32.xlu1 %v4158_v58 }
 0x5df   : > { %v4016_v60 = vpop.xlane.xlu0 %4015 }
 0x5e0   : > { %3263 = vadd.xlane.f32.xlu2 %v3262_v1  ;;  %v4076_v8 = vsub.f32 %v9143_v19, %v4016_v60  ;;  %v9288_v1 = vpop.f32.mrf.mxu1 }
 0x5e1   : > { %v4038_v41 = vsel %vm1381_vm3, %v9288_v1, -inf }
 0x5e2   : > { %v4125_v15 = vmul.f32 1.442695, %v4076_v8 }
 0x5e4   : > { %6865 = vpow2.f32 %v4125_v15 }
 0x5e7   : > { %v4019_v38 = vpop.xlane.xlu0 %4018 }
 0x5e8   : > { %4165 = vadd.xlane.f32.xlu2 %v4164_v42 }
 0x5ea   : > { %v9291_v42 = vpop.eup %6865 }
 0x5f0   : > { %4030 = vmax.xlane.f32.xlu2 %v4029_v17  ;;  %v4077_v17 = vsub.f32 %v9156_v48, %v4019_v38  ;;  %v3268_v48 = vsel %vm1381_vm3, %v8690_v7, 0.0 }
 0x5f4   : > { %2802 = vrot.lane.b32.xlu1 %v2710_v36, %s7154_s18  ;;  %v4127_v36 = vmul.f32 1.442695, %v4077_v17 }
 0x5f8   : > { %3272 = vadd.xlane.f32.xlu2 %v3271_v43  ;;  %4027 = vmax.xlane.f32.xlu0 %v4026_v56  ;;  %v4173_v56 = vsel %vm1381_vm3, %v8969_v54, 0.0  ;;  %v4170_v54 = vsel %vm1381_vm3, %v8936_v55, 0.0  ;;  %v3265_v55 = vsel %vm1381_vm3, %v8642_v11, 0.0 }
 0x5fa   : > { %v2801_v29 = vpop.permute.xlu0 %2800 }
 0x5fb   : > { %2870 = vst.msk [vmem:[#allocation4 + $0x6c] sm:$0xf] %vm2842_vm5, %v2801_v29  ;;  %v4013_v52 = vpop.xlane.xlu1 %4012 }
 0x5fc   : > { %v4075_v12 = vsub.f32 %v9132_v39, %v4013_v52 }
 0x5fe   : > { %v4123_v19 = vmul.f32 1.442695, %v4075_v12 }
 0x600   : > { %6867 = vpow2.f32 %v4123_v19  ;;  %3131 = vmax.xlane.f32.xlu2 %v3130_v32  ;;  %4162 = vadd.xlane.f32.xlu0 %v4161_v24  ;;  %v4023_v19 = vsel %vm1381_vm3, %v9242_v14, -inf  ;;  %v3469_v32 = vpop.f32.mrf.mxu0 }
 0x601   : > { %6869 = vpow2.f32 %v3224_v18 }
 0x602   : > { %v4022_v27 = vpop.xlane.xlu2 %4021 }
 0x603   : > { %v3117_v58 = vpop.xlane.xlu1 %3116  ;;  %v4078_v31 = vsub.f32 %v9185_v3, %v4022_v27  ;;  %v3277_v27 = vsel %vm1381_vm3, %v8725_v4, 0.0 }
 0x604   : > { %v3177_v39 = vsub.f32 %v9187_v28, %v3117_v58 }
 0x605   : > { %v4129_v28 = vmul.f32 1.442695, %v4078_v31 }
 0x606   : > { %v9293_v5 = vpop.eup %6867  ;;  %v3226_v60 = vmul.f32 1.442695, %v3177_v39 }
 0x607   : > { %v4291_v47 = vpack.c.bf16 %v9291_v42, %v9293_v5  ;;  %v9306_v8 = vpop.eup %6869 }
 0x608   : > { %6871 = vpow2.f32 %v3226_v60  ;;  %4039 = vmax.xlane.f32.xlu2 %v4038_v41  ;;  %3128 = vmax.xlane.f32.xlu0 %v3127_v9  ;;  %v3471_v58 = vpop.f32.mrf.mxu0  ;;  %v2647_v41 = vpop.f32.mrf.mxu2 }
 0x609   : > { %6175 = vmatmul.msk.bf16.gmra.mxu2 %vm1381_vm3, %v4291_v47  ;;  %6873 = vpow2.f32 %v4129_v28 }
 0x60a   : > { %v9304_v3 = vpop.xlane.xlu2 %4156  ;;  %6875 = vpow2.f32 %v4127_v36 }
 0x60e   : > { %v9308_v43 = vpop.eup %6871 }
 0x60f   : > { %v3392_v38 = vpack.c.bf16 %v9308_v43, %v9306_v8  ;;  %v9318_v15 = vpop.eup %6873 }
 0x610   : > { %4174 = vadd.xlane.f32.xlu2 %v4173_v56  ;;  %3269 = vadd.xlane.f32.xlu0 %v3268_v48  ;;  %v9320_v52 = vpop.eup %6875  ;;  %v9341_v56 = vpop.f32.mrf.mxu2 }
 0x611   : > { %6143 = vmatmul.msk.bf16.gmra.mxu0 %vm1381_vm3, %v3392_v38  ;;  %v4292_v7 = vpack.c.bf16 %v9318_v15, %v9320_v52 }
 0x612   : > { %v2805_v29 = vpop.permute.xlu2 %2804 }
 0x613   : > { %2872 = vst.msk [vmem:[#allocation4 + $0x74] sm:$0xf] %vm2842_vm5, %v2805_v29 }
 0x618   : > { %4171 = vadd.xlane.f32.xlu0 %v4170_v54 }
 0x619   : > { %6176 = vmatmul.msk.bf16.gmra.mxu2 %vm1381_vm3, %v4292_v7 }
 0x61b   : > { %v2797_v12 = vpop.permute.xlu1 %2796 }
 0x61c   : > { %2868 = vst.msk [vmem:[#allocation4 + $0x64] sm:$0xf] %vm2842_vm5, %v2797_v12 }
 0x61e   : > { %4024 = vmax.xlane.f32.xlu1 %v4023_v19 }
 0x620   : > { %4036 = vmax.xlane.f32.xlu0 %v4035_v49 }
 0x625   : > { %v3261_v24 = vpop.xlane.xlu0 %3260 }
 0x626   : > { %3266 = vadd.xlane.f32.xlu1 %v3265_v55  ;;  %6877 = vrcp.f32 %v3261_v24  ;;  %v4370_v55 = vpop.f32.mrf.mxu2 }
 0x627   : > { %6879 = vrcp.f32 %v9080_v37 }
 0x628   : > { %3278 = vadd.xlane.f32.xlu0 %v3277_v27  ;;  %v9349_v27 = vpop.f32.mrf.mxu1 }
 0x62c   : > { %v6878_v18 = vpop.eup %6877 }
 0x62d   : > { %v3550_v39 = vmul.f32 %v6878_v18, %v3471_v58  ;;  %v6880_v60 = vpop.eup %6879  ;;  %v3120_v9 = vpop.xlane.xlu0 %3119 }
 0x62e   : > { %v2681_v11 = vmul.f32 %v6880_v60, %v2647_v41  ;;  %v3178_v4 = vsub.f32 %v9208_v2, %v3120_v9  ;;  %v3124_v9 = vsel %vm1381_vm3, %v9261_v25, -inf }
 0x62f   : > { %v3582_v31 = vpack.c.bf16 %v3550_v39, %v3550_v39 }
 0x630   : > { %v2713_v47 = vpack.c.bf16 %v2681_v11, %v2681_v11  ;;  %v3228_v36 = vmul.f32 1.442695, %v3178_v4  ;;  %v4182_v11 = vsel %vm1381_vm3, %v9095_v51, 0.0  ;;  %v4167_v4 = vsel %vm1381_vm3, %v8940_v57, 0.0 }
 0x631   : > { %3647 = vrot.lane.b32.xlu2 %v3582_v31, %s7155_s28  ;;  %v3283_v31 = vsel %vm1381_vm3, %v9136_v35, 0.0  ;;  %v3274_v57 = vsel %vm1381_vm3, %v8727_v26, 0.0 }
 0x63f   : > { %2808 = vrot.lane.b32.xlu1 %v2713_v47, %s7154_s18 }
 0x640   : > { %v2807_v17 = vpop.permute.xlu0 %2806 }
 0x641   : > { %2873 = vst.msk [vmem:[#allocation4 + $0x78] sm:$0xf] %vm2842_vm5, %v2807_v17  ;;  %v4032_v17 = vsel %vm1381_vm3, %v9266_v62, -inf }
 0x646   : > { %v3258_v28 = vpop.xlane.xlu1 %3257 }
 0x647   : > { %6881 = vrcp.f32 %v3258_v28 }
 0x648   : > { %6883 = vpow2.f32 %v3228_v36  ;;  %v9378_v36 = vpop.f32.mrf.mxu3 }
 0x64b   : > { %v3123_v37 = vpop.xlane.xlu2 %3122 }
 0x64c   : > { %v3179_v48 = vsub.f32 %v9246_v44, %v3123_v37  ;;  %v9380_v37 = vpop.f32.mrf.mxu1 }
 0x64d   : > { %v6882_v38 = vpop.eup %6881 }
 0x64e   : > { %v3230_v29 = vmul.f32 1.442695, %v3179_v48  ;;  %v4160_v54 = vpop.xlane.xlu1 %4159  ;;  %v3549_v7 = vmul.f32 %v6882_v38, %v3469_v32  ;;  %v9345_v2 = vpop.eup %6883  ;;  %v4041_v32 = vsel %vm1381_vm3, %v9349_v27, -inf  ;;  %v3133_v48 = vsel %vm1381_vm3, %v9378_v36, -inf }
 0x64f   : > { %6885 = vrcp.f32 %v4160_v54 }
 0x650   : > { %6887 = vpow2.f32 %v3230_v29  ;;  %v3581_v12 = vpack.c.bf16 %v3549_v7, %v3549_v7  ;;  %v4044_v29 = vsel %vm1381_vm3, %v9380_v37, -inf }
 0x652   : > { %3645 = vrot.lane.b32.xlu0 %v3581_v12, %s7155_s28  ;;  %v4179_v12 = vsel %vm1381_vm3, %v9093_v59, 0.0  ;;  %v3474_v59 = vpop.f32.mrf.mxu0 }
 0x653   : > { %v3264_v19 = vpop.xlane.xlu2 %3263 }
 0x654   : > { %6889 = vrcp.f32 %v3264_v19 }
 0x655   : > { %v6886_v49 = vpop.eup %6885 }
 0x656   : > { %v9347_v24 = vpop.eup %6887  ;;  %v4449_v44 = vmul.f32 %v6886_v49, %v4370_v55  ;;  %v4176_v55 = vsel %vm1381_vm3, %v8971_v45, 0.0 }
 0x657   : > { %v3393_v18 = vpack.c.bf16 %v9347_v24, %v9345_v2 }
 0x658   : > { %v4481_v58 = vpack.c.bf16 %v4449_v44, %v4449_v44 }
 0x659   : > { %6144 = vmatmul.msk.bf16.gmra.mxu0 %vm1381_vm3, %v3393_v18 }
 0x65a   : > { %4546 = vrot.lane.b32.xlu0 %v4481_v58, %s7156_s19  ;;  %4042 = vmax.xlane.f32.xlu2 %v4041_v32  ;;  %v9397_v58 = vpop.f32.mrf.mxu3 }
 0x65b   : > { %v9357_v39 = vpop.xlane.xlu2 %4165 }
 0x662   : > { %3284 = vadd.xlane.f32.xlu2 %v3283_v31 }
 0x663   : > { %v9361_v60 = vpop.xlane.xlu2 %4030 }
 0x666   : > { %v2803_v41 = vpop.permute.xlu1 %2802 }
 0x667   : > { %2871 = vst.msk [vmem:[#allocation4 + $0x70] sm:$0xf] %vm2842_vm5, %v2803_v41  ;;  %v6890_v41 = vpop.eup %6889 }
 0x668   : > { %v3551_v19 = vmul.f32 %v6890_v41, %v3474_v59 }
 0x669   : > { %3125 = vmax.xlane.f32.xlu1 %v3124_v9 }
 0x66a   : > { %4183 = vadd.xlane.f32.xlu2 %v4182_v11 }
 0x66b   : > { %v9368_v47 = vpop.xlane.xlu2 %3272  ;;  %v4028_v51 = vpop.xlane.xlu0 %4027 }
 0x66c   : > { %v4080_v49 = vsub.f32 %v9252_v33, %v4028_v51  ;;  %v3136_v33 = vsel %vm1381_vm3, %v9397_v58, -inf  ;;  %v3583_v51 = vpack.c.bf16 %v3551_v19, %v3551_v19  ;;  %v9425_v19 = vpop.f32.mrf.mxu1 }
 0x66e   : > { %v4133_v44 = vmul.f32 1.442695, %v4080_v49 }
 0x670   : > { %6891 = vpow2.f32 %v4133_v44 }
 0x671   : > { %4033 = vmax.xlane.f32.xlu1 %v4032_v17 }
 0x673   : > { %v9372_v35 = vpop.xlane.xlu2 %3131  ;;  %v4163_v54 = vpop.xlane.xlu0 %4162 }
 0x676   : > { %v9401_v9 = vpop.eup %6891 }
 0x679   : > { %4168 = vadd.xlane.f32.xlu1 %v4167_v4 }
 0x67b   : > { %v9376_v28 = vpop.xlane.xlu2 %4039  ;;  %v3129_v32 = vpop.xlane.xlu0 %3128 }
 0x681   : > { %3134 = vmax.xlane.f32.xlu1 %v3133_v48 }
 0x683   : > { %v9384_v38 = vpop.xlane.xlu2 %4174  ;;  %v3270_v4 = vpop.xlane.xlu0 %3269 }
 0x684   : > { %4045 = vmax.xlane.f32.xlu0 %v4044_v29 }
 0x689   : > { %3275 = vadd.xlane.f32.xlu1 %v3274_v57  ;;  %v3476_v57 = vpop.f32.mrf.mxu0 }
 0x68b   : > { %v3648_v7 = vpop.permute.xlu2 %3647 }
 0x68c   : > { %3743 = vst.msk [vmem:[#allocation4 + $0x4] sm:$0xf] %vm3741_vm6, %v3648_v7  ;;  %4180 = vadd.xlane.f32.xlu0 %v4179_v12  ;;  %v4373_v7 = vpop.f32.mrf.mxu2 }
 0x691   : > { %4177 = vadd.xlane.f32.xlu1 %v4176_v55  ;;  %v4025_v18 = vpop.xlane.xlu1 %4024 }
 0x692   : > { %v4079_v26 = vsub.f32 %v9242_v14, %v4025_v18  ;;  %v9405_v14 = vpop.f32.mrf.mxu3  ;;  %v9414_v18 = vpop.xlane.xlu0 %4171 }
 0x694   : > { %v4131_v31 = vmul.f32 1.442695, %v4079_v26 }
 0x696   : > { %6893 = vpow2.f32 %v4131_v31 }
 0x697   : > { %6895 = vrcp.f32 %v4163_v54  ;;  %v3139_v54 = vsel %vm1381_vm3, %v9405_v14, -inf }
 0x699   : > { %3137 = vmax.xlane.f32.xlu1 %v3136_v33  ;;  %v3267_v45 = vpop.xlane.xlu1 %3266 }
 0x69a   : > { %6897 = vrcp.f32 %v3267_v45  ;;  %v9418_v59 = vpop.xlane.xlu0 %4036 }
 0x69b   : > { %6899 = vrcp.f32 %v9304_v3 }
 0x69c   : > { %v9403_v11 = vpop.eup %6893  ;;  %6901 = vrcp.f32 %v3270_v4  ;;  %v9452_v4 = vpop.f32.mrf.mxu3 }
 0x69d   : > { %v4293_v17 = vpack.c.bf16 %v9401_v9, %v9403_v11  ;;  %v6896_v48 = vpop.eup %6895 }
 0x69e   : > { %v4450_v49 = vmul.f32 %v6896_v48, %v4373_v7  ;;  %v9431_v48 = vpop.f32.mrf.mxu1 }
 0x69f   : > { %6177 = vmatmul.msk.bf16.gmra.mxu2 %vm1381_vm3, %v4293_v17 }
 0x6a0   : > { %v6898_v29 = vpop.eup %6897  ;;  %3649 = vrot.lane.b32.xlu0 %v3583_v51, %s7155_s28  ;;  %v4482_v44 = vpack.c.bf16 %v4450_v49, %v4450_v49  ;;  %v4047_v51 = vsel %vm1381_vm3, %v9425_v19, -inf }
 0x6a1   : > { %3140 = vmax.xlane.f32.xlu1 %v3139_v54  ;;  %v3552_v12 = vmul.f32 %v6898_v29, %v3476_v57  ;;  %v6900_v26 = vpop.eup %6899  ;;  %v3289_v29 = vsel %vm1381_vm3, %v9167_v61, 0.0  ;;  %v3181_v57 = vsub.f32 %v9268_v53, %v3129_v32  ;;  %v4185_v54 = vsel %vm1381_vm3, %v9151_v20, 0.0 }
 0x6a2   : > { %v4448_v41 = vmul.f32 %v6900_v26, %v9341_v56  ;;  %v9423_v45 = vpop.xlane.xlu0 %3278  ;;  %v4050_v56 = vsel %vm1381_vm3, %v9431_v48, -inf  ;;  %v4081_v61 = vsub.f32 %v9257_v46, %v9361_v60  ;;  %v3280_v20 = vsel %vm1381_vm3, %v9134_v6, 0.0 }
 0x6a3   : > { %v3584_v55 = vpack.c.bf16 %v3552_v12, %v3552_v12  ;;  %v3234_v7 = vmul.f32 1.442695, %v3181_v57  ;;  %v3182_v57 = vsub.f32 %v9279_v0, %v9372_v35 }
 0x6a4   : > { %v4480_v33 = vpack.c.bf16 %v4448_v41, %v4448_v41  ;;  %v4135_v32 = vmul.f32 1.442695, %v4081_v61 }
 0x6a5   : > { %3651 = vrot.lane.b32.xlu2 %v3584_v55, %s7155_s28  ;;  %v4188_v55 = vsel %vm1381_vm3, %v9154_v50, 0.0  ;;  %6903 = vpow2.f32 %v3234_v7 }
 0x6a8   : > { %4548 = vrot.lane.b32.xlu0 %v4482_v44, %s7156_s19 }
 0x6b1   : > { %v2809_v31 = vpop.permute.xlu1 %2808 }
 0x6b2   : > { %2874 = vst.msk [vmem:[#allocation4 + $0x7c] sm:$0xf] %vm2842_vm5, %v2809_v31  ;;  %v3479_v31 = vpop.f32.mrf.mxu0 }
 0x6ba   : > { %4544 = vrot.lane.b32.xlu1 %v4480_v33, %s7156_s19  ;;  %v3481_v7 = vpop.f32.mrf.mxu0 }
 0x6c4   : > { %v3646_v17 = vpop.permute.xlu0 %3645 }
 0x6c5   : > { %3742 = vst.msk [vmem:[#allocation4] sm:$0xf] %vm3741_vm6, %v3646_v17  ;;  %v4375_v17 = vpop.f32.mrf.mxu2 }
 0x6cc   : > { %v4547_v3 = vpop.permute.xlu0 %4546 }
 0x6cd   : > { %4642 = vst.msk [vmem:[#allocation4 + $0x4] sm:$0xf] %vm4640_vm7, %v4547_v3  ;;  %v9445_v53 = vpop.xlane.xlu2 %4042  ;;  %v4378_v35 = vpop.f32.mrf.mxu2 }
 0x6ce   : > { %4048 = vmax.xlane.f32.xlu2 %v4047_v51 }
 0x6d2   : > { %4051 = vmax.xlane.f32.xlu0 %v4050_v56 }
 0x6d6   : > { %3290 = vadd.xlane.f32.xlu2 %v3289_v29  ;;  %v9462_v29 = vpop.xlane.xlu2 %3284 }
 0x6da   : > { %4186 = vadd.xlane.f32.xlu0 %v4185_v54 }
 0x6dc   : > { %v3126_v12 = vpop.xlane.xlu1 %3125 }
 0x6dd   : > { %v3180_v49 = vsub.f32 %v9261_v25, %v3126_v12  ;;  %v6902_v25 = vpop.eup %6901  ;;  %v4083_v12 = vsub.f32 %v9276_v10, %v9418_v59 }
 0x6de   : > { %4189 = vadd.xlane.f32.xlu2 %v4188_v55  ;;  %v9450_v41 = vpop.eup %6903  ;;  %v3553_v60 = vmul.f32 %v6902_v25, %v3479_v31  ;;  %v4084_v55 = vsub.f32 %v9288_v1, %v9376_v28 }
 0x6df   : > { %v3232_v44 = vmul.f32 1.442695, %v3180_v49  ;;  %v9473_v49 = vpop.f32.mrf.mxu3 }
 0x6e0   : > { %v3585_v51 = vpack.c.bf16 %v3553_v60, %v3553_v60  ;;  %v4141_v25 = vmul.f32 1.442695, %v4084_v55  ;;  %v4085_v55 = vsub.f32 %v9349_v27, %v9445_v53  ;;  %v6291_v27 = vld [vmem:[%s11253_s7 + $0x8] sm:$0xff] }
 0x6e1   : > { %6905 = vpow2.f32 %v3232_v44  ;;  %4854 = vmatpush.bf16.msra.mxu3 %v6291_v27  ;;  %v4380_v27 = vpop.f32.mrf.mxu2 }
 0x6e2   : > { %6907 = vrcp.f32 %v9368_v47 }
 0x6e3   : > { %6909 = vpow2.f32 %v4135_v32  ;;  %v4139_v32 = vmul.f32 1.442695, %v4083_v12 }
 0x6e4   : > { %3281 = vadd.xlane.f32.xlu1 %v3280_v20  ;;  %v4034_v26 = vpop.xlane.xlu1 %4033  ;;  %v3236_v20 = vmul.f32 1.442695, %v3182_v57 }
 0x6e5   : > { %v4082_v50 = vsub.f32 %v9266_v62, %v4034_v26  ;;  %v3142_v62 = vsel %vm1381_vm3, %v9452_v4, -inf  ;;  %v3145_v26 = vsel %vm1381_vm3, %v9473_v49, -inf }
 0x6e7   : > { %v9454_v33 = vpop.eup %6905  ;;  %v4137_v46 = vmul.f32 1.442695, %v4082_v50  ;;  %v9484_v50 = vpop.xlane.xlu2 %4183 }
 0x6e8   : > { %v3394_v6 = vpack.c.bf16 %v9450_v41, %v9454_v33  ;;  %v6908_v56 = vpop.eup %6907 }
 0x6e9   : > { %6911 = vpow2.f32 %v4137_v46  ;;  %v9464_v47 = vpop.eup %6909  ;;  %v3554_v61 = vmul.f32 %v6908_v56, %v3481_v7 }
 0x6ea   : > { %6145 = vmatmul.msk.bf16.gmra.mxu0 %vm1381_vm3, %v3394_v6 }
 0x6eb   : > { %v3586_v59 = vpack.c.bf16 %v3554_v61, %v3554_v61 }
 0x6ec   : > { %3143 = vmax.xlane.f32.xlu1 %v3142_v62  ;;  %v4169_v3 = vpop.xlane.xlu1 %4168 }
 0x6ed   : > { %6913 = vrcp.f32 %v4169_v3 }
 0x6ee   : > { %3653 = vrot.lane.b32.xlu0 %v3585_v51, %s7155_s28  ;;  %6915 = vpow2.f32 %v3236_v20 }
 0x6ef   : > { %v9469_v54 = vpop.eup %6911  ;;  %6917 = vpow2.f32 %v4139_v32 }
 0x6f0   : > { %v4294_v44 = vpack.c.bf16 %v9469_v54, %v9464_v47  ;;  %6919 = vpow2.f32 %v4141_v25 }
 0x6f2   : > { %6178 = vmatmul.msk.bf16.gmra.mxu2 %vm1381_vm3, %v4294_v44 }
 0x6f3   : > { %v6914_v0 = vpop.eup %6913 }
 0x6f4   : > { %3146 = vmax.xlane.f32.xlu1 %v3145_v26  ;;  %v3135_v10 = vpop.xlane.xlu1 %3134  ;;  %v4452_v31 = vmul.f32 %v6914_v0, %v4378_v35  ;;  %v9487_v6 = vpop.eup %6915 }
 0x6f5   : > { %v3183_v1 = vsub.f32 %v9378_v36, %v3135_v10  ;;  %v9489_v3 = vpop.eup %6917  ;;  %v9521_v10 = vpop.f32.mrf.mxu1 }
 0x6f6   : > { %3655 = vrot.lane.b32.xlu2 %v3586_v59, %s7155_s28  ;;  %v4484_v28 = vpack.c.bf16 %v4452_v31, %v4452_v31  ;;  %v9491_v51 = vpop.eup %6919  ;;  %v6290_v31 = vld [vmem:[%s11253_s7] sm:$0xff] }
 0x6f7   : > { %v3238_v46 = vmul.f32 1.442695, %v3183_v1  ;;  %v4046_v60 = vpop.xlane.xlu0 %4045  ;;  %v4295_v12 = vpack.c.bf16 %v9491_v51, %v9489_v3  ;;  %4855 = vmatpush.bf16.msra.mxu3 %v6290_v31 }
 0x6f8   : > { %4552 = vrot.lane.b32.xlu0 %v4484_v28, %s7156_s19  ;;  %v4086_v56 = vsub.f32 %v9380_v37, %v4046_v60  ;;  %v4143_v37 = vmul.f32 1.442695, %v4085_v55 }
 0x6f9   : > { %6921 = vpow2.f32 %v3238_v46 }
 0x6fa   : > { %6923 = vrcp.f32 %v9357_v39  ;;  %v4145_v39 = vmul.f32 1.442695, %v4086_v56 }
 0x6fc   : > { %v3276_v62 = vpop.xlane.xlu1 %3275  ;;  %6925 = vpow2.f32 %v4145_v39  ;;  %v4191_v39 = vsel %vm1381_vm3, %v9175_v63, 0.0  ;;  %v3286_v63 = vsel %vm1381_vm3, %v9165_v30, 0.0 }
 0x6fd   : > { %6927 = vpow2.f32 %v4143_v37  ;;  %v9529_v56 = vpop.f32.mrf.mxu1 }
 0x6ff   : > { %v9494_v36 = vpop.eup %6921  ;;  %v3652_v57 = vpop.permute.xlu2 %3651 }
 0x700   : > { %3745 = vst.msk [vmem:[#allocation4 + $0xc] sm:$0xf] %vm3741_vm6, %v3652_v57  ;;  %v3395_v7 = vpack.c.bf16 %v9494_v36, %v9487_v6  ;;  %v6924_v44 = vpop.eup %6923  ;;  %v9508_v0 = vpop.xlane.xlu0 %4180 }
 0x701   : > { %v4451_v20 = vmul.f32 %v6924_v44, %v4375_v17  ;;  %v3295_v44 = vsel %vm1381_vm3, %v9213_v13, 0.0  ;;  %v9555_v13 = vpop.f32.mrf.mxu3 }
 0x702   : > { %6146 = vmatmul.msk.bf16.gmra.mxu0 %vm1381_vm3, %v3395_v7  ;;  %6179 = vmatmul.msk.bf16.gmra.mxu2 %vm1381_vm3, %v4295_v12  ;;  %v9510_v26 = vpop.eup %6925  ;;  %v4056_v7 = vsel %vm1381_vm3, %v9529_v56, -inf }
 0x703   : > { %v4483_v35 = vpack.c.bf16 %v4451_v20, %v4451_v20  ;;  %v9516_v53 = vpop.eup %6927  ;;  %v4194_v20 = vsel %vm1381_vm3, %v9173_v40, 0.0  ;;  %v4383_v40 = vpop.f32.mrf.mxu2 }
 0x704   : > { %v9506_v61 = vpop.xlane.xlu1 %4177  ;;  %v4296_v17 = vpack.c.bf16 %v9510_v26, %v9516_v53 }
 0x70c   : > { %v3138_v32 = vpop.xlane.xlu1 %3137 }
 0x70d   : > { %4550 = vrot.lane.b32.xlu1 %v4483_v35, %s7156_s19  ;;  %v3184_v25 = vsub.f32 %v9397_v58, %v3138_v32  ;;  %v3484_v32 = vpop.f32.mrf.mxu0 }
 0x70f   : > { %v3240_v1 = vmul.f32 1.442695, %v3184_v25 }
 0x711   : > { %6929 = vpow2.f32 %v3240_v1  ;;  %v3148_v1 = vsel %vm1381_vm3, %v9555_v13, -inf }
 0x712   : > { %v3650_v59 = vpop.permute.xlu0 %3649  ;;  %6180 = vmatmul.msk.bf16.gmra.mxu2 %vm1381_vm3, %v4296_v17 }
 0x713   : > { %3744 = vst.msk [vmem:[#allocation4 + $0x8] sm:$0xf] %vm3741_vm6, %v3650_v59 }
 0x714   : > { %v3141_v28 = vpop.xlane.xlu1 %3140 }
 0x715   : > { %v3185_v46 = vsub.f32 %v9405_v14, %v3141_v28  ;;  %v4053_v14 = vsel %vm1381_vm3, %v9521_v10, -inf  ;;  %v3486_v28 = vpop.f32.mrf.mxu0 }
 0x717   : > { %v3242_v58 = vmul.f32 1.442695, %v3185_v46  ;;  %v9532_v57 = vpop.eup %6929 }
 0x719   : > { %6931 = vpow2.f32 %v3242_v58  ;;  %v9562_v58 = vpop.f32.mrf.mxu3 }
 0x71a   : > { %v4549_v60 = vpop.permute.xlu0 %4548  ;;  %6933 = vrcp.f32 %v3276_v62 }
 0x71b   : > { %4643 = vst.msk [vmem:[#allocation4 + $0x8] sm:$0xf] %vm4640_vm7, %v4549_v60  ;;  %6935 = vrcp.f32 %v9423_v45 }
 0x71c   : > { %6937 = vrcp.f32 %v9384_v38 }
 0x71d   : > { %6939 = vrcp.f32 %v9506_v61  ;;  %v3151_v61 = vsel %vm1381_vm3, %v9562_v58, -inf }
 0x71f   : > { %v9536_v12 = vpop.eup %6931  ;;  %4057 = vmax.xlane.f32.xlu2 %v4056_v7 }
 0x720   : > { %v3396_v55 = vpack.c.bf16 %v9536_v12, %v9532_v57  ;;  %v6934_v25 = vpop.eup %6933 }
 0x721   : > { %v3555_v62 = vmul.f32 %v6934_v25, %v3484_v32  ;;  %v6936_v17 = vpop.eup %6935 }
 0x722   : > { %4054 = vmax.xlane.f32.xlu0 %v4053_v14  ;;  %6147 = vmatmul.msk.bf16.gmra.mxu0 %vm1381_vm3, %v3396_v55  ;;  %v6938_v31 = vpop.eup %6937  ;;  %v3556_v30 = vmul.f32 %v6936_v17, %v3486_v28 }
 0x723   : > { %v3587_v59 = vpack.c.bf16 %v3555_v62, %v3555_v62  ;;  %v4454_v46 = vmul.f32 %v6938_v31, %v4383_v40  ;;  %v6940_v7 = vpop.eup %6939 }
 0x724   : > { %v3588_v60 = vpack.c.bf16 %v3556_v30, %v3556_v30 }
 0x727   : > { %4192 = vadd.xlane.f32.xlu2 %v4191_v39  ;;  %v4486_v39 = vpack.c.bf16 %v4454_v46, %v4454_v46 }
 0x72a   : > { %3296 = vadd.xlane.f32.xlu0 %v3295_v44 }
 0x72c   : > { %v4545_v37 = vpop.permute.xlu1 %4544 }
 0x72d   : > { %4641 = vst.msk [vmem:[#allocation4] sm:$0xf] %vm4640_vm7, %v4545_v37  ;;  %v4385_v37 = vpop.f32.mrf.mxu2 }
 0x732   : > { %4195 = vadd.xlane.f32.xlu0 %v4194_v20 }
 0x734   : > { %v6292_v35 = vld [vmem:[#allocation4] sm:$0xff] }
 0x735   : > { %6255 = vmatmul.msk.bf16.vlgmr.msra.gmra.mxu3 %vm618_vm0, %v6292_v35 }
 0x737   : > { %3287 = vadd.xlane.f32.xlu1 %v3286_v63 }
 0x73f   : > { %3149 = vmax.xlane.f32.xlu1 %v3148_v1  ;;  %3657 = vrot.lane.b32.xlu2 %v3587_v59, %s7155_s28 }
 0x741   : > { %v4049_v45 = vpop.xlane.xlu2 %4048 }
 0x742   : > { %v4087_v38 = vsub.f32 %v9425_v19, %v4049_v45  ;;  %v4455_v19 = vmul.f32 %v6940_v7, %v4385_v37 }
 0x744   : > { %v4147_v55 = vmul.f32 1.442695, %v4087_v38  ;;  %v4487_v32 = vpack.c.bf16 %v4455_v19, %v4455_v19 }
 0x745   : > { %v4052_v14 = vpop.xlane.xlu0 %4051 }
 0x746   : > { %v4088_v44 = vsub.f32 %v9431_v48, %v4052_v14  ;;  %3659 = vrot.lane.b32.xlu0 %v3588_v60, %s7155_s28  ;;  %6941 = vpow2.f32 %v4147_v55 }
 0x747   : > { %3152 = vmax.xlane.f32.xlu1 %v3151_v61  ;;  %4556 = vrot.lane.b32.xlu2 %v4486_v39, %s7156_s19 }
 0x748   : > { %v4149_v20 = vmul.f32 1.442695, %v4088_v44  ;;  %v4388_v44 = vpop.f32.mrf.mxu2 }
 0x749   : > { %v9569_v35 = vpop.xlane.xlu2 %3290 }
 0x74a   : > { %6943 = vpow2.f32 %v4149_v20 }
 0x74b   : > { %6945 = vrcp.f32 %v9414_v18 }
 0x74c   : > { %v9572_v25 = vpop.eup %6941 }
 0x74d   : > { %v9584_v59 = vpop.xlane.xlu0 %4186 }
 0x74e   : > { %4558 = vrot.lane.b32.xlu0 %v4487_v32, %s7156_s19 }
 0x750   : > { %v9574_v48 = vpop.eup %6943  ;;  %v4390_v19 = vpop.f32.mrf.mxu2 }
 0x751   : > { %v9577_v63 = vpop.xlane.xlu2 %4189  ;;  %v4297_v62 = vpack.c.bf16 %v9574_v48, %v9572_v25  ;;  %v6946_v17 = vpop.eup %6945 }
 0x752   : > { %v4453_v1 = vmul.f32 %v6946_v17, %v4380_v27  ;;  %v3301_v27 = vsel %vm1381_vm3, %v9232_v16, 0.0 }
 0x753   : > { %6181 = vmatmul.msk.bf16.gmra.mxu2 %vm1381_vm3, %v4297_v62 }
 0x754   : > { %v4485_v28 = vpack.c.bf16 %v4453_v1, %v4453_v1 }
 0x757   : > { %v9582_v40 = vpop.xlane.xlu1 %3281 }
 0x759   : > { %v3656_v31 = vpop.permute.xlu2 %3655 }
 0x75a   : > { %3747 = vst.msk [vmem:[#allocation4 + $0x14] sm:$0xf] %vm3741_vm6, %v3656_v31 }
 0x75f   : > { %v3144_v30 = vpop.xlane.xlu1 %3143 }
 0x760   : > { %4554 = vrot.lane.b32.xlu1 %v4485_v28, %s7156_s19  ;;  %v3654_v18 = vpop.permute.xlu0 %3653  ;;  %v3186_v45 = vsub.f32 %v9452_v4, %v3144_v30 }
 0x761   : > { %3746 = vst.msk [vmem:[#allocation4 + $0x10] sm:$0xf] %vm3741_vm6, %v3654_v18 }
 0x762   : > { %v3244_v46 = vmul.f32 1.442695, %v3186_v45 }
 0x764   : > { %6947 = vpow2.f32 %v3244_v46 }
 0x767   : > { %v3147_v38 = vpop.xlane.xlu1 %3146 }
 0x768   : > { %v3187_v60 = vsub.f32 %v9473_v49, %v3147_v38  ;;  %v4197_v49 = vsel %vm1381_vm3, %v9225_v21, 0.0  ;;  %v3292_v21 = vsel %vm1381_vm3, %v9215_v23, 0.0 }
 0x76a   : > { %v3246_v7 = vmul.f32 1.442695, %v3187_v60  ;;  %v4553_v55 = vpop.permute.xlu0 %4552  ;;  %v9594_v14 = vpop.eup %6947 }
 0x76b   : > { %4645 = vst.msk [vmem:[#allocation4 + $0x10] sm:$0xf] %vm4640_vm7, %v4553_v55 }
 0x76c   : > { %6949 = vpow2.f32 %v3246_v7 }
 0x76d   : > { %6951 = vrcp.f32 %v9508_v0 }
 0x76e   : > { %6953 = vrcp.f32 %v9484_v50  ;;  %v9610_v50 = vpop.f32.mrf.mxu3 }
 0x76f   : > { %v3154_v31 = vsel %vm1381_vm3, %v9610_v50, -inf }
 0x770   : > { %3302 = vadd.xlane.f32.xlu2 %v3301_v27 }
 0x772   : > { %v9596_v39 = vpop.eup %6949 }
 0x773   : > { %v3397_v4 = vpack.c.bf16 %v9596_v39, %v9594_v14  ;;  %v6952_v16 = vpop.eup %6951 }
 0x774   : > { %v4456_v37 = vmul.f32 %v6952_v16, %v4388_v44  ;;  %v6954_v20 = vpop.eup %6953  ;;  %v4200_v44 = vsel %vm1381_vm3, %v9227_v22, 0.0 }
 0x775   : > { %6148 = vmatmul.msk.bf16.gmra.mxu0 %vm1381_vm3, %v3397_v4  ;;  %v4457_v62 = vmul.f32 %v6954_v20, %v4390_v19  ;;  %v3489_v4 = vpop.f32.mrf.mxu0  ;;  %v4203_v20 = vsel %vm1381_vm3, %v9293_v5, 0.0 }
 0x776   : > { %v4488_v32 = vpack.c.bf16 %v4456_v37, %v4456_v37  ;;  %v9616_v45 = vpop.f32.mrf.mxu3 }
 0x777   : > { %v4489_v0 = vpack.c.bf16 %v4457_v62, %v4457_v62  ;;  %v3157_v38 = vsel %vm1381_vm3, %v9616_v45, -inf }
 0x778   : > { %4198 = vadd.xlane.f32.xlu0 %v4197_v49 }
 0x77f   : > { %v4551_v61 = vpop.permute.xlu1 %4550 }
 0x780   : > { %4644 = vst.msk [vmem:[#allocation4 + $0xc] sm:$0xf] %vm4640_vm7, %v4551_v61 }
 0x787   : > { %v6293_v17 = vld [vmem:[#allocation4 + $0x8] sm:$0xff] }
 0x788   : > { %4560 = vrot.lane.b32.xlu2 %v4488_v32, %s7156_s19  ;;  %6256 = vmatmul.msk.bf16.gmra.mxu3 %vm618_vm0, %v6293_v17  ;;  %v3307_v32 = vsel %vm1381_vm3, %v9308_v43, 0.0 }
 0x78a   : > { %3293 = vadd.xlane.f32.xlu1 %v3292_v21 }
 0x78c   : > { %4562 = vrot.lane.b32.xlu0 %v4489_v0, %s7156_s19 }
 0x792   : > { %3155 = vmax.xlane.f32.xlu1 %v3154_v31  ;;  %v4058_v1 = vpop.xlane.xlu2 %4057 }
 0x793   : > { %v4090_v28 = vsub.f32 %v9529_v56, %v4058_v1  ;;  %v3298_v56 = vsel %vm1381_vm3, %v9235_v34, 0.0  ;;  %v3491_v34 = vpop.f32.mrf.mxu0 }
 0x795   : > { %v4153_v30 = vmul.f32 1.442695, %v4090_v28  ;;  %v4055_v18 = vpop.xlane.xlu0 %4054 }
 0x796   : > { %v4089_v23 = vsub.f32 %v9521_v10, %v4055_v18 }
 0x797   : > { %6955 = vpow2.f32 %v4153_v30 }
 0x798   : > { %v4151_v46 = vmul.f32 1.442695, %v4089_v23  ;;  %v4393_v23 = vpop.f32.mrf.mxu2 }
 0x79a   : > { %6957 = vpow2.f32 %v4151_v46  ;;  %3158 = vmax.xlane.f32.xlu1 %v3157_v38  ;;  %v9621_v60 = vpop.xlane.xlu2 %4192 }
 0x79b   : > { %6959 = vrcp.f32 %v9582_v40  ;;  %v9648_v62 = vpop.f32.mrf.mxu0 }
 0x79c   : > { %6961 = vrcp.f32 %v9569_v35 }
 0x79d   : > { %v9623_v7 = vpop.eup %6955  ;;  %v9633_v49 = vpop.xlane.xlu0 %3296  ;;  %6963 = vrcp.f32 %v9584_v59 }
 0x79e   : > { %6965 = vrcp.f32 %v9462_v29 }
 0x7a0   : > { %v9625_v55 = vpop.eup %6957 }
 0x7a1   : > { %v4298_v27 = vpack.c.bf16 %v9623_v7, %v9625_v55  ;;  %v6960_v21 = vpop.eup %6959 }
 0x7a2   : > { %3299 = vadd.xlane.f32.xlu1 %v3298_v56  ;;  %v3658_v10 = vpop.permute.xlu2 %3657  ;;  %v3557_v31 = vmul.f32 %v6960_v21, %v3489_v4  ;;  %v4206_v21 = vsel %vm1381_vm3, %v9291_v42, 0.0 }
 0x7a3   : > { %3748 = vst.msk [vmem:[#allocation4 + $0x18] sm:$0xf] %vm3741_vm6, %v3658_v10  ;;  %6182 = vmatmul.msk.bf16.gmra.mxu2 %vm1381_vm3, %v4298_v27  ;;  %v3496_v35 = vpop.f32.mrf.mxu0 }
 0x7a4   : > { %v3589_v30 = vpack.c.bf16 %v3557_v31, %v3557_v31 }
 0x7a5   : > { %v9640_v37 = vpop.xlane.xlu0 %4195 }
 0x7aa   : > { %4201 = vadd.xlane.f32.xlu1 %v4200_v44  ;;  %v4557_v16 = vpop.permute.xlu2 %4556  ;;  %v9637_v61 = vpop.xlane.xlu1 %3287 }
 0x7ab   : > { %4647 = vst.msk [vmem:[#allocation4 + $0x18] sm:$0xf] %vm4640_vm7, %v4557_v16 }
 0x7b1   : > { %4204 = vadd.xlane.f32.xlu2 %v4203_v20  ;;  %v3313_v20 = vsel %vm1381_vm3, %v9347_v24, 0.0 }
 0x7b2   : > { %v3150_v19 = vpop.xlane.xlu1 %3149 }
 0x7b3   : > { %v3188_v22 = vsub.f32 %v9555_v13, %v3150_v19  ;;  %v6962_v13 = vpop.eup %6961  ;;  %v3310_v19 = vsel %vm1381_vm3, %v9345_v2, 0.0 }
 0x7b4   : > { %v6964_v28 = vpop.eup %6963  ;;  %v3560_v59 = vmul.f32 %v6962_v13, %v3496_v35 }
 0x7b5   : > { %v3248_v0 = vmul.f32 1.442695, %v3188_v22  ;;  %v6966_v18 = vpop.eup %6965  ;;  %v4395_v22 = vpop.f32.mrf.mxu2 }
 0x7b6   : > { %3308 = vadd.xlane.f32.xlu0 %v3307_v32  ;;  %v3558_v38 = vmul.f32 %v6966_v18, %v3491_v34  ;;  %v3592_v27 = vpack.c.bf16 %v3560_v59, %v3560_v59  ;;  %v3304_v32 = vsel %vm1381_vm3, %v9306_v8, 0.0 }
 0x7b7   : > { %6967 = vpow2.f32 %v3248_v0 }
 0x7b8   : > { %v3660_v17 = vpop.permute.xlu0 %3659  ;;  %v3590_v4 = vpack.c.bf16 %v3558_v38, %v3558_v38 }
 0x7b9   : > { %3749 = vst.msk [vmem:[#allocation4 + $0x1c] sm:$0xf] %vm3741_vm6, %v3660_v17  ;;  %v4212_v17 = vsel %vm1381_vm3, %v9318_v15, 0.0 }
 0x7ba   : > { %v3153_v5 = vpop.xlane.xlu1 %3152 }
 0x7bb   : > { %v3189_v40 = vsub.f32 %v9562_v58, %v3153_v5  ;;  %v4458_v58 = vmul.f32 %v6964_v28, %v4393_v23  ;;  %v3499_v5 = vpop.f32.mrf.mxu0 }
 0x7bd   : > { %v3250_v43 = vmul.f32 1.442695, %v3189_v40  ;;  %v9657_v46 = vpop.eup %6967  ;;  %v4490_v10 = vpack.c.bf16 %v4458_v58, %v4458_v58  ;;  %v4398_v24 = vpop.f32.mrf.mxu2 }
 0x7bf   : > { %6969 = vpow2.f32 %v3250_v43 }
 0x7c0   : > { %v4559_v1 = vpop.permute.xlu0 %4558 }
 0x7c1   : > { %4648 = vst.msk [vmem:[#allocation4 + $0x1c] sm:$0xf] %vm4640_vm7, %v4559_v1 }
 0x7c3   : > { %3661 = vrot.lane.b32.xlu1 %v3589_v30, %s7155_s28 }
 0x7c5   : > { %v9659_v29 = vpop.eup %6969  ;;  %v4400_v1 = vpop.f32.mrf.mxu2 }
 0x7c6   : > { %v3398_v56 = vpack.c.bf16 %v9659_v29, %v9657_v46 }
 0x7c8   : > { %6149 = vmatmul.msk.bf16.gmra.mxu0 %vm1381_vm3, %v3398_v56  ;;  %v6295_v34 = vld [vmem:[#allocation4 + $0x18] sm:$0xff] }
 0x7c9   : > { %3667 = vrot.lane.b32.xlu2 %v3592_v27, %s7155_s28 }
 0x7ca   : > { %4564 = vrot.lane.b32.xlu0 %v4490_v10, %s7156_s19 }
 0x7cb   : > { %3663 = vrot.lane.b32.xlu1 %v3590_v4, %s7155_s28 }
 0x7d2   : > { %v4555_v44 = vpop.permute.xlu1 %4554 }
 0x7d3   : > { %4646 = vst.msk [vmem:[#allocation4 + $0x14] sm:$0xf] %vm4640_vm7, %v4555_v44 }
 0x7da   : > { %v6294_v16 = vld [vmem:[#allocation4 + $0x10] sm:$0xff] }
 0x7db   : > { %6257 = vmatmul.msk.bf16.gmra.mxu3 %vm618_vm0, %v6294_v16 }
 0x7eb   : > { %6258 = vmatmul.msk.bf16.gmra.mxu3 %vm618_vm0, %v6295_v34 }
 0x7f2   : > { %3314 = vadd.xlane.f32.xlu2 %v3313_v20 }
 0x7f4   : > { %3311 = vadd.xlane.f32.xlu0 %v3310_v19  ;;  %v4199_v19 = vpop.xlane.xlu0 %4198 }
 0x7f5   : > { %3305 = vadd.xlane.f32.xlu1 %v3304_v32  ;;  %v3501_v32 = vpop.f32.mrf.mxu0 }
 0x7fc   : > { %4213 = vadd.xlane.f32.xlu0 %v4212_v17  ;;  %v4215_v17 = vsel %vm1381_vm3, %v9403_v11, 0.0 }
 0x7fd   : > { %4207 = vadd.xlane.f32.xlu1 %v4206_v21  ;;  %v3294_v0 = vpop.xlane.xlu1 %3293 }
 0x7fe   : > { %6971 = vrcp.f32 %v3294_v0  ;;  %v4563_v0 = vpop.permute.xlu0 %4562 }
 0x7ff   : > { %6973 = vrcp.f32 %v9621_v60 }
 0x800   : > { %6975 = vrcp.f32 %v9640_v37 }
 0x801   : > { %6977 = vrcp.f32 %v9637_v61 }
 0x802   : > { %6979 = vrcp.f32 %v9577_v63 }
 0x804   : > { %v6972_v2 = vpop.eup %6971 }
 0x805   : > { %v3156_v8 = vpop.xlane.xlu1 %3155  ;;  %v3561_v40 = vmul.f32 %v6972_v2, %v3499_v5  ;;  %v6974_v43 = vpop.eup %6973 }
 0x806   : > { %v6976_v31 = vpop.eup %6975  ;;  %v3190_v13 = vsub.f32 %v9610_v50, %v3156_v8  ;;  %v4460_v42 = vmul.f32 %v6974_v43, %v4398_v24  ;;  %v3303_v50 = vpop.xlane.xlu2 %3302  ;;  %v4218_v24 = vsel %vm1381_vm3, %v9401_v9, 0.0 }
 0x807   : > { %v3593_v15 = vpack.c.bf16 %v3561_v40, %v3561_v40  ;;  %v4461_v28 = vmul.f32 %v6976_v31, %v4400_v1  ;;  %v6978_v30 = vpop.eup %6977  ;;  %v9716_v2 = vpop.f32.mrf.mxu0 }
 0x808   : > { %v3252_v60 = vmul.f32 1.442695, %v3190_v13  ;;  %v4492_v35 = vpack.c.bf16 %v4460_v42, %v4460_v42  ;;  %v3559_v59 = vmul.f32 %v6978_v30, %v9648_v62  ;;  %v6980_v38 = vpop.eup %6979 }
 0x809   : > { %v4493_v61 = vpack.c.bf16 %v4461_v28, %v4461_v28  ;;  %v4459_v63 = vmul.f32 %v6980_v38, %v4395_v22  ;;  %v3316_v22 = vsel %vm1381_vm3, %v9454_v33, 0.0  ;;  %v4209_v33 = vsel %vm1381_vm3, %v9320_v52, 0.0 }
 0x80a   : > { %3669 = vrot.lane.b32.xlu2 %v3593_v15, %s7155_s28  ;;  %6981 = vpow2.f32 %v3252_v60  ;;  %v3591_v58 = vpack.c.bf16 %v3559_v59, %v3559_v59  ;;  %v4403_v15 = vpop.f32.mrf.mxu2  ;;  %v4224_v38 = vsel %vm1381_vm3, %v9469_v54, 0.0 }
 0x80b   : > { %v4491_v10 = vpack.c.bf16 %v4459_v63, %v4459_v63 }
 0x80d   : > { %v3159_v18 = vpop.xlane.xlu1 %3158 }
 0x80e   : > { %v3191_v37 = vsub.f32 %v9616_v45, %v3159_v18  ;;  %v4561_v62 = vpop.permute.xlu2 %4560 }
 0x80f   : > { %v3506_v8 = vpop.f32.mrf.mxu0 }
 0x810   : > { %v3254_v23 = vmul.f32 1.442695, %v3191_v37  ;;  %4568 = vrot.lane.b32.xlu0 %v4492_v35, %s7156_s19  ;;  %v9691_v56 = vpop.eup %6981 }
 0x812   : > { %6983 = vpow2.f32 %v3254_v23  ;;  %4570 = vrot.lane.b32.xlu2 %v4493_v61, %s7156_s19  ;;  %v3325_v23 = vsel %vm1381_vm3, %v9494_v36, 0.0  ;;  %v3322_v61 = vsel %vm1381_vm3, %v9487_v6, 0.0  ;;  %v3319_v36 = vsel %vm1381_vm3, %v9450_v41, 0.0 }
 0x813   : > { %6985 = vrcp.f32 %v3303_v50 }
 0x814   : > { %6987 = vrcp.f32 %v4199_v19 }
 0x815   : > { %v9699_v4 = vpop.xlane.xlu1 %3299  ;;  %6989 = vrcp.f32 %v9633_v49 }
 0x816   : > { %3665 = vrot.lane.b32.xlu1 %v3591_v58, %s7155_s28  ;;  %v4405_v58 = vpop.f32.mrf.mxu2 }
 0x818   : > { %v9693_v45 = vpop.eup %6983 }
 0x819   : > { %v3399_v27 = vpack.c.bf16 %v9693_v45, %v9691_v56  ;;  %v6986_v11 = vpop.eup %6985 }
 0x81a   : > { %v6988_v40 = vpop.eup %6987  ;;  %v3564_v43 = vmul.f32 %v6986_v11, %v3506_v8 }
 0x81b   : > { %6150 = vmatmul.msk.bf16.gmra.mxu0 %vm1381_vm3, %v3399_v27  ;;  %v4462_v31 = vmul.f32 %v6988_v40, %v4403_v15  ;;  %v6990_v42 = vpop.eup %6989 }
 0x81c   : > { %v3596_v13 = vpack.c.bf16 %v3564_v43, %v3564_v43  ;;  %v3562_v1 = vmul.f32 %v6990_v42, %v3501_v32 }
 0x81d   : > { %v9703_v34 = vpop.xlane.xlu1 %4201  ;;  %v4494_v9 = vpack.c.bf16 %v4462_v31, %v4462_v31 }
 0x81e   : > { %4566 = vrot.lane.b32.xlu1 %v4491_v10, %s7156_s19  ;;  %v3594_v52 = vpack.c.bf16 %v3562_v1, %v3562_v1  ;;  %v4408_v27 = vpop.f32.mrf.mxu2 }
 0x824   : > { %v9701_v44 = vpop.xlane.xlu2 %4204 }
 0x826   : > { %v4410_v32 = vpop.f32.mrf.mxu2 }
 0x829   : > { %v9724_v28 = vpop.xlane.xlu0 %3308 }
 0x82c   : > { %v3668_v16 = vpop.permute.xlu2 %3667 }
 0x82d   : > { %3753 = vst.msk [vmem:[#allocation4 + $0x2c] sm:$0xf] %vm3741_vm6, %v3668_v16 }
 0x835   : > { %v3662_v20 = vpop.permute.xlu1 %3661 }
 0x836   : > { %3750 = vst.msk [vmem:[#allocation4 + $0x20] sm:$0xf] %vm3741_vm6, %v3662_v20 }
 0x837   : > { %4649 = vst.msk [vmem:[#allocation4 + $0x20] sm:$0xf] %vm4640_vm7, %v4561_v62  ;;  %v3509_v62 = vpop.f32.mrf.mxu0 }
 0x83a   : > { %3317 = vadd.xlane.f32.xlu0 %v3316_v22 }
 0x83b   : > { %4216 = vadd.xlane.f32.xlu2 %v4215_v17 }
 0x83c   : > { %v4565_v60 = vpop.permute.xlu0 %4564 }
 0x83d   : > { %v3664_v21 = vpop.permute.xlu1 %3663 }
 0x83e   : > { %3751 = vst.msk [vmem:[#allocation4 + $0x24] sm:$0xf] %vm3741_vm6, %v3664_v21 }
 0x83f   : > { %4650 = vst.msk [vmem:[#allocation4 + $0x24] sm:$0xf] %vm4640_vm7, %v4563_v0  ;;  %v3511_v15 = vpop.f32.mrf.mxu0 }
 0x842   : > { %4219 = vadd.xlane.f32.xlu0 %v4218_v24 }
 0x846   : > { %v6296_v5 = vld [vmem:[#allocation4 + $0x20] sm:$0xff] }
 0x847   : > { %6259 = vmatmul.msk.bf16.gmra.mxu3 %vm618_vm0, %v6296_v5 }
 0x848   : > { %4210 = vadd.xlane.f32.xlu1 %v4209_v33 }
 0x853   : > { %3675 = vrot.lane.b32.xlu2 %v3596_v13, %s7155_s28  ;;  %v9763_v13 = vpop.f32.mrf.mxu0 }
 0x856   : > { %4572 = vrot.lane.b32.xlu0 %v4494_v9, %s7156_s19  ;;  %v4230_v9 = vsel %vm1381_vm3, %v9491_v51, 0.0 }
 0x861   : > { %3671 = vrot.lane.b32.xlu1 %v3594_v52, %s7155_s28  ;;  %v4413_v52 = vpop.f32.mrf.mxu2 }
 0x865   : > { %v9727_v30 = vpop.xlane.xlu2 %3314 }
 0x867   : > { %v9730_v37 = vpop.xlane.xlu0 %3311 }
 0x868   : > { %v3306_v49 = vpop.xlane.xlu1 %3305 }
 0x869   : > { %6991 = vrcp.f32 %v3306_v49 }
 0x86a   : > { %6993 = vrcp.f32 %v9701_v44 }
 0x86d   : > { %v3670_v18 = vpop.permute.xlu2 %3669 }
 0x86e   : > { %3754 = vst.msk [vmem:[#allocation4 + $0x30] sm:$0xf] %vm3741_vm6, %v3670_v18 }
 0x86f   : > { %v9732_v35 = vpop.xlane.xlu0 %4213  ;;  %v6992_v6 = vpop.eup %6991 }
 0x870   : > { %v4208_v59 = vpop.xlane.xlu1 %4207  ;;  %v3565_v10 = vmul.f32 %v6992_v6, %v3509_v62  ;;  %v6994_v54 = vpop.eup %6993 }
 0x871   : > { %6995 = vrcp.f32 %v4208_v59  ;;  %v4464_v41 = vmul.f32 %v6994_v54, %v4408_v27  ;;  %v4233_v54 = vsel %vm1381_vm3, %v9516_v53, 0.0  ;;  %v3331_v53 = vsel %vm1381_vm3, %v9536_v12, 0.0 }
 0x872   : > { %v3597_v20 = vpack.c.bf16 %v3565_v10, %v3565_v10  ;;  %6997 = vrcp.f32 %v9699_v4 }
 0x873   : > { %v4496_v44 = vpack.c.bf16 %v4464_v41, %v4464_v41  ;;  %6999 = vrcp.f32 %v9703_v34  ;;  %v4227_v34 = vsel %vm1381_vm3, %v9489_v3, 0.0  ;;  %v4221_v3 = vsel %vm1381_vm3, %v9464_v47, 0.0 }
 0x874   : > { %7001 = vrcp.f32 %v9727_v30 }
 0x875   : > { %v4571_v11 = vpop.permute.xlu2 %4570 }
 0x877   : > { %v6996_v19 = vpop.eup %6995 }
 0x878   : > { %v4465_v22 = vmul.f32 %v6996_v19, %v4410_v32  ;;  %v6998_v0 = vpop.eup %6997  ;;  %v4236_v32 = vsel %vm1381_vm3, %v9510_v26, 0.0 }
 0x879   : > { %v3563_v24 = vmul.f32 %v6998_v0, %v9716_v2  ;;  %v7000_v33 = vpop.eup %6999  ;;  %v3328_v2 = vsel %vm1381_vm3, %v9532_v57, 0.0  ;;  %v3516_v57 = vpop.f32.mrf.mxu0 }
 0x87a   : > { %v4497_v21 = vpack.c.bf16 %v4465_v22, %v4465_v22  ;;  %v4463_v4 = vmul.f32 %v7000_v33, %v4405_v58  ;;  %v7002_v1 = vpop.eup %7001 }
 0x87b   : > { %v3595_v5 = vpack.c.bf16 %v3563_v24, %v3563_v24 }
 0x87c   : > { %3326 = vadd.xlane.f32.xlu2 %v3325_v23  ;;  %v4495_v8 = vpack.c.bf16 %v4463_v4, %v4463_v4 }
 0x880   : > { %3323 = vadd.xlane.f32.xlu0 %v3322_v61  ;;  %v4415_v61 = vpop.f32.mrf.mxu2 }
 0x881   : > { %v9793_v41 = vpop.f32.mrf.mxu0 }
 0x882   : > { %v4569_v50 = vpop.permute.xlu0 %4568 }
 0x883   : > { %4653 = vst.msk [vmem:[#allocation4 + $0x30] sm:$0xf] %vm4640_vm7, %v4569_v50 }
 0x888   : > { %4225 = vadd.xlane.f32.xlu0 %v4224_v38  ;;  %v3666_v63 = vpop.permute.xlu1 %3665  ;;  %v4418_v0 = vpop.f32.mrf.mxu2 }
 0x889   : > { %3752 = vst.msk [vmem:[#allocation4 + $0x28] sm:$0xf] %vm3741_vm6, %v3666_v63 }
 0x88a   : > { %4651 = vst.msk [vmem:[#allocation4 + $0x28] sm:$0xf] %vm4640_vm7, %v4565_v60  ;;  %v3568_v60 = vmul.f32 %v7002_v1, %v3516_v57 }
 0x88b   : > { %3320 = vadd.xlane.f32.xlu1 %v3319_v36 }
 0x88c   : > { %v3600_v18 = vpack.c.bf16 %v3568_v60, %v3568_v60 }
 0x890   : > { %v4567_v16 = vpop.permute.xlu1 %4566 }
 0x891   : > { %4652 = vst.msk [vmem:[#allocation4 + $0x2c] sm:$0xf] %vm4640_vm7, %v4567_v16  ;;  %v3334_v16 = vsel %vm1381_vm3, %v9594_v14, 0.0 }
 0x894   : > { %3677 = vrot.lane.b32.xlu2 %v3597_v20, %s7155_s28 }
 0x898   : > { %v6297_v17 = vld [vmem:[#allocation4 + $0x28] sm:$0xff] }
 0x899   : > { %6260 = vmatmul.msk.bf16.gmra.mxu3 %vm618_vm0, %v6297_v17 }
 0x89c   : > { %4576 = vrot.lane.b32.xlu0 %v4496_v44, %s7156_s19  ;;  %4578 = vrot.lane.b32.xlu2 %v4497_v21, %s7156_s19  ;;  %v3521_v21 = vpop.f32.mrf.mxu0 }
 0x8a4   : > { %3673 = vrot.lane.b32.xlu1 %v3595_v5, %s7155_s28 }
 0x8ac   : > { %4574 = vrot.lane.b32.xlu1 %v4495_v8, %s7156_s19 }
 0x8ad   : > { %v9776_v47 = vpop.xlane.xlu0 %3317 }
 0x8ae   : > { %v9756_v40 = vpop.xlane.xlu2 %4216 }
 0x8b5   : > { %v9780_v63 = vpop.xlane.xlu0 %4219 }
 0x8b6   : > { %v3676_v43 = vpop.permute.xlu2 %3675 }
 0x8b7   : > { %3757 = vst.msk [vmem:[#allocation4 + $0x3c] sm:$0xf] %vm3741_vm6, %v3676_v43 }
 0x8bb   : > { %v4211_v31 = vpop.xlane.xlu1 %4210 }
 0x8bc   : > { %7003 = vrcp.f32 %v4211_v31  ;;  %v4420_v31 = vpop.f32.mrf.mxu2 }
 0x8bd   : > { %7005 = vrcp.f32 %v9732_v35 }
 0x8be   : > { %7007 = vrcp.f32 %v9724_v28 }
 0x8c2   : > { %v7004_v51 = vpop.eup %7003 }
 0x8c3   : > { %v7006_v30 = vpop.eup %7005  ;;  %v4466_v49 = vmul.f32 %v7004_v51, %v4413_v52 }
 0x8c4   : > { %v4467_v59 = vmul.f32 %v7006_v30, %v4415_v61  ;;  %v7008_v58 = vpop.eup %7007  ;;  %v4423_v52 = vpop.f32.mrf.mxu2 }
 0x8c5   : > { %4228 = vadd.xlane.f32.xlu2 %v4227_v34  ;;  %v4498_v50 = vpack.c.bf16 %v4466_v49, %v4466_v49  ;;  %v3566_v38 = vmul.f32 %v7008_v58, %v3511_v15  ;;  %v3343_v34 = vsel %vm1381_vm3, %v9659_v29, 0.0  ;;  %v3524_v29 = vpop.f32.mrf.mxu0 }
 0x8c6   : > { %3329 = vadd.xlane.f32.xlu0 %v3328_v2  ;;  %v4499_v35 = vpack.c.bf16 %v4467_v59, %v4467_v59  ;;  %v3340_v2 = vsel %vm1381_vm3, %v9657_v46, 0.0 }
 0x8c7   : > { %v3598_v36 = vpack.c.bf16 %v3566_v38, %v3566_v38 }
 0x8c8   : > { %v4573_v27 = vpop.permute.xlu0 %4572 }
 0x8ce   : > { %4231 = vadd.xlane.f32.xlu0 %v4230_v9  ;;  %v4242_v9 = vsel %vm1381_vm3, %v9574_v48, 0.0  ;;  %v4425_v48 = vpop.f32.mrf.mxu2 }
 0x8d3   : > { %v3672_v42 = vpop.permute.xlu1 %3671 }
 0x8d4   : > { %3755 = vst.msk [vmem:[#allocation4 + $0x34] sm:$0xf] %vm3741_vm6, %v3672_v42  ;;  %v3337_v42 = vsel %vm1381_vm3, %v9596_v39, 0.0 }
 0x8d5   : > { %4654 = vst.msk [vmem:[#allocation4 + $0x34] sm:$0xf] %vm4640_vm7, %v4571_v11 }
 0x8d6   : > { %4222 = vadd.xlane.f32.xlu1 %v4221_v3 }
 0x8dc   : > { %v6298_v23 = vld [vmem:[#allocation4 + $0x30] sm:$0xff] }
 0x8dd   : > { %3683 = vrot.lane.b32.xlu2 %v3600_v18, %s7155_s28  ;;  %6261 = vmatmul.msk.bf16.gmra.mxu3 %vm618_vm0, %v6298_v23 }
 0x8e2   : > { %4580 = vrot.lane.b32.xlu0 %v4498_v50, %s7156_s19 }
 0x8e5   : > { %4582 = vrot.lane.b32.xlu2 %v4499_v35, %s7156_s19 }
 0x8ef   : > { %v9782_v6 = vpop.xlane.xlu2 %3326  ;;  %3679 = vrot.lane.b32.xlu1 %v3598_v36, %s7155_s28 }
 0x8f3   : > { %v3324_v28 = vpop.xlane.xlu0 %3323 }
 0x8f7   : > { %v3678_v62 = vpop.permute.xlu2 %3677 }
 0x8f8   : > { %3758 = vst.msk [vmem:[#allocation4 + $0x40] sm:$0xf] %vm3741_vm6, %v3678_v62  ;;  %v4245_v62 = vsel %vm1381_vm3, %v9625_v55, 0.0  ;;  %v4239_v55 = vsel %vm1381_vm3, %v9572_v25, 0.0 }
 0x8fb   : > { %v4226_v10 = vpop.xlane.xlu0 %4225 }
 0x8fe   : > { %v3321_v20 = vpop.xlane.xlu1 %3320 }
 0x8ff   : > { %7009 = vrcp.f32 %v3321_v20  ;;  %v4579_v8 = vpop.permute.xlu2 %4578 }
 0x900   : > { %7011 = vrcp.f32 %v9756_v40 }
 0x901   : > { %7013 = vrcp.f32 %v9730_v37 }
 0x902   : > { %7015 = vrcp.f32 %v3324_v28  ;;  %v3346_v28 = vsel %vm1381_vm3, %v9691_v56, 0.0 }
 0x905   : > { %v7010_v14 = vpop.eup %7009 }
 0x906   : > { %v7012_v44 = vpop.eup %7011  ;;  %v3570_v26 = vmul.f32 %v7010_v14, %v3521_v21 }
 0x907   : > { %v4468_v24 = vmul.f32 %v7012_v44, %v4418_v0  ;;  %v7014_v12 = vpop.eup %7013 }
 0x908   : > { %v3602_v5 = vpack.c.bf16 %v3570_v26, %v3570_v26  ;;  %v3567_v11 = vmul.f32 %v7014_v12, %v9763_v13  ;;  %v7016_v1 = vpop.eup %7015 }
 0x909   : > { %v4500_v33 = vpack.c.bf16 %v4468_v24, %v4468_v24  ;;  %v3571_v3 = vmul.f32 %v7016_v1, %v3524_v29 }
 0x90a   : > { %v3599_v40 = vpack.c.bf16 %v3567_v11, %v3567_v11 }
 0x90b   : > { %v3603_v60 = vpack.c.bf16 %v3571_v3, %v3571_v3 }
 0x90c   : > { %3335 = vadd.xlane.f32.xlu0 %v3334_v16 }
 0x90e   : > { %v4577_v19 = vpop.permute.xlu0 %4576  ;;  %4234 = vadd.xlane.f32.xlu2 %v4233_v54  ;;  %v4428_v54 = vpop.f32.mrf.mxu2 }
 0x90f   : > { %4657 = vst.msk [vmem:[#allocation4 + $0x40] sm:$0xf] %vm4640_vm7, %v4577_v19  ;;  %v4248_v19 = vsel %vm1381_vm3, %v9623_v7, 0.0 }
 0x914   : > { %4237 = vadd.xlane.f32.xlu0 %v4236_v32 }
 0x916   : > { %v3674_v22 = vpop.permute.xlu1 %3673 }
 0x917   : > { %3756 = vst.msk [vmem:[#allocation4 + $0x38] sm:$0xf] %vm3741_vm6, %v3674_v22 }
 0x918   : > { %4655 = vst.msk [vmem:[#allocation4 + $0x38] sm:$0xf] %vm4640_vm7, %v4573_v27  ;;  %v3526_v27 = vpop.f32.mrf.mxu0 }
 0x919   : > { %3332 = vadd.xlane.f32.xlu1 %v3331_v53  ;;  %v9850_v53 = vpop.f32.mrf.mxu2 }
 0x91e   : > { %v4575_v17 = vpop.permute.xlu1 %4574 }
 0x91f   : > { %4656 = vst.msk [vmem:[#allocation4 + $0x3c] sm:$0xf] %vm4640_vm7, %v4575_v17 }
 0x920   : > { %v9841_v20 = vpop.f32.mrf.mxu0 }
 0x926   : > { %3687 = vrot.lane.b32.xlu2 %v3602_v5, %s7155_s28  ;;  %v6299_v4 = vld [vmem:[#allocation4 + $0x38] sm:$0xff]  ;;  %v9855_v5 = vpop.f32.mrf.mxu2 }
 0x927   : > { %6262 = vmatmul.msk.bf16.gmra.mxu3 %vm618_vm0, %v6299_v4 }
 0x928   : > { %4584 = vrot.lane.b32.xlu0 %v4500_v33, %s7156_s19  ;;  %v3531_v14 = vpop.f32.mrf.mxu0 }
 0x930   : > { %v3534_v33 = vpop.f32.mrf.mxu0 }
 0x932   : > { %3681 = vrot.lane.b32.xlu1 %v3599_v40, %s7155_s28 }
 0x938   : > { %v9807_v43 = vpop.xlane.xlu2 %4228  ;;  %v3536_v29 = vpop.f32.mrf.mxu0 }
 0x940   : > { %v3684_v15 = vpop.permute.xlu2 %3683 }
 0x941   : > { %3761 = vst.msk [vmem:[#allocation4 + $0x4c] sm:$0xf] %vm3741_vm6, %v3684_v15 }
 0x948   : > { %v4583_v37 = vpop.permute.xlu2 %4582 }
 0x949   : > { %4660 = vst.msk [vmem:[#allocation4 + $0x4c] sm:$0xf] %vm4640_vm7, %v4583_v37  ;;  %v4223_v13 = vpop.xlane.xlu1 %4222 }
 0x94a   : > { %7017 = vrcp.f32 %v4223_v13 }
 0x94b   : > { %7019 = vrcp.f32 %v4226_v10 }
 0x94c   : > { %7021 = vrcp.f32 %v9776_v47 }
 0x94d   : > { %7023 = vrcp.f32 %v9780_v63  ;;  %v9833_v63 = vpop.xlane.xlu0 %3329 }
 0x94f   : > { %3344 = vadd.xlane.f32.xlu2 %v3343_v34 }
 0x950   : > { %v7018_v46 = vpop.eup %7017 }
 0x951   : > { %v7020_v51 = vpop.eup %7019  ;;  %v4470_v39 = vmul.f32 %v7018_v46, %v4423_v52 }
 0x952   : > { %3341 = vadd.xlane.f32.xlu0 %v3340_v2  ;;  %v4471_v18 = vmul.f32 %v7020_v51, %v4425_v48  ;;  %v7022_v49 = vpop.eup %7021 }
 0x953   : > { %v4502_v23 = vpack.c.bf16 %v4470_v39, %v4470_v39  ;;  %v3569_v59 = vmul.f32 %v7022_v49, %v9793_v41  ;;  %v7024_v47 = vpop.eup %7023 }
 0x954   : > { %v4503_v61 = vpack.c.bf16 %v4471_v18, %v4471_v18  ;;  %v4469_v35 = vmul.f32 %v7024_v47, %v4420_v31  ;;  %v3539_v18 = vpop.f32.mrf.mxu0 }
 0x955   : > { %v3601_v50 = vpack.c.bf16 %v3569_v59, %v3569_v59  ;;  %v9839_v10 = vpop.xlane.xlu0 %4231 }
 0x956   : > { %v4501_v58 = vpack.c.bf16 %v4469_v35, %v4469_v35 }
 0x95a   : > { %4243 = vadd.xlane.f32.xlu0 %v4242_v9 }
 0x95c   : > { %3338 = vadd.xlane.f32.xlu1 %v3337_v42 }
 0x95d   : > { %v4581_v32 = vpop.permute.xlu0 %4580 }
 0x961   : > { %v3680_v57 = vpop.permute.xlu1 %3679 }
 0x962   : > { %3759 = vst.msk [vmem:[#allocation4 + $0x44] sm:$0xf] %vm3741_vm6, %v3680_v57 }
 0x963   : > { %4658 = vst.msk [vmem:[#allocation4 + $0x44] sm:$0xf] %vm4640_vm7, %v4579_v8 }
 0x967   : > { %3689 = vrot.lane.b32.xlu2 %v3603_v60, %s7155_s28 }
 0x96a   : > { %v6300_v30 = vld [vmem:[#allocation4 + $0x40] sm:$0xff] }
 0x96b   : > { %6263 = vmatmul.msk.bf16.gmra.mxu3 %vm618_vm0, %v6300_v30 }
 0x96e   : > { %4588 = vrot.lane.b32.xlu0 %v4502_v23, %s7156_s19 }
 0x96f   : > { %4590 = vrot.lane.b32.xlu2 %v4503_v61, %s7156_s19 }
 0x975   : > { %3685 = vrot.lane.b32.xlu1 %v3601_v50, %s7155_s28 }
 0x97d   : > { %4586 = vrot.lane.b32.xlu1 %v4501_v58, %s7156_s19  ;;  %v3349_v58 = vsel %vm1381_vm3, %v9693_v45, 0.0 }
 0x97f   : > { %v3336_v22 = vpop.xlane.xlu0 %3335 }
 0x981   : > { %v9830_v38 = vpop.xlane.xlu2 %4234 }
 0x987   : > { %v4238_v0 = vpop.xlane.xlu0 %4237 }
 0x989   : > { %v3688_v36 = vpop.permute.xlu2 %3687 }
 0x98a   : > { %3763 = vst.msk [vmem:[#allocation4 + $0x54] sm:$0xf] %vm3741_vm6, %v3688_v36 }
 0x98c   : > { %v3333_v16 = vpop.xlane.xlu1 %3332 }
 0x98d   : > { %7025 = vrcp.f32 %v3333_v16 }
 0x98e   : > { %7027 = vrcp.f32 %v9807_v43  ;;  %v4435_v43 = vpop.f32.mrf.mxu2 }
 0x98f   : > { %7029 = vrcp.f32 %v3336_v22 }
 0x990   : > { %7031 = vrcp.f32 %v9782_v6  ;;  %v9859_v6 = vpop.f32.mrf.mxu3 }
 0x991   : > { %7033 = vrcp.f32 %v4238_v0 }
 0x993   : > { %v7026_v56 = vpop.eup %7025 }
 0x994   : > { %v3574_v7 = vmul.f32 %v7026_v56, %v3531_v14  ;;  %v7028_v17 = vpop.eup %7027 }
 0x995   : > { %v4472_v21 = vmul.f32 %v7028_v17, %v4428_v54  ;;  %v7030_v24 = vpop.eup %7029 }
 0x996   : > { %v3606_v26 = vpack.c.bf16 %v3574_v7, %v3574_v7  ;;  %v3575_v4 = vmul.f32 %v7030_v24, %v3534_v33  ;;  %v7032_v12 = vpop.eup %7031  ;;  %v9868_v48 = vpop.f32.mrf.mxu2 }
 0x997   : > { %v4504_v25 = vpack.c.bf16 %v4472_v21, %v4472_v21  ;;  %v3572_v11 = vmul.f32 %v7032_v12, %v3526_v27  ;;  %v7034_v40 = vpop.eup %7033 }
 0x998   : > { %4246 = vadd.xlane.f32.xlu2 %v4245_v62  ;;  %3347 = vadd.xlane.f32.xlu0 %v3346_v28  ;;  %v3607_v8 = vpack.c.bf16 %v3575_v4, %v3575_v4  ;;  %v4475_v15 = vmul.f32 %v7034_v40, %v4435_v43  ;;  %v9863_v13 = vpop.f32.mrf.mxu3 }
 0x999   : > { %v3604_v37 = vpack.c.bf16 %v3572_v11, %v3572_v11 }
 0x99a   : > { %v4507_v2 = vpack.c.bf16 %v4475_v15, %v4475_v15  ;;  %v4585_v31 = vpop.permute.xlu0 %4584 }
 0x99e   : > { %v4440_v59 = vpop.f32.mrf.mxu2 }
 0x9a0   : > { %4249 = vadd.xlane.f32.xlu0 %v4248_v19  ;;  %v9866_v52 = vpop.f32.mrf.mxu3 }
 0x9a4   : > { %v3682_v41 = vpop.permute.xlu1 %3681 }
 0x9a5   : > { %3760 = vst.msk [vmem:[#allocation4 + $0x48] sm:$0xf] %vm3741_vm6, %v3682_v41 }
 0x9a6   : > { %4659 = vst.msk [vmem:[#allocation4 + $0x48] sm:$0xf] %vm4640_vm7, %v4581_v32 }
 0x9a7   : > { %4240 = vadd.xlane.f32.xlu1 %v4239_v55 }
 0x9a8   : > { %v9871_v39 = vpop.f32.mrf.mxu3 }
 0x9ad   : > { %v6301_v44 = vld [vmem:[#allocation4 + $0x48] sm:$0xff] }
 0x9ae   : > { %6264 = vmatmul.msk.bf16.gmra.mxu3 %vm618_vm0, %v6301_v44 }
 0x9b0   : > { %3695 = vrot.lane.b32.xlu2 %v3606_v26, %s7155_s28  ;;  %v9875_v50 = vpop.f32.mrf.mxu3  ;;  %v4443_v26 = vpop.f32.mrf.mxu2 }
 0x9b4   : > { %4592 = vrot.lane.b32.xlu0 %v4504_v25, %s7156_s19 }
 0x9b8   : > { %v9882_v27 = vpop.f32.mrf.mxu3 }
 0x9bc   : > { %3697 = vrot.lane.b32.xlu0 %v3607_v8, %s7155_s28 }
 0x9c0   : > { %3691 = vrot.lane.b32.xlu1 %v3604_v37, %s7155_s28  ;;  %v9886_v16 = vpop.f32.mrf.mxu3 }
 0x9c2   : > { %v3345_v34 = vpop.xlane.xlu2 %3344 }
 0x9c4   : > { %4598 = vrot.lane.b32.xlu0 %v4507_v2, %s7156_s19 }
 0x9c5   : > { %v3342_v42 = vpop.xlane.xlu0 %3341 }
 0x9c8   : > { %v9891_v41 = vpop.f32.mrf.mxu3 }
 0x9ca   : > { %v3690_v9 = vpop.permute.xlu2 %3689 }
 0x9cb   : > { %3764 = vst.msk [vmem:[#allocation4 + $0x58] sm:$0xf] %vm3741_vm6, %v3690_v9 }
 0x9cd   : > { %v4244_v46 = vpop.xlane.xlu0 %4243 }
 0x9cf   : > { %v3339_v1 = vpop.xlane.xlu1 %3338 }
 0x9d0   : > { %7035 = vrcp.f32 %v3339_v1  ;;  %v9896_v14 = vpop.f32.mrf.mxu3 }
 0x9d1   : > { %7037 = vrcp.f32 %v3342_v42 }
 0x9d2   : > { %7039 = vrcp.f32 %v4244_v46  ;;  %v4591_v55 = vpop.permute.xlu2 %4590 }
 0x9d3   : > { %7041 = vrcp.f32 %v9833_v63 }
 0x9d4   : > { %7043 = vrcp.f32 %v9839_v10 }
 0x9d5   : > { %7045 = vrcp.f32 %v9830_v38 }
 0x9d6   : > { %v7036_v3 = vpop.eup %7035  ;;  %7047 = vrcp.f32 %v3345_v34 }
 0x9d7   : > { %v3576_v57 = vmul.f32 %v7036_v3, %v3536_v29  ;;  %v7038_v51 = vpop.eup %7037 }
 0x9d8   : > { %v3577_v30 = vmul.f32 %v7038_v51, %v3539_v18  ;;  %v7040_v61 = vpop.eup %7039  ;;  %v4879_v25 = vpop.f32.mrf.mxu3  ;;  %v9918_v51 = vld [vmem:[%s11257_s11] ss:$0 sm:$0xff] }
 0x9d9   : > { %v3608_v60 = vpack.c.bf16 %v3576_v57, %v3576_v57  ;;  %v4477_v47 = vmul.f32 %v7040_v61, %v4440_v59  ;;  %v7042_v54 = vpop.eup %7041 }
 0x9da   : > { %v3609_v23 = vpack.c.bf16 %v3577_v30, %v3577_v30  ;;  %v3573_v45 = vmul.f32 %v7042_v54, %v9841_v20  ;;  %v7044_v32 = vpop.eup %7043  ;;  %v4860_v30 = vadd.f32 %v9918_v51, %v9863_v13 }
 0x9db   : > { %3699 = vrot.lane.b32.xlu2 %v3608_v60, %s7155_s28  ;;  %v4509_v36 = vpack.c.bf16 %v4477_v47, %v4477_v47  ;;  %v4473_v63 = vmul.f32 %v7044_v32, %v9850_v53  ;;  %v7046_v22 = vpop.eup %7045  ;;  %v3541_v53 = vpop.f32.mrf.mxu0 }
 0x9dc   : > { %v3605_v19 = vpack.c.bf16 %v3573_v45, %v3573_v45  ;;  %v4474_v20 = vmul.f32 %v7046_v22, %v9855_v5  ;;  %v7048_v17 = vpop.eup %7047  ;;  %v4873_v45 = vadd.f32 %v9918_v51, %v9886_v16  ;;  %v4880_v22 = vadd.f32 %v9918_v51, %v4879_v25 }
 0x9dd   : > { %v4505_v56 = vpack.c.bf16 %v4473_v63, %v4473_v63  ;;  %v3578_v24 = vmul.f32 %v7048_v17, %v3541_v53  ;;  %v11418_v17 = vld [vmem:[#allocation18_spill] sm:$0xff] }
 0x9de   : > { %v4506_v44 = vpack.c.bf16 %v4474_v20, %v4474_v20  ;;  %v11420_v53 = vld [vmem:[#allocation14_spill] sm:$0xff] }
 0x9df   : > { %v3610_v5 = vpack.c.bf16 %v3578_v24, %v3578_v24  ;;  %v11421_v25 = vunpack.c.h.bf16 %v11420_v53 }
 0x9e0   : > { %v4589_v49 = vpop.permute.xlu0 %4588  ;;  %v9904_v40 = vpop.f32.mrf.mxu3 }
 0x9e1   : > { %4663 = vst.msk [vmem:[#allocation4 + $0x58] sm:$0xf] %vm4640_vm7, %v4589_v49 }
 0x9e3   : > { %3701 = vrot.lane.b32.xlu2 %v3609_v23, %s7155_s28  ;;  %v3544_v8 = vpop.f32.mrf.mxu0  ;;  %v11411_v23 = vld [vmem:[#allocation10_spill] sm:$0xff] }
 0x9e4   : > { %v11412_v61 = vunpack.c.h.bf16 %v11411_v23 }
 0x9e6   : > { %v9928_v59 = vadd.f32 %v11412_v61, %v4860_v30  ;;  %v11428_v61 = vld [vmem:[#allocation5_spill] sm:$0xff] }
 0x9e7   : > { %v3686_v35 = vpop.permute.xlu1 %3685 }
 0x9e8   : > { %3762 = vst.msk [vmem:[#allocation4 + $0x50] sm:$0xf] %vm3741_vm6, %v3686_v35  ;;  %v4884_v1 = vpop.f32.mrf.mxu3  ;;  %v4972_v13 = vsel %vm618_vm0, %v9928_v59, 0.0 }
 0x9e9   : > { %4661 = vst.msk [vmem:[#allocation4 + $0x50] sm:$0xf] %vm4640_vm7, %v4585_v31  ;;  %v4445_v31 = vpop.f32.mrf.mxu2 }
 0x9ea   : > { %3350 = vadd.xlane.f32.xlu1 %v3349_v58  ;;  %v4865_v58 = vadd.f32 %v9918_v51, %v9871_v39 }
 0x9eb   : > { %4602 = vrot.lane.b32.xlu2 %v4509_v36, %s7156_s19 }
 0x9ef   : > { %v4587_v62 = vpop.permute.xlu1 %4586 }
 0x9f0   : > { %4662 = vst.msk [vmem:[#allocation4 + $0x54] sm:$0xf] %vm4640_vm7, %v4587_v62  ;;  %v4887_v57 = vpop.f32.mrf.mxu3  ;;  %v11413_v62 = vld [vmem:[#allocation12_spill] sm:$0xff] }
 0x9f1   : > { %v11417_v20 = vunpack.c.l.bf16 %v11413_v62 }
 0x9f7   : > { %v6302_v28 = vld [vmem:[#allocation4 + $0x50] sm:$0xff] }
 0x9f8   : > { %6265 = vmatmul.msk.bf16.gmra.mxu3 %vm618_vm0, %v6302_v28  ;;  %v9924_v49 = vpop.f32.mrf.mxu3  ;;  %v11414_v28 = vunpack.c.h.bf16 %v11413_v62 }
 0x9fa   : > { %v9938_v54 = vadd.f32 %v11414_v28, %v4865_v58 }
 0xa00   : > { %v4892_v36 = vpop.f32.mrf.mxu3 }
 0xa01   : > { %v4893_v62 = vadd.f32 %v9918_v51, %v4892_v36 }
 0xa03   : > { %3693 = vrot.lane.b32.xlu1 %v3605_v19, %s7155_s28  ;;  %v4978_v19 = vsel %vm618_vm0, %v9938_v54, 0.0 }
 0xa08   : > { %v4894_v32 = vpop.f32.mrf.mxu3 }
 0xa0b   : > { %4594 = vrot.lane.b32.xlu1 %v4505_v56, %s7156_s19  ;;  %v4247_v10 = vpop.xlane.xlu2 %4246  ;;  %v3348_v7 = vpop.xlane.xlu0 %3347  ;;  %v4863_v56 = vadd.f32 %v9918_v51, %v9866_v52 }
 0xa0c   : > { %7049 = vrcp.f32 %v4247_v10 }
 0xa0d   : > { %7051 = vrcp.f32 %v3348_v7  ;;  %v9955_v16 = vadd.f32 %v11417_v20, %v4863_v56 }
 0xa0f   : > { %v4975_v52 = vsel %vm618_vm0, %v9955_v16, 0.0 }
 0xa10   : > { %v9957_v7 = vpop.f32.mrf.mxu3 }
 0xa12   : > { %v7050_v21 = vpop.eup %7049 }
 0xa13   : > { %v4478_v0 = vmul.f32 %v7050_v21, %v4443_v26  ;;  %4596 = vrot.lane.b32.xlu1 %v4506_v44, %s7156_s19  ;;  %v3696_v38 = vpop.permute.xlu2 %3695  ;;  %v4250_v4 = vpop.xlane.xlu0 %4249  ;;  %v11419_v44 = vunpack.c.h.bf16 %v11418_v17  ;;  %v4870_v26 = vadd.f32 %v9918_v51, %v9882_v27  ;;  %v4878_v27 = vadd.f32 %v9918_v51, %v9896_v14 }
 0xa14   : > { %3767 = vst.msk [vmem:[#allocation4 + $0x64] sm:$0xf] %vm3741_vm6, %v3696_v38  ;;  %v7052_v12 = vpop.eup %7051 }
 0xa15   : > { %v4510_v33 = vpack.c.bf16 %v4478_v0, %v4478_v0  ;;  %v3579_v43 = vmul.f32 %v7052_v12, %v3544_v8  ;;  %v9961_v21 = vadd.f32 %v11419_v44, %v4880_v22  ;;  %v4888_v0 = vadd.f32 %v9918_v51, %v4887_v57 }
 0xa16   : > { %v9972_v24 = vadd.f32 %v11421_v25, %v4870_v26 }
 0xa17   : > { %4604 = vrot.lane.b32.xlu2 %v4510_v33, %s7156_s19  ;;  %v3611_v37 = vpack.c.bf16 %v3579_v43, %v3579_v43  ;;  %v4996_v38 = vsel %vm618_vm0, %v9961_v21, 0.0  ;;  %v11422_v33 = vld [vmem:[#allocation6_spill] sm:$0xff]  ;;  %v4895_v43 = vadd.f32 %v9918_v51, %v4894_v32 }
 0xa18   : > { %v4899_v12 = vpop.f32.mrf.mxu3 }
 0xa1a   : > { %v4241_v11 = vpop.xlane.xlu1 %4240 }
 0xa1b   : > { %7053 = vrcp.f32 %v4241_v11  ;;  %3703 = vrot.lane.b32.xlu1 %v3610_v5, %s7155_s28  ;;  %v4984_v11 = vsel %vm618_vm0, %v9972_v24, 0.0 }
 0xa1c   : > { %7055 = vrcp.f32 %v4250_v4  ;;  %v11423_v4 = vunpack.c.l.bf16 %v11422_v33 }
 0xa1e   : > { %v9976_v5 = vadd.f32 %v11423_v4, %v4888_v0 }
 0xa21   : > { %v7054_v15 = vpop.eup %7053 }
 0xa22   : > { %v7056_v34 = vpop.eup %7055  ;;  %v4476_v2 = vmul.f32 %v7054_v15, %v9868_v48  ;;  %v5005_v15 = vsel %vm618_vm0, %v9976_v5, 0.0 }
 0xa23   : > { %3705 = vrot.lane.b32.xlu1 %v3611_v37, %s7155_s28  ;;  %v4479_v42 = vmul.f32 %v7056_v34, %v4445_v31  ;;  %v11424_v37 = vunpack.c.l.bf16 %v11418_v17 }
 0xa24   : > { %v4508_v9 = vpack.c.bf16 %v4476_v2, %v4476_v2  ;;  %v11426_v2 = vld [vmem:[#allocation7_spill] sm:$0xff] }
 0xa25   : > { %v4511_v3 = vpack.c.bf16 %v4479_v42, %v4479_v42  ;;  %v9987_v34 = vadd.f32 %v11424_v37, %v4878_v27  ;;  %v11427_v31 = vunpack.c.h.bf16 %v11426_v2  ;;  %v3546_v42 = vpop.f32.mrf.mxu0 }
 0xa26   : > { %v9908_v29 = vpop.permute.xlu0 %4592  ;;  %4600 = vrot.lane.b32.xlu0 %v4508_v9, %s7156_s19 }
 0xa27   : > { %11425 = vst [vmem:[#allocation31_spill] sm:$0xff] %v9987_v34  ;;  %v9991_v14 = vadd.f32 %v11427_v31, %v4895_v43 }
 0xa2b   : > { %4606 = vrot.lane.b32.xlu1 %v4511_v3, %s7156_s19  ;;  %v4885_v3 = vadd.f32 %v9918_v51, %v4884_v1  ;;  %v11430_v1 = vld [vmem:[#allocation9_spill] sm:$0xff] }
 0xa2c   : > { %v11431_v58 = vunpack.c.l.bf16 %v11430_v1 }
 0xa2e   : > { %v3698_v46 = vpop.permute.xlu0 %3697 }
 0xa2f   : > { %3768 = vst.msk [vmem:[#allocation4 + $0x68] sm:$0xf] %vm3741_vm6, %v3698_v46  ;;  %v4993_v46 = vsel %vm618_vm0, %v9987_v34, 0.0 }
 0xa31   : > { %v4902_v57 = vpop.f32.mrf.mxu3 }
 0xa32   : > { %v3692_v60 = vpop.permute.xlu1 %3691 }
 0xa33   : > { %3765 = vst.msk [vmem:[#allocation4 + $0x5c] sm:$0xf] %vm3741_vm6, %v3692_v60 }
 0xa34   : > { %4664 = vst.msk [vmem:[#allocation4 + $0x5c] sm:$0xf] %vm4640_vm7, %v4591_v55  ;;  %v11415_v55 = vld [vmem:[#allocation16_spill] sm:$0xff] }
 0xa35   : > { %v3700_v48 = vpop.permute.xlu2 %3699  ;;  %v11416_v63 = vunpack.c.l.bf16 %v11415_v55 }
 0xa36   : > { %3769 = vst.msk [vmem:[#allocation4 + $0x6c] sm:$0xf] %vm3741_vm6, %v3700_v48  ;;  %v4599_v18 = vpop.permute.xlu0 %4598  ;;  %v4903_v48 = vadd.f32 %v9918_v51, %v4902_v57  ;;  %v4868_v57 = vadd.f32 %v9918_v51, %v9875_v50  ;;  %v4875_v50 = vadd.f32 %v9918_v51, %v9891_v41  ;;  %v4890_v41 = vadd.f32 %v9918_v51, %v9924_v49 }
 0xa37   : > { %4668 = vst.msk [vmem:[#allocation4 + $0x6c] sm:$0xf] %vm4640_vm7, %v4599_v18  ;;  %v9946_v39 = vadd.f32 %v11416_v63, %v4873_v45  ;;  %v5014_v18 = vsel %vm618_vm0, %v9991_v14, 0.0  ;;  %v4900_v63 = vadd.f32 %v9918_v51, %v4899_v12 }
 0xa39   : > { %v4987_v10 = vsel %vm618_vm0, %v9946_v39, 0.0  ;;  %v4904_v56 = vpop.f32.mrf.mxu3 }
 0xa3a   : > { %v4905_v49 = vadd.f32 %v9918_v51, %v4904_v56 }
 0xa3b   : > { %v6303_v47 = vld [vmem:[#allocation4 + $0x58] sm:$0xff] }
 0xa3c   : > { %6266 = vmatmul.msk.bf16.gmra.mxu3 %vm618_vm0, %v6303_v47  ;;  %v11429_v47 = vunpack.c.h.bf16 %v11428_v61 }
 0xa3d   : > { %v3702_v35 = vpop.permute.xlu2 %3701 }
 0xa3e   : > { %3770 = vst.msk [vmem:[#allocation4 + $0x70] sm:$0xf] %vm3741_vm6, %v3702_v35  ;;  %v10001_v35 = vadd.f32 %v11429_v47, %v4885_v3 }
 0xa40   : > { %4973 = vadd.xlane.f32.xlu2 %v4972_v13  ;;  %v10006_v13 = vadd.f32 %v11431_v58, %v4903_v48  ;;  %v5002_v28 = vsel %vm618_vm0, %v10001_v35, 0.0  ;;  %v11442_v48 = vunpack.c.l.bf16 %v11420_v53  ;;  %v11443_v53 = vunpack.c.h.bf16 %v11415_v55 }
 0xa42   : > { %v5023_v45 = vsel %vm618_vm0, %v10006_v13, 0.0  ;;  %v10072_v58 = vadd.f32 %v11443_v53, %v4875_v50 }
 0xa45   : > { %v4603_v3 = vpop.permute.xlu2 %4602 }
 0xa48   : > { %4979 = vadd.xlane.f32.xlu2 %v4978_v19  ;;  %v11432_v19 = vunpack.c.l.bf16 %v11426_v2  ;;  %v4858_v2 = vadd.f32 %v9918_v51, %v9859_v6 }
 0xa4a   : > { %v10015_v32 = vadd.f32 %v11432_v19, %v4893_v62  ;;  %v4883_v62 = vadd.f32 %v9918_v51, %v9904_v40  ;;  %v11444_v19 = vunpack.c.l.bf16 %v11428_v61  ;;  %v11445_v40 = vunpack.c.h.bf16 %v11422_v33 }
 0xa4b   : > { %v11449_v33 = vunpack.c.h.bf16 %v11430_v1 }
 0xa4c   : > { %11433 = vst [vmem:[#allocation32_spill] sm:$0xff] %v10015_v32  ;;  %v5011_v22 = vsel %vm618_vm0, %v10015_v32, 0.0 }
 0xa50   : > { %4988 = vadd.xlane.f32.xlu2 %v4987_v10  ;;  %v11434_v10 = vld [vmem:[#allocation8_spill] sm:$0xff] }
 0xa51   : > { %v11435_v20 = vunpack.c.h.bf16 %v11434_v10 }
 0xa53   : > { %v10025_v17 = vadd.f32 %v11435_v20, %v4900_v63  ;;  %v10080_v63 = vadd.f32 %v11444_v19, %v4883_v62  ;;  %v11447_v20 = vunpack.c.l.bf16 %v11434_v10  ;;  %v11451_v10 = vld [vmem:[#allocation13_spill] sm:$0xff] }
 0xa54   : > { %v11454_v1 = vunpack.c.h.bf16 %v11451_v10  ;;  %v11461_v62 = vld [vmem:[#allocation17_spill] sm:$0xff] }
 0xa55   : > { %4976 = vadd.xlane.f32.xlu1 %v4975_v52  ;;  %11436 = vst [vmem:[#allocation23_spill] sm:$0xff] %v10025_v17  ;;  %v5020_v44 = vsel %vm618_vm0, %v10025_v17, 0.0  ;;  %v4999_v55 = vsel %vm618_vm0, %v10080_v63, 0.0 }
 0xa58   : > { %4997 = vadd.xlane.f32.xlu2 %v4996_v38  ;;  %v11437_v38 = vld [vmem:[#allocation11_spill] sm:$0xff] }
 0xa59   : > { %v11438_v25 = vunpack.c.l.bf16 %v11437_v38  ;;  %v11440_v43 = vunpack.c.h.bf16 %v11437_v38 }
 0xa5d   : > { %4985 = vadd.xlane.f32.xlu1 %v4984_v11  ;;  %v3351_v8 = vpop.xlane.xlu1 %3350 }
 0xa5e   : > { %7057 = vrcp.f32 %v3351_v8 }
 0xa60   : > { %5006 = vadd.xlane.f32.xlu2 %v5005_v15 }
 0xa64   : > { %v7058_v9 = vpop.eup %7057 }
 0xa65   : > { %v3580_v60 = vmul.f32 %v7058_v9, %v3546_v42  ;;  %4994 = vadd.xlane.f32.xlu1 %v4993_v46  ;;  %v11441_v9 = vunpack.c.l.bf16 %v11411_v23 }
 0xa67   : > { %v3612_v30 = vpack.c.bf16 %v3580_v60, %v3580_v60  ;;  %v10050_v42 = vadd.f32 %v11441_v9, %v4858_v2 }
 0xa68   : > { %5015 = vadd.xlane.f32.xlu2 %v5014_v18  ;;  %v10060_v18 = vadd.f32 %v11442_v48, %v4868_v57 }
 0xa69   : > { %3707 = vrot.lane.b32.xlu0 %v3612_v30, %s7155_s28  ;;  %v4969_v46 = vsel %vm618_vm0, %v10050_v42, 0.0 }
 0xa6a   : > { %v4981_v47 = vsel %vm618_vm0, %v10060_v18, 0.0 }
 0xa6d   : > { %5003 = vadd.xlane.f32.xlu1 %v5002_v28  ;;  %v4990_v28 = vsel %vm618_vm0, %v10072_v58, 0.0 }
 0xa70   : > { %5024 = vadd.xlane.f32.xlu2 %v5023_v45 }
 0xa71   : > { %v4605_v23 = vpop.permute.xlu2 %4604 }
 0xa75   : > { %5012 = vadd.xlane.f32.xlu1 %v5011_v22  ;;  %v3694_v36 = vpop.permute.xlu1 %3693  ;;  %v10089_v22 = vadd.f32 %v11445_v40, %v4890_v41  ;;  %v11464_v40 = vunpack.c.h.bf16 %v11461_v62 }
 0xa76   : > { %3766 = vst.msk [vmem:[#allocation4 + $0x60] sm:$0xf] %vm3741_vm6, %v3694_v36  ;;  %v4898_v36 = vadd.f32 %v9918_v51, %v9957_v7 }
 0xa77   : > { %4665 = vst.msk [vmem:[#allocation4 + $0x60] sm:$0xf] %vm4640_vm7, %v9908_v29  ;;  %v5008_v61 = vsel %vm618_vm0, %v10089_v22, 0.0 }
 0xa78   : > { %11446 = vst [vmem:[#allocation22_spill] sm:$0xff] %v10089_v22 }
 0xa7b   : > { %v4907_v26 = vpop.f32.mrf.mxu3 }
 0xa7c   : > { %v4908_v52 = vadd.f32 %v9918_v51, %v4907_v26 }
 0xa7d   : > { %5021 = vadd.xlane.f32.xlu1 %v5020_v44  ;;  %v4595_v0 = vpop.permute.xlu1 %4594  ;;  %v10097_v44 = vadd.f32 %v11447_v20, %v4898_v36 }
 0xa7e   : > { %4666 = vst.msk [vmem:[#allocation4 + $0x64] sm:$0xf] %vm4640_vm7, %v4595_v0  ;;  %v10033_v4 = vadd.f32 %v11438_v25, %v4908_v52  ;;  %v10104_v52 = vadd.f32 %v11449_v33, %v4905_v49  ;;  %v11452_v25 = vunpack.c.l.bf16 %v11451_v10 }
 0xa7f   : > { %11448 = vst [vmem:[#allocation26_spill] sm:$0xff] %v10097_v44  ;;  %v5017_v26 = vsel %vm618_vm0, %v10097_v44, 0.0 }
 0xa80   : > { %11439 = vst [vmem:[#allocation21_spill] sm:$0xff] %v10033_v4  ;;  %v5029_v29 = vsel %vm618_vm0, %v10033_v4, 0.0  ;;  %v5026_v38 = vsel %vm618_vm0, %v10104_v52, 0.0 }
 0xa81   : > { %11450 = vst [vmem:[#allocation34_spill] sm:$0xff] %v10104_v52 }
 0xa83   : > { %v4909_v27 = vpop.f32.mrf.mxu3 }
 0xa84   : > { %v4910_v12 = vadd.f32 %v9918_v51, %v4909_v27 }
 0xa85   : > { %5030 = vadd.xlane.f32.xlu1 %v5029_v29  ;;  %v4597_v11 = vpop.permute.xlu1 %4596  ;;  %v6304_v8 = vld [vmem:[#allocation4 + $0x60] sm:$0xff] }
 0xa86   : > { %4667 = vst.msk [vmem:[#allocation4 + $0x68] sm:$0xf] %vm4640_vm7, %v4597_v11  ;;  %v10041_v15 = vadd.f32 %v11440_v43, %v4910_v12  ;;  %6267 = vmatmul.msk.bf16.gmra.mxu3 %vm618_vm0, %v6304_v8 }
 0xa88   : > { %v5032_v37 = vsel %vm618_vm0, %v10041_v15, 0.0 }
 0xa89   : > { %5033 = vadd.xlane.f32.xlu2 %v5032_v37 }
 0xa8d   : > { %v3704_v31 = vpop.permute.xlu1 %3703  ;;  %v6305_v6 = vld [vmem:[#allocation4 + $0x68] sm:$0xff] }
 0xa8e   : > { %3771 = vst.msk [vmem:[#allocation4 + $0x74] sm:$0xf] %vm3741_vm6, %v3704_v31 }
 0xa8f   : > { %4670 = vst.msk [vmem:[#allocation4 + $0x74] sm:$0xf] %vm4640_vm7, %v4603_v3  ;;  %v11456_v3 = vld [vmem:[#allocation15_spill] sm:$0xff] }
 0xa90   : > { %v11457_v57 = vunpack.c.l.bf16 %v11456_v3 }
 0xa93   : > { %4970 = vadd.xlane.f32.xlu0 %v4969_v46 }
 0xa95   : > { %v3706_v60 = vpop.permute.xlu1 %3705 }
 0xa96   : > { %3772 = vst.msk [vmem:[#allocation4 + $0x78] sm:$0xf] %vm3741_vm6, %v3706_v60  ;;  %6268 = vmatmul.msk.bf16.gmra.mxu3 %vm618_vm0, %v6305_v6 }
 0xa97   : > { %4671 = vst.msk [vmem:[#allocation4 + $0x78] sm:$0xf] %vm4640_vm7, %v4605_v23  ;;  %v11459_v23 = vunpack.c.h.bf16 %v11456_v3 }
 0xa98   : > { %v4601_v30 = vpop.permute.xlu0 %4600 }
 0xa99   : > { %4669 = vst.msk [vmem:[#allocation4 + $0x70] sm:$0xf] %vm4640_vm7, %v4601_v30 }
 0xa9b   : > { %4982 = vadd.xlane.f32.xlu0 %v4981_v47 }
 0xa9d   : > { %v4607_v37 = vpop.permute.xlu1 %4606 }
 0xaa0   : > { %v6306_v45 = vld [vmem:[#allocation4 + $0x70] sm:$0xff] }
 0xaa3   : > { %4991 = vadd.xlane.f32.xlu0 %v4990_v28  ;;  %v11462_v28 = vunpack.c.l.bf16 %v11461_v62  ;;  %v5122_v62 = vmul.f32 %v10006_v13, %v10006_v13 }
 0xaa6   : > { %6269 = vmatmul.msk.bf16.gmra.mxu3 %vm618_vm0, %v6306_v45 }
 0xaab   : > { %5000 = vadd.xlane.f32.xlu0 %v4999_v55 }
 0xab3   : > { %5009 = vadd.xlane.f32.xlu0 %v5008_v61 }
 0xabb   : > { %5018 = vadd.xlane.f32.xlu0 %v5017_v26  ;;  %v11466_v26 = vld [vmem:[#allocation19_spill] sm:$0xff] }
 0xabc   : > { %v11467_v33 = vunpack.c.l.bf16 %v11466_v26 }
 0xabf   : > { %v4912_v0 = vpop.f32.mrf.mxu3 }
 0xac0   : > { %v4913_v7 = vadd.f32 %v9918_v51, %v4912_v0 }
 0xac2   : > { %v10111_v27 = vadd.f32 %v11452_v25, %v4913_v7  ;;  %v11469_v25 = vunpack.c.h.bf16 %v11466_v26  ;;  %v5125_v26 = vmul.f32 %v10041_v15, %v10041_v15 }
 0xac3   : > { %5027 = vadd.xlane.f32.xlu0 %v5026_v38 }
 0xac4   : > { %11453 = vst [vmem:[#allocation27_spill] sm:$0xff] %v10111_v27  ;;  %v5035_v12 = vsel %vm618_vm0, %v10111_v27, 0.0 }
 0xac7   : > { %v4914_v56 = vpop.f32.mrf.mxu3 }
 0xac8   : > { %v4915_v29 = vadd.f32 %v9918_v51, %v4914_v56 }
 0xaca   : > { %v10118_v11 = vadd.f32 %v11454_v1, %v4915_v29 }
 0xacb   : > { %5036 = vadd.xlane.f32.xlu0 %v5035_v12  ;;  %v5104_v12 = vmul.f32 %v10050_v42, %v10050_v42 }
 0xacc   : > { %11455 = vst [vmem:[#allocation28_spill] sm:$0xff] %v10118_v11  ;;  %v5038_v8 = vsel %vm618_vm0, %v10118_v11, 0.0 }
 0xacd   : > { %5039 = vadd.xlane.f32.xlu1 %v5038_v8  ;;  %v5136_v1 = vsel %vm618_vm0, %v5104_v12, 0.0  ;;  %v5107_v8 = vmul.f32 %v9938_v54, %v9938_v54  ;;  %v5108_v12 = vmul.f32 %v10060_v18, %v10060_v18 }
 0xadb   : > { %v3708_v43 = vpop.permute.xlu0 %3707 }
 0xadc   : > { %3773 = vst.msk [vmem:[#allocation4 + $0x7c] sm:$0xf] %vm3741_vm6, %v3708_v43  ;;  %v5145_v43 = vsel %vm618_vm0, %v5107_v8, 0.0 }
 0xadd   : > { %4672 = vst.msk [vmem:[#allocation4 + $0x7c] sm:$0xf] %vm4640_vm7, %v4607_v37  ;;  %v5110_v37 = vmul.f32 %v9946_v39, %v9946_v39 }
 0xae4   : > { %v6307_v2 = vld [vmem:[#allocation4 + $0x78] sm:$0xff] }
 0xae5   : > { %6270 = vmatmul.msk.bf16.gmra.mxu3 %vm618_vm0, %v6307_v2  ;;  %v5154_v2 = vsel %vm618_vm0, %v5110_v37, 0.0 }
 0xb09   : > { %v4917_v31 = vpop.f32.mrf.mxu3 }
 0xb0a   : > { %v4918_v9 = vadd.f32 %v9918_v51, %v4917_v31  ;;  %v5113_v31 = vmul.f32 %v9961_v21, %v9961_v21 }
 0xb0c   : > { %v10128_v46 = vadd.f32 %v11457_v57, %v4918_v9  ;;  %v10178_v9 = vpop.xlane.xlu1 %4976  ;;  %v5163_v3 = vsel %vm618_vm0, %v5113_v31, 0.0  ;;  %v5116_v57 = vmul.f32 %v9976_v5, %v9976_v5  ;;  %v5109_v31 = vmul.f32 %v9972_v24, %v9972_v24 }
 0xb0e   : > { %11458 = vst [vmem:[#allocation29_spill] sm:$0xff] %v10128_v46  ;;  %v5041_v60 = vsel %vm618_vm0, %v10128_v46, 0.0 }
 0xb0f   : > { %5042 = vadd.xlane.f32.xlu2 %v5041_v60  ;;  %v5172_v60 = vsel %vm618_vm0, %v5116_v57, 0.0 }
 0xb11   : > { %v4919_v6 = vpop.f32.mrf.mxu3 }
 0xb12   : > { %v4920_v48 = vadd.f32 %v9918_v51, %v4919_v6 }
 0xb14   : > { %v10135_v30 = vadd.f32 %v11459_v23, %v4920_v48  ;;  %v10184_v6 = vpop.xlane.xlu1 %4985  ;;  %v5119_v48 = vmul.f32 %v9991_v14, %v9991_v14 }
 0xb16   : > { %11460 = vst [vmem:[#allocation30_spill] sm:$0xff] %v10135_v30  ;;  %v5044_v50 = vsel %vm618_vm0, %v10135_v30, 0.0  ;;  %v5181_v23 = vsel %vm618_vm0, %v5119_v48, 0.0  ;;  %v5151_v48 = vsel %vm618_vm0, %v5109_v31, 0.0 }
 0xb17   : > { %5045 = vadd.xlane.f32.xlu0 %v5044_v50 }
 0xb19   : > { %v4922_v47 = vpop.f32.mrf.mxu3 }
 0xb1a   : > { %v4923_v53 = vadd.f32 %v9918_v51, %v4922_v47 }
 0xb1c   : > { %v10142_v45 = vadd.f32 %v11462_v28, %v4923_v53  ;;  %v10190_v53 = vpop.xlane.xlu1 %4994  ;;  %v11471_v28 = vld [vmem:[#allocation20_spill] sm:$0xff] }
 0xb1e   : > { %11463 = vst [vmem:[#allocation33_spill] sm:$0xff] %v10142_v45  ;;  %v5047_v19 = vsel %vm618_vm0, %v10142_v45, 0.0 }
 0xb1f   : > { %5048 = vadd.xlane.f32.xlu1 %v5047_v19  ;;  %v11472_v19 = vunpack.c.l.bf16 %v11471_v28 }
 0xb21   : > { %v4924_v41 = vpop.f32.mrf.mxu3 }
 0xb22   : > { %v4925_v55 = vadd.f32 %v9918_v51, %v4924_v41 }
 0xb24   : > { %v10149_v36 = vadd.f32 %v11464_v40, %v4925_v55  ;;  %v5190_v40 = vsel %vm618_vm0, %v5122_v62, 0.0  ;;  %v5112_v62 = vmul.f32 %v9987_v34, %v9987_v34 }
 0xb26   : > { %11465 = vst [vmem:[#allocation24_spill] sm:$0xff] %v10149_v36  ;;  %v5050_v61 = vsel %vm618_vm0, %v10149_v36, 0.0  ;;  %v5131_v57 = vmul.f32 %v10149_v36, %v10149_v36 }
 0xb27   : > { %5051 = vadd.xlane.f32.xlu2 %v5050_v61 }
 0xb29   : > { %v4927_v20 = vpop.f32.mrf.mxu3 }
 0xb2a   : > { %v4928_v49 = vadd.f32 %v9918_v51, %v4927_v20 }
 0xb2c   : > { %v10156_v0 = vadd.f32 %v11467_v33, %v4928_v49  ;;  %v5105_v49 = vmul.f32 %v9928_v59, %v9928_v59  ;;  %v11474_v33 = vunpack.c.h.bf16 %v11471_v28  ;;  %v5114_v28 = vmul.f32 %v10080_v63, %v10080_v63 }
 0xb2e   : > { %11468 = vst [vmem:[#allocation25_spill] sm:$0xff] %v10156_v0  ;;  %v5053_v7 = vsel %vm618_vm0, %v10156_v0, 0.0 }
 0xb2f   : > { %5054 = vadd.xlane.f32.xlu0 %v5053_v7 }
 0xb31   : > { %v4929_v38 = vpop.f32.mrf.mxu3 }
 0xb32   : > { %v4930_v10 = vadd.f32 %v9918_v51, %v4929_v38  ;;  %v10210_v38 = vpop.xlane.xlu1 %5003 }
 0xb34   : > { %v10163_v56 = vadd.f32 %v11469_v25, %v4930_v10  ;;  %v5139_v25 = vsel %vm618_vm0, %v5105_v49, 0.0 }
 0xb36   : > { %11470 = vst [vmem:[#allocation10_spill] sm:$0xff] %v10163_v56  ;;  %v5056_v29 = vsel %vm618_vm0, %v10163_v56, 0.0 }
 0xb37   : > { %5057 = vadd.xlane.f32.xlu1 %v5056_v29  ;;  %v5106_v29 = vmul.f32 %v9955_v16, %v9955_v16 }
 0xb39   : > { %v5142_v8 = vsel %vm618_vm0, %v5106_v29, 0.0 }
 0xb3a   : > { %v10224_v37 = vpop.xlane.xlu1 %5012 }
 0xb3f   : > { %5137 = vadd.xlane.f32.xlu1 %v5136_v1  ;;  %v5128_v1 = vmul.f32 %v10128_v46, %v10128_v46 }
 0xb47   : > { %5146 = vadd.xlane.f32.xlu1 %v5145_v43  ;;  %v5148_v43 = vsel %vm618_vm0, %v5108_v12, 0.0 }
 0xb4f   : > { %5155 = vadd.xlane.f32.xlu1 %v5154_v2  ;;  %v5208_v2 = vsel %vm618_vm0, %v5128_v1, 0.0 }
 0xb57   : > { %5164 = vadd.xlane.f32.xlu1 %v5163_v3  ;;  %v5111_v3 = vmul.f32 %v10072_v58, %v10072_v58 }
 0xb5f   : > { %5173 = vadd.xlane.f32.xlu1 %v5172_v60  ;;  %v10233_v60 = vpop.xlane.xlu2 %4973 }
 0xb67   : > { %5182 = vadd.xlane.f32.xlu1 %v5181_v23  ;;  %v5157_v23 = vsel %vm618_vm0, %v5111_v3, 0.0  ;;  %v4980_v49 = vpop.xlane.xlu2 %4979 }
 0xb68   : > { %v4932_v50 = vpop.f32.mrf.mxu3 }
 0xb69   : > { %v4933_v47 = vadd.f32 %v9918_v51, %v4932_v50  ;;  %v5217_v50 = vsel %vm618_vm0, %v5131_v57, 0.0 }
 0xb6b   : > { %v10196_v41 = vadd.f32 %v11472_v19, %v4933_v47  ;;  %v10238_v47 = vpop.xlane.xlu1 %5021 }
 0xb6d   : > { %11473 = vst [vmem:[#allocation12_spill] sm:$0xff] %v10196_v41  ;;  %v5059_v55 = vsel %vm618_vm0, %v10196_v41, 0.0  ;;  %v5134_v19 = vmul.f32 %v10196_v41, %v10196_v41 }
 0xb6e   : > { %5060 = vadd.xlane.f32.xlu2 %v5059_v55  ;;  %v4971_v55 = vpop.xlane.xlu0 %4970 }
 0xb6f   : > { %5191 = vadd.xlane.f32.xlu1 %v5190_v40  ;;  %v5160_v40 = vsel %vm618_vm0, %v5112_v62, 0.0  ;;  %v4989_v1 = vpop.xlane.xlu2 %4988  ;;  %v5123_v62 = vmul.f32 %v10104_v52, %v10104_v52 }
 0xb70   : > { %v4934_v61 = vpop.f32.mrf.mxu3 }
 0xb71   : > { %v4935_v20 = vadd.f32 %v9918_v51, %v4934_v61  ;;  %v5199_v51 = vsel %vm618_vm0, %v5125_v26, 0.0  ;;  %v5166_v61 = vsel %vm618_vm0, %v5114_v28, 0.0  ;;  %v5115_v26 = vmul.f32 %v10001_v35, %v10001_v35 }
 0xb73   : > { %v10208_v7 = vadd.f32 %v11474_v33, %v4935_v20  ;;  %v5226_v20 = vsel %vm618_vm0, %v5134_v19, 0.0  ;;  %v5117_v33 = vmul.f32 %v10089_v22, %v10089_v22  ;;  %v5169_v29 = vsel %vm618_vm0, %v5115_v26, 0.0 }
 0xb75   : > { %11475 = vst [vmem:[#allocation16_spill] sm:$0xff] %v10208_v7  ;;  %v5062_v10 = vsel %vm618_vm0, %v10208_v7, 0.0  ;;  %v5175_v12 = vsel %vm618_vm0, %v5117_v33, 0.0 }
 0xb76   : > { %5063 = vadd.xlane.f32.xlu0 %v5062_v10  ;;  %5140 = vadd.xlane.f32.xlu2 %v5139_v25  ;;  %v10253_v10 = vpop.xlane.xlu1 %5030  ;;  %v7157_v25 = vmov 32.0  }
 0xb77   : > { %5200 = vadd.xlane.f32.xlu1 %v5199_v51  ;;  %7059 = vrcp.f32 %v7157_v25  ;;  %v10255_v51 = vpop.xlane.xlu0 %4982  ;;  %v5124_v25 = vmul.f32 %v10033_v4, %v10033_v4 }
 0xb7d   : > { %v7060_v31 = vpop.eup %7059 }
 0xb7e   : > { %5143 = vadd.xlane.f32.xlu0 %v5142_v8  ;;  %5149 = vadd.xlane.f32.xlu2 %v5148_v43  ;;  %v5118_v8 = vmul.f32 %v10015_v32, %v10015_v32  ;;  %v5120_v43 = vmul.f32 %v10097_v44, %v10097_v44  ;;  %vm5070_vm8 = vweird.f32 %v7060_v31 }
 0xb7f   : > { %5209 = vadd.xlane.f32.xlu1 %v5208_v2  ;;  %v10263_v2 = vpop.xlane.xlu1 %5039 }
 0xb80   : > { %v5178_v3 = vsel %vm618_vm0, %v5118_v8, 0.0  ;;  %v5184_v57 = vsel %vm618_vm0, %v5120_v43, 0.0 }
 0xb86   : > { %5152 = vadd.xlane.f32.xlu0 %v5151_v48  ;;  %5158 = vadd.xlane.f32.xlu2 %v5157_v23  ;;  %v5066_v48 = vmul.f32 32.0, %v7060_v31  ;;  %v10267_v23 = vpop.xlane.xlu0 %4991 }
 0xb87   : > { %5218 = vadd.xlane.f32.xlu1 %v5217_v50  ;;  %v5121_v50 = vmul.f32 %v10025_v17, %v10025_v17 }
 0xb88   : > { %v5067_v28 = vsub.f32 1.0, %v5066_v48 }
 0xb8a   : > { %v5068_v26 = vmul.f32 %v7060_v31, %v5067_v28  ;;  %v5129_v28 = vmul.f32 %v10135_v30, %v10135_v30  ;;  %v5130_v30 = vmul.f32 %v10142_v45, %v10142_v45 }
 0xb8e   : > { %5161 = vadd.xlane.f32.xlu0 %v5160_v40  ;;  %5167 = vadd.xlane.f32.xlu2 %v5166_v61  ;;  %v10275_v40 = vpop.xlane.xlu2 %4997  ;;  %v5187_v61 = vsel %vm618_vm0, %v5121_v50, 0.0  ;;  %v10279_v33 = vpop.xlane.xlu0 %5000 }
 0xb8f   : > { %5227 = vadd.xlane.f32.xlu1 %v5226_v20  ;;  %v5193_v20 = vsel %vm618_vm0, %v5123_v62, 0.0  ;;  %v5127_v62 = vmul.f32 %v10118_v11, %v10118_v11 }
 0xb92   : > { %v10273_v19 = vpop.xlane.xlu1 %5048 }
 0xb93   : > { %11476 = vst [vmem:[#allocation18_spill] sm:$0xff] %v10273_v19 }
 0xb96   : > { %5170 = vadd.xlane.f32.xlu0 %v5169_v29  ;;  %5176 = vadd.xlane.f32.xlu2 %v5175_v12  ;;  %v5126_v29 = vmul.f32 %v10111_v27, %v10111_v27  ;;  %v5069_v12 = vadd.f32 %v7060_v31, %v5068_v26  ;;  %v10287_v43 = vpop.xlane.xlu2 %5006  ;;  %v10302_v26 = vpop.xlane.xlu0 %5009 }
 0xb98   : > { %v10291_v48 = vsel %vm5070_vm8, %v7060_v31, %v5069_v12 }
 0xb99   : > { %v10294_v50 = vmul.f32 %v10291_v48, %v4971_v55  ;;  %v5211_v55 = vsel %vm618_vm0, %v5129_v28, 0.0  ;;  %v10308_v12 = vmul.f32 %v10291_v48, %v4980_v49  ;;  %v10324_v45 = vmul.f32 %v10291_v48, %v4989_v1 }
 0xb9a   : > { %v10557_v4 = vmul.f32 %v10291_v48, %v10302_v26 }
 0xb9c   : > { %11486 = vst [vmem:[#allocation17_spill] sm:$0xff] %v10557_v4 }
 0xb9e   : > { %5179 = vadd.xlane.f32.xlu0 %v5178_v3  ;;  %5185 = vadd.xlane.f32.xlu2 %v5184_v57  ;;  %v5196_v3 = vsel %vm618_vm0, %v5124_v25, 0.0  ;;  %v5202_v57 = vsel %vm618_vm0, %v5126_v29, 0.0  ;;  %v5205_v29 = vsel %vm618_vm0, %v5127_v62, 0.0  ;;  %v5267_v62 = vmul.f32 %v10308_v12, %v10308_v12 }
 0xba6   : > { %5188 = vadd.xlane.f32.xlu0 %v5187_v61  ;;  %5194 = vadd.xlane.f32.xlu2 %v5193_v20  ;;  %v5264_v20 = vmul.f32 %v10294_v50, %v10294_v50 }
 0xbaa   : > { %v10285_v8 = vpop.xlane.xlu1 %5057 }
 0xbab   : > { %11477 = vst [vmem:[#allocation14_spill] sm:$0xff] %v10285_v8 }
 0xbae   : > { %5197 = vadd.xlane.f32.xlu0 %v5196_v3  ;;  %5203 = vadd.xlane.f32.xlu2 %v5202_v57  ;;  %v10310_v3 = vpop.xlane.xlu2 %5015 }
 0xbb2   : > { %v5138_v61 = vpop.xlane.xlu1 %5137 }
 0xbb3   : > { %v5232_v31 = vmul.f32 %v5138_v61, %v10291_v48  ;;  %v5132_v61 = vmul.f32 %v10156_v0, %v10156_v0 }
 0xbb5   : > { %v5296_v25 = vsub.f32 %v5232_v31, %v5264_v20  ;;  %v10319_v31 = vpop.xlane.xlu0 %5018 }
 0xbb6   : > { %5206 = vadd.xlane.f32.xlu0 %v5205_v29  ;;  %5212 = vadd.xlane.f32.xlu2 %v5211_v55  ;;  %v5214_v29 = vsel %vm618_vm0, %v5130_v30, 0.0  ;;  %v10326_v41 = vpop.xlane.xlu2 %5024 }
 0xbb7   : > { %v5360_v57 = vadd.f32 1e-05, %v5296_v25  ;;  %v5220_v25 = vsel %vm618_vm0, %v5132_v61, 0.0  ;;  %v5270_v61 = vmul.f32 %v10324_v45, %v10324_v45 }
 0xbb9   : > { %7061 = vrsqrt.f32 %v5360_v57  ;;  %vm5398_vm10 = vweird.f32 %v5360_v57 }
 0xbba   : > { %v5147_v20 = vpop.xlane.xlu1 %5146 }
 0xbbb   : > { %v5235_v28 = vmul.f32 %v5147_v20, %v10291_v48  ;;  %v5133_v20 = vmul.f32 %v10163_v56, %v10163_v56 }
 0xbbd   : > { %v5299_v49 = vsub.f32 %v5235_v28, %v5267_v62  ;;  %v5135_v62 = vmul.f32 %v10208_v7, %v10208_v7  ;;  %v10341_v7 = vpop.xlane.xlu0 %5027 }
 0xbbe   : > { %5215 = vadd.xlane.f32.xlu0 %v5214_v29  ;;  %5221 = vadd.xlane.f32.xlu2 %v5220_v25 }
 0xbbf   : > { %v7062_v55 = vpop.eup %7061  ;;  %v5363_v0 = vadd.f32 1e-05, %v5299_v49  ;;  %v5223_v49 = vsel %vm618_vm0, %v5133_v20, 0.0  ;;  %v5229_v36 = vsel %vm618_vm0, %v5135_v62, 0.0  ;;  %v10345_v20 = vpop.xlane.xlu2 %5033  ;;  %v5328_v62 = vsub.f32 %v10050_v42, %v10294_v50 }
 0xbc0   : > { %v5393_v11 = vmul.f32 %v7062_v55, %v5360_v57  ;;  %vm5399_vm9 = vweird.f32 %v7062_v55  ;;  %v10361_v57 = vld [vmem:[%s11259_s13] ss:$0 sm:$0xff] }
 0xbc1   : > { %7063 = vrsqrt.f32 %v5363_v0  ;;  %vm5400_vm11 = vmor %vm5398_vm10, %vm5399_vm9  ;;  %vm5428_vm13 = vweird.f32 %v5363_v0 }
 0xbc2   : > { %v5394_v30 = vmul.f32 %v7062_v55, %v5393_v11  ;;  %v5156_v28 = vpop.xlane.xlu1 %5155  ;;  %v10339_v11 = vmul.f32 %v10291_v48, %v10275_v40 }
 0xbc3   : > { %v5238_v29 = vmul.f32 %v5156_v28, %v10291_v48 }
 0xbc4   : > { %v5395_v1 = vmul.f32 0.5, %v5394_v30 }
 0xbc5   : > { %v5302_v25 = vsub.f32 %v5238_v29, %v5270_v61 }
 0xbc6   : > { %v5396_v8 = vsub.f32 1.5, %v5395_v1  ;;  %5224 = vadd.xlane.f32.xlu0 %v5223_v49  ;;  %5230 = vadd.xlane.f32.xlu2 %v5229_v36  ;;  %v10352_v36 = vld [vmem:[%s11258_s12] ss:$0 sm:$0xff] }
 0xbc7   : > { %v7064_v56 = vpop.eup %7063  ;;  %v10343_v46 = vadd.f32 1e-05, %v5302_v25 }
 0xbc8   : > { %v5397_v30 = vmul.f32 %v7062_v55, %v5396_v8  ;;  %v5423_v28 = vmul.f32 %v7064_v56, %v5363_v0  ;;  %v5273_v8 = vmul.f32 %v10339_v11, %v10339_v11  ;;  %vm5429_vm12 = vweird.f32 %v7064_v56 }
 0xbc9   : > { %7065 = vrsqrt.f32 %v10343_v46  ;;  %vm5430_vm14 = vmor %vm5428_vm13, %vm5429_vm12  ;;  %vm5458_vm1 = vweird.f32 %v10343_v46 }
 0xbca   : > { %v5401_v40 = vsel %vm5400_vm11, %v7062_v55, %v5397_v30  ;;  %v5424_v61 = vmul.f32 %v7064_v56, %v5423_v28  ;;  %v5165_v29 = vpop.xlane.xlu1 %5164  ;;  %v10372_v55 = vmul.f32 %v10291_v48, %v10233_v60 }
 0xbcb   : > { %v5712_v42 = vmul.f32 %v5401_v40, %v5328_v62  ;;  %v5241_v50 = vmul.f32 %v5165_v29, %v10291_v48  ;;  %v10376_v62 = vmul.f32 %v10291_v48, %v10287_v43  ;;  %v10383_v29 = vmul.f32 %v10291_v48, %v10178_v9  ;;  %v10392_v43 = vpop.xlane.xlu0 %5036 }
 0xbcc   : > { %v5425_v1 = vmul.f32 0.5, %v5424_v61  ;;  %v10401_v0 = vmul.f32 %v10372_v55, %v10372_v55 }
 0xbcd   : > { %v5747_v25 = vmul.f32 %v10352_v36, %v5712_v42  ;;  %v5305_v49 = vsub.f32 %v5241_v50, %v5273_v8  ;;  %v5331_v42 = vsub.f32 %v9938_v54, %v10308_v12  ;;  %v10390_v50 = vmul.f32 %v10291_v48, %v10184_v6 }
 0xbce   : > { %v5426_v30 = vsub.f32 1.5, %v5425_v1  ;;  %v10394_v1 = vpop.xlane.xlu2 %5042  ;;  %v10412_v19 = vmul.f32 %v10383_v29, %v10383_v29 }
 0xbcf   : > { %v7066_v28 = vpop.eup %7065  ;;  %v5782_v40 = vadd.f32 %v10361_v57, %v5747_v25  ;;  %v10379_v61 = vadd.f32 1e-05, %v5305_v49  ;;  %11478 = vst [vmem:[#allocation6_spill] sm:$0xff] %v10390_v50  ;;  %v5334_v25 = vsub.f32 %v9946_v39, %v10324_v45  ;;  %v5276_v49 = vmul.f32 %v10376_v62, %v10376_v62 }
 0xbd0   : > { %v5427_v8 = vmul.f32 %v7064_v56, %v5426_v30  ;;  %v5453_v60 = vmul.f32 %v7066_v28, %v10343_v46  ;;  %11479 = vst [vmem:[#allocation7_spill] sm:$0xff] %v10394_v1  ;;  %v10420_v39 = vmul.f32 %v10390_v50, %v10390_v50  ;;  %v10424_v45 = vmul.f32 %v10291_v48, %v10190_v53 }
 0xbd1   : > { %5814 = vst.msk [vmem:[%s10368_s21] sm:$0xff] %vm618_vm0, %v5782_v40  ;;  %7067 = vrsqrt.f32 %v10379_v61  ;;  %vm5459_vm15 = vweird.f32 %v7066_v28  ;;  %v10439_v53 = vmul.f32 %v10291_v48, %v10210_v38  ;;  %v10502_v50 = vmul.f32 %v10291_v48, %v10345_v20 }
 0xbd2   : > { %v5431_v9 = vsel %vm5430_vm14, %v7064_v56, %v5427_v8  ;;  %v5454_v12 = vmul.f32 %v7066_v28, %v5453_v60  ;;  %v5174_v6 = vpop.xlane.xlu1 %5173  ;;  %11480 = vst [vmem:[#allocation5_spill] sm:$0xff] %v10424_v45  ;;  %vm5460_vm2 = vmor %vm5458_vm1, %vm5459_vm15  ;;  %v10520_v20 = vmul.f32 %v10291_v48, %v10267_v23  ;;  %vm5488_vm4 = vweird.f32 %v10379_v61 }
 0xbd3   : > { %v5715_v30 = vmul.f32 %v5431_v9, %v5331_v42  ;;  %v5244_v40 = vmul.f32 %v5174_v6, %v10291_v48  ;;  %v10431_v6 = vmul.f32 %v10291_v48, %v10310_v3  ;;  %11481 = vst [vmem:[#allocation9_spill] sm:$0xff] %v10439_v53  ;;  %v10446_v3 = vmul.f32 %v10291_v48, %v10326_v41 }
 0xbd4   : > { %v5455_v8 = vmul.f32 0.5, %v5454_v12  ;;  %v10453_v9 = vmul.f32 %v10424_v45, %v10424_v45  ;;  %v10476_v56 = vmul.f32 %v10439_v53, %v10439_v53 }
 0xbd5   : > { %v5750_v60 = vmul.f32 %v10352_v36, %v5715_v30  ;;  %v5308_v42 = vsub.f32 %v5244_v40, %v5276_v49  ;;  %v5279_v46 = vmul.f32 %v10431_v6, %v10431_v6  ;;  %v11500_v27 = vsub.f32 %v9991_v14, %v10431_v6 }
 0xbd6   : > { %v5456_v1 = vsub.f32 1.5, %v5455_v8  ;;  %v10463_v41 = vpop.xlane.xlu2 %5051 }
 0xbd7   : > { %v10433_v12 = vpop.eup %7067  ;;  %v5785_v49 = vadd.f32 %v10361_v57, %v5750_v60  ;;  %v10442_v30 = vadd.f32 1e-05, %v5308_v42  ;;  %v10459_v60 = vmul.f32 %v10291_v48, %v10224_v37  ;;  %v10461_v42 = vpop.xlane.xlu0 %5045 }
 0xbd8   : > { %v5457_v40 = vmul.f32 %v7066_v28, %v5456_v1  ;;  %v5483_v8 = vmul.f32 %v10433_v12, %v10379_v61  ;;  %vm5489_vm3 = vweird.f32 %v10433_v12  ;;  %v10545_v61 = vmul.f32 %v10502_v50, %v10502_v50 }
 0xbd9   : > { %11482 = vst [vmem:[#allocation8_spill] sm:$0xff] %v10459_v60  ;;  %7069 = vrsqrt.f32 %v10442_v30  ;;  %v10491_v1 = vmul.f32 %v10459_v60, %v10459_v60  ;;  %vm5490_vm5 = vmor %vm5488_vm4, %vm5489_vm3  ;;  %vm5518_vm7 = vweird.f32 %v10442_v30 }
 0xbda   : > { %5817 = vst.msk [vmem:[%s10368_s21 + $0x18] sm:$0xff] %vm618_vm0, %v5785_v49  ;;  %v5461_v38 = vsel %vm5460_vm2, %v7066_v28, %v5457_v40  ;;  %v5484_v37 = vmul.f32 %v10433_v12, %v5483_v8  ;;  %v5183_v54 = vpop.xlane.xlu1 %5182  ;;  %v10480_v49 = vmul.f32 %v10291_v48, %v10238_v47  ;;  %v5282_v28 = vmul.f32 %v10446_v3, %v10446_v3 }
 0xbdb   : > { %v5718_v45 = vmul.f32 %v5461_v38, %v5334_v25  ;;  %v5247_v34 = vmul.f32 %v5183_v54, %v10291_v48  ;;  %v10495_v47 = vmul.f32 %v10291_v48, %v10253_v10 }
 0xbdc   : > { %11483 = vst [vmem:[#allocation11_spill] sm:$0xff] %v10480_v49  ;;  %v5485_v8 = vmul.f32 0.5, %v5484_v37  ;;  %v10509_v10 = vmul.f32 %v10480_v49, %v10480_v49  ;;  %v11487_v49 = vsub.f32 %v9961_v21, %v10339_v11  ;;  %v10577_v21 = vmul.f32 %v10291_v48, %v10319_v31 }
 0xbdd   : > { %11484 = vst [vmem:[#allocation13_spill] sm:$0xff] %v10495_v47  ;;  %v5753_v54 = vmul.f32 %v10352_v36, %v5718_v45  ;;  %v5311_v25 = vsub.f32 %v5247_v34, %v5279_v46  ;;  %v10513_v34 = vmul.f32 %v10291_v48, %v10255_v51  ;;  %v10530_v51 = vmul.f32 %v10495_v47, %v10495_v47 }
 0xbde   : > { %v5486_v37 = vsub.f32 1.5, %v5485_v8  ;;  %11488 = vst [vmem:[#allocation19_spill] sm:$0xff] %v10577_v21  ;;  %v10591_v31 = vmul.f32 %v10557_v4, %v10557_v4 }
 0xbdf   : > { %v10505_v40 = vpop.eup %7069  ;;  %v5788_v45 = vadd.f32 %v10361_v57, %v5753_v54  ;;  %v10516_v46 = vadd.f32 1e-05, %v5311_v25  ;;  %11485 = vst [vmem:[#allocation15_spill] sm:$0xff] %v10530_v51  ;;  %v10534_v25 = vpop.xlane.xlu0 %5054  ;;  %v11493_v51 = vld [vmem:[#allocation7_spill] sm:$0xff] }
 0xbe0   : > { %v5487_v8 = vmul.f32 %v10433_v12, %v5486_v37  ;;  %v5513_v38 = vmul.f32 %v10505_v40, %v10442_v30  ;;  %v10549_v37 = vmul.f32 %v10291_v48, %v10279_v33  ;;  %v10565_v33 = vmul.f32 %v10513_v34, %v10513_v34 }
 0xbe1   : > { %5820 = vst.msk [vmem:[%s10368_s21 + $0x30] sm:$0xff] %vm618_vm0, %v5788_v45  ;;  %7071 = vrsqrt.f32 %v10516_v46  ;;  %v10541_v23 = vpop.xlane.xlu2 %5060  ;;  %vm5519_vm6 = vweird.f32 %v10505_v40  ;;  %v10647_v53 = vmul.f32 %v10291_v48, %v11493_v51  ;;  %v11495_v51 = vld [vmem:[#allocation18_spill] sm:$0xff]  ;;  %vm5548_vm10 = vweird.f32 %v10516_v46 }
 0xbe2   : > { %v5491_v54 = vsel %vm5490_vm5, %v10433_v12, %v5487_v8  ;;  %v5514_v60 = vmul.f32 %v10505_v40, %v5513_v38  ;;  %v5192_v45 = vpop.xlane.xlu1 %5191  ;;  %v10571_v38 = vmul.f32 %v10520_v20, %v10520_v20  ;;  %vm5520_vm8 = vmor %vm5518_vm7, %vm5519_vm6  ;;  %v10718_v14 = vmul.f32 %v10291_v48, %v10541_v23 }
 0xbe3   : > { %v5721_v17 = vmul.f32 %v5491_v54, %v11487_v49  ;;  %v5250_v32 = vmul.f32 %v5192_v45, %v10291_v48  ;;  %v10582_v54 = vmul.f32 %v10549_v37, %v10549_v37  ;;  %v10602_v45 = vmul.f32 %v10291_v48, %v10392_v43 }
 0xbe4   : > { %v5515_v8 = vmul.f32 0.5, %v5514_v60 }
 0xbe5   : > { %v5756_v11 = vmul.f32 %v10352_v36, %v5721_v17  ;;  %v5314_v49 = vsub.f32 %v5250_v32, %v5282_v28  ;;  %v10595_v32 = vmul.f32 %v10291_v48, %v10341_v7  ;;  %11490 = vst [vmem:[#allocation35_spill] sm:$0xff] %v10602_v45  ;;  %v10612_v7 = vmul.f32 %v10577_v21, %v10577_v21 }
 0xbe6   : > { %v5516_v12 = vsub.f32 1.5, %v5515_v8  ;;  %v11492_v21 = vsub.f32 %v9976_v5, %v10376_v62  ;;  %v10651_v5 = vmul.f32 %v10291_v48, %v10461_v42 }
 0xbe7   : > { %v10587_v60 = vpop.eup %7071  ;;  %11489 = vst [vmem:[#allocation20_spill] sm:$0xff] %v10595_v32  ;;  %v5791_v17 = vadd.f32 %v10361_v57, %v5756_v11  ;;  %v10598_v28 = vadd.f32 1e-05, %v5314_v49 }
 0xbe8   : > { %v5517_v8 = vmul.f32 %v10505_v40, %v5516_v12  ;;  %v5543_v26 = vmul.f32 %v10587_v60, %v10516_v46  ;;  %v10623_v12 = vmul.f32 %v10291_v48, %v10263_v2  ;;  %11494 = vst [vmem:[#allocation7_spill] sm:$0xff] %v10651_v5  ;;  %vm5549_vm9 = vweird.f32 %v10587_v60 }
 0xbe9   : > { %5823 = vst.msk [vmem:[%s10368_s21 + $0x48] sm:$0xff] %vm618_vm0, %v5791_v17  ;;  %7073 = vrsqrt.f32 %v10598_v28  ;;  %v10619_v43 = vpop.xlane.xlu0 %5063  ;;  %v5141_v30 = vpop.xlane.xlu2 %5140  ;;  %v10630_v17 = vmul.f32 %v10595_v32, %v10595_v32  ;;  %vm5550_vm11 = vmor %vm5548_vm10, %vm5549_vm9  ;;  %vm5578_vm13 = vweird.f32 %v10598_v28 }
 0xbea   : > { %11491 = vst [vmem:[#allocation36_spill] sm:$0xff] %v10623_v12  ;;  %v5521_v49 = vsel %vm5520_vm8, %v10505_v40, %v5517_v8  ;;  %v5544_v47 = vmul.f32 %v10587_v60, %v5543_v26  ;;  %v5233_v4 = vmul.f32 %v5141_v30, %v10291_v48  ;;  %v5201_v22 = vpop.xlane.xlu1 %5200  ;;  %v10640_v40 = vmul.f32 %v10602_v45, %v10602_v45 }
 0xbeb   : > { %v5724_v44 = vmul.f32 %v5521_v49, %v11492_v21  ;;  %v5253_v2 = vmul.f32 %v5201_v22, %v10291_v48  ;;  %v10657_v21 = vmul.f32 %v10623_v12, %v10623_v12  ;;  %v10664_v49 = vmul.f32 %v10291_v48, %v11495_v51  ;;  %v11497_v51 = vld [vmem:[#allocation29_spill] sm:$0xff] }
 0xbec   : > { %v5545_v8 = vmul.f32 0.5, %v5544_v47  ;;  %v5297_v30 = vsub.f32 %v5233_v4, %v10401_v0 }
 0xbed   : > { %v5759_v22 = vmul.f32 %v10352_v36, %v5724_v44  ;;  %v5317_v62 = vsub.f32 %v5253_v2, %v10545_v61  ;;  %11496 = vst [vmem:[#allocation18_spill] sm:$0xff] %v10664_v49  ;;  %v10668_v44 = vmul.f32 %v10291_v48, %v10463_v41  ;;  %v10683_v41 = vmul.f32 %v10651_v5, %v10651_v5 }
 0xbee   : > { %v5546_v47 = vsub.f32 1.5, %v5545_v8  ;;  %v10660_v4 = vadd.f32 1e-05, %v5297_v30  ;;  %v5288_v30 = vmul.f32 %v10647_v53, %v10647_v53  ;;  %v10695_v5 = vmul.f32 %v10664_v49, %v10664_v49  ;;  %v11502_v49 = vld [vmem:[#allocation14_spill] sm:$0xff] }
 0xbef   : > { %v7074_v0 = vpop.eup %7073  ;;  %v5794_v42 = vadd.f32 %v10361_v57, %v5759_v22  ;;  %v10671_v61 = vadd.f32 1e-05, %v5317_v62  ;;  %11498 = vst [vmem:[#allocation29_spill] sm:$0xff] %v10683_v41  ;;  %v10713_v32 = vmul.f32 %v10291_v48, %v11502_v49 }
 0xbf0   : > { %v5547_v2 = vmul.f32 %v10587_v60, %v5546_v47  ;;  %v5573_v8 = vmul.f32 %v7074_v0, %v10598_v28  ;;  %7075 = vrsqrt.f32 %v10660_v4  ;;  %11499 = vst [vmem:[#allocation37_spill] sm:$0xff] %v10695_v5  ;;  %vm5579_vm12 = vweird.f32 %v7074_v0 }
 0xbf1   : > { %5826 = vst.msk [vmem:[%s10368_s21 + $0x60] sm:$0xff] %vm618_vm0, %v5794_v42  ;;  %7077 = vrsqrt.f32 %v10671_v61  ;;  %v5144_v46 = vpop.xlane.xlu0 %5143  ;;  %v5150_v22 = vpop.xlane.xlu2 %5149  ;;  %v10699_v42 = vmul.f32 %v10668_v44, %v10668_v44  ;;  %vm5580_vm14 = vmor %vm5578_vm13, %vm5579_vm12  ;;  %vm5408_vm1 = vweird.f32 %v10660_v4  ;;  %vm5608_vm2 = vweird.f32 %v10671_v61 }
 0xbf2   : > { %v5551_v62 = vsel %vm5550_vm11, %v10587_v60, %v5547_v2  ;;  %v5574_v47 = vmul.f32 %v7074_v0, %v5573_v8  ;;  %v5234_v11 = vmul.f32 %v5144_v46, %v10291_v48  ;;  %v5236_v26 = vmul.f32 %v5150_v22, %v10291_v48  ;;  %v5210_v45 = vpop.xlane.xlu1 %5209  ;;  %11503 = vst [vmem:[#allocation14_spill] sm:$0xff] %v10713_v32 }
 0xbf3   : > { %v5727_v12 = vmul.f32 %v5551_v62, %v11500_v27  ;;  %v5256_v60 = vmul.f32 %v5210_v45, %v10291_v48  ;;  %v10707_v2 = vmul.f32 %v10291_v48, %v10534_v25 }
 0xbf4   : > { %v5575_v8 = vmul.f32 0.5, %v5574_v47  ;;  %v5298_v46 = vsub.f32 %v5234_v11, %v10412_v19  ;;  %v5300_v22 = vsub.f32 %v5236_v26, %v10565_v33  ;;  %v11504_v11 = vld [vmem:[#allocation24_spill] sm:$0xff] }
 0xbf5   : > { %11501 = vst [vmem:[#allocation38_spill] sm:$0xff] %v10707_v2  ;;  %v5762_v52 = vmul.f32 %v10352_v36, %v5727_v12  ;;  %v5320_v27 = vsub.f32 %v5256_v60, %v5288_v30  ;;  %v10741_v47 = vmul.f32 %v10707_v2, %v10707_v2 }
 0xbf6   : > { %v10720_v6 = vpop.eup %7075  ;;  %v5576_v25 = vsub.f32 1.5, %v5575_v8  ;;  %v10722_v45 = vadd.f32 1e-05, %v5298_v46  ;;  %v10724_v19 = vadd.f32 1e-05, %v5300_v22  ;;  %v10754_v46 = vmul.f32 %v10718_v14, %v10718_v14 }
 0xbf7   : > { %v10726_v33 = vpop.eup %7077  ;;  %v5797_v12 = vadd.f32 %v10361_v57, %v5762_v52  ;;  %v5403_v23 = vmul.f32 %v10720_v6, %v10660_v4  ;;  %v10733_v49 = vadd.f32 1e-05, %v5320_v27  ;;  %11505 = vst [vmem:[#allocation24_spill] sm:$0xff] %v10741_v47  ;;  %v10745_v52 = vmul.f32 %v10713_v32, %v10713_v32 }
 0xbf8   : > { %v5577_v30 = vmul.f32 %v7074_v0, %v5576_v25  ;;  %v5603_v62 = vmul.f32 %v10726_v33, %v10671_v61  ;;  %7079 = vrsqrt.f32 %v10722_v45  ;;  %vm5409_vm15 = vweird.f32 %v10720_v6 }
 0xbf9   : > { %11506 = vst [vmem:[#allocation39_spill] sm:$0xff] %v10745_v52  ;;  %v5404_v60 = vmul.f32 %v10720_v6, %v5403_v23  ;;  %7081 = vrsqrt.f32 %v10724_v19  ;;  %v5153_v28 = vpop.xlane.xlu0 %5152  ;;  %v5159_v8 = vpop.xlane.xlu2 %5158  ;;  %v11508_v52 = vld [vmem:[#allocation12_spill] sm:$0xff]  ;;  %vm5609_vm3 = vweird.f32 %v10726_v33  ;;  %vm5418_vm4 = vweird.f32 %v10722_v45  ;;  %vm5410_vm5 = vmor %vm5408_vm1, %vm5409_vm15 }
 0xbfa   : > { %5829 = vst.msk [vmem:[%s10368_s21 + $0x78] sm:$0xff] %vm618_vm0, %v5797_v12  ;;  %v5581_v22 = vsel %vm5580_vm14, %v7074_v0, %v5577_v30  ;;  %v5604_v27 = vmul.f32 %v10726_v33, %v5603_v62  ;;  %7083 = vrsqrt.f32 %v10733_v49  ;;  %v5219_v25 = vpop.xlane.xlu1 %5218  ;;  %v11507_v12 = vsub.f32 %v10006_v13, %v10446_v3  ;;  %vm5610_vm6 = vmor %vm5608_vm2, %vm5609_vm3 }
 0xbfb   : > { %v5405_v32 = vmul.f32 0.5, %v5404_v60  ;;  %v5237_v23 = vmul.f32 %v5153_v28, %v10291_v48  ;;  %v5239_v2 = vmul.f32 %v5159_v8, %v10291_v48  ;;  %v5358_v47 = vsub.f32 %v11508_v52, %v10718_v14 }
 0xbfc   : > { %v5730_v26 = vmul.f32 %v5581_v22, %v11507_v12  ;;  %v10767_v0 = vmul.f32 %v10291_v48, %v10619_v43  ;;  %v5605_v30 = vmul.f32 0.5, %v5604_v27  ;;  %v5259_v62 = vmul.f32 %v5219_v25, %v10291_v48 }
 0xbfd   : > { %v5406_v41 = vsub.f32 1.5, %v5405_v32  ;;  %v5301_v13 = vsub.f32 %v5237_v23, %v10420_v39  ;;  %v5303_v39 = vsub.f32 %v5239_v2, %v10571_v38  ;;  %v11510_v61 = vsub.f32 %v10041_v15, %v10502_v50 }
 0xbfe   : > { %v5765_v5 = vmul.f32 %v10352_v36, %v5730_v26  ;;  %v10773_v3 = vpop.eup %7079  ;;  %v5606_v60 = vsub.f32 1.5, %v5605_v30  ;;  %vm5438_vm11 = vweird.f32 %v10724_v19  ;;  %vm5638_vm13 = vweird.f32 %v10733_v49 }
 0xbff   : > { %v10778_v43 = vpop.eup %7081  ;;  %v5407_v32 = vmul.f32 %v10720_v6, %v5406_v41  ;;  %v5413_v26 = vmul.f32 %v10773_v3, %v10722_v45  ;;  %v10791_v27 = vadd.f32 1e-05, %v5301_v13  ;;  %vm5419_vm7 = vweird.f32 %v10773_v3 }
 0xc00   : > { %v5800_v28 = vadd.f32 %v10361_v57, %v5765_v5  ;;  %v10786_v4 = vpop.eup %7083  ;;  %v5607_v8 = vmul.f32 %v10726_v33, %v5606_v60  ;;  %v5433_v22 = vmul.f32 %v10778_v43, %v10724_v19  ;;  %v5323_v5 = vsub.f32 %v5259_v62, %v10699_v42  ;;  %vm5420_vm10 = vmor %vm5418_vm4, %vm5419_vm7 }
 0xc01   : > { %v5411_v41 = vsel %vm5410_vm5, %v10720_v6, %v5407_v32  ;;  %v5414_v38 = vmul.f32 %v10773_v3, %v5413_v26  ;;  %v5633_v2 = vmul.f32 %v10786_v4, %v10733_v49  ;;  %v5162_v25 = vpop.xlane.xlu0 %5161  ;;  %v5168_v12 = vpop.xlane.xlu2 %5167  ;;  %v11509_v42 = vsub.f32 %v9928_v59, %v10372_v55 }
 0xc02   : > { %5832 = vst.msk [vmem:[%s10368_s21 + $0x90] sm:$0xff] %vm618_vm0, %v5800_v28  ;;  %v5611_v6 = vsel %vm5610_vm6, %v10726_v33, %v5607_v8  ;;  %v5434_v30 = vmul.f32 %v10778_v43, %v5433_v22  ;;  %7085 = vrsqrt.f32 %v10791_v27  ;;  %vm5439_vm8 = vweird.f32 %v10778_v43 }
 0xc03   : > { %v5713_v23 = vmul.f32 %v5411_v41, %v11509_v42  ;;  %v5733_v62 = vmul.f32 %v5611_v6, %v11510_v61  ;;  %v5415_v13 = vmul.f32 0.5, %v5414_v38  ;;  %v5634_v60 = vmul.f32 %v10786_v4, %v5633_v2  ;;  %vm5440_vm12 = vmor %vm5438_vm11, %vm5439_vm8 }
 0xc04   : > { %v5435_v32 = vmul.f32 0.5, %v5434_v30  ;;  %v10817_v59 = vadd.f32 1e-05, %v5303_v39  ;;  %v10819_v55 = vadd.f32 1e-05, %v5323_v5  ;;  %v5240_v15 = vmul.f32 %v5162_v25, %v10291_v48 }
 0xc05   : > { %v5748_v28 = vmul.f32 %v10352_v36, %v5713_v23  ;;  %v5768_v33 = vmul.f32 %v10352_v36, %v5733_v62  ;;  %v5416_v26 = vsub.f32 1.5, %v5415_v13  ;;  %v5635_v8 = vmul.f32 0.5, %v5634_v60  ;;  %v5228_v23 = vpop.xlane.xlu1 %5227 }
 0xc06   : > { %v5436_v22 = vsub.f32 1.5, %v5435_v32  ;;  %vm5639_vm9 = vweird.f32 %v10786_v4  ;;  %7087 = vrsqrt.f32 %v10817_v59  ;;  %v5304_v25 = vsub.f32 %v5240_v15, %v10453_v9 }
 0xc07   : > { %v5783_v50 = vadd.f32 %v10361_v57, %v5748_v28  ;;  %v5803_v41 = vadd.f32 %v10361_v57, %v5768_v33  ;;  %v5417_v39 = vmul.f32 %v10773_v3, %v5416_v26  ;;  %v5636_v5 = vsub.f32 1.5, %v5635_v8  ;;  %vm5640_vm14 = vmor %vm5638_vm13, %vm5639_vm9 }
 0xc08   : > { %7089 = vrsqrt.f32 %v10819_v55  ;;  %v10829_v38 = vpop.eup %7085  ;;  %v5437_v2 = vmul.f32 %v10778_v43, %v5436_v22  ;;  %v5242_v42 = vmul.f32 %v5168_v12, %v10291_v48  ;;  %v10852_v9 = vmul.f32 %v10767_v0, %v10767_v0 }
 0xc09   : > { %5815 = vst.msk [vmem:[%s10368_s21 + $0x8] sm:$0xff] %vm618_vm0, %v5783_v50  ;;  %v5421_v6 = vsel %vm5420_vm10, %v10773_v3, %v5417_v39  ;;  %v5637_v30 = vmul.f32 %v10786_v4, %v5636_v5  ;;  %v5443_v45 = vmul.f32 %v10829_v38, %v10791_v27  ;;  %v5171_v19 = vpop.xlane.xlu0 %5170  ;;  %v5177_v61 = vpop.xlane.xlu2 %5176  ;;  %v11511_v12 = vsub.f32 %v9955_v16, %v10383_v29 }
 0xc0a   : > { %5835 = vst.msk [vmem:[%s10368_s21 + $0xa8] sm:$0xff] %vm618_vm0, %v5803_v41  ;;  %v5441_v62 = vsel %vm5440_vm12, %v10778_v43, %v5437_v2  ;;  %v10860_v13 = vadd.f32 1e-05, %v5304_v25  ;;  %v11512_v49 = vsub.f32 %v10060_v18, %v10513_v34  ;;  %v5306_v33 = vsub.f32 %v5242_v42, %v10582_v54 }
 0xc0b   : > { %v5714_v3 = vmul.f32 %v5421_v6, %v11511_v12  ;;  %v5641_v28 = vsel %vm5640_vm14, %v10786_v4, %v5637_v30  ;;  %v5444_v32 = vmul.f32 %v10829_v38, %v5443_v45  ;;  %v11513_v29 = vsub.f32 %v11497_v51, %v10647_v53 }
 0xc0c   : > { %v5716_v60 = vmul.f32 %v5441_v62, %v11512_v49  ;;  %v7088_v26 = vpop.eup %7087  ;;  %7091 = vrsqrt.f32 %v10860_v13  ;;  %v5262_v8 = vmul.f32 %v5228_v23, %v10291_v48  ;;  %vm5448_vm15 = vweird.f32 %v10791_v27 }
 0xc0d   : > { %v5749_v16 = vmul.f32 %v10352_v36, %v5714_v3  ;;  %v5736_v43 = vmul.f32 %v5641_v28, %v11513_v29  ;;  %v5445_v4 = vmul.f32 0.5, %v5444_v32  ;;  %v5463_v54 = vmul.f32 %v7088_v26, %v10817_v59  ;;  %v11514_v32 = vld [vmem:[#allocation6_spill] sm:$0xff] }
 0xc0e   : > { %v7090_v18 = vpop.eup %7089  ;;  %v5751_v34 = vmul.f32 %v10352_v36, %v5716_v60  ;;  %vm5449_vm1 = vweird.f32 %v10829_v38  ;;  %v10882_v39 = vadd.f32 1e-05, %v5306_v33  ;;  %v5326_v25 = vsub.f32 %v5262_v8, %v10754_v46 }
 0xc0f   : > { %v5784_v15 = vadd.f32 %v10361_v57, %v5749_v16  ;;  %v5771_v50 = vmul.f32 %v10352_v36, %v5736_v43  ;;  %v5663_v53 = vmul.f32 %v7090_v18, %v10819_v55  ;;  %v5446_v22 = vsub.f32 1.5, %v5445_v4  ;;  %vm5450_vm3 = vmor %vm5448_vm15, %vm5449_vm1 }
 0xc10   : > { %v5786_v51 = vadd.f32 %v10361_v57, %v5751_v34  ;;  %v5464_v41 = vmul.f32 %v7088_v26, %v5463_v54  ;;  %v5243_v42 = vmul.f32 %v5171_v19, %v10291_v48  ;;  %vm5468_vm2 = vweird.f32 %v10817_v59 }
 0xc11   : > { %5816 = vst.msk [vmem:[%s10368_s21 + $0x10] sm:$0xff] %vm618_vm0, %v5784_v15  ;;  %v5806_v5 = vadd.f32 %v10361_v57, %v5771_v50  ;;  %v5664_v2 = vmul.f32 %v7090_v18, %v5663_v53  ;;  %v5447_v23 = vmul.f32 %v10829_v38, %v5446_v22  ;;  %7093 = vrsqrt.f32 %v10882_v39  ;;  %v5180_v30 = vpop.xlane.xlu0 %5179  ;;  %v5186_v45 = vpop.xlane.xlu2 %5185 }
 0xc12   : > { %5818 = vst.msk [vmem:[%s10368_s21 + $0x20] sm:$0xff] %vm618_vm0, %v5786_v51  ;;  %v5465_v6 = vmul.f32 0.5, %v5464_v41  ;;  %v7092_v12 = vpop.eup %7091  ;;  %v10900_v19 = vadd.f32 1e-05, %v5326_v25  ;;  %v5307_v3 = vsub.f32 %v5243_v42, %v10476_v56  ;;  %v5245_v62 = vmul.f32 %v5177_v61, %v10291_v48 }
 0xc13   : > { %5838 = vst.msk [vmem:[%s10368_s21 + $0xc0] sm:$0xff] %vm618_vm0, %v5806_v5  ;;  %v5665_v46 = vmul.f32 0.5, %v5664_v2  ;;  %v5451_v49 = vsel %vm5450_vm3, %v10829_v38, %v5447_v23  ;;  %vm5469_vm4 = vweird.f32 %v7088_v26  ;;  %v5473_v28 = vmul.f32 %v7092_v12, %v10860_v13 }
 0xc14   : > { %v5466_v60 = vsub.f32 1.5, %v5465_v6  ;;  %v11515_v33 = vsub.f32 %v9972_v24, %v11514_v32  ;;  %vm5669_vm5 = vweird.f32 %v7090_v18  ;;  %7095 = vrsqrt.f32 %v10900_v19  ;;  %vm5470_vm6 = vmor %vm5468_vm2, %vm5469_vm4 }
 0xc15   : > { %v5666_v29 = vsub.f32 1.5, %v5665_v46  ;;  %v5474_v43 = vmul.f32 %v7092_v12, %v5473_v28  ;;  %v10910_v8 = vadd.f32 1e-05, %v5307_v3  ;;  %v5309_v56 = vsub.f32 %v5245_v62, %v10591_v31  ;;  %v11519_v62 = vld [vmem:[#allocation5_spill] sm:$0xff] }
 0xc16   : > { %v5717_v16 = vmul.f32 %v5451_v49, %v11515_v33  ;;  %v5467_v27 = vmul.f32 %v7088_v26, %v5466_v60  ;;  %vm5668_vm7 = vweird.f32 %v10819_v55  ;;  %v5246_v24 = vmul.f32 %v5180_v30, %v10291_v48 }
 0xc17   : > { %v5667_v61 = vmul.f32 %v7090_v18, %v5666_v29  ;;  %v10918_v34 = vpop.eup %7093  ;;  %vm5670_vm8 = vmor %vm5668_vm7, %vm5669_vm5  ;;  %v5475_v54 = vmul.f32 0.5, %v5474_v43  ;;  %7097 = vrsqrt.f32 %v10910_v8  ;;  %v5248_v31 = vmul.f32 %v5186_v45, %v10291_v48 }
 0xc18   : > { %v5752_v38 = vmul.f32 %v10352_v36, %v5717_v16  ;;  %v5471_v4 = vsel %vm5470_vm6, %v7088_v26, %v5467_v27  ;;  %v11516_v59 = vsub.f32 %v10072_v58, %v10520_v20  ;;  %v5493_v55 = vmul.f32 %v10918_v34, %v10882_v39 }
 0xc19   : > { %v5671_v53 = vsel %vm5670_vm8, %v7090_v18, %v5667_v61  ;;  %v11517_v26 = vsub.f32 %v11504_v11, %v10668_v44  ;;  %v5476_v22 = vsub.f32 1.5, %v5475_v54  ;;  %vm5479_vm9 = vweird.f32 %v7092_v12  ;;  %v5189_v5 = vpop.xlane.xlu0 %5188  ;;  %v5195_v2 = vpop.xlane.xlu2 %5194 }
 0xc1a   : > { %v5787_v15 = vadd.f32 %v10361_v57, %v5752_v38  ;;  %v5719_v50 = vmul.f32 %v5471_v4, %v11516_v59  ;;  %v10931_v41 = vadd.f32 1e-05, %v5309_v56  ;;  %v7096_v25 = vpop.eup %7095  ;;  %vm5478_vm10 = vweird.f32 %v10860_v13 }
 0xc1b   : > { %v5739_v51 = vmul.f32 %v5671_v53, %v11517_v26  ;;  %v5494_v20 = vmul.f32 %v10918_v34, %v5493_v55  ;;  %v5310_v18 = vsub.f32 %v5246_v24, %v10491_v1  ;;  %v5477_v11 = vmul.f32 %v7092_v12, %v5476_v22  ;;  %vm5480_vm11 = vmor %vm5478_vm10, %vm5479_vm9 }
 0xc1c   : > { %5819 = vst.msk [vmem:[%s10368_s21 + $0x28] sm:$0xff] %vm618_vm0, %v5787_v15  ;;  %v5754_v58 = vmul.f32 %v10352_v36, %v5719_v50  ;;  %v5693_v42 = vmul.f32 %v7096_v25, %v10900_v19  ;;  %v5312_v23 = vsub.f32 %v5248_v31, %v10612_v7  ;;  %vm5498_vm12 = vweird.f32 %v10882_v39  ;;  %v11518_v7 = vld [vmem:[#allocation31_spill] sm:$0xff] }
 0xc1d   : > { %v5774_v44 = vmul.f32 %v10352_v36, %v5739_v51  ;;  %v5495_v30 = vmul.f32 0.5, %v5494_v20  ;;  %7099 = vrsqrt.f32 %v10931_v41  ;;  %v10946_v13 = vpop.eup %7097  ;;  %v5481_v45 = vsel %vm5480_vm11, %v7092_v12, %v5477_v11  ;;  %v11522_v11 = vld [vmem:[#allocation9_spill] sm:$0xff] }
 0xc1e   : > { %v5789_v6 = vadd.f32 %v10361_v57, %v5754_v58  ;;  %v5694_v46 = vmul.f32 %v7096_v25, %v5693_v42  ;;  %v10949_v3 = vadd.f32 1e-05, %v5310_v18  ;;  %v11520_v49 = vsub.f32 %v11518_v7, %v11519_v62  ;;  %v11524_v7 = vld [vmem:[#allocation15_spill] sm:$0xff] }
 0xc1f   : > { %v5809_v1 = vadd.f32 %v10361_v57, %v5774_v44  ;;  %v5496_v28 = vsub.f32 1.5, %v5495_v30  ;;  %vm5499_vm13 = vweird.f32 %v10918_v34  ;;  %v5503_v32 = vmul.f32 %v10946_v13, %v10910_v8 }
 0xc20   : > { %5821 = vst.msk [vmem:[%s10368_s21 + $0x38] sm:$0xff] %vm618_vm0, %v5789_v6  ;;  %v5720_v60 = vmul.f32 %v5481_v45, %v11520_v49  ;;  %v5695_v33 = vmul.f32 0.5, %v5694_v46  ;;  %vm5698_vm14 = vweird.f32 %v10900_v19  ;;  %7101 = vrsqrt.f32 %v10949_v3  ;;  %vm5500_vm15 = vmor %vm5498_vm12, %vm5499_vm13 }
 0xc21   : > { %5841 = vst.msk [vmem:[%s10368_s21 + $0xd8] sm:$0xff] %vm618_vm0, %v5809_v1  ;;  %v10963_v12 = vadd.f32 1e-05, %v5312_v23  ;;  %v5497_v29 = vmul.f32 %v10918_v34, %v5496_v28  ;;  %v5504_v27 = vmul.f32 %v10946_v13, %v5503_v32  ;;  %v5249_v43 = vmul.f32 %v5189_v5, %v10291_v48  ;;  %v5198_v61 = vpop.xlane.xlu0 %5197  ;;  %v5204_v24 = vpop.xlane.xlu2 %5203 }
 0xc22   : > { %v5755_v16 = vmul.f32 %v10352_v36, %v5720_v60  ;;  %v5696_v56 = vsub.f32 1.5, %v5695_v33  ;;  %vm5699_vm1 = vweird.f32 %v7096_v25  ;;  %v5251_v38 = vmul.f32 %v5195_v2, %v10291_v48 }
 0xc23   : > { %7103 = vrsqrt.f32 %v10963_v12  ;;  %v7100_v4 = vpop.eup %7099  ;;  %v5501_v31 = vsel %vm5500_vm15, %v10918_v34, %v5497_v29  ;;  %v5505_v15 = vmul.f32 0.5, %v5504_v27  ;;  %v5313_v59 = vsub.f32 %v5249_v43, %v10509_v10  ;;  %vm5700_vm3 = vmor %vm5698_vm14, %vm5699_vm1 }
 0xc24   : > { %v5790_v54 = vadd.f32 %v10361_v57, %v5755_v16  ;;  %v11521_v39 = vsub.f32 %v10080_v63, %v10549_v37  ;;  %v5697_v53 = vmul.f32 %v7096_v25, %v5696_v56  ;;  %vm5508_vm2 = vweird.f32 %v10910_v8  ;;  %v11525_v56 = vld [vmem:[#allocation22_spill] sm:$0xff] }
 0xc25   : > { %v5523_v55 = vmul.f32 %v7100_v4, %v10931_v41  ;;  %v5506_v26 = vsub.f32 1.5, %v5505_v15  ;;  %vm5509_vm4 = vweird.f32 %v10946_v13  ;;  %vm5528_vm5 = vweird.f32 %v10931_v41 }
 0xc26   : > { %v5722_v50 = vmul.f32 %v5501_v31, %v11521_v39  ;;  %5822 = vst.msk [vmem:[%s10368_s21 + $0x40] sm:$0xff] %vm618_vm0, %v5790_v54  ;;  %v10988_v10 = vadd.f32 1e-05, %v5313_v59  ;;  %v7102_v63 = vpop.eup %7101  ;;  %v5701_v34 = vsel %vm5700_vm3, %v7096_v25, %v5697_v53  ;;  %v5315_v22 = vsub.f32 %v5251_v38, %v10630_v17  ;;  %vm5510_vm7 = vmor %vm5508_vm2, %vm5509_vm4  ;;  %v11526_v38 = vld [vmem:[#allocation17_spill] sm:$0xff] }
 0xc27   : > { %v5524_v51 = vmul.f32 %v7100_v4, %v5523_v55  ;;  %v5742_v19 = vmul.f32 %v5701_v34, %v5358_v47  ;;  %v5507_v5 = vmul.f32 %v10946_v13, %v5506_v26  ;;  %v5533_v2 = vmul.f32 %v7102_v63, %v10949_v3  ;;  %v11528_v55 = vld [vmem:[#allocation32_spill] sm:$0xff] }
 0xc28   : > { %v5757_v37 = vmul.f32 %v10352_v36, %v5722_v50  ;;  %vm5538_vm6 = vweird.f32 %v10949_v3  ;;  %v5252_v58 = vmul.f32 %v5198_v61, %v10291_v48  ;;  %7105 = vrsqrt.f32 %v10988_v10  ;;  %v11529_v3 = vld [vmem:[#allocation8_spill] sm:$0xff] }
 0xc29   : > { %v10999_v20 = vpop.eup %7103  ;;  %v5525_v17 = vmul.f32 0.5, %v5524_v51  ;;  %v5254_v14 = vmul.f32 %v5204_v24, %v10291_v48  ;;  %v5777_v47 = vmul.f32 %v10352_v36, %v5742_v19  ;;  %v5511_v52 = vsel %vm5510_vm7, %v10946_v13, %v5507_v5  ;;  %v5207_v30 = vpop.xlane.xlu0 %5206  ;;  %v11071_v5 = vld [vmem:[%s11258_s12] ss:$0 sm:$0xff] }
 0xc2a   : > { %v5792_v25 = vadd.f32 %v10361_v57, %v5757_v37  ;;  %v5534_v18 = vmul.f32 %v7102_v63, %v5533_v2  ;;  %v5553_v44 = vmul.f32 %v10999_v20, %v10963_v12  ;;  %v11523_v8 = vsub.f32 %v10001_v35, %v11522_v11  ;;  %v5213_v1 = vpop.xlane.xlu2 %5212  ;;  %v11090_v11 = vld [vmem:[%s11259_s13] ss:$0 sm:$0xff] }
 0xc2b   : > { %v5526_v23 = vsub.f32 1.5, %v5525_v17  ;;  %vm5529_vm8 = vweird.f32 %v7100_v4  ;;  %v11017_v6 = vadd.f32 1e-05, %v5315_v22  ;;  %v5812_v45 = vadd.f32 %v10361_v57, %v5777_v47  ;;  %v11534_v47 = vld [vmem:[#allocation29_spill] sm:$0xff] }
 0xc2c   : > { %5824 = vst.msk [vmem:[%s10368_s21 + $0x50] sm:$0xff] %vm618_vm0, %v5792_v25  ;;  %v5723_v42 = vmul.f32 %v5511_v52, %v11523_v8  ;;  %v5535_v13 = vmul.f32 0.5, %v5534_v18  ;;  %v5554_v46 = vmul.f32 %v10999_v20, %v5553_v44  ;;  %v5316_v62 = vsub.f32 %v5252_v58, %v11524_v7  ;;  %vm5530_vm10 = vmor %vm5528_vm5, %vm5529_vm8  ;;  %v11531_v58 = vld [vmem:[#allocation26_spill] sm:$0xff]  ;;  %v11532_v25 = vld [vmem:[#allocation19_spill] sm:$0xff] }
 0xc2d   : > { %v5527_v60 = vmul.f32 %v7100_v4, %v5526_v23  ;;  %vm5539_vm9 = vweird.f32 %v7102_v63  ;;  %7107 = vrsqrt.f32 %v11017_v6  ;;  %5844 = vst.msk [vmem:[%s10368_s21 + $0xf0] sm:$0xff] %vm618_vm0, %v5812_v45  ;;  %v5318_v33 = vsub.f32 %v5254_v14, %v10640_v40  ;;  %v11535_v7 = vld [vmem:[#allocation37_spill] sm:$0xff] }
 0xc2e   : > { %v5758_v49 = vmul.f32 %v10352_v36, %v5723_v42  ;;  %v5536_v35 = vsub.f32 1.5, %v5535_v13  ;;  %v5555_v28 = vmul.f32 0.5, %v5554_v46  ;;  %v11028_v32 = vadd.f32 1e-05, %v5316_v62  ;;  %v11031_v16 = vpop.eup %7105  ;;  %vm5540_vm12 = vmor %vm5538_vm6, %vm5539_vm9 }
 0xc2f   : > { %v5531_v27 = vsel %vm5530_vm10, %v7100_v4, %v5527_v60  ;;  %vm5559_vm11 = vweird.f32 %v10999_v20  ;;  %v5255_v43 = vmul.f32 %v5207_v30, %v10291_v48  ;;  %v11527_v61 = vsub.f32 %v11525_v56, %v11526_v38 }
 0xc30   : > { %v5793_v29 = vadd.f32 %v10361_v57, %v5758_v49  ;;  %v5537_v24 = vmul.f32 %v7102_v63, %v5536_v35  ;;  %v5556_v54 = vsub.f32 1.5, %v5555_v28  ;;  %v5563_v31 = vmul.f32 %v11031_v16, %v10988_v10 }
 0xc31   : > { %v5725_v41 = vmul.f32 %v5531_v27, %v11527_v61  ;;  %vm5558_vm13 = vweird.f32 %v10963_v12  ;;  %7109 = vrsqrt.f32 %v11028_v32  ;;  %v11048_v40 = vadd.f32 1e-05, %v5318_v33  ;;  %v5216_v12 = vpop.xlane.xlu0 %5215  ;;  %v11537_v27 = vld [vmem:[#allocation11_spill] sm:$0xff] }
 0xc32   : > { %5825 = vst.msk [vmem:[%s10368_s21 + $0x58] sm:$0xff] %vm618_vm0, %v5793_v29  ;;  %v5257_v4 = vmul.f32 %v5213_v1, %v10291_v48  ;;  %v5541_v59 = vsel %vm5540_vm12, %v7102_v63, %v5537_v24  ;;  %v5557_v39 = vmul.f32 %v10999_v20, %v5556_v54  ;;  %v5564_v50 = vmul.f32 %v11031_v16, %v5563_v31  ;;  %vm5560_vm14 = vmor %vm5558_vm13, %vm5559_vm11  ;;  %v5222_v63 = vpop.xlane.xlu2 %5221  ;;  %v11536_v29 = vld [vmem:[#allocation23_spill] sm:$0xff] }
 0xc33   : > { %v5760_v15 = vmul.f32 %v10352_v36, %v5725_v41  ;;  %v11054_v53 = vpop.eup %7107  ;;  %v11530_v26 = vsub.f32 %v11528_v55, %v11529_v3  ;;  %vm5568_vm15 = vweird.f32 %v10988_v10  ;;  %7111 = vrsqrt.f32 %v11048_v40 }
 0xc34   : > { %v5319_v36 = vsub.f32 %v5255_v43, %v10657_v21  ;;  %v5561_v51 = vsel %vm5560_vm14, %v10999_v20, %v5557_v39  ;;  %v5565_v22 = vmul.f32 0.5, %v5564_v50  ;;  %v5583_v19 = vmul.f32 %v11054_v53, %v11017_v6 }
 0xc35   : > { %v5726_v37 = vmul.f32 %v5541_v59, %v11530_v26  ;;  %v5795_v34 = vadd.f32 %v10361_v57, %v5760_v15  ;;  %v11533_v21 = vsub.f32 %v11531_v58, %v11532_v25  ;;  %vm5569_vm1 = vweird.f32 %v11031_v16 }
 0xc36   : > { %v11078_v57 = vadd.f32 1e-05, %v5319_v36  ;;  %v5566_v20 = vsub.f32 1.5, %v5565_v22  ;;  %v5584_v14 = vmul.f32 %v11054_v53, %v5583_v19  ;;  %v5321_v52 = vsub.f32 %v5257_v4, %v11534_v47  ;;  %vm5570_vm4 = vmor %vm5568_vm15, %vm5569_vm1  ;;  %v11539_v4 = vld [vmem:[#allocation24_spill] sm:$0xff]  ;;  %v11540_v36 = vld [vmem:[#allocation34_spill] sm:$0xff] }
 0xc37   : > { %v5761_v2 = vmul.f32 %v11071_v5, %v5726_v37  ;;  %v5728_v17 = vmul.f32 %v5561_v51, %v11533_v21  ;;  %5827 = vst.msk [vmem:[%s10368_s21 + $0x68] sm:$0xff] %vm618_vm0, %v5795_v34  ;;  %v5258_v18 = vmul.f32 %v5216_v12, %v10291_v48  ;;  %v11085_v44 = vpop.eup %7109  ;;  %vm5588_vm2 = vweird.f32 %v11017_v6  ;;  %v11541_v12 = vld [vmem:[#allocation20_spill] sm:$0xff] }
 0xc38   : > { %7113 = vrsqrt.f32 %v11078_v57  ;;  %v5567_v23 = vmul.f32 %v11031_v16, %v5566_v20  ;;  %v5585_v30 = vmul.f32 0.5, %v5584_v14  ;;  %vm5589_vm3 = vweird.f32 %v11054_v53  ;;  %v11544_v47 = vld [vmem:[#allocation36_spill] sm:$0xff] }
 0xc39   : > { %v5796_v8 = vadd.f32 %v11090_v11, %v5761_v2  ;;  %v5763_v42 = vmul.f32 %v11071_v5, %v5728_v17  ;;  %v5593_v1 = vmul.f32 %v11085_v44, %v11028_v32  ;;  %v11100_v45 = vpop.eup %7111  ;;  %v11109_v46 = vadd.f32 1e-05, %v5321_v52  ;;  %v5225_v56 = vpop.xlane.xlu0 %5224  ;;  %vm5590_vm7 = vmor %vm5588_vm2, %vm5589_vm3  ;;  %v11543_v2 = vld [vmem:[#allocation39_spill] sm:$0xff]  ;;  %v11545_v52 = vld [vmem:[#allocation28_spill] sm:$0xff] }
 0xc3a   : > { %v5322_v62 = vsub.f32 %v5258_v18, %v11535_v7  ;;  %v5260_v49 = vmul.f32 %v5222_v63, %v10291_v48  ;;  %v5571_v60 = vsel %vm5570_vm4, %v11031_v16, %v5567_v23  ;;  %v5586_v35 = vsub.f32 1.5, %v5585_v30  ;;  %v5231_v16 = vpop.xlane.xlu2 %5230 }
 0xc3b   : > { %5828 = vst.msk [vmem:[%s10368_s21 + $0x70] sm:$0xff] %vm618_vm0, %v5796_v8  ;;  %v5798_v13 = vadd.f32 %v11090_v11, %v5763_v42  ;;  %v5594_v28 = vmul.f32 %v11085_v44, %v5593_v1  ;;  %v5613_v33 = vmul.f32 %v11100_v45, %v11048_v40  ;;  %v11538_v10 = vsub.f32 %v11536_v29, %v11537_v27  ;;  %v11546_v8 = vld [vmem:[#allocation21_spill] sm:$0xff] }
 0xc3c   : > { %vm5598_vm5 = vweird.f32 %v11028_v32  ;;  %vm5599_vm6 = vweird.f32 %v11085_v44  ;;  %7115 = vrsqrt.f32 %v11109_v46  ;;  %v5587_v38 = vmul.f32 %v11054_v53, %v5586_v35  ;;  %v11547_v42 = vld [vmem:[#allocation13_spill] sm:$0xff] }
 0xc3d   : > { %5830 = vst.msk [vmem:[%s10368_s21 + $0x80] sm:$0xff] %vm618_vm0, %v5798_v13  ;;  %v5729_v43 = vmul.f32 %v5571_v60, %v11538_v10  ;;  %v5595_v61 = vmul.f32 0.5, %v5594_v28  ;;  %v5614_v41 = vmul.f32 %v11100_v45, %v5613_v33  ;;  %v11127_v24 = vadd.f32 1e-05, %v5322_v62  ;;  %vm5600_vm10 = vmor %vm5598_vm5, %vm5599_vm6  ;;  %v11549_v62 = vld [vmem:[#allocation27_spill] sm:$0xff] }
 0xc3e   : > { %v7114_v54 = vpop.eup %7113  ;;  %v5324_v15 = vsub.f32 %v5260_v49, %v11539_v4  ;;  %v5261_v59 = vmul.f32 %v5225_v56, %v10291_v48  ;;  %v5263_v39 = vmul.f32 %v5231_v16, %v10291_v48  ;;  %v5591_v50 = vsel %vm5590_vm7, %v11054_v53, %v5587_v38  ;;  %v11550_v49 = vld [vmem:[#allocation35_spill] sm:$0xff] }
 0xc3f   : > { %v5764_v31 = vmul.f32 %v11071_v5, %v5729_v43  ;;  %v5596_v55 = vsub.f32 1.5, %v5595_v61  ;;  %v5615_v3 = vmul.f32 0.5, %v5614_v41  ;;  %v5623_v26 = vmul.f32 %v7114_v54, %v11078_v57 }
 0xc40   : > { %v11542_v63 = vsub.f32 %v11540_v36, %v11541_v12  ;;  %vm5618_vm8 = vweird.f32 %v11048_v40  ;;  %7117 = vrsqrt.f32 %v11127_v24  ;;  %vm5619_vm9 = vweird.f32 %v11100_v45 }
 0xc41   : > { %v5799_v37 = vadd.f32 %v11090_v11, %v5764_v31  ;;  %v5597_v34 = vmul.f32 %v11085_v44, %v5596_v55  ;;  %v5616_v51 = vsub.f32 1.5, %v5615_v3  ;;  %v5624_v48 = vmul.f32 %v7114_v54, %v5623_v26  ;;  %vm5620_vm11 = vmor %vm5618_vm8, %vm5619_vm9 }
 0xc42   : > { %v5731_v6 = vmul.f32 %v5591_v50, %v11542_v63  ;;  %v7116_v53 = vpop.eup %7115  ;;  %v11154_v19 = vadd.f32 1e-05, %v5324_v15  ;;  %v5325_v58 = vsub.f32 %v5261_v59, %v11543_v2  ;;  %v5327_v25 = vsub.f32 %v5263_v39, %v10852_v9  ;;  %v11552_v15 = vld [vmem:[#allocation7_spill] sm:$0xff]  ;;  %v11553_v59 = vld [vmem:[#allocation30_spill] sm:$0xff] }
 0xc43   : > { %5831 = vst.msk [vmem:[%s10368_s21 + $0x88] sm:$0xff] %vm618_vm0, %v5799_v37  ;;  %v5601_v21 = vsel %vm5600_vm10, %v11085_v44, %v5597_v34  ;;  %v5617_v17 = vmul.f32 %v11100_v45, %v5616_v51  ;;  %v5625_v20 = vmul.f32 0.5, %v5624_v48  ;;  %v5643_v14 = vmul.f32 %v7116_v53, %v11109_v46  ;;  %v11554_v34 = vld [vmem:[#allocation18_spill] sm:$0xff]  ;;  %v11555_v51 = vld [vmem:[#allocation33_spill] sm:$0xff] }
 0xc44   : > { %v5766_v22 = vmul.f32 %v11071_v5, %v5731_v6  ;;  %v5351_v18 = vsub.f32 %v11545_v52, %v11544_v47  ;;  %v11548_v23 = vsub.f32 %v11546_v8, %v11547_v42  ;;  %7119 = vrsqrt.f32 %v11154_v19  ;;  %v11556_v47 = vld [vmem:[#allocation38_spill] sm:$0xff]  ;;  %v11557_v52 = vld [vmem:[#allocation25_spill] sm:$0xff] }
 0xc45   : > { %v5621_v9 = vsel %vm5620_vm11, %v11100_v45, %v5617_v17  ;;  %v5626_v44 = vsub.f32 1.5, %v5625_v20  ;;  %vm5629_vm12 = vweird.f32 %v7114_v54  ;;  %v5644_v1 = vmul.f32 %v7116_v53, %v5643_v14 }
 0xc46   : > { %v5801_v32 = vadd.f32 %v11090_v11, %v5766_v22  ;;  %v5732_v30 = vmul.f32 %v5601_v21, %v11548_v23  ;;  %v7118_v13 = vpop.eup %7117  ;;  %v11551_v60 = vsub.f32 %v11549_v62, %v11550_v49  ;;  %v11179_v28 = vadd.f32 1e-05, %v5325_v58 }
 0xc47   : > { %v11181_v40 = vadd.f32 1e-05, %v5327_v25  ;;  %v5627_v33 = vmul.f32 %v7114_v54, %v5626_v44  ;;  %vm5628_vm13 = vweird.f32 %v11078_v57  ;;  %v5645_v45 = vmul.f32 0.5, %v5644_v1  ;;  %v11558_v1 = vld [vmem:[#allocation14_spill] sm:$0xff] }
 0xc48   : > { %5833 = vst.msk [vmem:[%s10368_s21 + $0x98] sm:$0xff] %vm618_vm0, %v5801_v32  ;;  %v5767_v7 = vmul.f32 %v11071_v5, %v5732_v30  ;;  %v5734_v35 = vmul.f32 %v5621_v9, %v11551_v60  ;;  %v5653_v29 = vmul.f32 %v7118_v13, %v11127_v24  ;;  %vm5630_vm14 = vmor %vm5628_vm13, %vm5629_vm12  ;;  %vm5649_vm15 = vweird.f32 %v7116_v53  ;;  %v11560_v60 = vld [vmem:[#allocation16_spill] sm:$0xff] }
 0xc49   : > { %7121 = vrsqrt.f32 %v11179_v28  ;;  %v5631_v43 = vsel %vm5630_vm14, %v7114_v54, %v5627_v33  ;;  %v5646_v56 = vsub.f32 1.5, %v5645_v45  ;;  %vm5648_vm1 = vweird.f32 %v11109_v46 }
 0xc4a   : > { %v5802_v27 = vadd.f32 %v11090_v11, %v5767_v7  ;;  %v5769_v10 = vmul.f32 %v11071_v5, %v5734_v35  ;;  %v5654_v16 = vmul.f32 %v7118_v13, %v5653_v29  ;;  %7123 = vrsqrt.f32 %v11181_v40  ;;  %v7120_v38 = vpop.eup %7119  ;;  %vm5650_vm2 = vmor %vm5648_vm1, %vm5649_vm15 }
 0xc4b   : > { %v5735_v61 = vmul.f32 %v5631_v43, %v5351_v18  ;;  %v5647_v41 = vmul.f32 %v7116_v53, %v5646_v56  ;;  %v5673_v4 = vmul.f32 %v7120_v38, %v11154_v19  ;;  %v5353_v39 = vsub.f32 %v11553_v59, %v11552_v15 }
 0xc4c   : > { %5834 = vst.msk [vmem:[%s10368_s21 + $0xa0] sm:$0xff] %vm618_vm0, %v5802_v27  ;;  %v5804_v57 = vadd.f32 %v11090_v11, %v5769_v10  ;;  %v5655_v31 = vmul.f32 0.5, %v5654_v16  ;;  %vm5659_vm3 = vweird.f32 %v7118_v13  ;;  %vm5658_vm4 = vweird.f32 %v11127_v24 }
 0xc4d   : > { %v5770_v54 = vmul.f32 %v11071_v5, %v5735_v61  ;;  %v5651_v50 = vsel %vm5650_vm2, %v7116_v53, %v5647_v41  ;;  %v5674_v3 = vmul.f32 %v7120_v38, %v5673_v4  ;;  %v5354_v48 = vsub.f32 %v11555_v51, %v11554_v34  ;;  %vm5660_vm5 = vmor %vm5658_vm4, %vm5659_vm3 }
 0xc4e   : > { %5836 = vst.msk [vmem:[%s10368_s21 + $0xb0] sm:$0xff] %vm618_vm0, %v5804_v57  ;;  %v5656_v55 = vsub.f32 1.5, %v5655_v31  ;;  %v5737_v37 = vmul.f32 %v5651_v50, %v5353_v39  ;;  %vm5679_vm6 = vweird.f32 %v7120_v38  ;;  %vm5678_vm7 = vweird.f32 %v11154_v19 }
 0xc4f   : > { %v7122_v26 = vpop.eup %7121  ;;  %v5805_v46 = vadd.f32 %v11090_v11, %v5770_v54  ;;  %v5675_v63 = vmul.f32 0.5, %v5674_v3  ;;  %v5356_v18 = vsub.f32 %v11557_v52, %v11556_v47  ;;  %vm5680_vm8 = vmor %vm5678_vm7, %vm5679_vm6  ;;  %vm5688_vm11 = vweird.f32 %v11179_v28 }
 0xc50   : > { %v7124_v36 = vpop.eup %7123  ;;  %v5657_v12 = vmul.f32 %v7118_v13, %v5656_v55  ;;  %v5683_v6 = vmul.f32 %v7122_v26, %v11179_v28  ;;  %v5772_v53 = vmul.f32 %v11071_v5, %v5737_v37  ;;  %vm5689_vm9 = vweird.f32 %v7122_v26 }
 0xc51   : > { %5837 = vst.msk [vmem:[%s10368_s21 + $0xb8] sm:$0xff] %vm618_vm0, %v5805_v46  ;;  %v5703_v22 = vmul.f32 %v7124_v36, %v11181_v40  ;;  %v5676_v58 = vsub.f32 1.5, %v5675_v63  ;;  %vm5709_vm10 = vweird.f32 %v7124_v36  ;;  %vm5690_vm12 = vmor %vm5688_vm11, %vm5689_vm9  ;;  %vm5708_vm13 = vweird.f32 %v11181_v40 }
 0xc52   : > { %v5661_v2 = vsel %vm5660_vm5, %v7118_v13, %v5657_v12  ;;  %v5684_v25 = vmul.f32 %v7122_v26, %v5683_v6  ;;  %v5807_v24 = vadd.f32 %v11090_v11, %v5772_v53  ;;  %v11559_v13 = vld [vmem:[#allocation10_spill] sm:$0xff]  ;;  %v5359_v35 = vsub.f32 %v11560_v60, %v10767_v0  ;;  %vm5710_vm14 = vmor %vm5708_vm13, %vm5709_vm10 }
 0xc53   : > { %v5738_v21 = vmul.f32 %v5661_v2, %v5354_v48  ;;  %v5704_v17 = vmul.f32 %v7124_v36, %v5703_v22  ;;  %v5677_v20 = vmul.f32 %v7120_v38, %v5676_v58  ;;  %v5357_v7 = vsub.f32 %v11559_v13, %v11558_v1 }
 0xc54   : > { %v5685_v14 = vmul.f32 0.5, %v5684_v25  ;;  %5839 = vst.msk [vmem:[%s10368_s21 + $0xc8] sm:$0xff] %vm618_vm0, %v5807_v24 }
 0xc55   : > { %v5773_v32 = vmul.f32 %v11071_v5, %v5738_v21  ;;  %v5705_v8 = vmul.f32 0.5, %v5704_v17  ;;  %v5681_v42 = vsel %vm5680_vm8, %v7120_v38, %v5677_v20 }
 0xc56   : > { %v5686_v23 = vsub.f32 1.5, %v5685_v14  ;;  %v5740_v9 = vmul.f32 %v5681_v42, %v5356_v18 }
 0xc57   : > { %v5808_v30 = vadd.f32 %v11090_v11, %v5773_v32  ;;  %v5706_v44 = vsub.f32 1.5, %v5705_v8 }
 0xc58   : > { %v5687_v19 = vmul.f32 %v7122_v26, %v5686_v23  ;;  %v5775_v62 = vmul.f32 %v11071_v5, %v5740_v9 }
 0xc59   : > { %5840 = vst.msk [vmem:[%s10368_s21 + $0xd0] sm:$0xff] %vm618_vm0, %v5808_v30  ;;  %v5707_v49 = vmul.f32 %v7124_v36, %v5706_v44 }
 0xc5a   : > { %v5691_v33 = vsel %vm5690_vm12, %v7122_v26, %v5687_v19  ;;  %v5810_v28 = vadd.f32 %v11090_v11, %v5775_v62 }
 0xc5b   : > { %v5741_v45 = vmul.f32 %v5691_v33, %v5357_v7  ;;  %v5711_v29 = vsel %vm5710_vm14, %v7124_v36, %v5707_v49 }
 0xc5c   : > { %v5743_v27 = vmul.f32 %v5711_v29, %v5359_v35  ;;  %5842 = vst.msk [vmem:[%s10368_s21 + $0xe0] sm:$0xff] %vm618_vm0, %v5810_v28 }
 0xc5d   : > { %v5776_v10 = vmul.f32 %v11071_v5, %v5741_v45 }
 0xc5e   : > { %v5778_v43 = vmul.f32 %v11071_v5, %v5743_v27 }
 0xc5f   : > { %v5811_v56 = vadd.f32 %v11090_v11, %v5776_v10 }
 0xc60   : > { %v5813_v40 = vadd.f32 %v11090_v11, %v5778_v43 }
 0xc61   : > { %5843 = vst.msk [vmem:[%s10368_s21 + $0xe8] sm:$0xff] %vm618_vm0, %v5811_v56 }
 0xc62   : > { %5845 = vst.msk [vmem:[%s10368_s21 + $0xf8] sm:$0xff] %vm618_vm0, %v5813_v40 }
 0xc63 PF: > { %s24_s15 = sadd.s32 1, %s7149_s15   ;;  %s11561_s29 = smov %s7145_s30 }
 0xc64   : > { %p21_p5 = scmp.ge.s32.totalorder %s24_s15, 4   ;;  %s11562_s30 = smov %s11564_s16 }
 0xc66   :  { %23 = sbr.rel (!%p21_p5) target bundleno = 2 (0x2), region = 116 }

</bundles_post_ra>
